<compile_context>
chip_gen: v6e
topology: v6e:2x2x1
jax: 0.10.0
libtpu: 0.0.40
codegen_flags: <defaults>
</compile_context>

<pallas_src>
import math
from functools import partial

import jax
import jax.numpy as jnp
from jax import lax
from jax.experimental import pallas as pl
from jax.experimental.pallas import tpu as pltpu

# Large finite negative mask value (instead of -inf) so the online-softmax
# rescale exp(m_prev - m_new) is always well defined (never inf - inf).
_MASK_VALUE = -1e30


# ------------------------------------------------------------------
# Kernel 1: fused QKV projection  x @ [Wq|Wk|Wv] + [bq|bk|bv], emitting
# q/k/v already in (B, H, S, D) layout (heads-first relayout done once here).
# The 1/sqrt(head_dim) query scale is folded into Wq / bq on the host.
# ------------------------------------------------------------------
def _qkv_proj_kernel(x_ref, w_ref, b_ref, q_ref, k_ref, v_ref, *, num_heads):
    rows = x_ref.shape[1]
    e = w_ref.shape[1] // 3
    d = e // num_heads

    x = x_ref[0].astype(w_ref.dtype)                       # (rows, E) MXU operand
    acc = jnp.dot(x, w_ref[...],
                  preferred_element_type=jnp.float32) + b_ref[...]   # (rows, 3E) f32

    def heads_first(m):                                    # (rows, E) -> (H, rows, D)
        return jnp.transpose(m.reshape(rows, num_heads, d), (1, 0, 2))

    q_ref[0] = heads_first(acc[:, :e]).astype(q_ref.dtype)
    k_ref[0] = heads_first(acc[:, e:2 * e]).astype(k_ref.dtype)
    v_ref[0] = heads_first(acc[:, 2 * e:]).astype(v_ref.dtype)


def qkv_projection(x, w_qkv, b_qkv, num_heads, *, out_dtype, row_block=512):
    # x: (B, S, E);  w_qkv: (E, 3E);  b_qkv: (1, 3E) f32.
    B, S, E = x.shape
    E3 = w_qkv.shape[1]
    H = num_heads
    D = E // H

    rows = min(row_block, S)
    if S % rows != 0 or rows % 8 != 0:
        rows = S                                           # full-extent fallback

    out_sd = jax.ShapeDtypeStruct((B, H, S, D), out_dtype)
    qkv_spec = pl.BlockSpec((1, H, rows, D), lambda b, r: (b, 0, r, 0))

    cost = pl.CostEstimate(
        flops=int(2 * B * S * E * E3),
        transcendentals=0,
        bytes_accessed=int(B * S * E * jnp.dtype(x.dtype).itemsize
                           + E * E3 * jnp.dtype(w_qkv.dtype).itemsize
                           + E3 * 4
                           + 3 * B * S * E * jnp.dtype(out_dtype).itemsize))

    return pl.pallas_call(
        partial(_qkv_proj_kernel, num_heads=H),
        grid=(B, S // rows),
        in_specs=[pl.BlockSpec((1, rows, E), lambda b, r: (b, r, 0)),
                  pl.BlockSpec((E, E3), lambda b, r: (0, 0)),   # weights resident
                  pl.BlockSpec((1, E3), lambda b, r: (0, 0))],  # bias resident
        out_specs=(qkv_spec, qkv_spec, qkv_spec),
        out_shape=(out_sd, out_sd, out_sd),
        compiler_params=pltpu.CompilerParams(
            dimension_semantics=("parallel", "parallel")),
        cost_estimate=cost,
    )(x, w_qkv, b_qkv)


# ------------------------------------------------------------------
# Kernel 2: flash-style sliding-window attention.
# grid = (B, head_group, q_block, key_block); key_block axis is "arbitrary"
# with online-softmax accumulators (m, l, acc) in VMEM scratch.
# ------------------------------------------------------------------
def _sliding_flash_kernel(q_ref, k_ref, v_ref, o_ref, m_scr, l_scr, acc_scr,
                          *, w, blocks_per_q, num_key_blocks):
    qi = pl.program_id(2)
    ki = pl.program_id(3)
    nk = pl.num_programs(3)
    Hg, Tq, D = q_ref.shape[1], q_ref.shape[2], q_ref.shape[3]

    @pl.when(ki == 0)
    def _init():
        m_scr[...] = jnp.full_like(m_scr, _MASK_VALUE)
        l_scr[...] = jnp.zeros_like(l_scr)
        acc_scr[...] = jnp.zeros_like(acc_scr)

    # Intended (pre-clamp) key block.  The BlockSpec clamps it into range, so a
    # block that is fully out of the sequence re-fetches a valid block; those
    # duplicated edge blocks are fully masked and we skip their compute.
    kb = blocks_per_q * qi - 1 + ki

    @pl.when((kb >= 0) & (kb < num_key_blocks))
    def _compute():
        q = q_ref[0]                                        # (Hg, Tq, D)
        k = k_ref[0]                                        # (Hg, w,  D)
        v = v_ref[0]                                        # (Hg, w,  D)

        s = jnp.einsum('hqd,hkd->hqk', q, k,
                       preferred_element_type=jnp.float32)  # (Hg, Tq, w) f32

        # Band mask in local coords: j_global - i_global = (ki - 1)*w + c - r.
        r = lax.broadcasted_iota(jnp.int32, (Tq, w), 0)
        c = lax.broadcasted_iota(jnp.int32, (Tq, w), 1)
        rel = c - r + (ki - 1) * w
        band = (rel >= -w) & (rel <= w)
        s = jnp.where(band[None], s, _MASK_VALUE)

        m_prev = m_scr[...]                                 # (Hg, Tq, 1)
        m_new = jnp.maximum(m_prev, jnp.max(s, axis=-1, keepdims=True))
        alpha = jnp.exp(m_prev - m_new)
        p = jnp.exp(s - m_new)

        l_scr[...] = alpha * l_scr[...] + jnp.sum(p, axis=-1, keepdims=True)
        acc_scr[...] = alpha * acc_scr[...] + jnp.einsum(
            'hqk,hkd->hqd', p.astype(v.dtype), v,
            preferred_element_type=jnp.float32)
        m_scr[...] = m_new

    @pl.when(ki == nk - 1)
    def _finalize():
        out = acc_scr[...] / l_scr[...]                     # exact normalization
        # Single small relayout of the output tile -> lane-dense (Tq, Hg*D).
        out = jnp.transpose(out, (1, 0, 2)).reshape(Tq, Hg * D)
        o_ref[0] = out.astype(o_ref.dtype)


def _default_head_group(num_heads, head_dim):
    # Largest divisor of H whose score/acc tiles stay modest and whose output
    # slab (Hg*D) is lane-legal (multiple of 128, or all heads).
    for hg in range(num_heads, 0, -1):
        if num_heads % hg == 0 and hg * head_dim <= 512 and \
           (hg == num_heads or (hg * head_dim) % 128 == 0):
            return hg
    return num_heads


def sliding_chunks_attention(q, k, v, w, *, out_dtype=jnp.float32,
                             q_chunk_blocks=2, head_group_size=None):
    # q, k, v: (B, H, S, D)  ->  output (B, S, H*D) = (bsz, seq, hidden).
    B, H, S, D = q.shape
    t = q_chunk_blocks
    Tq = t * w
    assert w % 8 == 0, "attention_window must be a multiple of 8 for TPU tiling"
    assert S % w == 0 and S % Tq == 0
    nqb = S // Tq                      # query blocks
    nkb_total = S // w                 # total w-sized key blocks
    nkb = t + 2                        # key blocks touched per query block
    E = H * D

    Hg = head_group_size or _default_head_group(H, D)
    if H % Hg != 0 or (Hg != H and (Hg * D) % 128 != 0):
        Hg = H
    G = H // Hg

    q_spec = pl.BlockSpec((1, Hg, Tq, D), lambda b, g, i, j: (b, g, i, 0))

    def kv_idx(b, g, i, j):
        return (b, g, jnp.clip(t * i - 1 + j, 0, nkb_total - 1), 0)
    kv_spec = pl.BlockSpec((1, Hg, w, D), kv_idx)

    # Lane-dense output: (B, S, E) with (1, Tq, Hg*D) blocks.
    o_spec = pl.BlockSpec((1, Tq, Hg * D), lambda b, g, i, j: (b, i, g))

    itemsize = jnp.dtype(q.dtype).itemsize
    cost = pl.CostEstimate(
        flops=int(4 * B * H * S * nkb * w * D),
        transcendentals=int(B * H * S * nkb * w),
        bytes_accessed=int(B * H * S * D * itemsize * (1 + 2 * nkb / t)
                           + B * S * E * jnp.dtype(out_dtype).itemsize))

    kernel = partial(_sliding_flash_kernel, w=w, blocks_per_q=t,
                     num_key_blocks=nkb_total)

    return pl.pallas_call(
        kernel,
        grid=(B, G, nqb, nkb),
        in_specs=[q_spec, kv_spec, kv_spec],
        out_specs=o_spec,
        out_shape=jax.ShapeDtypeStruct((B, S, E), out_dtype),
        scratch_shapes=[pltpu.VMEM((Hg, Tq, 1), jnp.float32),   # running max
                        pltpu.VMEM((Hg, Tq, 1), jnp.float32),   # running denom
                        pltpu.VMEM((Hg, Tq, D), jnp.float32)],  # running acc
        compiler_params=pltpu.CompilerParams(
            dimension_semantics=("parallel", "parallel", "parallel", "arbitrary")),
        cost_estimate=cost,
    )(q, k, v)


# ------------------------------------------------------------------
# Host-side parameter prep: fold 1/sqrt(head_dim) into Wq/bq, concat to (E,3E).
# ------------------------------------------------------------------
def prepare_params(raw, head_dim):
    scale = 1.0 / math.sqrt(head_dim)
    w_qkv = jnp.concatenate(
        [raw["wq"].T * scale, raw["wk"].T, raw["wv"].T], axis=1)      # (E, 3E)
    b_qkv = jnp.concatenate(
        [raw["bq"] * scale, raw["bk"], raw["bv"]]).reshape(1, -1)     # (1, 3E)
    return {"w_qkv": w_qkv, "b_qkv": b_qkv}


# ------------------------------------------------------------------
# Full forward pass (local-attention path; attention_mask=None, eval mode).
# ------------------------------------------------------------------
def longformer_self_attention(hidden_states, params, num_heads, attention_window,
                              *, compute_dtype=jnp.bfloat16, q_chunk_blocks=2,
                              head_group_size=None):
    B, S, E = hidden_states.shape
    H = num_heads
    D = E // H
    w = attention_window
    assert E % H == 0
    assert S % (2 * w) == 0, "seqlen must be a multiple of 2*attention_window"

    # bf16 MXU operands on the fast path; bias stays f32 (added to f32 acc).
    w_qkv = params["w_qkv"].astype(compute_dtype)
    b_qkv = params["b_qkv"].astype(jnp.float32)

    # Fused projection -> q/k/v already in (B, H, S, D); no wrapper transposes.
    q, k, v = qkv_projection(hidden_states, w_qkv, b_qkv, H,
                             out_dtype=compute_dtype)

    # Flash-style sliding-window attention -> lane-dense (B, S, E) output.
    out = sliding_chunks_attention(q, k, v, w,
                                   out_dtype=hidden_states.dtype,
                                   q_chunk_blocks=q_chunk_blocks,
                                   head_group_size=head_group_size)
    return out                                              # (bsz, seq, hidden)

# TODO(synk): global-attention path (attention_mask > 0), key-padding masking,
# attention dropout (training) and output_attentions are not exercised here
# (attention_mask=None, eval mode).


# ------------------------------------------------------------------
# Pure-JAX f32 reference of the module math (uses un-folded parameters).
# ------------------------------------------------------------------
def _reference(hidden_states, raw, num_heads, w):
    B, S, E = hidden_states.shape
    H = num_heads
    D = E // H
    x = hidden_states.reshape(B * S, E)
    q = (x @ raw["wq"].T + raw["bq"]) / math.sqrt(D)
    k = x @ raw["wk"].T + raw["bk"]
    v = x @ raw["wv"].T + raw["bv"]
    q = q.reshape(B, S, H, D)
    k = k.reshape(B, S, H, D)
    v = v.reshape(B, S, H, D)
    s = jnp.einsum("bqhd,bkhd->bhqk", q, k)
    i = jnp.arange(S)[:, None]
    j = jnp.arange(S)[None, :]
    band = jnp.abs(i - j) <= w
    s = jnp.where(band[None, None], s, -jnp.inf)
    p = jax.nn.softmax(s, axis=-1)
    o = jnp.einsum("bhqk,bkhd->bqhd", p, v)
    return o.reshape(B, S, E)


if __name__ == "__main__":
    # Small config: hidden_size=64, num_attention_heads=4 -> head_dim=16,
    # attention_window=16, attention_dilation=1, mode='sliding_chunks'.
    B, S, E = 2, 256, 64
    H, W = 4, 16

    key = jax.random.PRNGKey(0)
    kx, kq, kk, kv, kbq, kbk, kbv = jax.random.split(key, 7)

    hidden_states = jax.random.normal(kx, (B, S, E), dtype=jnp.float32)

    # torch Linear stores weight as (out_features, in_features).
    raw = {
        "wq": jax.random.normal(kq, (E, E), dtype=jnp.float32) * 0.05,
        "wk": jax.random.normal(kk, (E, E), dtype=jnp.float32) * 0.05,
        "wv": jax.random.normal(kv, (E, E), dtype=jnp.float32) * 0.05,
        "bq": jax.random.normal(kbq, (E,), dtype=jnp.float32) * 0.01,
        "bk": jax.random.normal(kbk, (E,), dtype=jnp.float32) * 0.01,
        "bv": jax.random.normal(kbv, (E,), dtype=jnp.float32) * 0.01,
    }
    params = prepare_params(raw, E // H)

    ref = _reference(hidden_states, raw, H, W)

    # f32-operand run: validates tiling / masking / indexing (exact softmax div).
    out_f32 = jax.block_until_ready(
        longformer_self_attention(hidden_states, params, H, W,
                                  compute_dtype=jnp.float32))
    assert out_f32.shape == (B, S, E)
    assert jnp.allclose(out_f32, ref, rtol=5e-3, atol=3e-3), "f32 path mismatch"

    # bf16 MXU-operand run (default fast path); looser tolerance covers bf16.
    out_bf16 = jax.block_until_ready(
        longformer_self_attention(hidden_states, params, H, W,
                                  compute_dtype=jnp.bfloat16))
    assert out_bf16.shape == (B, S, E)
    assert jnp.allclose(out_bf16, ref, rtol=2e-2, atol=2e-2), "bf16 path mismatch"

    print("KERNEL_OK")
</pallas_src>

<mosaic_0001>
module attributes {stable_mosaic.version = 11 : i64} {
  func.func @_qkv_proj_kernel(%arg0: i32, %arg1: i32, %arg2: memref<1x256x64xf32, #tpu.memory_space<vmem>>, %arg3: memref<64x192xf32, #tpu.memory_space<vmem>>, %arg4: memref<1x192xf32, #tpu.memory_space<vmem>>, %arg5: memref<1x4x256x16xf32, #tpu.memory_space<vmem>>, %arg6: memref<1x4x256x16xf32, #tpu.memory_space<vmem>>, %arg7: memref<1x4x256x16xf32, #tpu.memory_space<vmem>>) attributes {dimension_semantics = [#tpu.dimension_semantics<parallel>, #tpu.dimension_semantics<parallel>], iteration_bounds = array<i64: 2, 1>, scalar_prefetch = 0 : i64, scratch_operands = 0 : i64, tpu.core_type = #tpu.core_type<tc>, window_params = [{transform_indices = @transform_0, window_bounds = array<i64: 1, 256, 64>}, {pipeline_mode = #tpu.pipeline_mode<synchronous>, transform_indices = @transform_1, window_bounds = array<i64: 64, 192>}, {pipeline_mode = #tpu.pipeline_mode<synchronous>, transform_indices = @transform_2, window_bounds = array<i64: 1, 192>}, {transform_indices = @transform_3, window_bounds = array<i64: 1, 4, 256, 16>}, {transform_indices = @transform_4, window_bounds = array<i64: 1, 4, 256, 16>}, {transform_indices = @transform_5, window_bounds = array<i64: 1, 4, 256, 16>}]} {
    %c0 = arith.constant 0 : index
    %c0_0 = arith.constant 0 : index
    %c0_1 = arith.constant 0 : index
    %0 = vector.load %arg2[%c0, %c0_0, %c0_1] : memref<1x256x64xf32, #tpu.memory_space<vmem>>, vector<1x256x64xf32>
    %1 = vector.shape_cast %0 : vector<1x256x64xf32> to vector<256x64xf32>
    %c0_2 = arith.constant 0 : index
    %c0_3 = arith.constant 0 : index
    %2 = vector.load %arg3[%c0_2, %c0_3] : memref<64x192xf32, #tpu.memory_space<vmem>>, vector<64x192xf32>
    %cst = arith.constant dense<0.000000e+00> : vector<256x192xf32>
    %3 = tpu.matmul %1, %2, %cst {dimension_numbers = #tpu.dot_dimension_numbers<[1], [0], [0], [1], [0, 0, 1, 1], [], []>} : vector<256x64xf32>, vector<64x192xf32>, vector<256x192xf32> -> vector<256x192xf32>
    %c0_4 = arith.constant 0 : index
    %c0_5 = arith.constant 0 : index
    %4 = vector.load %arg4[%c0_4, %c0_5] : memref<1x192xf32, #tpu.memory_space<vmem>>, vector<1x192xf32>
    %5 = vector.broadcast %4 : vector<1x192xf32> to vector<256x192xf32>
    %6 = arith.addf %3, %5 : vector<256x192xf32>
    %7 = vector.extract_strided_slice %6 {offsets = [0, 0], sizes = [256, 64], strides = [1, 1]} : vector<256x192xf32> to vector<256x64xf32>
    %8 = vector.shape_cast %7 : vector<256x64xf32> to vector<256x4x16xf32>
    %9 = tpu.transpose %8, [1, 0, 2] : vector<256x4x16xf32> -> vector<4x256x16xf32>
    %c0_6 = arith.constant 0 : index
    %c0_7 = arith.constant 0 : index
    %c0_8 = arith.constant 0 : index
    %c0_9 = arith.constant 0 : index
    %10 = vector.load %arg5[%c0_6, %c0_7, %c0_8, %c0_9] : memref<1x4x256x16xf32, #tpu.memory_space<vmem>>, vector<1x4x256x16xf32>
    %11 = vector.shape_cast %10 : vector<1x4x256x16xf32> to vector<4x256x16xf32>
    %12 = vector.shape_cast %9 : vector<4x256x16xf32> to vector<1x4x256x16xf32>
    tpu.vector_store %arg5[%c0_6, %c0_7, %c0_8, %c0_9], %12 {strides = array<i32>} : memref<1x4x256x16xf32, #tpu.memory_space<vmem>>, vector<1x4x256x16xf32>,
    %13 = vector.extract_strided_slice %6 {offsets = [0, 64], sizes = [256, 64], strides = [1, 1]} : vector<256x192xf32> to vector<256x64xf32>
    %14 = vector.shape_cast %13 : vector<256x64xf32> to vector<256x4x16xf32>
    %15 = tpu.transpose %14, [1, 0, 2] : vector<256x4x16xf32> -> vector<4x256x16xf32>
    %c0_10 = arith.constant 0 : index
    %c0_11 = arith.constant 0 : index
    %c0_12 = arith.constant 0 : index
    %c0_13 = arith.constant 0 : index
    %16 = vector.load %arg6[%c0_10, %c0_11, %c0_12, %c0_13] : memref<1x4x256x16xf32, #tpu.memory_space<vmem>>, vector<1x4x256x16xf32>
    %17 = vector.shape_cast %16 : vector<1x4x256x16xf32> to vector<4x256x16xf32>
    %18 = vector.shape_cast %15 : vector<4x256x16xf32> to vector<1x4x256x16xf32>
    tpu.vector_store %arg6[%c0_10, %c0_11, %c0_12, %c0_13], %18 {strides = array<i32>} : memref<1x4x256x16xf32, #tpu.memory_space<vmem>>, vector<1x4x256x16xf32>,
    %19 = vector.extract_strided_slice %6 {offsets = [0, 128], sizes = [256, 64], strides = [1, 1]} : vector<256x192xf32> to vector<256x64xf32>
    %20 = vector.shape_cast %19 : vector<256x64xf32> to vector<256x4x16xf32>
    %21 = tpu.transpose %20, [1, 0, 2] : vector<256x4x16xf32> -> vector<4x256x16xf32>
    %c0_14 = arith.constant 0 : index
    %c0_15 = arith.constant 0 : index
    %c0_16 = arith.constant 0 : index
    %c0_17 = arith.constant 0 : index
    %22 = vector.load %arg7[%c0_14, %c0_15, %c0_16, %c0_17] : memref<1x4x256x16xf32, #tpu.memory_space<vmem>>, vector<1x4x256x16xf32>
    %23 = vector.shape_cast %22 : vector<1x4x256x16xf32> to vector<4x256x16xf32>
    %24 = vector.shape_cast %21 : vector<4x256x16xf32> to vector<1x4x256x16xf32>
    tpu.vector_store %arg7[%c0_14, %c0_15, %c0_16, %c0_17], %24 {strides = array<i32>} : memref<1x4x256x16xf32, #tpu.memory_space<vmem>>, vector<1x4x256x16xf32>,
    return
  }
  func.func @transform_0(%arg0: i32, %arg1: i32) -> (i32, i32, i32) {
    %c0_i32 = arith.constant 0 : i32
    %c0_i32_0 = arith.constant 0 : i32
    return %arg0, %arg1, %c0_i32 : i32, i32, i32
  }
  func.func @transform_1(%arg0: i32, %arg1: i32) -> (i32, i32) {
    %c0_i32 = arith.constant 0 : i32
    %c0_i32_0 = arith.constant 0 : i32
    %c0_i32_1 = arith.constant 0 : i32
    return %c0_i32, %c0_i32_0 : i32, i32
  }
  func.func @transform_2(%arg0: i32, %arg1: i32) -> (i32, i32) {
    %c0_i32 = arith.constant 0 : i32
    %c0_i32_0 = arith.constant 0 : i32
    %c0_i32_1 = arith.constant 0 : i32
    return %c0_i32, %c0_i32_0 : i32, i32
  }
  func.func @transform_3(%arg0: i32, %arg1: i32) -> (i32, i32, i32, i32) {
    %c0_i32 = arith.constant 0 : i32
    %c0_i32_0 = arith.constant 0 : i32
    %c0_i32_1 = arith.constant 0 : i32
    return %arg0, %c0_i32, %arg1, %c0_i32_0 : i32, i32, i32, i32
  }
  func.func @transform_4(%arg0: i32, %arg1: i32) -> (i32, i32, i32, i32) {
    %c0_i32 = arith.constant 0 : i32
    %c0_i32_0 = arith.constant 0 : i32
    %c0_i32_1 = arith.constant 0 : i32
    return %arg0, %c0_i32, %arg1, %c0_i32_0 : i32, i32, i32, i32
  }
  func.func @transform_5(%arg0: i32, %arg1: i32) -> (i32, i32, i32, i32) {
    %c0_i32 = arith.constant 0 : i32
    %c0_i32_0 = arith.constant 0 : i32
    %c0_i32_1 = arith.constant 0 : i32
    return %arg0, %c0_i32, %arg1, %c0_i32_0 : i32, i32, i32, i32
  }
}

</mosaic_0001>

<bundles_post_ra>
// kernel: tpu_custom_call.1
= control target key start
LH: loop header
LB: loop body
LE: loop exit
PB: predicated region body
PF: predicated region fallthrough
CT: control target
= control target key end

     0   :  { %s15729_s18 = smov 0   ;;  %s15731_s19 = smov 0   ;;  %s21374_s0 = inlined_call_operand.vmem [shape: f32[2,256,64], index: 0, kind: input, shape index: {}]   ;;  %s21375_s1 = inlined_call_operand.vmem [shape: f32[64,192], index: 1, kind: input, shape index: {}]   ;;  %s21376_s2 = inlined_call_operand.vmem [shape: f32[1,192], index: 2, kind: input, shape index: {}]   ;;  %s21377_s3 = inlined_call_operand.vmem [shape: f32[2,4,256,16], index: 3, kind: output, shape index: {0}]   ;;  %s21378_s4 = inlined_call_operand.vmem [shape: f32[2,4,256,16], index: 4, kind: output, shape index: {1}]   ;;  %s21379_s5 = inlined_call_operand.vmem [shape: f32[2,4,256,16], index: 5, kind: output, shape index: {2}]  }
   0x1   :  { %s15733_s20 = smov 0  }
   0x2 LB: > { %s28_s21 = sadd.s32 1, %s15686_s19  ;;  %p15381_p0 = scmp.ge.s32.totalorder %s15690_s20, 1  ;;  %s15690_s20 = sphi %s15733_s20, %s16_s20   ;;  %s15686_s19 = sphi %s15731_s19, %s22148_s19   ;;  %s15682_s18 = sphi %s15729_s18, %s22147_s18  }
   0x3   : > { %p30_p1 = scmp.ge.s32.totalorder %s28_s21, 2  ;;  %p217_p2 = scmp.lt.s32.totalorder %s15690_s20, 3 }
   0x5   : > { %s22150_s21 = smov (%p30_p1, %s28_s21), 0  ;;  %p218_p3 = pnand %p15381_p0, %p217_p2 }
   0x7   : > { %221 = sbr.rel (%p218_p3) target bundleno = 1336 (0x538), region = 32 }
   0xc   : > { %v358_v0 = vld [vmem:[%s21375_s1 + $0x78] sm:$0xff]  ;;  %v357_v1 = vld [vmem:[%s21375_s1 + $0x70] sm:$0xff]  ;;  %v356_v2 = vld [vmem:[%s21375_s1 + $0x68] sm:$0xff]  ;;  %p272_p4 = scmp.lt.s32.totalorder %s15682_s18, 1  ;;  %vm371_vm0 = vcmask 523264   ;;  %v15692_v18 = vmov 0.0   ;;  %v361_v49 = vlaneseq }
   0xd   : > { %484 = vmatprep.subr.mxu0 %v358_v0  ;;  %15620 = vmatprep.subr.mxu1 %v358_v0  ;;  %v355_v3 = vld [vmem:[%s21375_s1 + $0x60] sm:$0xff]  ;;  %v354_v4 = vld [vmem:[%s21375_s1 + $0x58] sm:$0xff]  ;;  %v353_v5 = vld [vmem:[%s21375_s1 + $0x50] sm:$0xff]  ;;  %s15693_s14 = smov 112   ;;  %s15694_s15 = smov 96   ;;  %vm5397_vm1 = vcmask 130048  }
   0xe   : > { %485 = vmatpush1.msra.mxu0 %v357_v1  ;;  %15628 = vmatpush1.msra.mxu1 %v357_v1  ;;  %v352_v6 = vld [vmem:[%s21375_s1 + $0x48] sm:$0xff]  ;;  %v351_v7 = vld [vmem:[%s21375_s1 + $0x40] sm:$0xff]  ;;  %s22152_s18 = smov (!%p272_p4, %s15682_s18), 1  ;;  %v350_v8 = vld [vmem:[%s21375_s1 + $0x38] sm:$0xff]  ;;  %v15899_v50 = vshrl.u32 %v361_v49, 7  ;;  %s15695_s16 = smov 80  }
   0xf   : > { %486 = vmatprep.subr.mxu0 %v356_v2  ;;  %15621 = vmatprep.subr.mxu1 %v356_v2  ;;  %v349_v9 = vld [vmem:[%s21375_s1 + $0x30] sm:$0xff]  ;;  %v348_v10 = vld [vmem:[%s21375_s1 + $0x28] sm:$0xff]  ;;  %v347_v11 = vld [vmem:[%s21375_s1 + $0x20] sm:$0xff]  ;;  %s15616_s25 = sshll.u32 %s22152_s18, 8  ;;  %s15696_s17 = smov 64  }
  0x10   : > { %487 = vmatpush1.msra.mxu0 %v355_v3  ;;  %15629 = vmatpush1.msra.mxu1 %v355_v3  ;;  %v346_v12 = vld [vmem:[%s21375_s1 + $0x18] sm:$0xff]  ;;  %v345_v13 = vld [vmem:[%s21375_s1 + $0x10] sm:$0xff]  ;;  %v344_v14 = vld [vmem:[%s21375_s1 + $0x8] sm:$0xff]  ;;  %s15798_s9 = scalar_lea.vmem %s21374_s0, %s15616_s25  ;;  %21624 = vst [vmem:[#allocation2_spill] sm:$0xff] %v15899_v50  ;;  %v363_v51 = vsub.s32 0, %v15899_v50  ;;  %s16311_s22 = sshll.u32 %s22152_s18, 10 }
  0x11   : > { %488 = vmatprep.subr.mxu0 %v354_v4  ;;  %15622 = vmatprep.subr.mxu1 %v354_v4  ;;  %v343_v15 = vld [vmem:[%s21375_s1] sm:$0xff]  ;;  %v328_v19 = vld [vmem:[%s15798_s9 + $0x88] sm:$0xff]  ;;  %v313_v21 = vld [vmem:[%s15798_s9 + $0x10] sm:$0xff]  ;;  %s16325_s24 = scalar_lea.vmem %s21377_s3, %s16311_s22  ;;  %s18673_s29 = scalar_lea.vmem %s21378_s4, %s16311_s22 }
  0x12   : > { %489 = vmatpush1.msra.mxu0 %v353_v5  ;;  %15630 = vmatpush1.msra.mxu1 %v353_v5  ;;  %v311_v16 = vld [vmem:[%s15798_s9] sm:$0xff]  ;;  %v312_v20 = vld [vmem:[%s15798_s9 + $0x8] sm:$0xff]  ;;  %v329_v22 = vld [vmem:[%s15798_s9 + $0x90] sm:$0xff]  ;;  %s20399_s7 = scalar_lea.vmem %s21379_s5, %s16311_s22 }
  0x13   : > { %490 = vmatprep.subr.mxu0 %v352_v6  ;;  %15623 = vmatprep.subr.mxu1 %v352_v6  ;;  %v327_v17 = vld [vmem:[%s15798_s9 + $0x80] sm:$0xff]  ;;  %v314_v23 = vld [vmem:[%s15798_s9 + $0x18] sm:$0xff]  ;;  %v316_v27 = vld [vmem:[%s15798_s9 + $0x28] sm:$0xff] }
  0x14   : > { %491 = vmatpush1.msra.mxu0 %v351_v7  ;;  %15631 = vmatpush1.msra.mxu1 %v351_v7  ;;  %v330_v24 = vld [vmem:[%s15798_s9 + $0x98] sm:$0xff]  ;;  %v315_v25 = vld [vmem:[%s15798_s9 + $0x20] sm:$0xff]  ;;  %v332_v28 = vld [vmem:[%s15798_s9 + $0xa8] sm:$0xff] }
  0x15   : > { %492 = vmatprep.subr.mxu0 %v350_v8  ;;  %15624 = vmatprep.subr.mxu1 %v350_v8  ;;  %v331_v26 = vld [vmem:[%s15798_s9 + $0xa0] sm:$0xff]  ;;  %v317_v29 = vld [vmem:[%s15798_s9 + $0x30] sm:$0xff]  ;;  %v318_v31 = vld [vmem:[%s15798_s9 + $0x38] sm:$0xff] }
  0x16   : > { %493 = vmatpush1.msra.mxu0 %v349_v9  ;;  %15632 = vmatpush1.msra.mxu1 %v349_v9  ;;  %v333_v30 = vld [vmem:[%s15798_s9 + $0xb0] sm:$0xff]  ;;  %v334_v32 = vld [vmem:[%s15798_s9 + $0xb8] sm:$0xff]  ;;  %v319_v33 = vld [vmem:[%s15798_s9 + $0x40] sm:$0xff] }
  0x17   : > { %494 = vmatprep.subr.mxu0 %v348_v10  ;;  %15625 = vmatprep.subr.mxu1 %v348_v10  ;;  %v335_v34 = vld [vmem:[%s15798_s9 + $0xc0] sm:$0xff]  ;;  %v320_v35 = vld [vmem:[%s15798_s9 + $0x48] sm:$0xff]  ;;  %v321_v37 = vld [vmem:[%s15798_s9 + $0x50] sm:$0xff] }
  0x18   : > { %495 = vmatpush1.msra.mxu0 %v347_v11  ;;  %15633 = vmatpush1.msra.mxu1 %v347_v11  ;;  %v336_v36 = vld [vmem:[%s15798_s9 + $0xc8] sm:$0xff]  ;;  %v337_v38 = vld [vmem:[%s15798_s9 + $0xd0] sm:$0xff]  ;;  %v322_v39 = vld [vmem:[%s15798_s9 + $0x58] sm:$0xff] }
  0x19   : > { %496 = vmatprep.subr.mxu0 %v346_v12  ;;  %15626 = vmatprep.subr.mxu1 %v346_v12  ;;  %v338_v40 = vld [vmem:[%s15798_s9 + $0xd8] sm:$0xff]  ;;  %v323_v41 = vld [vmem:[%s15798_s9 + $0x60] sm:$0xff]  ;;  %v324_v42 = vld [vmem:[%s15798_s9 + $0x68] sm:$0xff] }
  0x1a   : > { %497 = vmatpush1.msra.mxu0 %v345_v13  ;;  %15634 = vmatpush1.msra.mxu1 %v345_v13  ;;  %v339_v43 = vld [vmem:[%s15798_s9 + $0xe0] sm:$0xff]  ;;  %v340_v44 = vld [vmem:[%s15798_s9 + $0xe8] sm:$0xff]  ;;  %v325_v45 = vld [vmem:[%s15798_s9 + $0x70] sm:$0xff] }
  0x1b   : > { %498 = vmatprep.subr.mxu0 %v344_v14  ;;  %15627 = vmatprep.subr.mxu1 %v344_v14  ;;  %v326_v46 = vld [vmem:[%s15798_s9 + $0x78] sm:$0xff]  ;;  %v341_v47 = vld [vmem:[%s15798_s9 + $0xf0] sm:$0xff]  ;;  %v359_v52 = vld [vmem:[%s21376_s2] sm:$0x3] }
  0x1c   : > { %499 = vmatpush1.msra.mxu0 %v343_v15  ;;  %15635 = vmatpush1.msra.mxu1 %v343_v15  ;;  %v342_v48 = vld [vmem:[%s15798_s9 + $0xf8] sm:$0xff]  ;;  %v15905_v53 = vrot.slane %v359_v52, %v363_v51 }
  0x1d   : > { %532 = vmatprep.mubr.f32.mxu0 %v15692_v18  ;;  %628 = vmatprep.mubr.f32.mxu1 %v15692_v18 }
  0x1e   : > { %15390 = vmatmul.mubr.msk.f32.vlgmr.msra.gmra.mxu0 %vm371_vm0, %v311_v16  ;;  %15406 = vmatmul.mubr.msk.f32.vlgmr.msra.gmra.mxu1 %vm371_vm0, %v327_v17 }
  0x1f   : > { %634 = vmatprep.mubr.f32.mxu1 %v15692_v18  ;;  %538 = vmatprep.mubr.f32.mxu0 %v15692_v18 }
  0x22   : > { %15407 = vmatmul.mubr.msk.f32.gmra.mxu1 %vm371_vm0, %v328_v19  ;;  %15391 = vmatmul.mubr.msk.f32.gmra.mxu0 %vm371_vm0, %v312_v20 }
  0x23   : > { %544 = vmatprep.mubr.f32.mxu0 %v15692_v18  ;;  %640 = vmatprep.mubr.f32.mxu1 %v15692_v18 }
  0x26   : > { %15392 = vmatmul.mubr.msk.f32.gmra.mxu0 %vm371_vm0, %v313_v21  ;;  %15408 = vmatmul.mubr.msk.f32.gmra.mxu1 %vm371_vm0, %v329_v22 }
  0x27   : > { %550 = vmatprep.mubr.f32.mxu0 %v15692_v18  ;;  %646 = vmatprep.mubr.f32.mxu1 %v15692_v18 }
  0x2a   : > { %15393 = vmatmul.mubr.msk.f32.gmra.mxu0 %vm371_vm0, %v314_v23  ;;  %15409 = vmatmul.mubr.msk.f32.gmra.mxu1 %vm371_vm0, %v330_v24 }
  0x2b   : > { %556 = vmatprep.mubr.f32.mxu0 %v15692_v18  ;;  %652 = vmatprep.mubr.f32.mxu1 %v15692_v18 }
  0x2e   : > { %15394 = vmatmul.mubr.msk.f32.gmra.mxu0 %vm371_vm0, %v315_v25  ;;  %15410 = vmatmul.mubr.msk.f32.gmra.mxu1 %vm371_vm0, %v331_v26 }
  0x2f   : > { %562 = vmatprep.mubr.f32.mxu0 %v15692_v18  ;;  %658 = vmatprep.mubr.f32.mxu1 %v15692_v18 }
  0x32   : > { %15395 = vmatmul.mubr.msk.f32.gmra.mxu0 %vm371_vm0, %v316_v27  ;;  %15411 = vmatmul.mubr.msk.f32.gmra.mxu1 %vm371_vm0, %v332_v28 }
  0x33   : > { %568 = vmatprep.mubr.f32.mxu0 %v15692_v18  ;;  %664 = vmatprep.mubr.f32.mxu1 %v15692_v18 }
  0x36   : > { %15396 = vmatmul.mubr.msk.f32.gmra.mxu0 %vm371_vm0, %v317_v29  ;;  %15412 = vmatmul.mubr.msk.f32.gmra.mxu1 %vm371_vm0, %v333_v30 }
  0x37   : > { %574 = vmatprep.mubr.f32.mxu0 %v15692_v18  ;;  %670 = vmatprep.mubr.f32.mxu1 %v15692_v18 }
  0x3a   : > { %15397 = vmatmul.mubr.msk.f32.gmra.mxu0 %vm371_vm0, %v318_v31  ;;  %15413 = vmatmul.mubr.msk.f32.gmra.mxu1 %vm371_vm0, %v334_v32 }
  0x3b   : > { %580 = vmatprep.mubr.f32.mxu0 %v15692_v18  ;;  %676 = vmatprep.mubr.f32.mxu1 %v15692_v18 }
  0x3e   : > { %15398 = vmatmul.mubr.msk.f32.gmra.mxu0 %vm371_vm0, %v319_v33  ;;  %15414 = vmatmul.mubr.msk.f32.gmra.mxu1 %vm371_vm0, %v335_v34 }
  0x3f   : > { %586 = vmatprep.mubr.f32.mxu0 %v15692_v18  ;;  %682 = vmatprep.mubr.f32.mxu1 %v15692_v18 }
  0x42   : > { %15399 = vmatmul.mubr.msk.f32.gmra.mxu0 %vm371_vm0, %v320_v35  ;;  %15415 = vmatmul.mubr.msk.f32.gmra.mxu1 %vm371_vm0, %v336_v36 }
  0x43   : > { %592 = vmatprep.mubr.f32.mxu0 %v15692_v18  ;;  %688 = vmatprep.mubr.f32.mxu1 %v15692_v18 }
  0x46   : > { %15400 = vmatmul.mubr.msk.f32.gmra.mxu0 %vm371_vm0, %v321_v37  ;;  %15416 = vmatmul.mubr.msk.f32.gmra.mxu1 %vm371_vm0, %v337_v38 }
  0x47   : > { %598 = vmatprep.mubr.f32.mxu0 %v15692_v18  ;;  %694 = vmatprep.mubr.f32.mxu1 %v15692_v18 }
  0x4a   : > { %15401 = vmatmul.mubr.msk.f32.gmra.mxu0 %vm371_vm0, %v322_v39  ;;  %15417 = vmatmul.mubr.msk.f32.gmra.mxu1 %vm371_vm0, %v338_v40 }
  0x4b   : > { %604 = vmatprep.mubr.f32.mxu0 %v15692_v18  ;;  %700 = vmatprep.mubr.f32.mxu1 %v15692_v18 }
  0x4e   : > { %15402 = vmatmul.mubr.msk.f32.gmra.mxu0 %vm371_vm0, %v323_v41  ;;  %15418 = vmatmul.mubr.msk.f32.gmra.mxu1 %vm371_vm0, %v339_v43 }
  0x4f   : > { %610 = vmatprep.mubr.f32.mxu0 %v15692_v18  ;;  %706 = vmatprep.mubr.f32.mxu1 %v15692_v18 }
  0x52   : > { %15403 = vmatmul.mubr.msk.f32.gmra.mxu0 %vm371_vm0, %v324_v42  ;;  %15419 = vmatmul.mubr.msk.f32.gmra.mxu1 %vm371_vm0, %v340_v44 }
  0x53   : > { %616 = vmatprep.mubr.f32.mxu0 %v15692_v18  ;;  %712 = vmatprep.mubr.f32.mxu1 %v15692_v18 }
  0x56   : > { %15404 = vmatmul.mubr.msk.f32.gmra.mxu0 %vm371_vm0, %v325_v45  ;;  %15420 = vmatmul.mubr.msk.f32.gmra.mxu1 %vm371_vm0, %v341_v47 }
  0x57   : > { %622 = vmatprep.mubr.f32.mxu0 %v15692_v18  ;;  %718 = vmatprep.mubr.f32.mxu1 %v15692_v18 }
  0x5a   : > { %15405 = vmatmul.mubr.msk.f32.gmra.mxu0 %vm371_vm0, %v326_v46  ;;  %15421 = vmatmul.mubr.msk.f32.gmra.mxu1 %vm371_vm0, %v342_v48 }
  0xde   : > { %v534_v54 = vpop.f32.mrf.mxu0  ;;  %v630_v55 = vpop.f32.mrf.mxu1 }
  0xdf   : > { %v15908_v56 = vadd.f32 %v534_v54, %v15905_v53  ;;  %v15917_v60 = vadd.f32 %v630_v55, %v15905_v53 }
  0xe0   : > { %v15910_v57 = vpop.f32.mrf.mxu1  ;;  %v15912_v58 = vpop.f32.mrf.mxu0 }
  0xe1   : > { %21625 = vst [vmem:[#allocation3_spill] sm:$0xff] %v15910_v57  ;;  %21626 = vst [vmem:[#allocation4_spill] sm:$0xff] %v15912_v58  ;;  %757 = vrot.lane.b32.xlu0 %v15908_v56, %s15693_s14 }
  0xe2   : > { %v636_v59 = vpop.f32.mrf.mxu1  ;;  %v540_v62 = vpop.f32.mrf.mxu0 }
  0xe3   : > { %v15920_v61 = vadd.f32 %v636_v59, %v15905_v53  ;;  %v15923_v63 = vadd.f32 %v540_v62, %v15905_v53 }
  0xe4   : > { %v15945_v0 = vpop.f32.mrf.mxu0  ;;  %v15951_v2 = vpop.f32.mrf.mxu1 }
  0xe5   : > { %791 = vrot.lane.b32.xlu1 %v15920_v61, %s15693_s14  ;;  %789 = vrot.lane.b32.xlu0 %v15917_v60, %s15693_s14  ;;  %21627 = vst [vmem:[#allocation5_spill] sm:$0xff] %v15945_v0  ;;  %21628 = vst [vmem:[#allocation6_spill] sm:$0xff] %v15951_v2 }
  0xe6   : > { %v546_v1 = vpop.f32.mrf.mxu0  ;;  %v642_v4 = vpop.f32.mrf.mxu1 }
  0xe7   : > { %v15956_v5 = vadd.f32 %v546_v1, %v15905_v53  ;;  %v15968_v9 = vadd.f32 %v642_v4, %v15905_v53 }
  0xe8   : > { %v15953_v3 = vpop.f32.mrf.mxu0  ;;  %v15962_v7 = vpop.f32.mrf.mxu1 }
  0xe9   : > { %855 = vrot.lane.b32.xlu1 %v15923_v63, %s15694_s15  ;;  %853 = vrot.lane.b32.xlu0 %v15908_v56, %s15694_s15  ;;  %21629 = vst [vmem:[#allocation7_spill] sm:$0xff] %v15953_v3  ;;  %21630 = vst [vmem:[#allocation8_spill] sm:$0xff] %v15962_v7 }
  0xea   : > { %v552_v6 = vpop.f32.mrf.mxu0  ;;  %v648_v10 = vpop.f32.mrf.mxu1 }
  0xeb   : > { %v15965_v8 = vadd.f32 %v552_v6, %v15905_v53  ;;  %v15975_v11 = vadd.f32 %v648_v10, %v15905_v53 }
  0xec   : > { %v15993_v12 = vpop.f32.mrf.mxu0  ;;  %v15995_v13 = vpop.f32.mrf.mxu1 }
  0xed   : > { %887 = vrot.lane.b32.xlu1 %v15920_v61, %s15694_s15  ;;  %885 = vrot.lane.b32.xlu0 %v15917_v60, %s15694_s15  ;;  %21631 = vst [vmem:[#allocation9_spill] sm:$0xff] %v15993_v12  ;;  %21632 = vst [vmem:[#allocation10_spill] sm:$0xff] %v15995_v13 }
  0xee   : > { %v558_v14 = vpop.f32.mrf.mxu0  ;;  %v654_v15 = vpop.f32.mrf.mxu1 }
  0xef   : > { %v16010_v19 = vadd.f32 %v558_v14, %v15905_v53  ;;  %v16022_v23 = vadd.f32 %v654_v15, %v15905_v53  ;;  %v15697_v14 = vmov 1983009808  }
  0xf0   : > { %v16001_v16 = vpop.f32.mrf.mxu0  ;;  %v16007_v17 = vpop.f32.mrf.mxu1  ;;  %v1048_v15 = vunpack.c.l.s4 %v15697_v14 }
  0xf1   : > { %951 = vrot.lane.b32.xlu1 %v15923_v63, %s15695_s16  ;;  %949 = vrot.lane.b32.xlu0 %v15908_v56, %s15695_s16  ;;  %21633 = vst [vmem:[#allocation11_spill] sm:$0xff] %v16001_v16  ;;  %21634 = vst [vmem:[#allocation12_spill] sm:$0xff] %v16007_v17 }
  0xf2   : > { %v564_v18 = vpop.f32.mrf.mxu0  ;;  %v660_v20 = vpop.f32.mrf.mxu1 }
  0xf3   : > { %v16019_v22 = vadd.f32 %v564_v18, %v15905_v53  ;;  %v16031_v27 = vadd.f32 %v660_v20, %v15905_v53  ;;  %v15698_v20 = vmov 1934713408  }
  0xf4   : > { %v16016_v21 = vpop.f32.mrf.mxu0  ;;  %v16028_v24 = vpop.f32.mrf.mxu1 }
  0xf5   : > { %983 = vrot.lane.b32.xlu1 %v15920_v61, %s15695_s16  ;;  %981 = vrot.lane.b32.xlu0 %v15917_v60, %s15695_s16  ;;  %21635 = vst [vmem:[#allocation13_spill] sm:$0xff] %v16016_v21  ;;  %21636 = vst [vmem:[#allocation14_spill] sm:$0xff] %v16028_v24 }
  0xf6   : > { %v570_v25 = vpop.f32.mrf.mxu0  ;;  %v666_v26 = vpop.f32.mrf.mxu1 }
  0xf7   : > { %v16078_v41 = vadd.f32 %v570_v25, %v15905_v53  ;;  %v16090_v46 = vadd.f32 %v666_v26, %v15905_v53  ;;  %v1080_v25 = vunpack.c.l.s4 %v15698_v20 }
  0xf8   : > { %v16037_v28 = vpop.f32.mrf.mxu0  ;;  %v16039_v29 = vpop.f32.mrf.mxu1 }
  0xf9   : > { %5528 = vrot.lane.b32.xlu1 %v15923_v63, %s15696_s17  ;;  %5526 = vrot.lane.b32.xlu0 %v15908_v56, %s15696_s17  ;;  %21637 = vst [vmem:[#allocation15_spill] sm:$0xff] %v16037_v28  ;;  %21638 = vst [vmem:[#allocation16_spill] sm:$0xff] %v16039_v29  ;;  %v1081_v14 = vunpack.c.0.s8 %v1080_v25 }
  0xfa   : > { %v576_v30 = vpop.f32.mrf.mxu0  ;;  %v672_v31 = vpop.f32.mrf.mxu1 }
  0xfb   : > { %v16087_v45 = vadd.f32 %v576_v30, %v15905_v53  ;;  %v16101_v49 = vadd.f32 %v672_v31, %v15905_v53  ;;  %v16163_v25 = vsub.s32 %v1081_v14, %v15899_v50 }
  0xfc   : > { %v16049_v32 = vpop.f32.mrf.mxu0  ;;  %v16051_v33 = vpop.f32.mrf.mxu1 }
  0xfd   : > { %5560 = vrot.lane.b32.xlu1 %v15920_v61, %s15696_s17  ;;  %5558 = vrot.lane.b32.xlu0 %v15917_v60, %s15696_s17  ;;  %21639 = vst [vmem:[#allocation17_spill] sm:$0xff] %v16049_v32  ;;  %21640 = vst [vmem:[#allocation18_spill] sm:$0xff] %v16051_v33 }
  0xfe   : > { %v16053_v34 = vpop.f32.mrf.mxu0  ;;  %v16059_v35 = vpop.f32.mrf.mxu1 }
 0x100   : > { %v16061_v36 = vpop.f32.mrf.mxu0  ;;  %v16067_v37 = vpop.f32.mrf.mxu1 }
 0x101   : > { %761 = vrot.lane.b32.xlu1 %v15956_v5, %s15693_s14  ;;  %759 = vrot.lane.b32.xlu0 %v15923_v63, %s15693_s14  ;;  %21641 = vst [vmem:[#allocation19_spill] sm:$0xff] %v16061_v36  ;;  %21642 = vst [vmem:[#allocation20_spill] sm:$0xff] %v16067_v37 }
 0x102   : > { %v16069_v38 = vpop.f32.mrf.mxu0  ;;  %v684_v39 = vpop.f32.mrf.mxu1 }
 0x104   : > { %v16075_v40 = vpop.f32.mrf.mxu0  ;;  %v16084_v42 = vpop.f32.mrf.mxu1 }
 0x105   : > { %763 = vrot.lane.b32.xlu1 %v15965_v8, %s15693_s14  ;;  %793 = vrot.lane.b32.xlu0 %v15968_v9, %s15693_s14  ;;  %21643 = vst [vmem:[#allocation21_spill] sm:$0xff] %v16075_v40  ;;  %21644 = vst [vmem:[#allocation22_spill] sm:$0xff] %v16084_v42  ;;  %v16175_v40 = vadd.f32 %v16059_v35, %v15905_v53 }
 0x106   : > { %v594_v43 = vpop.f32.mrf.mxu0  ;;  %v690_v44 = vpop.f32.mrf.mxu1 }
 0x107   : > { %v16187_v37 = vadd.f32 %v690_v44, %v15905_v53 }
 0x108   : > { %v16096_v47 = vpop.f32.mrf.mxu0  ;;  %v16098_v48 = vpop.f32.mrf.mxu1 }
 0x109   : > { %795 = vrot.lane.b32.xlu1 %v15975_v11, %s15693_s14  ;;  %857 = vrot.lane.b32.xlu0 %v15956_v5, %s15694_s15  ;;  %21645 = vst [vmem:[#allocation23_spill] sm:$0xff] %v16096_v47  ;;  %21646 = vst [vmem:[#allocation24_spill] sm:$0xff] %v16098_v48  ;;  %v16151_v47 = vadd.f32 %v16053_v34, %v15905_v53  ;;  %v16171_v34 = vadd.f32 %v16069_v38, %v15905_v53 }
 0x10a   : > { %v600_v51 = vpop.f32.mrf.mxu0  ;;  %v696_v52 = vpop.f32.mrf.mxu1  ;;  %21656 = vst [vmem:[#allocation34_spill] sm:$0xff] %v16187_v37 }
 0x10b   : > { %v16184_v14 = vadd.f32 %v600_v51, %v15905_v53  ;;  %v16190_v36 = vadd.f32 %v696_v52, %v15905_v53 }
 0x10c   : > { %v16111_v54 = vpop.f32.mrf.mxu0  ;;  %v16113_v55 = vpop.f32.mrf.mxu1 }
 0x10d   : > { %859 = vrot.lane.b32.xlu1 %v15965_v8, %s15694_s15  ;;  %889 = vrot.lane.b32.xlu0 %v15968_v9, %s15694_s15  ;;  %21647 = vst [vmem:[#allocation25_spill] sm:$0xff] %v16111_v54  ;;  %21648 = vst [vmem:[#allocation26_spill] sm:$0xff] %v16113_v55 }
 0x10e   : > { %v606_v59 = vpop.f32.mrf.mxu0  ;;  %v702_v62 = vpop.f32.mrf.mxu1  ;;  %21655 = vst [vmem:[#allocation33_spill] sm:$0xff] %v16184_v14  ;;  %21657 = vst [vmem:[#allocation35_spill] sm:$0xff] %v16190_v36 }
 0x10f   : > { %v16199_v35 = vadd.f32 %v606_v59, %v15905_v53 }
 0x110   : > { %v16119_v1 = vpop.f32.mrf.mxu0  ;;  %v16125_v4 = vpop.f32.mrf.mxu1 }
 0x111   : > { %891 = vrot.lane.b32.xlu1 %v15975_v11, %s15694_s15  ;;  %953 = vrot.lane.b32.xlu0 %v15956_v5, %s15695_s16  ;;  %21649 = vst [vmem:[#allocation27_spill] sm:$0xff] %v16119_v1  ;;  %21650 = vst [vmem:[#allocation28_spill] sm:$0xff] %v16125_v4  ;;  %v1049_v4 = vunpack.c.0.s8 %v1048_v15 }
 0x112   : > { %v612_v10 = vpop.f32.mrf.mxu0  ;;  %v708_v18 = vpop.f32.mrf.mxu1  ;;  %21659 = vst [vmem:[#allocation37_spill] sm:$0xff] %v16199_v35 }
 0x113   : > { %v16158_v15 = vsub.s32 %v1049_v4, %v15899_v50  ;;  %v16178_v4 = vadd.f32 %v684_v39, %v15905_v53  ;;  %v16202_v39 = vadd.f32 %v612_v10, %v15905_v53  ;;  %v16212_v52 = vadd.f32 %v708_v18, %v15905_v53 }
 0x114   : > { %v16137_v31 = vpop.f32.mrf.mxu0  ;;  %v16143_v1 = vpop.f32.mrf.mxu1 }
 0x115   : > { %955 = vrot.lane.b32.xlu1 %v15965_v8, %s15695_s16  ;;  %985 = vrot.lane.b32.xlu0 %v15968_v9, %s15695_s16  ;;  %21651 = vst [vmem:[#allocation29_spill] sm:$0xff] %v16137_v31  ;;  %21652 = vst [vmem:[#allocation30_spill] sm:$0xff] %v16143_v1 }
 0x116   : > { %v618_v55 = vpop.f32.mrf.mxu0  ;;  %v714_v54 = vpop.f32.mrf.mxu1  ;;  %21654 = vst [vmem:[#allocation32_spill] sm:$0xff] %v16178_v4  ;;  %21661 = vst [vmem:[#allocation39_spill] sm:$0xff] %v16212_v52 }
 0x118   : > { %v16160_v1 = vpop.f32.mrf.mxu0  ;;  %v16192_v38 = vpop.f32.mrf.mxu1 }
 0x119   : > { %987 = vrot.lane.b32.xlu1 %v15975_v11, %s15695_s16  ;;  %5530 = vrot.lane.b32.xlu0 %v15956_v5, %s15696_s17  ;;  %21653 = vst [vmem:[#allocation31_spill] sm:$0xff] %v16160_v1  ;;  %v16181_v1 = vadd.f32 %v594_v43, %v15905_v53  ;;  %21658 = vst [vmem:[#allocation36_spill] sm:$0xff] %v16192_v38  ;;  %v16205_v43 = vadd.f32 %v702_v62, %v15905_v53 }
 0x11a   : > { %v16215_v38 = vadd.f32 %v618_v55, %v15905_v53  ;;  %v624_v59 = vpop.f32.mrf.mxu0  ;;  %v720_v24 = vpop.f32.mrf.mxu1 }
 0x11b   : > { %21660 = vst [vmem:[#allocation38_spill] sm:$0xff] %v16205_v43  ;;  %v16234_v28 = vadd.f32 %v624_v59, %v15905_v53  ;;  %v16248_v21 = vadd.f32 %v720_v24, %v15905_v53 }
 0x11c   : > { %21662 = vst [vmem:[#allocation40_spill] sm:$0xff] %v16215_v38 }
 0x11d   : > { %5532 = vrot.lane.b32.xlu1 %v15965_v8, %s15696_s17  ;;  %5562 = vrot.lane.b32.xlu0 %v15968_v9, %s15696_s17  ;;  %21665 = vst [vmem:[#allocation43_spill] sm:$0xff] %v16234_v28 }
 0x121   : > { %5564 = vrot.lane.b32.xlu1 %v15975_v11, %s15696_s17  ;;  %765 = vrot.lane.b32.xlu0 %v16010_v19, %s15693_s14 }
 0x125   : > { %767 = vrot.lane.b32.xlu1 %v16019_v22, %s15693_s14  ;;  %797 = vrot.lane.b32.xlu0 %v16022_v23, %s15693_s14 }
 0x129   : > { %799 = vrot.lane.b32.xlu1 %v16031_v27, %s15693_s14  ;;  %861 = vrot.lane.b32.xlu0 %v16010_v19, %s15694_s15 }
 0x12d   : > { %863 = vrot.lane.b32.xlu1 %v16019_v22, %s15694_s15  ;;  %893 = vrot.lane.b32.xlu0 %v16022_v23, %s15694_s15 }
 0x131   : > { %895 = vrot.lane.b32.xlu1 %v16031_v27, %s15694_s15  ;;  %957 = vrot.lane.b32.xlu0 %v16010_v19, %s15695_s16 }
 0x135   : > { %959 = vrot.lane.b32.xlu1 %v16019_v22, %s15695_s16  ;;  %989 = vrot.lane.b32.xlu0 %v16022_v23, %s15695_s16 }
 0x139   : > { %991 = vrot.lane.b32.xlu1 %v16031_v27, %s15695_s16  ;;  %5534 = vrot.lane.b32.xlu0 %v16010_v19, %s15696_s17 }
 0x13d   : > { %5536 = vrot.lane.b32.xlu1 %v16019_v22, %s15696_s17  ;;  %5566 = vrot.lane.b32.xlu0 %v16022_v23, %s15696_s17 }
 0x141   : > { %5568 = vrot.lane.b32.xlu1 %v16031_v27, %s15696_s17  ;;  %769 = vrot.lane.b32.xlu0 %v16078_v41, %s15693_s14 }
 0x145   : > { %771 = vrot.lane.b32.xlu1 %v16087_v45, %s15693_s14  ;;  %801 = vrot.lane.b32.xlu0 %v16090_v46, %s15693_s14 }
 0x149   : > { %803 = vrot.lane.b32.xlu1 %v16101_v49, %s15693_s14  ;;  %865 = vrot.lane.b32.xlu0 %v16078_v41, %s15694_s15 }
 0x14d   : > { %867 = vrot.lane.b32.xlu1 %v16087_v45, %s15694_s15  ;;  %897 = vrot.lane.b32.xlu0 %v16090_v46, %s15694_s15 }
 0x151   : > { %899 = vrot.lane.b32.xlu1 %v16101_v49, %s15694_s15  ;;  %961 = vrot.lane.b32.xlu0 %v16078_v41, %s15695_s16 }
 0x153   : > { %v16127_v6 = vpop.permute.xlu0 %757 }
 0x155   : > { %963 = vrot.lane.b32.xlu1 %v16087_v45, %s15695_s16  ;;  %993 = vrot.lane.b32.xlu0 %v16090_v46, %s15695_s16 }
 0x157   : > { %v16133_v26 = vpop.permute.xlu1 %791  ;;  %v16135_v30 = vpop.permute.xlu0 %789 }
 0x159   : > { %995 = vrot.lane.b32.xlu1 %v16101_v49, %s15695_s16  ;;  %5538 = vrot.lane.b32.xlu0 %v16078_v41, %s15696_s17 }
 0x15b   : > { %v16145_v48 = vpop.permute.xlu1 %855  ;;  %v16147_v20 = vpop.permute.xlu0 %853 }
 0x15c   : > { %v1045_v44 = vcombine.low %v15908_v56, %v16147_v20  ;;  %v1046_v51 = vcombine.high %v15908_v56, %v16147_v20 }
 0x15d   : > { %5540 = vrot.lane.b32.xlu1 %v16087_v45, %s15696_s17  ;;  %5570 = vrot.lane.b32.xlu0 %v16090_v46, %s15696_s17 }
 0x15e   : > { %v1053_v59 = vrot.slane %v1045_v44, %v16158_v15 }
 0x15f   : > { %v16165_v31 = vpop.permute.xlu1 %887  ;;  %v16167_v42 = vpop.permute.xlu0 %885 }
 0x160   : > { %v2201_v10 = vcombine.low %v15920_v61, %v16165_v31  ;;  %v2202_v62 = vcombine.high %v15920_v61, %v16165_v31  ;;  %v2133_v33 = vcombine.low %v15917_v60, %v16167_v42  ;;  %v2134_v32 = vcombine.high %v15917_v60, %v16167_v42 }
 0x161   : > { %5572 = vrot.lane.b32.xlu1 %v16101_v49, %s15696_s17  ;;  %773 = vrot.lane.b32.xlu0 %v16151_v47, %s15693_s14  ;;  %v16237_v61 = vadd.f32 %v714_v54, %v15905_v53  ;;  %v1060_v54 = vrot.slane %v1046_v51, %v16158_v15 }
 0x162   : > { %v2209_v7 = vrot.slane %v2201_v10, %v16158_v15  ;;  %v2216_v17 = vrot.slane %v2202_v62, %v16158_v15  ;;  %v16257_v2 = vrot.slane %v2133_v33, %v16158_v15  ;;  %v16260_v57 = vrot.slane %v2134_v32, %v16158_v15 }
 0x163   : > { %v16225_v56 = vpop.permute.xlu1 %951  ;;  %v16227_v18 = vpop.permute.xlu0 %949 }
 0x164   : > { %21663 = vst [vmem:[#allocation41_spill] sm:$0xff] %v16225_v56  ;;  %21664 = vst [vmem:[#allocation42_spill] sm:$0xff] %v16227_v18  ;;  %v1061_v55 = vcombine.low %v16127_v6, %v16227_v18  ;;  %v1062_v29 = vcombine.high %v16127_v6, %v16227_v18 }
 0x165   : > { %775 = vrot.lane.b32.xlu1 %v16171_v34, %s15693_s14  ;;  %805 = vrot.lane.b32.xlu0 %v16175_v40, %s15693_s14 }
 0x166   : > { %v1069_v13 = vrot.slane %v1061_v55, %v16158_v15  ;;  %v1076_v60 = vrot.slane %v1062_v29, %v16158_v15 }
 0x167   : > { %v16262_v53 = vpop.permute.xlu1 %983  ;;  %v16264_v24 = vpop.permute.xlu0 %981 }
 0x168   : > { %21666 = vst [vmem:[#allocation44_spill] sm:$0xff] %v16262_v53  ;;  %21667 = vst [vmem:[#allocation45_spill] sm:$0xff] %v16264_v24  ;;  %v1077_v44 = vcombine.low %v1053_v59, %v1069_v13  ;;  %v1078_v51 = vcombine.high %v1053_v59, %v1069_v13  ;;  %v1093_v16 = vcombine.low %v1060_v54, %v1076_v60 }
 0x169   : > { %v1094_v55 = vcombine.high %v1060_v54, %v1076_v60  ;;  %v2217_v29 = vcombine.low %v16133_v26, %v16262_v53  ;;  %v2218_v10 = vcombine.high %v16133_v26, %v16262_v53  ;;  %v2149_v33 = vcombine.low %v16135_v30, %v16264_v24  ;;  %807 = vrot.lane.b32.xlu1 %v16178_v4, %s15693_s14 }
 0x16a   : > { %v2150_v32 = vcombine.high %v16135_v30, %v16264_v24  ;;  %v1085_v62 = vrot.slane %v1077_v44, %v16163_v25  ;;  %v1092_v13 = vrot.slane %v1078_v51, %v16163_v25  ;;  %v1101_v60 = vrot.slane %v1093_v16, %v16163_v25  ;;  %869 = vrot.lane.b32.xlu0 %v16151_v47, %s15694_s15 }
 0x16b   : > { %v1108_v59 = vrot.slane %v1094_v55, %v16163_v25  ;;  %v2225_v54 = vrot.slane %v2217_v29, %v16158_v15  ;;  %v2232_v12 = vrot.slane %v2218_v10, %v16158_v15  ;;  %v16285_v3 = vrot.slane %v2149_v33, %v16158_v15  ;;  %v16290_v44 = vpop.permute.xlu1 %5528  ;;  %v16292_v51 = vpop.permute.xlu0 %5526 }
 0x16c   : > { %v16288_v0 = vrot.slane %v2150_v32, %v16158_v15  ;;  %21668 = vst [vmem:[#allocation46_spill] sm:$0xff] %v16290_v44  ;;  %21669 = vst [vmem:[#allocation47_spill] sm:$0xff] %v16292_v51  ;;  %v3221_v16 = vcombine.low %v1085_v62, %v1092_v13  ;;  %v15422_v55 = vcombine.high %v1085_v62, %v1092_v13 }
 0x16d   : > { %v3237_v58 = vcombine.low %v1101_v60, %v1108_v59  ;;  %v15423_v50 = vcombine.high %v1101_v60, %v1108_v59  ;;  %v2233_v53 = vcombine.low %v2209_v7, %v2225_v54  ;;  %v2234_v24 = vcombine.high %v2209_v7, %v2225_v54  ;;  %871 = vrot.lane.b32.xlu1 %v16171_v34, %s15694_s15 }
 0x16e   : > { %v2249_v29 = vcombine.low %v2216_v17, %v2232_v12  ;;  %v2250_v18 = vcombine.high %v2216_v17, %v2232_v12  ;;  %v3228_v10 = vrot.slane %v3221_v16, %v16158_v15  ;;  %v3236_v33 = vrot.slane %v15422_v55, %v16158_v15  ;;  %901 = vrot.lane.b32.xlu0 %v16175_v40, %s15694_s15 }
 0x16f   : > { %v3244_v32 = vrot.slane %v3237_v58, %v16158_v15  ;;  %v3252_v44 = vrot.slane %v15423_v50, %v16158_v15  ;;  %v2241_v62 = vrot.slane %v2233_v53, %v16163_v25  ;;  %v2248_v7 = vrot.slane %v2234_v24, %v16163_v25  ;;  %v16306_v13 = vpop.permute.xlu1 %5560  ;;  %v16308_v60 = vpop.permute.xlu0 %5558 }
 0x170   : > { %v2257_v12 = vrot.slane %v2249_v29, %v16163_v25  ;;  %v2264_v17 = vrot.slane %v2250_v18, %v16163_v25  ;;  %21670 = vst [vmem:[#allocation48_spill] sm:$0xff] %v16306_v13  ;;  %21671 = vst [vmem:[#allocation49_spill] sm:$0xff] %v16308_v60  ;;  %v3253_v58 = vcombine.low %v3228_v10, %v3236_v33 }
 0x171   : > { %v3254_v50 = vcombine.high %v3228_v10, %v3236_v33  ;;  %v3269_v59 = vcombine.low %v3244_v32, %v3252_v44  ;;  %v3270_v54 = vcombine.high %v3244_v32, %v3252_v44  ;;  %v4377_v16 = vcombine.low %v2241_v62, %v2248_v7  ;;  %903 = vrot.lane.b32.xlu1 %v16178_v4, %s15694_s15 }
 0x172   : > { %v15456_v55 = vcombine.high %v2241_v62, %v2248_v7  ;;  %v4393_v53 = vcombine.low %v2257_v12, %v2264_v17  ;;  %v15457_v51 = vcombine.high %v2257_v12, %v2264_v17  ;;  %v3261_v18 = vrot.slane %v3253_v58, %v16163_v25  ;;  %965 = vrot.lane.b32.xlu0 %v16151_v47, %s15695_s16 }
 0x173   : > { %v3268_v24 = vrot.slane %v3254_v50, %v16163_v25  ;;  %v3277_v29 = vrot.slane %v3269_v59, %v16163_v25  ;;  %v3284_v13 = vrot.slane %v3270_v54, %v16163_v25  ;;  %v4384_v44 = vrot.slane %v4377_v16, %v16158_v15  ;;  %v16331_v62 = vpop.permute.xlu1 %761  ;;  %v16333_v7 = vpop.permute.xlu0 %759 }
 0x174   : > { %v4392_v10 = vrot.slane %v15456_v55, %v16158_v15  ;;  %v4400_v33 = vrot.slane %v4393_v53, %v16158_v15  ;;  %v4408_v32 = vrot.slane %v15457_v51, %v16158_v15  ;;  %v2165_v51 = vcombine.low %v16257_v2, %v16285_v3 }
 0x175   : > { %v3285_v12 = vcombine.low %v3261_v18, %v3277_v29  ;;  %v3286_v17 = vcombine.high %v3261_v18, %v3277_v29  ;;  %v3287_v58 = vcombine.low %v3268_v24, %v3284_v13  ;;  %v3288_v50 = vcombine.high %v3268_v24, %v3284_v13  ;;  %967 = vrot.lane.b32.xlu1 %v16171_v34, %s15695_s16 }
 0x176   : > { %v4409_v59 = vcombine.low %v4384_v44, %v4392_v10  ;;  %v4410_v54 = vcombine.high %v4384_v44, %v4392_v10  ;;  %v4425_v16 = vcombine.low %v4400_v33, %v4408_v32  ;;  %v4426_v60 = vcombine.high %v4400_v33, %v4408_v32  ;;  %997 = vrot.lane.b32.xlu0 %v16175_v40, %s15695_s16 }
 0x177   : > { %5398 = vst.msk [vmem:[%s16325_s24] sm:$0xff] %vm5397_vm1, %v3285_v12  ;;  %5430 = vst.msk [vmem:[%s16325_s24 + $0x100] sm:$0xff] %vm5397_vm1, %v3286_v17  ;;  %v2166_v13 = vcombine.high %v16257_v2, %v16285_v3  ;;  %v2181_v55 = vcombine.low %v16260_v57, %v16288_v0  ;;  %v2182_v53 = vcombine.high %v16260_v57, %v16288_v0  ;;  %v16359_v10 = vpop.permute.xlu1 %763  ;;  %v16361_v2 = vpop.permute.xlu0 %793 }
 0x178   : > { %5462 = vst.msk [vmem:[%s16325_s24 + $0x200] sm:$0xff] %vm5397_vm1, %v3287_v58  ;;  %5494 = vst.msk [vmem:[%s16325_s24 + $0x300] sm:$0xff] %vm5397_vm1, %v3288_v50  ;;  %v4417_v18 = vrot.slane %v4409_v59, %v16163_v25  ;;  %v4424_v24 = vrot.slane %v4410_v54, %v16163_v25  ;;  %v4433_v29 = vrot.slane %v4425_v16, %v16163_v25 }
 0x179   : > { %v4440_v44 = vrot.slane %v4426_v60, %v16163_v25  ;;  %21672 = vst [vmem:[#allocation50_spill] sm:$0xff] %v16359_v10  ;;  %21673 = vst [vmem:[#allocation51_spill] sm:$0xff] %v16361_v2  ;;  %v2173_v3 = vrot.slane %v2165_v51, %v16163_v25  ;;  %v2180_v57 = vrot.slane %v2166_v13, %v16163_v25  ;;  %999 = vrot.lane.b32.xlu1 %v16178_v4, %s15695_s16 }
 0x17a   : > { %v2189_v0 = vrot.slane %v2181_v55, %v16163_v25  ;;  %v2196_v33 = vrot.slane %v2182_v53, %v16163_v25  ;;  %v4441_v32 = vcombine.low %v4417_v18, %v4433_v29  ;;  %v4442_v12 = vcombine.high %v4417_v18, %v4433_v29  ;;  %5542 = vrot.lane.b32.xlu0 %v16151_v47, %s15696_s17 }
 0x17b   : > { %v4443_v17 = vcombine.low %v4424_v24, %v4440_v44  ;;  %v4444_v60 = vcombine.high %v4424_v24, %v4440_v44  ;;  %v4309_v58 = vcombine.low %v2173_v3, %v2180_v57  ;;  %v15454_v50 = vcombine.high %v2173_v3, %v2180_v57  ;;  %v16391_v24 = vpop.permute.xlu1 %795  ;;  %v16393_v29 = vpop.permute.xlu0 %857 }
 0x17c   : > { %v4325_v59 = vcombine.low %v2189_v0, %v2196_v33  ;;  %v15455_v54 = vcombine.high %v2189_v0, %v2196_v33  ;;  %v21674_v16 = vcombine.low %v15923_v63, %v16145_v48  ;;  %v21675_v13 = vcombine.high %v15923_v63, %v16145_v48  ;;  %5415 = vst.msk [vmem:[%s16325_s24 + $0x88] sm:$0xff] %vm5397_vm1, %v4441_v32 }
 0x17d   : > { %5447 = vst.msk [vmem:[%s16325_s24 + $0x188] sm:$0xff] %vm5397_vm1, %v4442_v12  ;;  %5479 = vst.msk [vmem:[%s16325_s24 + $0x288] sm:$0xff] %vm5397_vm1, %v4443_v17  ;;  %v1129_v53 = vcombine.low %v16333_v7, %v16225_v56  ;;  %v1130_v18 = vcombine.high %v16333_v7, %v16225_v56  ;;  %v4316_v63 = vrot.slane %v4309_v58, %v16158_v15  ;;  %5544 = vrot.lane.b32.xlu1 %v16171_v34, %s15696_s17 }
 0x17e   : > { %v1121_v51 = vrot.slane %v21674_v16, %v16158_v15  ;;  %v1128_v55 = vrot.slane %v21675_v13, %v16158_v15  ;;  %5511 = vst.msk [vmem:[%s16325_s24 + $0x388] sm:$0xff] %vm5397_vm1, %v4444_v60  ;;  %21676 = vst [vmem:[#allocation52_spill] sm:$0xff] %v16393_v29  ;;  %v4324_v44 = vrot.slane %v15454_v50, %v16158_v15  ;;  %5574 = vrot.lane.b32.xlu0 %v16175_v40, %s15696_s17 }
 0x17f   : > { %v4332_v3 = vrot.slane %v4325_v59, %v16158_v15  ;;  %v4340_v57 = vrot.slane %v15455_v54, %v16158_v15  ;;  %v1137_v0 = vrot.slane %v1129_v53, %v16158_v15  ;;  %v1144_v33 = vrot.slane %v1130_v18, %v16158_v15  ;;  %v16409_v53 = vpop.permute.xlu1 %859  ;;  %v16411_v18 = vpop.permute.xlu0 %889 }
 0x180   : > { %v1181_v32 = vcombine.low %v15956_v5, %v16393_v29  ;;  %v1182_v12 = vcombine.high %v15956_v5, %v16393_v29  ;;  %v4341_v17 = vcombine.low %v4316_v63, %v4324_v44  ;;  %v4342_v60 = vcombine.high %v4316_v63, %v4324_v44  ;;  %21677 = vst [vmem:[#allocation53_spill] sm:$0xff] %v16409_v53 }
 0x181   : > { %v4357_v58 = vcombine.low %v4332_v3, %v4340_v57  ;;  %v4358_v50 = vcombine.high %v4332_v3, %v4340_v57  ;;  %v1145_v59 = vcombine.low %v1121_v51, %v1137_v0  ;;  %v1146_v54 = vcombine.high %v1121_v51, %v1137_v0  ;;  %21678 = vst [vmem:[#allocation54_spill] sm:$0xff] %v16411_v18 }
 0x182   : > { %v1161_v16 = vcombine.low %v1128_v55, %v1144_v33  ;;  %v1162_v13 = vcombine.high %v1128_v55, %v1144_v33  ;;  %v4349_v5 = vrot.slane %v4341_v17, %v16163_v25  ;;  %v4356_v56 = vrot.slane %v4342_v60, %v16163_v25  ;;  %5576 = vrot.lane.b32.xlu1 %v16178_v4, %s15696_s17 }
 0x183   : > { %v4365_v29 = vrot.slane %v4357_v58, %v16163_v25  ;;  %v4372_v63 = vrot.slane %v4358_v50, %v16163_v25  ;;  %v1153_v44 = vrot.slane %v1145_v59, %v16163_v25  ;;  %v1160_v3 = vrot.slane %v1146_v54, %v16163_v25  ;;  %777 = vrot.lane.b32.xlu0 %v16181_v1, %s15693_s14  ;;  %v16425_v54 = vpop.permute.xlu1 %891 }
 0x184   : > { %v1169_v51 = vrot.slane %v1161_v16, %v16163_v25  ;;  %v1176_v55 = vrot.slane %v1162_v13, %v16163_v25  ;;  %21679 = vst [vmem:[#allocation55_spill] sm:$0xff] %v16425_v54  ;;  %v16427_v16 = vpop.permute.xlu0 %953  ;;  %v1249_v13 = vcombine.low %v15965_v8, %v16409_v53 }
 0x185   : > { %v4373_v57 = vcombine.low %v4349_v5, %v4365_v29  ;;  %v4374_v0 = vcombine.high %v4349_v5, %v4365_v29  ;;  %v4375_v33 = vcombine.low %v4356_v56, %v4372_v63  ;;  %v4376_v17 = vcombine.high %v4356_v56, %v4372_v63  ;;  %21680 = vst [vmem:[#allocation56_spill] sm:$0xff] %v16427_v16 }
 0x186   : > { %v3289_v60 = vcombine.low %v1153_v44, %v1160_v3  ;;  %v15424_v58 = vcombine.high %v1153_v44, %v1160_v3  ;;  %v3305_v50 = vcombine.low %v1169_v51, %v1176_v55  ;;  %v15425_v59 = vcombine.high %v1169_v51, %v1176_v55  ;;  %779 = vrot.lane.b32.xlu1 %v16184_v14, %s15693_s14 }
 0x187   : > { %5414 = vst.msk [vmem:[%s16325_s24 + $0x80] sm:$0xff] %vm5397_vm1, %v4373_v57  ;;  %5446 = vst.msk [vmem:[%s16325_s24 + $0x180] sm:$0xff] %vm5397_vm1, %v4374_v0  ;;  %v16438_v56 = vrot.slane %v1181_v32, %v16158_v15  ;;  %v16441_v29 = vrot.slane %v1182_v12, %v16158_v15  ;;  %v1250_v5 = vcombine.high %v15965_v8, %v16409_v53  ;;  %809 = vrot.lane.b32.xlu0 %v16187_v37, %s15693_s14 }
 0x188   : > { %5478 = vst.msk [vmem:[%s16325_s24 + $0x280] sm:$0xff] %vm5397_vm1, %v4375_v33  ;;  %5510 = vst.msk [vmem:[%s16325_s24 + $0x380] sm:$0xff] %vm5397_vm1, %v4376_v17  ;;  %v3296_v63 = vrot.slane %v3289_v60, %v16158_v15  ;;  %v3304_v44 = vrot.slane %v15424_v58, %v16158_v15  ;;  %v3312_v3 = vrot.slane %v3305_v50, %v16158_v15  ;;  %v16465_v60 = vpop.permute.xlu1 %955  ;;  %v16467_v58 = vpop.permute.xlu0 %985 }
 0x189   : > { %v3320_v51 = vrot.slane %v15425_v59, %v16158_v15  ;;  %v16454_v32 = vrot.slane %v1249_v13, %v16158_v15  ;;  %v16457_v12 = vrot.slane %v1250_v5, %v16158_v15  ;;  %v2269_v8 = vcombine.low %v15968_v9, %v16411_v18  ;;  %21681 = vst [vmem:[#allocation57_spill] sm:$0xff] %v16465_v60 }
 0x18a   : > { %v2270_v55 = vcombine.high %v15968_v9, %v16411_v18  ;;  %v3321_v57 = vcombine.low %v3296_v63, %v3304_v44  ;;  %v3322_v0 = vcombine.high %v3296_v63, %v3304_v44  ;;  %21682 = vst [vmem:[#allocation58_spill] sm:$0xff] %v16467_v58  ;;  %v2337_v9 = vcombine.low %v15975_v11, %v16425_v54 }
 0x18b   : > { %v3337_v33 = vcombine.low %v3312_v3, %v3320_v51  ;;  %v3338_v17 = vcombine.high %v3312_v3, %v3320_v51  ;;  %v16470_v50 = vrot.slane %v2269_v8, %v16158_v15  ;;  %v2338_v13 = vcombine.high %v15975_v11, %v16425_v54  ;;  %811 = vrot.lane.b32.xlu1 %v16190_v36, %s15693_s14 }
 0x18c   : > { %v16473_v59 = vrot.slane %v2270_v55, %v16158_v15  ;;  %v3329_v5 = vrot.slane %v3321_v57, %v16163_v25  ;;  %v3336_v63 = vrot.slane %v3322_v0, %v16163_v25  ;;  %v16486_v51 = vrot.slane %v2337_v9, %v16158_v15  ;;  %873 = vrot.lane.b32.xlu0 %v16181_v1, %s15694_s15  ;;  %v16497_v9 = vpop.permute.xlu1 %987  ;;  %v16499_v54 = vpop.permute.xlu0 %5530 }
 0x18d   : > { %v3345_v44 = vrot.slane %v3337_v33, %v16163_v25  ;;  %v3352_v3 = vrot.slane %v3338_v17, %v16163_v25  ;;  %v16489_v8 = vrot.slane %v2338_v13, %v16158_v15  ;;  %v1197_v11 = vcombine.low %v16331_v62, %v16427_v16  ;;  %21683 = vst [vmem:[#allocation59_spill] sm:$0xff] %v16497_v9 }
 0x18e   : > { %v1198_v55 = vcombine.high %v16331_v62, %v16427_v16  ;;  %21684 = vst [vmem:[#allocation60_spill] sm:$0xff] %v16499_v54  ;;  %v1265_v53 = vcombine.low %v16359_v10, %v16465_v60  ;;  %v1266_v16 = vcombine.high %v16359_v10, %v16465_v60 }
 0x18f   : > { %v3353_v57 = vcombine.low %v3329_v5, %v3345_v44  ;;  %v3354_v0 = vcombine.high %v3329_v5, %v3345_v44  ;;  %v3355_v33 = vcombine.low %v3336_v63, %v3352_v3  ;;  %v3356_v17 = vcombine.high %v3336_v63, %v3352_v3  ;;  %875 = vrot.lane.b32.xlu1 %v16184_v14, %s15694_s15 }
 0x190   : > { %v1205_v13 = vrot.slane %v1197_v11, %v16158_v15  ;;  %v1212_v18 = vrot.slane %v1198_v55, %v16158_v15  ;;  %v2285_v5 = vcombine.low %v16361_v2, %v16467_v58  ;;  %v2286_v63 = vcombine.high %v16361_v2, %v16467_v58  ;;  %905 = vrot.lane.b32.xlu0 %v16187_v37, %s15694_s15  ;;  %v16539_v54 = vpop.permute.xlu1 %5532 }
 0x191   : > { %5399 = vst.msk [vmem:[%s16325_s24 + $0x8] sm:$0xff] %vm5397_vm1, %v3353_v57  ;;  %5431 = vst.msk [vmem:[%s16325_s24 + $0x108] sm:$0xff] %vm5397_vm1, %v3354_v0 }
 0x192   : > { %5463 = vst.msk [vmem:[%s16325_s24 + $0x208] sm:$0xff] %vm5397_vm1, %v3355_v33  ;;  %5495 = vst.msk [vmem:[%s16325_s24 + $0x308] sm:$0xff] %vm5397_vm1, %v3356_v17  ;;  %v1213_v11 = vcombine.low %v16438_v56, %v1205_v13  ;;  %v1214_v55 = vcombine.high %v16438_v56, %v1205_v13  ;;  %v1229_v57 = vcombine.low %v16441_v29, %v1212_v18  ;;  %v16541_v56 = vpop.permute.xlu0 %5562 }
 0x193   : > { %v1230_v0 = vcombine.high %v16441_v29, %v1212_v18  ;;  %v1273_v33 = vrot.slane %v1265_v53, %v16158_v15  ;;  %v1280_v17 = vrot.slane %v1266_v16, %v16158_v15  ;;  %v16534_v3 = vrot.slane %v2285_v5, %v16158_v15  ;;  %21685 = vst [vmem:[#allocation61_spill] sm:$0xff] %v16539_v54 }
 0x194   : > { %v16537_v44 = vrot.slane %v2286_v63, %v16158_v15  ;;  %21686 = vst [vmem:[#allocation62_spill] sm:$0xff] %v16541_v56  ;;  %v1221_v13 = vrot.slane %v1213_v11, %v16163_v25  ;;  %v1228_v18 = vrot.slane %v1214_v55, %v16163_v25  ;;  %v1237_v29 = vrot.slane %v1229_v57, %v16163_v25 }
 0x195   : > { %v1244_v53 = vrot.slane %v1230_v0, %v16163_v25  ;;  %v1281_v16 = vcombine.low %v16454_v32, %v1273_v33  ;;  %v1282_v5 = vcombine.high %v16454_v32, %v1273_v33  ;;  %v1297_v58 = vcombine.low %v16457_v12, %v1280_v17  ;;  %907 = vrot.lane.b32.xlu1 %v16190_v36, %s15694_s15  ;;  %v16559_v33 = vpop.permute.xlu1 %5564 }
 0x196   : > { %v1298_v63 = vcombine.high %v16457_v12, %v1280_v17  ;;  %v3357_v56 = vcombine.low %v1221_v13, %v1228_v18  ;;  %v15426_v54 = vcombine.high %v1221_v13, %v1228_v18  ;;  %969 = vrot.lane.b32.xlu0 %v16181_v1, %s15695_s16  ;;  %21687 = vst [vmem:[#allocation63_spill] sm:$0xff] %v16559_v33  ;;  %v16561_v12 = vpop.permute.xlu0 %765 }
 0x197   : > { %v3373_v11 = vcombine.low %v1237_v29, %v1244_v53  ;;  %v15427_v60 = vcombine.high %v1237_v29, %v1244_v53  ;;  %v1289_v55 = vrot.slane %v1281_v16, %v16163_v25  ;;  %v1296_v57 = vrot.slane %v1282_v5, %v16163_v25 }
 0x198   : > { %v1305_v32 = vrot.slane %v1297_v58, %v16163_v25  ;;  %v1312_v0 = vrot.slane %v1298_v63, %v16163_v25  ;;  %v3364_v17 = vrot.slane %v3357_v56, %v16158_v15  ;;  %v3372_v13 = vrot.slane %v15426_v54, %v16158_v15 }
 0x199   : > { %v3380_v18 = vrot.slane %v3373_v11, %v16158_v15  ;;  %v3388_v29 = vrot.slane %v15427_v60, %v16158_v15  ;;  %v3425_v53 = vcombine.low %v1289_v55, %v1296_v57  ;;  %v15428_v16 = vcombine.high %v1289_v55, %v1296_v57  ;;  %971 = vrot.lane.b32.xlu1 %v16184_v14, %s15695_s16  ;;  %v16575_v55 = vpop.permute.xlu1 %767 }
 0x19a   : > { %v3441_v2 = vcombine.low %v1305_v32, %v1312_v0  ;;  %v15429_v5 = vcombine.high %v1305_v32, %v1312_v0  ;;  %v3389_v58 = vcombine.low %v3364_v17, %v3372_v13  ;;  %v3390_v63 = vcombine.high %v3364_v17, %v3372_v13  ;;  %1001 = vrot.lane.b32.xlu0 %v16187_v37, %s15695_s16  ;;  %v16577_v57 = vpop.permute.xlu0 %797 }
 0x19b   : > { %v3405_v33 = vcombine.low %v3380_v18, %v3388_v29  ;;  %v3406_v4 = vcombine.high %v3380_v18, %v3388_v29  ;;  %v3432_v54 = vrot.slane %v3425_v53, %v16158_v15  ;;  %v3440_v56 = vrot.slane %v15428_v16, %v16158_v15 }
 0x19c   : > { %v3448_v60 = vrot.slane %v3441_v2, %v16158_v15  ;;  %v3456_v11 = vrot.slane %v15429_v5, %v16158_v15  ;;  %v3397_v32 = vrot.slane %v3389_v58, %v16163_v25  ;;  %v3404_v0 = vrot.slane %v3390_v63, %v16163_v25 }
 0x19d   : > { %v3413_v17 = vrot.slane %v3405_v33, %v16163_v25  ;;  %v3420_v13 = vrot.slane %v3406_v4, %v16163_v25  ;;  %v3457_v18 = vcombine.low %v3432_v54, %v3440_v56  ;;  %v3458_v29 = vcombine.high %v3432_v54, %v3440_v56  ;;  %1003 = vrot.lane.b32.xlu1 %v16190_v36, %s15695_s16  ;;  %v16591_v56 = vpop.permute.xlu1 %799 }
 0x19e   : > { %v3473_v53 = vcombine.low %v3448_v60, %v3456_v11  ;;  %v3474_v2 = vcombine.high %v3448_v60, %v3456_v11  ;;  %5546 = vrot.lane.b32.xlu0 %v16181_v1, %s15696_s17  ;;  %v16593_v60 = vpop.permute.xlu0 %861  ;;  %v2301_v11 = vcombine.low %v16470_v50, %v16534_v3 }
 0x19f   : > { %v3421_v16 = vcombine.low %v3397_v32, %v3413_v17  ;;  %v3422_v5 = vcombine.high %v3397_v32, %v3413_v17  ;;  %v3423_v58 = vcombine.low %v3404_v0, %v3420_v13  ;;  %v3424_v10 = vcombine.high %v3404_v0, %v3420_v13 }
 0x1a0   : > { %v3465_v4 = vrot.slane %v3457_v18, %v16163_v25  ;;  %v3472_v33 = vrot.slane %v3458_v29, %v16163_v25  ;;  %v3481_v63 = vrot.slane %v3473_v53, %v16163_v25  ;;  %v3488_v54 = vrot.slane %v3474_v2, %v16163_v25 }
 0x1a1   : > { %5400 = vst.msk [vmem:[%s16325_s24 + $0x10] sm:$0xff] %vm5397_vm1, %v3421_v16  ;;  %5432 = vst.msk [vmem:[%s16325_s24 + $0x110] sm:$0xff] %vm5397_vm1, %v3422_v5  ;;  %v2302_v32 = vcombine.high %v16470_v50, %v16534_v3  ;;  %v2317_v0 = vcombine.low %v16473_v59, %v16537_v44  ;;  %v2318_v17 = vcombine.high %v16473_v59, %v16537_v44  ;;  %5548 = vrot.lane.b32.xlu1 %v16184_v14, %s15696_s17 }
 0x1a2   : > { %5464 = vst.msk [vmem:[%s16325_s24 + $0x210] sm:$0xff] %vm5397_vm1, %v3423_v58  ;;  %5496 = vst.msk [vmem:[%s16325_s24 + $0x310] sm:$0xff] %vm5397_vm1, %v3424_v10  ;;  %v3489_v13 = vcombine.low %v3465_v4, %v3481_v63  ;;  %v3490_v18 = vcombine.high %v3465_v4, %v3481_v63  ;;  %v3491_v29 = vcombine.low %v3472_v33, %v3488_v54  ;;  %5578 = vrot.lane.b32.xlu0 %v16187_v37, %s15696_s17  ;;  %v16641_v63 = vpop.permute.xlu0 %893 }
 0x1a3   : > { %v3492_v53 = vcombine.high %v3472_v33, %v3488_v54  ;;  %v2309_v10 = vrot.slane %v2301_v11, %v16163_v25  ;;  %v2316_v2 = vrot.slane %v2302_v32, %v16163_v25  ;;  %v2325_v50 = vrot.slane %v2317_v0, %v16163_v25  ;;  %v16639_v33 = vpop.permute.xlu1 %863  ;;  %21691 = vst [vmem:[#allocation65_spill] sm:$0xff] %v16641_v63 }
 0x1a4   : > { %v2332_v3 = vrot.slane %v2318_v17, %v16163_v25  ;;  %5401 = vst.msk [vmem:[%s16325_s24 + $0x18] sm:$0xff] %vm5397_vm1, %v3489_v13  ;;  %5433 = vst.msk [vmem:[%s16325_s24 + $0x118] sm:$0xff] %vm5397_vm1, %v3490_v18  ;;  %v21688_v59 = vcombine.low %v16391_v24, %v16497_v9  ;;  %v21689_v16 = vcombine.high %v16391_v24, %v16497_v9 }
 0x1a5   : > { %5465 = vst.msk [vmem:[%s16325_s24 + $0x218] sm:$0xff] %vm5397_vm1, %v3491_v29  ;;  %5497 = vst.msk [vmem:[%s16325_s24 + $0x318] sm:$0xff] %vm5397_vm1, %v3492_v53  ;;  %v1317_v58 = vcombine.low %v16010_v19, %v16593_v60  ;;  %v1318_v4 = vcombine.high %v16010_v19, %v16593_v60  ;;  %v4445_v54 = vcombine.low %v2309_v10, %v2316_v2  ;;  %5580 = vrot.lane.b32.xlu1 %v16190_v36, %s15696_s17 }
 0x1a6   : > { %v2361_v44 = vrot.slane %v21688_v59, %v16158_v15  ;;  %v2368_v5 = vrot.slane %v21689_v16, %v16158_v15  ;;  %21690 = vst [vmem:[#allocation64_spill] sm:$0xff] %v16639_v33  ;;  %v15458_v11 = vcombine.high %v2309_v10, %v2316_v2  ;;  %v4461_v32 = vcombine.low %v2325_v50, %v2332_v3 }
 0x1a7   : > { %v15459_v0 = vcombine.high %v2325_v50, %v2332_v3  ;;  %v4452_v19 = vrot.slane %v4445_v54, %v16158_v15  ;;  %781 = vrot.lane.b32.xlu0 %v16199_v35, %s15693_s14  ;;  %v16659_v3 = vpop.permute.xlu1 %895 }
 0x1a8   : > { %v2369_v17 = vcombine.low %v16486_v51, %v2361_v44  ;;  %v2370_v13 = vcombine.high %v16486_v51, %v2361_v44  ;;  %v2385_v18 = vcombine.low %v16489_v8, %v2368_v5  ;;  %v2386_v29 = vcombine.high %v16489_v8, %v2368_v5  ;;  %21692 = vst [vmem:[#allocation66_spill] sm:$0xff] %v16659_v3  ;;  %v16661_v44 = vpop.permute.xlu0 %957 }
 0x1a9   : > { %v4460_v53 = vrot.slane %v15458_v11, %v16158_v15  ;;  %v4468_v59 = vrot.slane %v4461_v32, %v16158_v15  ;;  %v4476_v10 = vrot.slane %v15459_v0, %v16158_v15  ;;  %21693 = vst [vmem:[#allocation67_spill] sm:$0xff] %v16661_v44  ;;  %783 = vrot.lane.b32.xlu1 %v16202_v39, %s15693_s14 }
 0x1aa   : > { %v2377_v51 = vrot.slane %v2369_v17, %v16163_v25  ;;  %v2384_v2 = vrot.slane %v2370_v13, %v16163_v25  ;;  %v2393_v8 = vrot.slane %v2385_v18, %v16163_v25  ;;  %v2400_v50 = vrot.slane %v2386_v29, %v16163_v25 }
 0x1ab   : > { %v4477_v16 = vcombine.low %v4452_v19, %v4460_v53  ;;  %v4478_v5 = vcombine.high %v4452_v19, %v4460_v53  ;;  %v4493_v54 = vcombine.low %v4468_v59, %v4476_v10  ;;  %v4494_v11 = vcombine.high %v4468_v59, %v4476_v10  ;;  %813 = vrot.lane.b32.xlu0 %v16205_v43, %s15693_s14 }
 0x1ac   : > { %v4513_v32 = vcombine.low %v2377_v51, %v2384_v2  ;;  %v15460_v0 = vcombine.high %v2377_v51, %v2384_v2  ;;  %v4529_v9 = vcombine.low %v2393_v8, %v2400_v50  ;;  %v15461_v36 = vcombine.high %v2393_v8, %v2400_v50  ;;  %v16675_v51 = vpop.permute.xlu1 %959  ;;  %v16677_v2 = vpop.permute.xlu0 %989 }
 0x1ad   : > { %v4485_v17 = vrot.slane %v4477_v16, %v16163_v25  ;;  %v4492_v13 = vrot.slane %v4478_v5, %v16163_v25  ;;  %v4501_v18 = vrot.slane %v4493_v54, %v16163_v25  ;;  %v4508_v29 = vrot.slane %v4494_v11, %v16163_v25  ;;  %21694 = vst [vmem:[#allocation68_spill] sm:$0xff] %v16675_v51 }
 0x1ae   : > { %v4520_v19 = vrot.slane %v4513_v32, %v16158_v15  ;;  %v4528_v53 = vrot.slane %v15460_v0, %v16158_v15  ;;  %v4536_v59 = vrot.slane %v4529_v9, %v16158_v15  ;;  %v4544_v10 = vrot.slane %v15461_v36, %v16158_v15  ;;  %21695 = vst [vmem:[#allocation69_spill] sm:$0xff] %v16677_v2 }
 0x1af   : > { %v4509_v8 = vcombine.low %v4485_v17, %v4501_v18  ;;  %v4510_v50 = vcombine.high %v4485_v17, %v4501_v18  ;;  %v4511_v16 = vcombine.low %v4492_v13, %v4508_v29  ;;  %v4512_v5 = vcombine.high %v4492_v13, %v4508_v29  ;;  %815 = vrot.lane.b32.xlu1 %v16212_v52, %s15693_s14 }
 0x1b0   : > { %v4545_v54 = vcombine.low %v4520_v19, %v4528_v53  ;;  %v4546_v11 = vcombine.high %v4520_v19, %v4528_v53  ;;  %v4561_v32 = vcombine.low %v4536_v59, %v4544_v10  ;;  %v4562_v37 = vcombine.high %v4536_v59, %v4544_v10  ;;  %877 = vrot.lane.b32.xlu0 %v16199_v35, %s15694_s15 }
 0x1b1   : > { %5416 = vst.msk [vmem:[%s16325_s24 + $0x90] sm:$0xff] %vm5397_vm1, %v4509_v8  ;;  %5448 = vst.msk [vmem:[%s16325_s24 + $0x190] sm:$0xff] %vm5397_vm1, %v4510_v50  ;;  %v1325_v36 = vrot.slane %v1317_v58, %v16158_v15  ;;  %v1332_v9 = vrot.slane %v1318_v4, %v16158_v15  ;;  %v1385_v0 = vcombine.low %v16019_v22, %v16639_v33  ;;  %v16701_v58 = vpop.permute.xlu1 %991  ;;  %v16703_v4 = vpop.permute.xlu0 %5534 }
 0x1b2   : > { %5480 = vst.msk [vmem:[%s16325_s24 + $0x290] sm:$0xff] %vm5397_vm1, %v4511_v16  ;;  %5512 = vst.msk [vmem:[%s16325_s24 + $0x390] sm:$0xff] %vm5397_vm1, %v4512_v5  ;;  %v1386_v17 = vcombine.high %v16019_v22, %v16639_v33  ;;  %v4553_v13 = vrot.slane %v4545_v54, %v16163_v25  ;;  %v4560_v18 = vrot.slane %v4546_v11, %v16163_v25 }
 0x1b3   : > { %v4569_v29 = vrot.slane %v4561_v32, %v16163_v25  ;;  %v4576_v19 = vrot.slane %v4562_v37, %v16163_v25  ;;  %21696 = vst [vmem:[#allocation70_spill] sm:$0xff] %v16701_v58  ;;  %21697 = vst [vmem:[#allocation71_spill] sm:$0xff] %v16703_v4  ;;  %v1393_v53 = vrot.slane %v1385_v0, %v16158_v15  ;;  %879 = vrot.lane.b32.xlu1 %v16202_v39, %s15694_s15 }
 0x1b4   : > { %v1400_v22 = vrot.slane %v1386_v17, %v16158_v15  ;;  %v2405_v59 = vcombine.low %v16022_v23, %v16641_v63  ;;  %v2406_v10 = vcombine.high %v16022_v23, %v16641_v63  ;;  %v2473_v11 = vcombine.low %v16031_v27, %v16659_v3  ;;  %909 = vrot.lane.b32.xlu0 %v16205_v43, %s15694_s15 }
 0x1b5   : > { %v4577_v8 = vcombine.low %v4553_v13, %v4569_v29  ;;  %v4578_v37 = vcombine.high %v4553_v13, %v4569_v29  ;;  %v4579_v50 = vcombine.low %v4560_v18, %v4576_v19  ;;  %v4580_v16 = vcombine.high %v4560_v18, %v4576_v19  ;;  %v16741_v13 = vpop.permute.xlu1 %5536  ;;  %v16743_v18 = vpop.permute.xlu0 %5566 }
 0x1b6   : > { %v16714_v5 = vrot.slane %v2405_v59, %v16158_v15  ;;  %v16717_v54 = vrot.slane %v2406_v10, %v16158_v15  ;;  %v2474_v32 = vcombine.high %v16031_v27, %v16659_v3  ;;  %v1333_v23 = vcombine.low %v16561_v12, %v16661_v44  ;;  %21698 = vst [vmem:[#allocation72_spill] sm:$0xff] %v16741_v13 }
 0x1b7   : > { %5417 = vst.msk [vmem:[%s16325_s24 + $0x98] sm:$0xff] %vm5397_vm1, %v4577_v8  ;;  %5449 = vst.msk [vmem:[%s16325_s24 + $0x198] sm:$0xff] %vm5397_vm1, %v4578_v37  ;;  %v1334_v0 = vcombine.high %v16561_v12, %v16661_v44  ;;  %v1401_v27 = vcombine.low %v16575_v55, %v16675_v51  ;;  %v1402_v17 = vcombine.high %v16575_v55, %v16675_v51  ;;  %911 = vrot.lane.b32.xlu1 %v16212_v52, %s15694_s15 }
 0x1b8   : > { %5481 = vst.msk [vmem:[%s16325_s24 + $0x298] sm:$0xff] %vm5397_vm1, %v4579_v50  ;;  %5513 = vst.msk [vmem:[%s16325_s24 + $0x398] sm:$0xff] %vm5397_vm1, %v4580_v16  ;;  %v16746_v29 = vrot.slane %v2473_v11, %v16158_v15  ;;  %v16749_v19 = vrot.slane %v2474_v32, %v16158_v15  ;;  %v2421_v59 = vcombine.low %v16577_v57, %v16677_v2  ;;  %973 = vrot.lane.b32.xlu0 %v16199_v35, %s15695_s16 }
 0x1b9   : > { %21699 = vst [vmem:[#allocation73_spill] sm:$0xff] %v16743_v18  ;;  %v2422_v10 = vcombine.high %v16577_v57, %v16677_v2  ;;  %v1341_v8 = vrot.slane %v1333_v23, %v16158_v15  ;;  %v1348_v37 = vrot.slane %v1334_v0, %v16158_v15  ;;  %v1409_v50 = vrot.slane %v1401_v27, %v16158_v15  ;;  %v16773_v4 = vpop.permute.xlu1 %5568 }
 0x1ba   : > { %v1416_v16 = vrot.slane %v1402_v17, %v16158_v15  ;;  %v16762_v11 = vrot.slane %v2421_v59, %v16158_v15  ;;  %21700 = vst [vmem:[#allocation74_spill] sm:$0xff] %v16773_v4  ;;  %v16775_v59 = vpop.permute.xlu0 %769 }
 0x1bb   : > { %v16765_v32 = vrot.slane %v2422_v10, %v16158_v15  ;;  %v1349_v0 = vcombine.low %v1325_v36, %v1341_v8  ;;  %v1350_v27 = vcombine.high %v1325_v36, %v1341_v8  ;;  %v1365_v17 = vcombine.low %v1332_v9, %v1348_v37  ;;  %975 = vrot.lane.b32.xlu1 %v16202_v39, %s15695_s16 }
 0x1bc   : > { %v1366_v13 = vcombine.high %v1332_v9, %v1348_v37  ;;  %v1417_v2 = vcombine.low %v1393_v53, %v1409_v50  ;;  %v1418_v10 = vcombine.high %v1393_v53, %v1409_v50  ;;  %v1433_v51 = vcombine.low %v1400_v22, %v1416_v16  ;;  %1005 = vrot.lane.b32.xlu0 %v16205_v43, %s15695_s16 }
 0x1bd   : > { %v1434_v44 = vcombine.high %v1400_v22, %v1416_v16  ;;  %v1357_v18 = vrot.slane %v1349_v0, %v16163_v25  ;;  %v1364_v14 = vrot.slane %v1350_v27, %v16163_v25  ;;  %v1373_v23 = vrot.slane %v1365_v17, %v16163_v25  ;;  %v16789_v0 = vpop.permute.xlu1 %771 }
 0x1be   : > { %v1380_v3 = vrot.slane %v1366_v13, %v16163_v25  ;;  %v1425_v36 = vrot.slane %v1417_v2, %v16163_v25  ;;  %v1432_v9 = vrot.slane %v1418_v10, %v16163_v25  ;;  %v1441_v8 = vrot.slane %v1433_v51, %v16163_v25  ;;  %v16791_v13 = vpop.permute.xlu0 %801 }
 0x1bf   : > { %v1448_v53 = vrot.slane %v1434_v44, %v16163_v25  ;;  %v3493_v22 = vcombine.low %v1357_v18, %v1364_v14  ;;  %v15430_v37 = vcombine.high %v1357_v18, %v1364_v14  ;;  %1007 = vrot.lane.b32.xlu1 %v16212_v52, %s15695_s16 }
 0x1c0   : > { %v3509_v50 = vcombine.low %v1373_v23, %v1380_v3  ;;  %v15431_v16 = vcombine.high %v1373_v23, %v1380_v3  ;;  %v3561_v27 = vcombine.low %v1425_v36, %v1432_v9  ;;  %v15432_v17 = vcombine.high %v1425_v36, %v1432_v9  ;;  %5550 = vrot.lane.b32.xlu0 %v16199_v35, %s15696_s17 }
 0x1c1   : > { %v3577_v2 = vcombine.low %v1441_v8, %v1448_v53  ;;  %v15433_v4 = vcombine.high %v1441_v8, %v1448_v53  ;;  %v3500_v10 = vrot.slane %v3493_v22, %v16158_v15  ;;  %v3508_v51 = vrot.slane %v15430_v37, %v16158_v15  ;;  %v16805_v22 = vpop.permute.xlu1 %803 }
 0x1c2   : > { %v3516_v44 = vrot.slane %v3509_v50, %v16158_v15  ;;  %v3524_v63 = vrot.slane %v15431_v16, %v16158_v15  ;;  %v3568_v14 = vrot.slane %v3561_v27, %v16158_v15  ;;  %v3576_v3 = vrot.slane %v15432_v17, %v16158_v15  ;;  %v16807_v37 = vpop.permute.xlu0 %865 }
 0x1c3   : > { %v3584_v18 = vrot.slane %v3577_v2, %v16158_v15  ;;  %v3592_v23 = vrot.slane %v15433_v4, %v16158_v15  ;;  %v3525_v36 = vcombine.low %v3500_v10, %v3508_v51  ;;  %v3526_v9 = vcombine.high %v3500_v10, %v3508_v51  ;;  %5552 = vrot.lane.b32.xlu1 %v16202_v39, %s15696_s17 }
 0x1c4   : > { %v3541_v8 = vcombine.low %v3516_v44, %v3524_v63  ;;  %v3542_v53 = vcombine.high %v3516_v44, %v3524_v63  ;;  %v3593_v50 = vcombine.low %v3568_v14, %v3576_v3  ;;  %v3594_v16 = vcombine.high %v3568_v14, %v3576_v3  ;;  %5582 = vrot.lane.b32.xlu0 %v16205_v43, %s15696_s17 }
 0x1c5   : > { %v3609_v27 = vcombine.low %v3584_v18, %v3592_v23  ;;  %v3610_v33 = vcombine.high %v3584_v18, %v3592_v23  ;;  %v3533_v17 = vrot.slane %v3525_v36, %v16163_v25  ;;  %v3540_v2 = vrot.slane %v3526_v9, %v16163_v25  ;;  %v16821_v36 = vpop.permute.xlu1 %867 }
 0x1c6   : > { %v3549_v4 = vrot.slane %v3541_v8, %v16163_v25  ;;  %v3556_v35 = vrot.slane %v3542_v53, %v16163_v25  ;;  %v3601_v63 = vrot.slane %v3593_v50, %v16163_v25  ;;  %v3608_v10 = vrot.slane %v3594_v16, %v16163_v25  ;;  %v16823_v9 = vpop.permute.xlu0 %897 }
 0x1c7   : > { %v3617_v51 = vrot.slane %v3609_v27, %v16163_v25  ;;  %v3624_v44 = vrot.slane %v3610_v33, %v16163_v25  ;;  %v2438_v33 = vcombine.high %v16714_v5, %v16762_v11  ;;  %v2453_v27 = vcombine.low %v16717_v54, %v16765_v32  ;;  %5584 = vrot.lane.b32.xlu1 %v16212_v52, %s15696_s17 }
 0x1c8   : > { %v3557_v14 = vcombine.low %v3533_v17, %v3549_v4  ;;  %v3558_v3 = vcombine.high %v3533_v17, %v3549_v4  ;;  %v3559_v18 = vcombine.low %v3540_v2, %v3556_v35  ;;  %v3560_v23 = vcombine.high %v3540_v2, %v3556_v35  ;;  %785 = vrot.lane.b32.xlu0 %v16215_v38, %s15693_s14 }
 0x1c9   : > { %v3625_v8 = vcombine.low %v3601_v63, %v3617_v51  ;;  %v3626_v53 = vcombine.high %v3601_v63, %v3617_v51  ;;  %v3627_v50 = vcombine.low %v3608_v10, %v3624_v44  ;;  %v3628_v16 = vcombine.high %v3608_v10, %v3624_v44 }
 0x1ca   : > { %5402 = vst.msk [vmem:[%s16325_s24 + $0x20] sm:$0xff] %vm5397_vm1, %v3557_v14  ;;  %5434 = vst.msk [vmem:[%s16325_s24 + $0x120] sm:$0xff] %vm5397_vm1, %v3558_v3  ;;  %v2437_v35 = vcombine.low %v16714_v5, %v16762_v11  ;;  %v2454_v17 = vcombine.high %v16717_v54, %v16765_v32  ;;  %v21701_v5 = vcombine.low %v16591_v56, %v16701_v58  ;;  %v16869_v14 = vpop.permute.xlu1 %899  ;;  %v16871_v3 = vpop.permute.xlu0 %961 }
 0x1cb   : > { %5466 = vst.msk [vmem:[%s16325_s24 + $0x220] sm:$0xff] %vm5397_vm1, %v3559_v18  ;;  %5498 = vst.msk [vmem:[%s16325_s24 + $0x320] sm:$0xff] %vm5397_vm1, %v3560_v23  ;;  %v21702_v54 = vcombine.high %v16591_v56, %v16701_v58  ;;  %v2452_v10 = vrot.slane %v2438_v33, %v16163_v25  ;;  %v2461_v51 = vrot.slane %v2453_v27, %v16163_v25  ;;  %787 = vrot.lane.b32.xlu1 %v16234_v28, %s15693_s14 }
 0x1cc   : > { %5403 = vst.msk [vmem:[%s16325_s24 + $0x28] sm:$0xff] %vm5397_vm1, %v3625_v8  ;;  %5435 = vst.msk [vmem:[%s16325_s24 + $0x128] sm:$0xff] %vm5397_vm1, %v3626_v53  ;;  %v2497_v11 = vrot.slane %v21701_v5, %v16158_v15  ;;  %v2445_v63 = vrot.slane %v2437_v35, %v16163_v25  ;;  %v2468_v44 = vrot.slane %v2454_v17, %v16163_v25  ;;  %817 = vrot.lane.b32.xlu0 %v16237_v61, %s15693_s14 }
 0x1cd   : > { %5467 = vst.msk [vmem:[%s16325_s24 + $0x228] sm:$0xff] %vm5397_vm1, %v3627_v50  ;;  %5499 = vst.msk [vmem:[%s16325_s24 + $0x328] sm:$0xff] %vm5397_vm1, %v3628_v16  ;;  %v2504_v32 = vrot.slane %v21702_v54, %v16158_v15 }
 0x1ce   : > { %21703 = vst [vmem:[#allocation75_spill] sm:$0xff] %v16871_v3  ;;  %v2505_v18 = vcombine.low %v16746_v29, %v2497_v11  ;;  %v2506_v23 = vcombine.high %v16746_v29, %v2497_v11  ;;  %v4581_v50 = vcombine.low %v2445_v63, %v2452_v10  ;;  %v15462_v16 = vcombine.high %v2445_v63, %v2452_v10  ;;  %v16889_v63 = vpop.permute.xlu1 %963  ;;  %v16891_v10 = vpop.permute.xlu0 %993 }
 0x1cf   : > { %v2521_v8 = vcombine.low %v16749_v19, %v2504_v32  ;;  %v2522_v53 = vcombine.high %v16749_v19, %v2504_v32  ;;  %v4597_v35 = vcombine.low %v2461_v51, %v2468_v44  ;;  %v15463_v33 = vcombine.high %v2461_v51, %v2468_v44  ;;  %21704 = vst [vmem:[#allocation76_spill] sm:$0xff] %v16889_v63 }
 0x1d0   : > { %v2513_v27 = vrot.slane %v2505_v18, %v16163_v25  ;;  %v2520_v17 = vrot.slane %v2506_v23, %v16163_v25  ;;  %v4588_v29 = vrot.slane %v4581_v50, %v16158_v15  ;;  %v4596_v19 = vrot.slane %v15462_v16, %v16158_v15  ;;  %21705 = vst [vmem:[#allocation77_spill] sm:$0xff] %v16891_v10 }
 0x1d1   : > { %v2529_v5 = vrot.slane %v2521_v8, %v16163_v25  ;;  %v2536_v54 = vrot.slane %v2522_v53, %v16163_v25  ;;  %v4604_v11 = vrot.slane %v4597_v35, %v16158_v15  ;;  %v4612_v32 = vrot.slane %v15463_v33, %v16158_v15  ;;  %819 = vrot.lane.b32.xlu1 %v16248_v21, %s15693_s14 }
 0x1d2   : > { %v4649_v51 = vcombine.low %v2513_v27, %v2520_v17  ;;  %v15464_v44 = vcombine.high %v2513_v27, %v2520_v17  ;;  %v4613_v8 = vcombine.low %v4588_v29, %v4596_v19  ;;  %v4614_v53 = vcombine.high %v4588_v29, %v4596_v19  ;;  %881 = vrot.lane.b32.xlu0 %v16215_v38, %s15694_s15  ;;  %v16905_v29 = vpop.permute.xlu1 %995  ;;  %v16907_v19 = vpop.permute.xlu0 %5538 }
 0x1d3   : > { %v4665_v18 = vcombine.low %v2529_v5, %v2536_v54  ;;  %v15465_v23 = vcombine.high %v2529_v5, %v2536_v54  ;;  %v4629_v4 = vcombine.low %v4604_v11, %v4612_v32  ;;  %v4630_v2 = vcombine.high %v4604_v11, %v4612_v32  ;;  %21706 = vst [vmem:[#allocation78_spill] sm:$0xff] %v16905_v29 }
 0x1d4   : > { %v4656_v50 = vrot.slane %v4649_v51, %v16158_v15  ;;  %v4664_v16 = vrot.slane %v15464_v44, %v16158_v15  ;;  %v4621_v27 = vrot.slane %v4613_v8, %v16163_v25  ;;  %v4628_v17 = vrot.slane %v4614_v53, %v16163_v25  ;;  %21707 = vst [vmem:[#allocation79_spill] sm:$0xff] %v16907_v19 }
 0x1d5   : > { %v4672_v35 = vrot.slane %v4665_v18, %v16158_v15  ;;  %v4680_v33 = vrot.slane %v15465_v23, %v16158_v15  ;;  %v4637_v5 = vrot.slane %v4629_v4, %v16163_v25  ;;  %v4644_v54 = vrot.slane %v4630_v2, %v16163_v25  ;;  %883 = vrot.lane.b32.xlu1 %v16234_v28, %s15694_s15 }
 0x1d6   : > { %v4681_v11 = vcombine.low %v4656_v50, %v4664_v16  ;;  %v4682_v32 = vcombine.high %v4656_v50, %v4664_v16  ;;  %913 = vrot.lane.b32.xlu0 %v16237_v61, %s15694_s15  ;;  %v21708_v50 = vcombine.low %v16078_v41, %v16807_v37 }
 0x1d7   : > { %v4697_v51 = vcombine.low %v4672_v35, %v4680_v33  ;;  %v4698_v44 = vcombine.high %v4672_v35, %v4680_v33  ;;  %v4645_v18 = vcombine.low %v4621_v27, %v4637_v5  ;;  %v4646_v23 = vcombine.high %v4621_v27, %v4637_v5  ;;  %v16937_v5 = vpop.permute.xlu1 %5540 }
 0x1d8   : > { %v4647_v8 = vcombine.low %v4628_v17, %v4644_v54  ;;  %v4648_v53 = vcombine.high %v4628_v17, %v4644_v54  ;;  %v4689_v2 = vrot.slane %v4681_v11, %v16163_v25  ;;  %v4696_v4 = vrot.slane %v4682_v32, %v16163_v25  ;;  %21710 = vst [vmem:[#allocation80_spill] sm:$0xff] %v16937_v5  ;;  %v16939_v54 = vpop.permute.xlu0 %5570 }
 0x1d9   : > { %v4705_v19 = vrot.slane %v4697_v51, %v16163_v25  ;;  %v4712_v58 = vrot.slane %v4698_v44, %v16163_v25  ;;  %5418 = vst.msk [vmem:[%s16325_s24 + $0xa0] sm:$0xff] %vm5397_vm1, %v4645_v18  ;;  %5450 = vst.msk [vmem:[%s16325_s24 + $0x1a0] sm:$0xff] %vm5397_vm1, %v4646_v23  ;;  %v1461_v16 = vrot.slane %v21708_v50, %v16158_v15  ;;  %915 = vrot.lane.b32.xlu1 %v16248_v21, %s15694_s15 }
 0x1da   : > { %5482 = vst.msk [vmem:[%s16325_s24 + $0x2a0] sm:$0xff] %vm5397_vm1, %v4647_v8  ;;  %5514 = vst.msk [vmem:[%s16325_s24 + $0x3a0] sm:$0xff] %vm5397_vm1, %v4648_v53  ;;  %v21709_v35 = vcombine.high %v16078_v41, %v16807_v37  ;;  %v1521_v27 = vcombine.low %v16087_v45, %v16821_v36  ;;  %v1522_v17 = vcombine.high %v16087_v45, %v16821_v36  ;;  %977 = vrot.lane.b32.xlu0 %v16215_v38, %s15695_s16 }
 0x1db   : > { %21711 = vst [vmem:[#allocation81_spill] sm:$0xff] %v16939_v54  ;;  %v4713_v11 = vcombine.low %v4689_v2, %v4705_v19  ;;  %v4714_v32 = vcombine.high %v4689_v2, %v4705_v19  ;;  %v4715_v51 = vcombine.low %v4696_v4, %v4712_v58  ;;  %v4716_v44 = vcombine.high %v4696_v4, %v4712_v58  ;;  %v16977_v50 = vpop.permute.xlu1 %5572 }
 0x1dc   : > { %v1468_v33 = vrot.slane %v21709_v35, %v16158_v15  ;;  %v1529_v41 = vrot.slane %v1521_v27, %v16158_v15  ;;  %v1536_v18 = vrot.slane %v1522_v17, %v16158_v15  ;;  %v2541_v23 = vcombine.low %v16090_v46, %v16823_v9  ;;  %21712 = vst [vmem:[#allocation82_spill] sm:$0xff] %v16977_v50  ;;  %v16979_v35 = vpop.permute.xlu0 %773 }
 0x1dd   : > { %v2542_v8 = vcombine.high %v16090_v46, %v16823_v9  ;;  %5419 = vst.msk [vmem:[%s16325_s24 + $0xa8] sm:$0xff] %vm5397_vm1, %v4713_v11  ;;  %5451 = vst.msk [vmem:[%s16325_s24 + $0x1a8] sm:$0xff] %vm5397_vm1, %v4714_v32  ;;  %v2609_v45 = vcombine.low %v16101_v49, %v16869_v14  ;;  %v2610_v58 = vcombine.high %v16101_v49, %v16869_v14  ;;  %979 = vrot.lane.b32.xlu1 %v16234_v28, %s15695_s16 }
 0x1de   : > { %5483 = vst.msk [vmem:[%s16325_s24 + $0x2a8] sm:$0xff] %vm5397_vm1, %v4715_v51  ;;  %5515 = vst.msk [vmem:[%s16325_s24 + $0x3a8] sm:$0xff] %vm5397_vm1, %v4716_v44  ;;  %v1469_v46 = vcombine.low %v16775_v59, %v16871_v3  ;;  %v1470_v19 = vcombine.high %v16775_v59, %v16871_v3  ;;  %v16968_v53 = vrot.slane %v2541_v23, %v16158_v15  ;;  %1009 = vrot.lane.b32.xlu0 %v16237_v61, %s15695_s16 }
 0x1df   : > { %v16971_v2 = vrot.slane %v2542_v8, %v16158_v15  ;;  %v1537_v4 = vcombine.low %v16789_v0, %v16889_v63  ;;  %v1538_v49 = vcombine.high %v16789_v0, %v16889_v63  ;;  %v16982_v27 = vrot.slane %v2609_v45, %v16158_v15  ;;  %v16999_v5 = vpop.permute.xlu1 %775 }
 0x1e0   : > { %v16985_v17 = vrot.slane %v2610_v58, %v16158_v15  ;;  %v1477_v11 = vrot.slane %v1469_v46, %v16158_v15  ;;  %v1484_v32 = vrot.slane %v1470_v19, %v16158_v15  ;;  %v17001_v23 = vpop.permute.xlu0 %805 }
 0x1e1   : > { %v1545_v51 = vrot.slane %v1537_v4, %v16158_v15  ;;  %v1552_v44 = vrot.slane %v1538_v49, %v16158_v15  ;;  %1011 = vrot.lane.b32.xlu1 %v16248_v21, %s15695_s16 }
 0x1e2   : > { %v1485_v45 = vcombine.low %v1461_v16, %v1477_v11  ;;  %v1486_v58 = vcombine.high %v1461_v16, %v1477_v11  ;;  %v1501_v50 = vcombine.low %v1468_v33, %v1484_v32  ;;  %v1502_v54 = vcombine.high %v1468_v33, %v1484_v32  ;;  %5554 = vrot.lane.b32.xlu0 %v16215_v38, %s15696_s17 }
 0x1e3   : > { %v1553_v46 = vcombine.low %v1529_v41, %v1545_v51  ;;  %v1554_v19 = vcombine.high %v1529_v41, %v1545_v51  ;;  %v1569_v4 = vcombine.low %v1536_v18, %v1552_v44  ;;  %v1570_v49 = vcombine.high %v1536_v18, %v1552_v44  ;;  %v17015_v52 = vpop.permute.xlu1 %807 }
 0x1e4   : > { %v1493_v8 = vrot.slane %v1485_v45, %v16163_v25  ;;  %v1500_v63 = vrot.slane %v1486_v58, %v16163_v25  ;;  %v1509_v3 = vrot.slane %v1501_v50, %v16163_v25  ;;  %v1516_v16 = vrot.slane %v1502_v54, %v16163_v25 }
 0x1e5   : > { %v1561_v33 = vrot.slane %v1553_v46, %v16163_v25  ;;  %v1568_v11 = vrot.slane %v1554_v19, %v16163_v25  ;;  %v1577_v41 = vrot.slane %v1569_v4, %v16163_v25  ;;  %v1584_v18 = vrot.slane %v1570_v49, %v16163_v25  ;;  %5556 = vrot.lane.b32.xlu1 %v16234_v28, %s15696_s17 }
 0x1e6   : > { %v3629_v32 = vcombine.low %v1493_v8, %v1500_v63  ;;  %v15434_v51 = vcombine.high %v1493_v8, %v1500_v63  ;;  %v3645_v44 = vcombine.low %v1509_v3, %v1516_v16  ;;  %v15435_v45 = vcombine.high %v1509_v3, %v1516_v16  ;;  %v17021_v63 = vpop.permute.xlu0 %869  ;;  %5586 = vrot.lane.b32.xlu0 %v16237_v61, %s15696_s17 }
 0x1e7   : > { %v3697_v50 = vcombine.low %v1561_v33, %v1568_v11  ;;  %v15436_v54 = vcombine.high %v1561_v33, %v1568_v11  ;;  %v3713_v58 = vcombine.low %v1577_v41, %v1584_v18  ;;  %v15437_v46 = vcombine.high %v1577_v41, %v1584_v18  ;;  %v17031_v38 = vpop.permute.xlu1 %871 }
 0x1e8   : > { %v3636_v19 = vrot.slane %v3629_v32, %v16158_v15  ;;  %v3644_v4 = vrot.slane %v15434_v51, %v16158_v15  ;;  %v3652_v49 = vrot.slane %v3645_v44, %v16158_v15  ;;  %v3660_v43 = vrot.slane %v15435_v45, %v16158_v15 }
 0x1e9   : > { %v3704_v3 = vrot.slane %v3697_v50, %v16158_v15  ;;  %v3712_v8 = vrot.slane %v15436_v54, %v16158_v15  ;;  %v3720_v16 = vrot.slane %v3713_v58, %v16158_v15  ;;  %v3728_v33 = vrot.slane %v15437_v46, %v16158_v15  ;;  %5588 = vrot.lane.b32.xlu1 %v16248_v21, %s15696_s17 }
 0x1ea   : > { %v3661_v11 = vcombine.low %v3636_v19, %v3644_v4  ;;  %v3662_v41 = vcombine.high %v3636_v19, %v3644_v4  ;;  %v3677_v18 = vcombine.low %v3652_v49, %v3660_v43  ;;  %v3678_v32 = vcombine.high %v3652_v49, %v3660_v43  ;;  %v17037_v19 = vpop.permute.xlu0 %901  ;;  %5590 = vrot.lane.b32.xlu0 %v16127_v6, %s15696_s17 }
 0x1eb   : > { %v3729_v51 = vcombine.low %v3704_v3, %v3712_v8  ;;  %v3730_v44 = vcombine.high %v3704_v3, %v3712_v8  ;;  %v3745_v45 = vcombine.low %v3720_v16, %v3728_v33  ;;  %v3746_v50 = vcombine.high %v3720_v16, %v3728_v33 }
 0x1ec   : > { %v3669_v54 = vrot.slane %v3661_v11, %v16163_v25  ;;  %v3676_v58 = vrot.slane %v3662_v41, %v16163_v25  ;;  %v3685_v46 = vrot.slane %v3677_v18, %v16163_v25  ;;  %v3692_v28 = vrot.slane %v3678_v32, %v16163_v25 }
 0x1ed   : > { %v3737_v43 = vrot.slane %v3729_v51, %v16163_v25  ;;  %v3744_v4 = vrot.slane %v3730_v44, %v16163_v25  ;;  %v3753_v49 = vrot.slane %v3745_v45, %v16163_v25  ;;  %v3760_v3 = vrot.slane %v3746_v50, %v16163_v25  ;;  %v17047_v44 = vpop.permute.xlu1 %903  ;;  %5592 = vrot.lane.b32.xlu1 %v16333_v7, %s15696_s17 }
 0x1ee   : > { %v3693_v8 = vcombine.low %v3669_v54, %v3685_v46  ;;  %v3694_v16 = vcombine.high %v3669_v54, %v3685_v46  ;;  %v3695_v33 = vcombine.low %v3676_v58, %v3692_v28  ;;  %v3696_v11 = vcombine.high %v3676_v58, %v3692_v28  ;;  %v17069_v46 = vpop.permute.xlu0 %965  ;;  %5622 = vrot.lane.b32.xlu0 %v16135_v30, %s15696_s17 }
 0x1ef   : > { %v3761_v41 = vcombine.low %v3737_v43, %v3753_v49  ;;  %v3762_v18 = vcombine.high %v3737_v43, %v3753_v49  ;;  %v3763_v32 = vcombine.low %v3744_v4, %v3760_v3  ;;  %v3764_v51 = vcombine.high %v3744_v4, %v3760_v3 }
 0x1f0   : > { %5404 = vst.msk [vmem:[%s16325_s24 + $0x30] sm:$0xff] %vm5397_vm1, %v3693_v8  ;;  %5436 = vst.msk [vmem:[%s16325_s24 + $0x130] sm:$0xff] %vm5397_vm1, %v3694_v16  ;;  %v21713_v28 = vcombine.low %v16791_v13, %v16891_v10  ;;  %v21714_v45 = vcombine.high %v16791_v13, %v16891_v10  ;;  %v2625_v54 = vcombine.low %v16805_v22, %v16905_v29 }
 0x1f1   : > { %5468 = vst.msk [vmem:[%s16325_s24 + $0x230] sm:$0xff] %vm5397_vm1, %v3695_v33  ;;  %5500 = vst.msk [vmem:[%s16325_s24 + $0x330] sm:$0xff] %vm5397_vm1, %v3696_v11  ;;  %v2626_v58 = vcombine.high %v16805_v22, %v16905_v29  ;;  %v1589_v43 = vcombine.low %v16151_v47, %v17021_v63  ;;  %v1590_v4 = vcombine.high %v16151_v47, %v17021_v63  ;;  %5624 = vrot.lane.b32.xlu1 %v16133_v26, %s15696_s17 }
 0x1f2   : > { %v2565_v6 = vrot.slane %v21713_v28, %v16158_v15  ;;  %v2572_v50 = vrot.slane %v21714_v45, %v16158_v15  ;;  %5405 = vst.msk [vmem:[%s16325_s24 + $0x38] sm:$0xff] %vm5397_vm1, %v3761_v41  ;;  %5437 = vst.msk [vmem:[%s16325_s24 + $0x138] sm:$0xff] %vm5397_vm1, %v3762_v18  ;;  %v1657_v49 = vcombine.low %v16171_v34, %v17031_v38  ;;  %v17109_v28 = vpop.permute.xlu0 %997  ;;  %5654 = vrot.lane.b32.xlu0 %v16147_v20, %s15696_s17 }
 0x1f3   : > { %5469 = vst.msk [vmem:[%s16325_s24 + $0x238] sm:$0xff] %vm5397_vm1, %v3763_v32  ;;  %5501 = vst.msk [vmem:[%s16325_s24 + $0x338] sm:$0xff] %vm5397_vm1, %v3764_v51  ;;  %v2633_v47 = vrot.slane %v2625_v54, %v16158_v15  ;;  %v2640_v41 = vrot.slane %v2626_v58, %v16158_v15  ;;  %v17098_v18 = vrot.slane %v1589_v43, %v16158_v15  ;;  %v17103_v32 = vpop.permute.xlu1 %967 }
 0x1f4   : > { %v2573_v8 = vcombine.low %v16968_v53, %v2565_v6  ;;  %v2574_v16 = vcombine.high %v16968_v53, %v2565_v6  ;;  %v2589_v33 = vcombine.low %v16971_v2, %v2572_v50  ;;  %v2590_v11 = vcombine.high %v16971_v2, %v2572_v50  ;;  %21715 = vst [vmem:[#allocation83_spill] sm:$0xff] %v17109_v28 }
 0x1f5   : > { %v17101_v7 = vrot.slane %v1590_v4, %v16158_v15  ;;  %v2641_v6 = vcombine.low %v16982_v27, %v2633_v47  ;;  %v2642_v45 = vcombine.high %v16982_v27, %v2633_v47  ;;  %v2657_v50 = vcombine.low %v16985_v17, %v2640_v41  ;;  %5656 = vrot.lane.b32.xlu1 %v16145_v48, %s15696_s17 }
 0x1f6   : > { %v2581_v53 = vrot.slane %v2573_v8, %v16163_v25  ;;  %v2588_v51 = vrot.slane %v2574_v16, %v16163_v25  ;;  %v2597_v2 = vrot.slane %v2589_v33, %v16163_v25  ;;  %v2604_v30 = vrot.slane %v2590_v11, %v16163_v25  ;;  %5686 = vrot.lane.b32.xlu0 %v16167_v42, %s15696_s17 }
 0x1f7   : > { %v2658_v54 = vcombine.high %v16985_v17, %v2640_v41  ;;  %v2649_v16 = vrot.slane %v2641_v6, %v16163_v25  ;;  %v2656_v33 = vrot.slane %v2642_v45, %v16163_v25  ;;  %v2665_v27 = vrot.slane %v2657_v50, %v16163_v25  ;;  %v17123_v47 = vpop.permute.xlu1 %999 }
 0x1f8   : > { %v4717_v58 = vcombine.low %v2581_v53, %v2588_v51  ;;  %v15466_v43 = vcombine.high %v2581_v53, %v2588_v51  ;;  %v4733_v4 = vcombine.low %v2597_v2, %v2604_v30  ;;  %v15467_v8 = vcombine.high %v2597_v2, %v2604_v30  ;;  %v17129_v51 = vpop.permute.xlu0 %5542 }
 0x1f9   : > { %v2672_v11 = vrot.slane %v2658_v54, %v16163_v25  ;;  %21716 = vst [vmem:[#allocation84_spill] sm:$0xff] %v17129_v51  ;;  %v4785_v20 = vcombine.low %v2649_v16, %v2656_v33  ;;  %v15468_v2 = vcombine.high %v2649_v16, %v2656_v33  ;;  %5688 = vrot.lane.b32.xlu1 %v16165_v31, %s15696_s17 }
 0x1fa   : > { %v4724_v17 = vrot.slane %v4717_v58, %v16158_v15  ;;  %v4732_v26 = vrot.slane %v15466_v43, %v16158_v15  ;;  %v4740_v41 = vrot.slane %v4733_v4, %v16158_v15  ;;  %v4748_v53 = vrot.slane %v15467_v8, %v16158_v15  ;;  %5594 = vrot.lane.b32.xlu0 %v16331_v62, %s15696_s17 }
 0x1fb   : > { %v4801_v30 = vcombine.low %v2665_v27, %v2672_v11  ;;  %v15469_v6 = vcombine.high %v2665_v27, %v2672_v11  ;;  %v4792_v58 = vrot.slane %v4785_v20, %v16158_v15  ;;  %v4800_v43 = vrot.slane %v15468_v2, %v16158_v15  ;;  %v17139_v16 = vpop.permute.xlu1 %5544 }
 0x1fc   : > { %v4749_v45 = vcombine.low %v4724_v17, %v4732_v26  ;;  %v4750_v50 = vcombine.high %v4724_v17, %v4732_v26  ;;  %v4765_v54 = vcombine.low %v4740_v41, %v4748_v53  ;;  %v4766_v3 = vcombine.high %v4740_v41, %v4748_v53  ;;  %21717 = vst [vmem:[#allocation85_spill] sm:$0xff] %v17139_v16  ;;  %v17145_v17 = vpop.permute.xlu0 %5574 }
 0x1fd   : > { %v4808_v4 = vrot.slane %v4801_v30, %v16158_v15  ;;  %v4816_v8 = vrot.slane %v15469_v6, %v16158_v15  ;;  %21718 = vst [vmem:[#allocation86_spill] sm:$0xff] %v17145_v17  ;;  %v4817_v42 = vcombine.low %v4792_v58, %v4800_v43  ;;  %v4818_v26 = vcombine.high %v4792_v58, %v4800_v43 }
 0x1fe   : > { %v4757_v33 = vrot.slane %v4749_v45, %v16163_v25  ;;  %v4764_v48 = vrot.slane %v4750_v50, %v16163_v25  ;;  %v4773_v27 = vrot.slane %v4765_v54, %v16163_v25  ;;  %v4780_v11 = vrot.slane %v4766_v3, %v16163_v25 }
 0x1ff   : > { %v4833_v41 = vcombine.low %v4808_v4, %v4816_v8  ;;  %v4834_v53 = vcombine.high %v4808_v4, %v4816_v8  ;;  %v4825_v3 = vrot.slane %v4817_v42, %v16163_v25  ;;  %v4832_v45 = vrot.slane %v4818_v26, %v16163_v25  ;;  %v17155_v58 = vpop.permute.xlu1 %5576  ;;  %v21721_v42 = vld [vmem:[#allocation50_spill] sm:$0xff] }
 0x200   : > { %v4781_v20 = vcombine.low %v4757_v33, %v4773_v27  ;;  %v4782_v2 = vcombine.high %v4757_v33, %v4773_v27  ;;  %v4783_v30 = vcombine.low %v4764_v48, %v4780_v11  ;;  %v4784_v6 = vcombine.high %v4764_v48, %v4780_v11  ;;  %21719 = vst [vmem:[#allocation87_spill] sm:$0xff] %v17155_v58  ;;  %v17177_v33 = vpop.permute.xlu0 %777 }
 0x201   : > { %v4841_v50 = vrot.slane %v4833_v41, %v16163_v25  ;;  %v4848_v54 = vrot.slane %v4834_v53, %v16163_v25  ;;  %v1665_v31 = vrot.slane %v1657_v49, %v16158_v15  ;;  %v21720_v62 = vcombine.high %v16171_v34, %v17031_v38  ;;  %5596 = vrot.lane.b32.xlu1 %v21721_v42, %s15696_s17  ;;  %v21722_v41 = vld [vmem:[#allocation32_spill] sm:$0xff] }
 0x202   : > { %5420 = vst.msk [vmem:[%s16325_s24 + $0xb0] sm:$0xff] %vm5397_vm1, %v4781_v20  ;;  %5452 = vst.msk [vmem:[%s16325_s24 + $0x1b0] sm:$0xff] %vm5397_vm1, %v4782_v2  ;;  %v2677_v4 = vcombine.low %v16175_v40, %v17037_v19  ;;  %v2678_v8 = vcombine.high %v16175_v40, %v17037_v19  ;;  %v2745_v53 = vcombine.low %v21722_v41, %v17047_v44  ;;  %v21723_v20 = vld [vmem:[#allocation51_spill] sm:$0xff] }
 0x203   : > { %5484 = vst.msk [vmem:[%s16325_s24 + $0x2b0] sm:$0xff] %vm5397_vm1, %v4783_v30  ;;  %5516 = vst.msk [vmem:[%s16325_s24 + $0x3b0] sm:$0xff] %vm5397_vm1, %v4784_v6  ;;  %v1672_v43 = vrot.slane %v21720_v62, %v16158_v15  ;;  %v4849_v48 = vcombine.low %v4825_v3, %v4841_v50  ;;  %v4850_v27 = vcombine.high %v4825_v3, %v4841_v50  ;;  %5626 = vrot.lane.b32.xlu0 %v21723_v20, %s15696_s17  ;;  %v21724_v20 = vld [vmem:[#allocation52_spill] sm:$0xff] }
 0x204   : > { %v4851_v11 = vcombine.low %v4832_v45, %v4848_v54  ;;  %v4852_v49 = vcombine.high %v4832_v45, %v4848_v54  ;;  %v17182_v34 = vrot.slane %v2677_v4, %v16158_v15  ;;  %v17185_v26 = vrot.slane %v2678_v8, %v16158_v15  ;;  %v17209_v45 = vpop.permute.xlu1 %779  ;;  %v17221_v8 = vpop.permute.xlu0 %809 }
 0x205   : > { %v2746_v40 = vcombine.high %v21722_v41, %v17047_v44  ;;  %5421 = vst.msk [vmem:[%s16325_s24 + $0xb8] sm:$0xff] %vm5397_vm1, %v4849_v48  ;;  %5453 = vst.msk [vmem:[%s16325_s24 + $0x1b8] sm:$0xff] %vm5397_vm1, %v4850_v27  ;;  %v1605_v2 = vcombine.low %v16979_v35, %v17069_v46  ;;  %v1606_v30 = vcombine.high %v16979_v35, %v17069_v46  ;;  %5628 = vrot.lane.b32.xlu1 %v16391_v24, %s15696_s17 }
 0x206   : > { %5485 = vst.msk [vmem:[%s16325_s24 + $0x2b8] sm:$0xff] %vm5397_vm1, %v4851_v11  ;;  %5517 = vst.msk [vmem:[%s16325_s24 + $0x3b8] sm:$0xff] %vm5397_vm1, %v4852_v49  ;;  %v1673_v6 = vcombine.low %v16999_v5, %v17103_v32  ;;  %v1674_v3 = vcombine.high %v16999_v5, %v17103_v32  ;;  %v17212_v50 = vrot.slane %v2745_v53, %v16158_v15 }
 0x207   : > { %v17215_v54 = vrot.slane %v2746_v40, %v16158_v15  ;;  %v2693_v62 = vcombine.low %v17001_v23, %v17109_v28  ;;  %v2694_v4 = vcombine.high %v17001_v23, %v17109_v28  ;;  %v1613_v48 = vrot.slane %v1605_v2, %v16158_v15  ;;  %5658 = vrot.lane.b32.xlu0 %v21724_v20, %s15696_s17 }
 0x208   : > { %v1620_v27 = vrot.slane %v1606_v30, %v16158_v15  ;;  %v1681_v11 = vrot.slane %v1673_v6, %v16158_v15  ;;  %v1688_v49 = vrot.slane %v1674_v3, %v16158_v15  ;;  %v17245_v3 = vpop.permute.xlu1 %811  ;;  %v17247_v17 = vpop.permute.xlu0 %873 }
 0x209   : > { %v17230_v42 = vrot.slane %v2693_v62, %v16158_v15  ;;  %v17233_v41 = vrot.slane %v2694_v4, %v16158_v15  ;;  %v1621_v2 = vcombine.low %v17098_v18, %v1613_v48  ;;  %v1622_v30 = vcombine.high %v17098_v18, %v1613_v48  ;;  %v21725_v48 = vld [vmem:[#allocation53_spill] sm:$0xff] }
 0x20a   : > { %v1637_v24 = vcombine.low %v17101_v7, %v1620_v27  ;;  %v1638_v6 = vcombine.high %v17101_v7, %v1620_v27  ;;  %v1689_v62 = vcombine.low %v1665_v31, %v1681_v11  ;;  %v1690_v4 = vcombine.high %v1665_v31, %v1681_v11  ;;  %5660 = vrot.lane.b32.xlu1 %v21725_v48, %s15696_s17  ;;  %v21726_v11 = vld [vmem:[#allocation54_spill] sm:$0xff] }
 0x20b   : > { %v1705_v58 = vcombine.low %v1672_v43, %v1688_v49  ;;  %v1706_v53 = vcombine.high %v1672_v43, %v1688_v49  ;;  %v1629_v40 = vrot.slane %v1621_v2, %v16163_v25  ;;  %v1636_v20 = vrot.slane %v1622_v30, %v16163_v25  ;;  %5690 = vrot.lane.b32.xlu0 %v21726_v11, %s15696_s17 }
 0x20c   : > { %v1645_v16 = vrot.slane %v1637_v24, %v16163_v25  ;;  %v1652_v18 = vrot.slane %v1638_v6, %v16163_v25  ;;  %v1697_v7 = vrot.slane %v1689_v62, %v16163_v25  ;;  %v1704_v27 = vrot.slane %v1690_v4, %v16163_v25  ;;  %v17261_v51 = vpop.permute.xlu1 %875  ;;  %v17263_v62 = vpop.permute.xlu0 %905 }
 0x20d   : > { %v1713_v31 = vrot.slane %v1705_v58, %v16163_v25  ;;  %v1720_v43 = vrot.slane %v1706_v53, %v16163_v25  ;;  %v3765_v49 = vcombine.low %v1629_v40, %v1636_v20  ;;  %v15438_v2 = vcombine.high %v1629_v40, %v1636_v20  ;;  %v21727_v40 = vld [vmem:[#allocation55_spill] sm:$0xff] }
 0x20e   : > { %v3781_v30 = vcombine.low %v1645_v16, %v1652_v18  ;;  %v15439_v24 = vcombine.high %v1645_v16, %v1652_v18  ;;  %v3833_v6 = vcombine.low %v1697_v7, %v1704_v27  ;;  %v15440_v28 = vcombine.high %v1697_v7, %v1704_v27  ;;  %5692 = vrot.lane.b32.xlu1 %v21727_v40, %s15696_s17 }
 0x20f   : > { %v3849_v48 = vcombine.low %v1713_v31, %v1720_v43  ;;  %v15441_v29 = vcombine.high %v1713_v31, %v1720_v43  ;;  %v3772_v4 = vrot.slane %v3765_v49, %v16158_v15  ;;  %v3780_v58 = vrot.slane %v15438_v2, %v16158_v15  ;;  %5598 = vrot.lane.b32.xlu0 %v16561_v12, %s15696_s17 }
 0x210   : > { %v3788_v53 = vrot.slane %v3781_v30, %v16158_v15  ;;  %v3796_v11 = vrot.slane %v15439_v24, %v16158_v15  ;;  %v3840_v16 = vrot.slane %v3833_v6, %v16158_v15  ;;  %v3848_v20 = vrot.slane %v15440_v28, %v16158_v15  ;;  %v17277_v2 = vpop.permute.xlu1 %907  ;;  %v17279_v6 = vpop.permute.xlu0 %969 }
 0x211   : > { %v3856_v18 = vrot.slane %v3849_v48, %v16158_v15  ;;  %v3864_v7 = vrot.slane %v15441_v29, %v16158_v15  ;;  %v3797_v27 = vcombine.low %v3772_v4, %v3780_v58  ;;  %v3798_v31 = vcombine.high %v3772_v4, %v3780_v58 }
 0x212   : > { %v3813_v43 = vcombine.low %v3788_v53, %v3796_v11  ;;  %v3814_v49 = vcombine.high %v3788_v53, %v3796_v11  ;;  %v3865_v30 = vcombine.low %v3840_v16, %v3848_v20  ;;  %v3866_v24 = vcombine.high %v3840_v16, %v3848_v20  ;;  %5600 = vrot.lane.b32.xlu1 %v16575_v55, %s15696_s17 }
 0x213   : > { %v3881_v40 = vcombine.low %v3856_v18, %v3864_v7  ;;  %v3882_v10 = vcombine.high %v3856_v18, %v3864_v7  ;;  %v3805_v28 = vrot.slane %v3797_v27, %v16163_v25  ;;  %v3812_v48 = vrot.slane %v3798_v31, %v16163_v25  ;;  %5630 = vrot.lane.b32.xlu0 %v16577_v57, %s15696_s17 }
 0x214   : > { %v3821_v29 = vrot.slane %v3813_v43, %v16163_v25  ;;  %v3828_v12 = vrot.slane %v3814_v49, %v16163_v25  ;;  %v3873_v4 = vrot.slane %v3865_v30, %v16163_v25  ;;  %v3880_v58 = vrot.slane %v3866_v24, %v16163_v25  ;;  %v17293_v55 = vpop.permute.xlu1 %971  ;;  %v17295_v30 = vpop.permute.xlu0 %1001 }
 0x215   : > { %v3889_v53 = vrot.slane %v3881_v40, %v16163_v25  ;;  %v3896_v11 = vrot.slane %v3882_v10, %v16163_v25  ;;  %v2709_v57 = vcombine.low %v17182_v34, %v17230_v42  ;;  %v2710_v10 = vcombine.high %v17182_v34, %v17230_v42 }
 0x216   : > { %v3829_v16 = vcombine.low %v3805_v28, %v3821_v29  ;;  %v3830_v20 = vcombine.high %v3805_v28, %v3821_v29  ;;  %v3831_v18 = vcombine.low %v3812_v48, %v3828_v12  ;;  %v3832_v7 = vcombine.high %v3812_v48, %v3828_v12  ;;  %5632 = vrot.lane.b32.xlu1 %v16591_v56, %s15696_s17 }
 0x217   : > { %v3897_v27 = vcombine.low %v3873_v4, %v3889_v53  ;;  %v3898_v31 = vcombine.high %v3873_v4, %v3889_v53  ;;  %v3899_v43 = vcombine.low %v3880_v58, %v3896_v11  ;;  %v3900_v49 = vcombine.high %v3880_v58, %v3896_v11  ;;  %5662 = vrot.lane.b32.xlu0 %v16593_v60, %s15696_s17 }
 0x218   : > { %5406 = vst.msk [vmem:[%s16325_s24 + $0x40] sm:$0xff] %vm5397_vm1, %v3829_v16  ;;  %5438 = vst.msk [vmem:[%s16325_s24 + $0x140] sm:$0xff] %vm5397_vm1, %v3830_v20  ;;  %v2725_v24 = vcombine.low %v17185_v26, %v17233_v41  ;;  %v2726_v40 = vcombine.high %v17185_v26, %v17233_v41  ;;  %v21728_v34 = vcombine.low %v17015_v52, %v17123_v47  ;;  %v17341_v58 = vpop.permute.xlu1 %1003 }
 0x219   : > { %5470 = vst.msk [vmem:[%s16325_s24 + $0x240] sm:$0xff] %vm5397_vm1, %v3831_v18  ;;  %5502 = vst.msk [vmem:[%s16325_s24 + $0x340] sm:$0xff] %vm5397_vm1, %v3832_v7  ;;  %v21729_v26 = vcombine.high %v17015_v52, %v17123_v47  ;;  %v1725_v56 = vcombine.low %v16181_v1, %v17247_v17  ;;  %v1726_v28 = vcombine.high %v16181_v1, %v17247_v17  ;;  %v17347_v18 = vpop.permute.xlu0 %5546 }
 0x21a   : > { %5407 = vst.msk [vmem:[%s16325_s24 + $0x48] sm:$0xff] %vm5397_vm1, %v3897_v27  ;;  %5439 = vst.msk [vmem:[%s16325_s24 + $0x148] sm:$0xff] %vm5397_vm1, %v3898_v31  ;;  %v2769_v42 = vrot.slane %v21728_v34, %v16158_v15  ;;  %v2717_v48 = vrot.slane %v2709_v57, %v16163_v25  ;;  %v2724_v29 = vrot.slane %v2710_v10, %v16163_v25 }
 0x21b   : > { %5471 = vst.msk [vmem:[%s16325_s24 + $0x248] sm:$0xff] %vm5397_vm1, %v3899_v43  ;;  %5503 = vst.msk [vmem:[%s16325_s24 + $0x348] sm:$0xff] %vm5397_vm1, %v3900_v49  ;;  %v2776_v41 = vrot.slane %v21729_v26, %v16158_v15  ;;  %v2733_v12 = vrot.slane %v2725_v24, %v16163_v25  ;;  %v2740_v4 = vrot.slane %v2726_v40, %v16163_v25  ;;  %v21730_v43 = vld [vmem:[#allocation64_spill] sm:$0xff]  ;;  %v21731_v24 = vld [vmem:[#allocation65_spill] sm:$0xff] }
 0x21c   : > { %v2777_v53 = vcombine.low %v17212_v50, %v2769_v42  ;;  %v2778_v11 = vcombine.high %v17212_v50, %v2769_v42  ;;  %v4853_v60 = vcombine.low %v2717_v48, %v2724_v29  ;;  %v15470_v7 = vcombine.high %v2717_v48, %v2724_v29  ;;  %5664 = vrot.lane.b32.xlu1 %v21730_v43, %s15696_s17  ;;  %v17361_v26 = vpop.permute.xlu1 %5548 }
 0x21d   : > { %v2793_v16 = vcombine.low %v17215_v54, %v2776_v41  ;;  %v2794_v20 = vcombine.high %v17215_v54, %v2776_v41  ;;  %v4869_v27 = vcombine.low %v2733_v12, %v2740_v4  ;;  %v15471_v31 = vcombine.high %v2733_v12, %v2740_v4  ;;  %5694 = vrot.lane.b32.xlu0 %v21731_v24, %s15696_s17  ;;  %v17363_v4 = vpop.permute.xlu0 %5578 }
 0x21e   : > { %v2785_v49 = vrot.slane %v2777_v53, %v16163_v25  ;;  %v2792_v57 = vrot.slane %v2778_v11, %v16163_v25  ;;  %v4860_v54 = vrot.slane %v4853_v60, %v16158_v15  ;;  %v4868_v40 = vrot.slane %v15470_v7, %v16158_v15  ;;  %v21732_v60 = vld [vmem:[#allocation66_spill] sm:$0xff] }
 0x21f   : > { %v2801_v10 = vrot.slane %v2793_v16, %v16163_v25  ;;  %v2808_v50 = vrot.slane %v2794_v20, %v16163_v25  ;;  %v4876_v34 = vrot.slane %v4869_v27, %v16158_v15  ;;  %v4884_v42 = vrot.slane %v15471_v31, %v16158_v15 }
 0x220   : > { %v4921_v41 = vcombine.low %v2785_v49, %v2792_v57  ;;  %v15472_v48 = vcombine.high %v2785_v49, %v2792_v57  ;;  %v4885_v53 = vcombine.low %v4860_v54, %v4868_v40  ;;  %v4886_v11 = vcombine.high %v4860_v54, %v4868_v40  ;;  %5696 = vrot.lane.b32.xlu1 %v21732_v60, %s15696_s17  ;;  %v17377_v24 = vpop.permute.xlu1 %5580  ;;  %v21733_v60 = vld [vmem:[#allocation33_spill] sm:$0xff] }
 0x221   : > { %v4937_v29 = vcombine.low %v2801_v10, %v2808_v50  ;;  %v15473_v12 = vcombine.high %v2801_v10, %v2808_v50  ;;  %v4901_v16 = vcombine.low %v4876_v34, %v4884_v42  ;;  %v4902_v20 = vcombine.high %v4876_v34, %v4884_v42  ;;  %5602 = vrot.lane.b32.xlu0 %v16775_v59, %s15696_s17 }
 0x222   : > { %v4928_v7 = vrot.slane %v4921_v41, %v16158_v15  ;;  %v4936_v27 = vrot.slane %v15472_v48, %v16158_v15  ;;  %v4893_v49 = vrot.slane %v4885_v53, %v16163_v25  ;;  %v4900_v57 = vrot.slane %v4886_v11, %v16163_v25  ;;  %v17379_v41 = vpop.permute.xlu0 %781 }
 0x223   : > { %v4944_v31 = vrot.slane %v4937_v29, %v16158_v15  ;;  %v4952_v43 = vrot.slane %v15473_v12, %v16158_v15  ;;  %v4909_v10 = vrot.slane %v4901_v16, %v16163_v25  ;;  %v4916_v50 = vrot.slane %v4902_v20, %v16163_v25 }
 0x224   : > { %v4953_v54 = vcombine.low %v4928_v7, %v4936_v27  ;;  %v4954_v40 = vcombine.high %v4928_v7, %v4936_v27  ;;  %5604 = vrot.lane.b32.xlu1 %v16789_v0, %s15696_s17  ;;  %v1733_v0 = vrot.slane %v1725_v56, %v16158_v15  ;;  %v1793_v7 = vcombine.low %v21733_v60, %v17261_v51 }
 0x225   : > { %v4969_v34 = vcombine.low %v4944_v31, %v4952_v43  ;;  %v4970_v42 = vcombine.high %v4944_v31, %v4952_v43  ;;  %v4917_v59 = vcombine.low %v4893_v49, %v4909_v10  ;;  %v4918_v48 = vcombine.high %v4893_v49, %v4909_v10  ;;  %5634 = vrot.lane.b32.xlu0 %v16791_v13, %s15696_s17  ;;  %v17409_v31 = vpop.permute.xlu1 %783 }
 0x226   : > { %v4919_v29 = vcombine.low %v4900_v57, %v4916_v50  ;;  %v4920_v12 = vcombine.high %v4900_v57, %v4916_v50  ;;  %v4961_v53 = vrot.slane %v4953_v54, %v16163_v25  ;;  %v4968_v11 = vrot.slane %v4954_v40, %v16163_v25  ;;  %v17411_v10 = vpop.permute.xlu0 %813  ;;  %v21734_v50 = vld [vmem:[#allocation34_spill] sm:$0xff] }
 0x227   : > { %v4977_v16 = vrot.slane %v4969_v34, %v16163_v25  ;;  %v4984_v20 = vrot.slane %v4970_v42, %v16163_v25  ;;  %5422 = vst.msk [vmem:[%s16325_s24 + $0xc0] sm:$0xff] %vm5397_vm1, %v4917_v59  ;;  %5454 = vst.msk [vmem:[%s16325_s24 + $0x1c0] sm:$0xff] %vm5397_vm1, %v4918_v48  ;;  %v1740_v13 = vrot.slane %v1726_v28, %v16158_v15  ;;  %v21735_v34 = vld [vmem:[#allocation35_spill] sm:$0xff] }
 0x228   : > { %5486 = vst.msk [vmem:[%s16325_s24 + $0x2c0] sm:$0xff] %vm5397_vm1, %v4919_v29  ;;  %5518 = vst.msk [vmem:[%s16325_s24 + $0x3c0] sm:$0xff] %vm5397_vm1, %v4920_v12  ;;  %v1794_v27 = vcombine.high %v21733_v60, %v17261_v51  ;;  %v1801_v1 = vrot.slane %v1793_v7, %v16158_v15  ;;  %v2813_v54 = vcombine.low %v21734_v50, %v17263_v62  ;;  %5636 = vrot.lane.b32.xlu1 %v16805_v22, %s15696_s17 }
 0x229   : > { %v4985_v43 = vcombine.low %v4961_v53, %v4977_v16  ;;  %v4986_v49 = vcombine.high %v4961_v53, %v4977_v16  ;;  %v4987_v57 = vcombine.low %v4968_v11, %v4984_v20  ;;  %v4988_v56 = vcombine.high %v4968_v11, %v4984_v20  ;;  %5666 = vrot.lane.b32.xlu0 %v16807_v37, %s15696_s17  ;;  %v17449_v16 = vpop.permute.xlu1 %815 }
 0x22a   : > { %v1808_v28 = vrot.slane %v1794_v27, %v16158_v15  ;;  %v2814_v40 = vcombine.high %v21734_v50, %v17263_v62  ;;  %v2881_v42 = vcombine.low %v21735_v34, %v17277_v2  ;;  %v2882_v59 = vcombine.high %v21735_v34, %v17277_v2  ;;  %v17459_v27 = vpop.permute.xlu0 %877 }
 0x22b   : > { %5423 = vst.msk [vmem:[%s16325_s24 + $0xc8] sm:$0xff] %vm5397_vm1, %v4985_v43  ;;  %5455 = vst.msk [vmem:[%s16325_s24 + $0x1c8] sm:$0xff] %vm5397_vm1, %v4986_v49  ;;  %v1741_v48 = vcombine.low %v17177_v33, %v17279_v6  ;;  %v1742_v22 = vcombine.high %v17177_v33, %v17279_v6  ;;  %v17440_v29 = vrot.slane %v2813_v54, %v16158_v15 }
 0x22c   : > { %5487 = vst.msk [vmem:[%s16325_s24 + $0x2c8] sm:$0xff] %vm5397_vm1, %v4987_v57  ;;  %5519 = vst.msk [vmem:[%s16325_s24 + $0x3c8] sm:$0xff] %vm5397_vm1, %v4988_v56  ;;  %v17443_v12 = vrot.slane %v2814_v40, %v16158_v15  ;;  %v1809_v53 = vcombine.low %v17209_v45, %v17293_v55  ;;  %v1810_v11 = vcombine.high %v17209_v45, %v17293_v55  ;;  %5668 = vrot.lane.b32.xlu1 %v16821_v36, %s15696_s17 }
 0x22d   : > { %v17452_v20 = vrot.slane %v2881_v42, %v16158_v15  ;;  %v17455_v60 = vrot.slane %v2882_v59, %v16158_v15  ;;  %v1749_v37 = vrot.slane %v1741_v48, %v16158_v15  ;;  %v1756_v7 = vrot.slane %v1742_v22, %v16158_v15  ;;  %5698 = vrot.lane.b32.xlu0 %v16823_v9, %s15696_s17 }
 0x22e   : > { %v1817_v43 = vrot.slane %v1809_v53, %v16158_v15  ;;  %v1824_v49 = vrot.slane %v1810_v11, %v16158_v15  ;;  %v17471_v53 = vpop.permute.xlu1 %879 }
 0x22f   : > { %v1757_v50 = vcombine.low %v1733_v0, %v1749_v37  ;;  %v1758_v54 = vcombine.high %v1733_v0, %v1749_v37  ;;  %v1773_v40 = vcombine.low %v1740_v13, %v1756_v7  ;;  %v1774_v34 = vcombine.high %v1740_v13, %v1756_v7  ;;  %v17477_v0 = vpop.permute.xlu0 %909 }
 0x230   : > { %v1825_v42 = vcombine.low %v1801_v1, %v1817_v43  ;;  %v1826_v59 = vcombine.high %v1801_v1, %v1817_v43  ;;  %v1841_v48 = vcombine.low %v1808_v28, %v1824_v49  ;;  %v1842_v22 = vcombine.high %v1808_v28, %v1824_v49  ;;  %5700 = vrot.lane.b32.xlu1 %v16869_v14, %s15696_s17 }
 0x231   : > { %v1765_v11 = vrot.slane %v1757_v50, %v16163_v25  ;;  %v1772_v56 = vrot.slane %v1758_v54, %v16163_v25  ;;  %v1781_v57 = vrot.slane %v1773_v40, %v16163_v25  ;;  %v1788_v36 = vrot.slane %v1774_v34, %v16163_v25  ;;  %5606 = vrot.lane.b32.xlu0 %v16979_v35, %s15696_s17 }
 0x232   : > { %v1833_v13 = vrot.slane %v1825_v42, %v16163_v25  ;;  %v1840_v9 = vrot.slane %v1826_v59, %v16163_v25  ;;  %v1849_v1 = vrot.slane %v1841_v48, %v16163_v25  ;;  %v1856_v28 = vrot.slane %v1842_v22, %v16163_v25  ;;  %v17487_v42 = vpop.permute.xlu1 %911 }
 0x233   : > { %v3901_v37 = vcombine.low %v1765_v11, %v1772_v56  ;;  %v15442_v7 = vcombine.high %v1765_v11, %v1772_v56  ;;  %v3917_v43 = vcombine.low %v1781_v57, %v1788_v36  ;;  %v15443_v49 = vcombine.high %v1781_v57, %v1788_v36  ;;  %v17493_v56 = vpop.permute.xlu0 %973 }
 0x234   : > { %v3969_v50 = vcombine.low %v1833_v13, %v1840_v9  ;;  %v15444_v54 = vcombine.high %v1833_v13, %v1840_v9  ;;  %v3985_v40 = vcombine.low %v1849_v1, %v1856_v28  ;;  %v15445_v34 = vcombine.high %v1849_v1, %v1856_v28  ;;  %5608 = vrot.lane.b32.xlu1 %v16999_v5, %s15696_s17 }
 0x235   : > { %v3908_v59 = vrot.slane %v3901_v37, %v16158_v15  ;;  %v3916_v48 = vrot.slane %v15442_v7, %v16158_v15  ;;  %v3924_v22 = vrot.slane %v3917_v43, %v16158_v15  ;;  %v3932_v14 = vrot.slane %v15443_v49, %v16158_v15  ;;  %5638 = vrot.lane.b32.xlu0 %v17001_v23, %s15696_s17 }
 0x236   : > { %v3976_v57 = vrot.slane %v3969_v50, %v16158_v15  ;;  %v3984_v35 = vrot.slane %v15444_v54, %v16158_v15  ;;  %v3992_v11 = vrot.slane %v3985_v40, %v16158_v15  ;;  %v4000_v36 = vrot.slane %v15445_v34, %v16158_v15  ;;  %v17503_v50 = vpop.permute.xlu1 %975 }
 0x237   : > { %v3933_v13 = vcombine.low %v3908_v59, %v3916_v48  ;;  %v3934_v9 = vcombine.high %v3908_v59, %v3916_v48  ;;  %v3949_v1 = vcombine.low %v3924_v22, %v3932_v14  ;;  %v3950_v28 = vcombine.high %v3924_v22, %v3932_v14  ;;  %v17509_v59 = vpop.permute.xlu0 %1005 }
 0x238   : > { %v4001_v37 = vcombine.low %v3976_v57, %v3984_v35  ;;  %v4002_v7 = vcombine.high %v3976_v57, %v3984_v35  ;;  %v4017_v43 = vcombine.low %v3992_v11, %v4000_v36  ;;  %v4018_v49 = vcombine.high %v3992_v11, %v4000_v36  ;;  %5640 = vrot.lane.b32.xlu1 %v17015_v52, %s15696_s17 }
 0x239   : > { %v3941_v54 = vrot.slane %v3933_v13, %v16163_v25  ;;  %v3948_v40 = vrot.slane %v3934_v9, %v16163_v25  ;;  %v3957_v34 = vrot.slane %v3949_v1, %v16163_v25  ;;  %v3964_v5 = vrot.slane %v3950_v28, %v16163_v25  ;;  %5670 = vrot.lane.b32.xlu0 %v17021_v63, %s15696_s17 }
 0x23a   : > { %v4009_v48 = vrot.slane %v4001_v37, %v16163_v25  ;;  %v4016_v23 = vrot.slane %v4002_v7, %v16163_v25  ;;  %v4025_v22 = vrot.slane %v4017_v43, %v16163_v25  ;;  %v4032_v14 = vrot.slane %v4018_v49, %v16163_v25  ;;  %v17519_v37 = vpop.permute.xlu1 %1007 }
 0x23b   : > { %v3965_v57 = vcombine.low %v3941_v54, %v3957_v34  ;;  %v3966_v35 = vcombine.high %v3941_v54, %v3957_v34  ;;  %v3967_v11 = vcombine.low %v3948_v40, %v3964_v5  ;;  %v3968_v36 = vcombine.high %v3948_v40, %v3964_v5  ;;  %v17541_v40 = vpop.permute.xlu0 %5550  ;;  %v21738_v34 = vld [vmem:[#allocation37_spill] sm:$0xff] }
 0x23c   : > { %v4033_v13 = vcombine.low %v4009_v48, %v4025_v22  ;;  %v4034_v9 = vcombine.high %v4009_v48, %v4025_v22  ;;  %v4035_v1 = vcombine.low %v4016_v23, %v4032_v14  ;;  %v4036_v28 = vcombine.high %v4016_v23, %v4032_v14  ;;  %5672 = vrot.lane.b32.xlu1 %v17031_v38, %s15696_s17 }
 0x23d   : > { %5408 = vst.msk [vmem:[%s16325_s24 + $0x50] sm:$0xff] %vm5397_vm1, %v3965_v57  ;;  %5440 = vst.msk [vmem:[%s16325_s24 + $0x150] sm:$0xff] %vm5397_vm1, %v3966_v35  ;;  %v21736_v52 = vcombine.low %v17221_v8, %v17295_v30  ;;  %v21737_v7 = vcombine.high %v17221_v8, %v17295_v30  ;;  %v2897_v49 = vcombine.low %v17245_v3, %v17341_v58  ;;  %5702 = vrot.lane.b32.xlu0 %v17037_v19, %s15696_s17 }
 0x23e   : > { %5472 = vst.msk [vmem:[%s16325_s24 + $0x250] sm:$0xff] %vm5397_vm1, %v3967_v11  ;;  %5504 = vst.msk [vmem:[%s16325_s24 + $0x350] sm:$0xff] %vm5397_vm1, %v3968_v36  ;;  %v2898_v54 = vcombine.high %v17245_v3, %v17341_v58  ;;  %v1861_v5 = vcombine.low %v21738_v34, %v17459_v27  ;;  %v1862_v48 = vcombine.high %v21738_v34, %v17459_v27 }
 0x23f   : > { %v2837_v63 = vrot.slane %v21736_v52, %v16158_v15  ;;  %v2844_v43 = vrot.slane %v21737_v7, %v16158_v15  ;;  %5409 = vst.msk [vmem:[%s16325_s24 + $0x58] sm:$0xff] %vm5397_vm1, %v4033_v13  ;;  %5441 = vst.msk [vmem:[%s16325_s24 + $0x158] sm:$0xff] %vm5397_vm1, %v4034_v9  ;;  %v1929_v23 = vcombine.low %v16202_v39, %v17471_v53  ;;  %v17581_v52 = vpop.permute.xlu0 %5582 }
 0x240   : > { %5473 = vst.msk [vmem:[%s16325_s24 + $0x258] sm:$0xff] %vm5397_vm1, %v4035_v1  ;;  %5505 = vst.msk [vmem:[%s16325_s24 + $0x358] sm:$0xff] %vm5397_vm1, %v4036_v28  ;;  %v1930_v22 = vcombine.high %v16202_v39, %v17471_v53  ;;  %v2905_v36 = vrot.slane %v2897_v49, %v16158_v15  ;;  %v2912_v13 = vrot.slane %v2898_v54, %v16158_v15  ;;  %v17575_v1 = vpop.permute.xlu1 %5552  ;;  %5704 = vrot.lane.b32.xlu1 %v17047_v44, %s15696_s17 }
 0x241   : > { %v2845_v14 = vcombine.low %v17440_v29, %v2837_v63  ;;  %v2846_v57 = vcombine.high %v17440_v29, %v2837_v63  ;;  %v2861_v35 = vcombine.low %v17443_v12, %v2844_v43  ;;  %v2862_v11 = vcombine.high %v17443_v12, %v2844_v43  ;;  %21739 = vst [vmem:[#allocation50_spill] sm:$0xff] %v17581_v52 }
 0x242   : > { %v17570_v9 = vrot.slane %v1861_v5, %v16158_v15  ;;  %v17573_v38 = vrot.slane %v1862_v48, %v16158_v15  ;;  %v2913_v63 = vcombine.low %v17452_v20, %v2905_v36  ;;  %v2914_v7 = vcombine.high %v17452_v20, %v2905_v36  ;;  %5610 = vrot.lane.b32.xlu0 %v17177_v33, %s15696_s17 }
 0x243   : > { %v2853_v29 = vrot.slane %v2845_v14, %v16163_v25  ;;  %v2860_v28 = vrot.slane %v2846_v57, %v16163_v25  ;;  %v2869_v12 = vrot.slane %v2861_v35, %v16163_v25  ;;  %v2876_v19 = vrot.slane %v2862_v11, %v16163_v25 }
 0x244   : > { %v2929_v43 = vcombine.low %v17455_v60, %v2912_v13  ;;  %v2930_v49 = vcombine.high %v17455_v60, %v2912_v13  ;;  %v2921_v14 = vrot.slane %v2913_v63, %v16163_v25  ;;  %v2928_v57 = vrot.slane %v2914_v7, %v16163_v25  ;;  %v17595_v11 = vpop.permute.xlu1 %5584  ;;  %5612 = vrot.lane.b32.xlu1 %v17209_v45, %s15696_s17 }
 0x245   : > { %v4989_v54 = vcombine.low %v2853_v29, %v2860_v28  ;;  %v15474_v34 = vcombine.high %v2853_v29, %v2860_v28  ;;  %v5005_v5 = vcombine.low %v2869_v12, %v2876_v19  ;;  %v15475_v48 = vcombine.high %v2869_v12, %v2876_v19  ;;  %21740 = vst [vmem:[#allocation32_spill] sm:$0xff] %v17595_v11  ;;  %v17601_v29 = vpop.permute.xlu0 %785 }
 0x246   : > { %v2937_v20 = vrot.slane %v2929_v43, %v16163_v25  ;;  %v2944_v35 = vrot.slane %v2930_v49, %v16163_v25  ;;  %v5057_v33 = vcombine.low %v2921_v14, %v2928_v57  ;;  %v15476_v28 = vcombine.high %v2921_v14, %v2928_v57  ;;  %5642 = vrot.lane.b32.xlu0 %v17221_v8, %s15696_s17 }
 0x247   : > { %v4996_v60 = vrot.slane %v4989_v54, %v16158_v15  ;;  %v5004_v44 = vrot.slane %v15474_v34, %v16158_v15  ;;  %v5012_v36 = vrot.slane %v5005_v5, %v16158_v15  ;;  %v5020_v13 = vrot.slane %v15475_v48, %v16158_v15 }
 0x248   : > { %v5073_v12 = vcombine.low %v2937_v20, %v2944_v35  ;;  %v15477_v19 = vcombine.high %v2937_v20, %v2944_v35  ;;  %v5064_v54 = vrot.slane %v5057_v33, %v16158_v15  ;;  %v5072_v34 = vrot.slane %v15476_v28, %v16158_v15  ;;  %v17611_v14 = vpop.permute.xlu1 %787  ;;  %5644 = vrot.lane.b32.xlu1 %v17245_v3, %s15696_s17 }
 0x249   : > { %v5021_v63 = vcombine.low %v4996_v60, %v5004_v44  ;;  %v5022_v7 = vcombine.high %v4996_v60, %v5004_v44  ;;  %v5037_v43 = vcombine.low %v5012_v36, %v5020_v13  ;;  %v5038_v49 = vcombine.high %v5012_v36, %v5020_v13  ;;  %v17617_v60 = vpop.permute.xlu0 %817 }
 0x24a   : > { %v5080_v5 = vrot.slane %v5073_v12, %v16158_v15  ;;  %v5088_v48 = vrot.slane %v15477_v19, %v16158_v15  ;;  %v5089_v8 = vcombine.low %v5064_v54, %v5072_v34  ;;  %v5090_v44 = vcombine.high %v5064_v54, %v5072_v34  ;;  %5674 = vrot.lane.b32.xlu0 %v17247_v17, %s15696_s17  ;;  %v21741_v34 = vld [vmem:[#allocation38_spill] sm:$0xff] }
 0x24b   : > { %v5029_v57 = vrot.slane %v5021_v63, %v16163_v25  ;;  %v5036_v45 = vrot.slane %v5022_v7, %v16163_v25  ;;  %v5045_v20 = vrot.slane %v5037_v43, %v16163_v25  ;;  %v5052_v35 = vrot.slane %v5038_v49, %v16163_v25 }
 0x24c   : > { %v5105_v36 = vcombine.low %v5080_v5, %v5088_v48  ;;  %v5106_v13 = vcombine.high %v5080_v5, %v5088_v48  ;;  %v5097_v63 = vrot.slane %v5089_v8, %v16163_v25  ;;  %v5104_v7 = vrot.slane %v5090_v44, %v16163_v25  ;;  %v17627_v54 = vpop.permute.xlu1 %819  ;;  %5676 = vrot.lane.b32.xlu1 %v17261_v51, %s15696_s17  ;;  %v21742_v8 = vld [vmem:[#allocation39_spill] sm:$0xff] }
 0x24d   : > { %v5053_v33 = vcombine.low %v5029_v57, %v5045_v20  ;;  %v5054_v28 = vcombine.high %v5029_v57, %v5045_v20  ;;  %v5055_v12 = vcombine.low %v5036_v45, %v5052_v35  ;;  %v5056_v19 = vcombine.high %v5036_v45, %v5052_v35  ;;  %v17649_v57 = vpop.permute.xlu0 %881 }
 0x24e   : > { %v5113_v43 = vrot.slane %v5105_v36, %v16163_v25  ;;  %v5120_v49 = vrot.slane %v5106_v13, %v16163_v25  ;;  %v1937_v17 = vrot.slane %v1929_v23, %v16158_v15  ;;  %v1944_v3 = vrot.slane %v1930_v22, %v16158_v15  ;;  %5706 = vrot.lane.b32.xlu0 %v17263_v62, %s15696_s17 }
 0x24f   : > { %5424 = vst.msk [vmem:[%s16325_s24 + $0xd0] sm:$0xff] %vm5397_vm1, %v5053_v33  ;;  %5456 = vst.msk [vmem:[%s16325_s24 + $0x1d0] sm:$0xff] %vm5397_vm1, %v5054_v28  ;;  %v2949_v5 = vcombine.low %v21741_v34, %v17477_v0  ;;  %v2950_v48 = vcombine.high %v21741_v34, %v17477_v0  ;;  %v3017_v44 = vcombine.low %v21742_v8, %v17487_v42 }
 0x250   : > { %5488 = vst.msk [vmem:[%s16325_s24 + $0x2d0] sm:$0xff] %vm5397_vm1, %v5055_v12  ;;  %5520 = vst.msk [vmem:[%s16325_s24 + $0x3d0] sm:$0xff] %vm5397_vm1, %v5056_v19  ;;  %v5121_v45 = vcombine.low %v5097_v63, %v5113_v43  ;;  %v5122_v20 = vcombine.high %v5097_v63, %v5113_v43  ;;  %v5123_v35 = vcombine.low %v5104_v7, %v5120_v49  ;;  %v17681_v28 = vpop.permute.xlu1 %883  ;;  %5708 = vrot.lane.b32.xlu1 %v17277_v2, %s15696_s17 }
 0x251   : > { %v5124_v23 = vcombine.high %v5104_v7, %v5120_v49  ;;  %v17654_v39 = vrot.slane %v2949_v5, %v16158_v15  ;;  %v17657_v22 = vrot.slane %v2950_v48, %v16158_v15  ;;  %v3018_v36 = vcombine.high %v21742_v8, %v17487_v42  ;;  %v17693_v43 = vpop.permute.xlu0 %913 }
 0x252   : > { %5425 = vst.msk [vmem:[%s16325_s24 + $0xd8] sm:$0xff] %vm5397_vm1, %v5121_v45  ;;  %5457 = vst.msk [vmem:[%s16325_s24 + $0x1d8] sm:$0xff] %vm5397_vm1, %v5122_v20  ;;  %v1877_v51 = vcombine.low %v17379_v41, %v17493_v56  ;;  %v1878_v13 = vcombine.high %v17379_v41, %v17493_v56  ;;  %v1945_v33 = vcombine.low %v17409_v31, %v17503_v50  ;;  %5614 = vrot.lane.b32.xlu0 %v17379_v41, %s15696_s17 }
 0x253   : > { %5489 = vst.msk [vmem:[%s16325_s24 + $0x2d8] sm:$0xff] %vm5397_vm1, %v5123_v35  ;;  %5521 = vst.msk [vmem:[%s16325_s24 + $0x3d8] sm:$0xff] %vm5397_vm1, %v5124_v23  ;;  %v1946_v62 = vcombine.high %v17409_v31, %v17503_v50  ;;  %v17684_v12 = vrot.slane %v3017_v44, %v16158_v15  ;;  %v17687_v19 = vrot.slane %v3018_v36, %v16158_v15 }
 0x254   : > { %v2965_v63 = vcombine.low %v17411_v10, %v17509_v59  ;;  %v2966_v7 = vcombine.high %v17411_v10, %v17509_v59  ;;  %v1885_v49 = vrot.slane %v1877_v51, %v16158_v15  ;;  %v1892_v34 = vrot.slane %v1878_v13, %v16158_v15  ;;  %v17717_v51 = vpop.permute.xlu1 %915  ;;  %5616 = vrot.lane.b32.xlu1 %v17409_v31, %s15696_s17 }
 0x255   : > { %v1953_v5 = vrot.slane %v1945_v33, %v16158_v15  ;;  %v1960_v48 = vrot.slane %v1946_v62, %v16158_v15 }
 0x256   : > { %v17702_v45 = vrot.slane %v2965_v63, %v16158_v15  ;;  %v17705_v20 = vrot.slane %v2966_v7, %v16158_v15  ;;  %v1893_v8 = vcombine.low %v17570_v9, %v1885_v49  ;;  %v1894_v44 = vcombine.high %v17570_v9, %v1885_v49  ;;  %v17719_v7 = vpop.permute.xlu0 %977  ;;  %5646 = vrot.lane.b32.xlu0 %v17411_v10, %s15696_s17 }
 0x257   : > { %v1909_v2 = vcombine.low %v17573_v38, %v1892_v34  ;;  %v1910_v36 = vcombine.high %v17573_v38, %v1892_v34  ;;  %v1961_v13 = vcombine.low %v1937_v17, %v1953_v5  ;;  %v1962_v33 = vcombine.high %v1937_v17, %v1953_v5 }
 0x258   : > { %v1977_v62 = vcombine.low %v1944_v3, %v1960_v48  ;;  %v1978_v63 = vcombine.high %v1944_v3, %v1960_v48  ;;  %v1901_v23 = vrot.slane %v1893_v8, %v16163_v25  ;;  %v1908_v41 = vrot.slane %v1894_v44, %v16163_v25  ;;  %v17733_v44 = vpop.permute.xlu1 %979  ;;  %5648 = vrot.lane.b32.xlu1 %v17449_v16, %s15696_s17 }
 0x259   : > { %v1917_v35 = vrot.slane %v1909_v2, %v16163_v25  ;;  %v1924_v9 = vrot.slane %v1910_v36, %v16163_v25  ;;  %v1969_v38 = vrot.slane %v1961_v13, %v16163_v25  ;;  %v1976_v49 = vrot.slane %v1962_v33, %v16163_v25 }
 0x25a   : > { %v1985_v17 = vrot.slane %v1977_v62, %v16163_v25  ;;  %v1992_v3 = vrot.slane %v1978_v63, %v16163_v25  ;;  %v4037_v34 = vcombine.low %v1901_v23, %v1908_v41  ;;  %v15446_v5 = vcombine.high %v1901_v23, %v1908_v41  ;;  %v17735_v13 = vpop.permute.xlu0 %1009  ;;  %5678 = vrot.lane.b32.xlu0 %v17459_v27, %s15696_s17 }
 0x25b   : > { %v4053_v48 = vcombine.low %v1917_v35, %v1924_v9  ;;  %v15447_v8 = vcombine.high %v1917_v35, %v1924_v9  ;;  %v4105_v2 = vcombine.low %v1969_v38, %v1976_v49  ;;  %v15448_v36 = vcombine.high %v1969_v38, %v1976_v49 }
 0x25c   : > { %v4121_v31 = vcombine.low %v1985_v17, %v1992_v3  ;;  %v15449_v11 = vcombine.high %v1985_v17, %v1992_v3  ;;  %v4044_v33 = vrot.slane %v4037_v34, %v16158_v15  ;;  %v4052_v62 = vrot.slane %v15446_v5, %v16158_v15  ;;  %v17749_v34 = vpop.permute.xlu1 %1011  ;;  %5680 = vrot.lane.b32.xlu1 %v17471_v53, %s15696_s17 }
 0x25d   : > { %v4060_v63 = vrot.slane %v4053_v48, %v16158_v15  ;;  %v4068_v10 = vrot.slane %v15447_v8, %v16158_v15  ;;  %v4112_v35 = vrot.slane %v4105_v2, %v16158_v15  ;;  %v4120_v23 = vrot.slane %v15448_v36, %v16158_v15 }
 0x25e   : > { %v4128_v41 = vrot.slane %v4121_v31, %v16158_v15  ;;  %v4136_v9 = vrot.slane %v15449_v11, %v16158_v15  ;;  %v4069_v38 = vcombine.low %v4044_v33, %v4052_v62  ;;  %v4070_v49 = vcombine.high %v4044_v33, %v4052_v62  ;;  %v17751_v2 = vpop.permute.xlu0 %5554  ;;  %5710 = vrot.lane.b32.xlu0 %v17477_v0, %s15696_s17 }
 0x25f   : > { %v4085_v17 = vcombine.low %v4060_v63, %v4068_v10  ;;  %v4086_v3 = vcombine.high %v4060_v63, %v4068_v10  ;;  %v4137_v5 = vcombine.low %v4112_v35, %v4120_v23  ;;  %v4138_v48 = vcombine.high %v4112_v35, %v4120_v23 }
 0x260   : > { %v4153_v8 = vcombine.low %v4128_v41, %v4136_v9  ;;  %v4154_v52 = vcombine.high %v4128_v41, %v4136_v9  ;;  %v4077_v36 = vrot.slane %v4069_v38, %v16163_v25  ;;  %v4084_v31 = vrot.slane %v4070_v49, %v16163_v25  ;;  %v17765_v53 = vpop.permute.xlu1 %5556  ;;  %5712 = vrot.lane.b32.xlu1 %v17487_v42, %s15696_s17  ;;  %v21747_v42 = vld [vmem:[#allocation40_spill] sm:$0xff] }
 0x261   : > { %v4093_v11 = vrot.slane %v4085_v17, %v16163_v25  ;;  %v4100_v27 = vrot.slane %v4086_v3, %v16163_v25  ;;  %v4145_v33 = vrot.slane %v4137_v5, %v16163_v25  ;;  %v4152_v62 = vrot.slane %v4138_v48, %v16163_v25  ;;  %21743 = vst [vmem:[#allocation51_spill] sm:$0xff] %v17765_v53  ;;  %v21843_v53 = vld [vmem:[#allocation31_spill] sm:$0xff] }
 0x262   : > { %v4161_v63 = vrot.slane %v4153_v8, %v16163_v25  ;;  %v4168_v10 = vrot.slane %v4154_v52, %v16163_v25  ;;  %v17767_v5 = vpop.permute.xlu0 %5586  ;;  %v2981_v0 = vcombine.low %v17654_v39, %v17702_v45  ;;  %v2982_v52 = vcombine.high %v17654_v39, %v17702_v45  ;;  %5618 = vrot.lane.b32.xlu0 %v17601_v29, %s15696_s17 }
 0x263   : > { %v4101_v35 = vcombine.low %v4077_v36, %v4093_v11  ;;  %v4102_v23 = vcombine.high %v4077_v36, %v4093_v11  ;;  %v4103_v41 = vcombine.low %v4084_v31, %v4100_v27  ;;  %v4104_v9 = vcombine.high %v4084_v31, %v4100_v27  ;;  %21744 = vst [vmem:[#allocation52_spill] sm:$0xff] %v17767_v5  ;;  %v21845_v5 = vld [vmem:[#allocation36_spill] sm:$0xff] }
 0x264   : > { %v4169_v38 = vcombine.low %v4145_v33, %v4161_v63  ;;  %v4170_v49 = vcombine.high %v4145_v33, %v4161_v63  ;;  %v4171_v17 = vcombine.low %v4152_v62, %v4168_v10  ;;  %v4172_v3 = vcombine.high %v4152_v62, %v4168_v10  ;;  %v17813_v63 = vpop.permute.xlu1 %5588 }
 0x265   : > { %5410 = vst.msk [vmem:[%s16325_s24 + $0x60] sm:$0xff] %vm5397_vm1, %v4101_v35  ;;  %5442 = vst.msk [vmem:[%s16325_s24 + $0x160] sm:$0xff] %vm5397_vm1, %v4102_v23  ;;  %v2997_v48 = vcombine.low %v17657_v22, %v17705_v20  ;;  %v2998_v8 = vcombine.high %v17657_v22, %v17705_v20  ;;  %v21745_v39 = vcombine.low %v17449_v16, %v17519_v37 }
 0x266   : > { %5474 = vst.msk [vmem:[%s16325_s24 + $0x260] sm:$0xff] %vm5397_vm1, %v4103_v41  ;;  %5506 = vst.msk [vmem:[%s16325_s24 + $0x360] sm:$0xff] %vm5397_vm1, %v4104_v9  ;;  %v21746_v22 = vcombine.high %v17449_v16, %v17519_v37  ;;  %v1997_v36 = vcombine.low %v21747_v42, %v17649_v57  ;;  %v1998_v31 = vcombine.high %v21747_v42, %v17649_v57  ;;  %v17819_v41 = vpop.permute.xlu0 %5590  ;;  %5650 = vrot.lane.b32.xlu0 %v17617_v60, %s15696_s17 }
 0x267   : > { %5411 = vst.msk [vmem:[%s16325_s24 + $0x68] sm:$0xff] %vm5397_vm1, %v4169_v38  ;;  %5443 = vst.msk [vmem:[%s16325_s24 + $0x168] sm:$0xff] %vm5397_vm1, %v4170_v49  ;;  %v3041_v45 = vrot.slane %v21745_v39, %v16158_v15  ;;  %v2989_v11 = vrot.slane %v2981_v0, %v16163_v25  ;;  %v2996_v27 = vrot.slane %v2982_v52, %v16163_v25 }
 0x268   : > { %5475 = vst.msk [vmem:[%s16325_s24 + $0x268] sm:$0xff] %vm5397_vm1, %v4171_v17  ;;  %5507 = vst.msk [vmem:[%s16325_s24 + $0x368] sm:$0xff] %vm5397_vm1, %v4172_v3  ;;  %v3048_v20 = vrot.slane %v21746_v22, %v16158_v15  ;;  %v3005_v33 = vrot.slane %v2997_v48, %v16163_v25  ;;  %v3012_v62 = vrot.slane %v2998_v8, %v16163_v25  ;;  %v21750_v3 = vld [vmem:[#allocation41_spill] sm:$0xff]  ;;  %v17833_v22 = vpop.permute.xlu1 %5592 }
 0x269   : > { %21748 = vst [vmem:[#allocation53_spill] sm:$0xff] %v17813_v63  ;;  %v3049_v16 = vcombine.low %v17684_v12, %v3041_v45  ;;  %v3050_v10 = vcombine.high %v17684_v12, %v3041_v45  ;;  %21749 = vst [vmem:[#allocation54_spill] sm:$0xff] %v17819_v41  ;;  %v5125_v9 = vcombine.low %v2989_v11, %v2996_v27  ;;  %5720 = vrot.lane.b32.xlu1 %v21750_v3, %s15696_s17 }
 0x26a   : > { %v3065_v35 = vcombine.low %v17687_v19, %v3048_v20  ;;  %v3066_v23 = vcombine.high %v17687_v19, %v3048_v20  ;;  %v15478_v38 = vcombine.high %v2989_v11, %v2996_v27  ;;  %v5141_v49 = vcombine.low %v3005_v33, %v3012_v62  ;;  %5682 = vrot.lane.b32.xlu0 %v17649_v57, %s15696_s17 }
 0x26b   : > { %v15479_v17 = vcombine.high %v3005_v33, %v3012_v62  ;;  %v3057_v0 = vrot.slane %v3049_v16, %v16163_v25  ;;  %v3064_v52 = vrot.slane %v3050_v10, %v16163_v25  ;;  %v5132_v19 = vrot.slane %v5125_v9, %v16158_v15  ;;  %v17835_v62 = vpop.permute.xlu0 %5622 }
 0x26c   : > { %v3073_v48 = vrot.slane %v3065_v35, %v16163_v25  ;;  %v3080_v12 = vrot.slane %v3066_v23, %v16163_v25  ;;  %v5140_v8 = vrot.slane %v15478_v38, %v16158_v15  ;;  %v5148_v39 = vrot.slane %v5141_v49, %v16158_v15  ;;  %21751 = vst [vmem:[#allocation55_spill] sm:$0xff] %v17835_v62 }
 0x26d   : > { %v5156_v45 = vrot.slane %v15479_v17, %v16158_v15  ;;  %v5193_v20 = vcombine.low %v3057_v0, %v3064_v52  ;;  %v15480_v11 = vcombine.high %v3057_v0, %v3064_v52  ;;  %5620 = vrot.lane.b32.xlu1 %v17611_v14, %s15696_s17 }
 0x26e   : > { %v5209_v27 = vcombine.low %v3073_v48, %v3080_v12  ;;  %v15481_v33 = vcombine.high %v3073_v48, %v3080_v12  ;;  %v5157_v16 = vcombine.low %v5132_v19, %v5140_v8  ;;  %v5158_v10 = vcombine.high %v5132_v19, %v5140_v8  ;;  %v17849_v12 = vpop.permute.xlu1 %5624  ;;  %5714 = vrot.lane.b32.xlu0 %v17693_v43, %s15696_s17 }
 0x26f   : > { %v5173_v35 = vcombine.low %v5148_v39, %v5156_v45  ;;  %v5174_v23 = vcombine.high %v5148_v39, %v5156_v45  ;;  %v5200_v9 = vrot.slane %v5193_v20, %v16158_v15  ;;  %v5208_v38 = vrot.slane %v15480_v11, %v16158_v15  ;;  %21752 = vst [vmem:[#allocation64_spill] sm:$0xff] %v17849_v12  ;;  %v17851_v20 = vpop.permute.xlu0 %5654 }
 0x270   : > { %v5216_v49 = vrot.slane %v5209_v27, %v16158_v15  ;;  %v5224_v17 = vrot.slane %v15481_v33, %v16158_v15  ;;  %v5165_v3 = vrot.slane %v5157_v16, %v16163_v25  ;;  %v5172_v0 = vrot.slane %v5158_v10, %v16163_v25 }
 0x271   : > { %v5181_v52 = vrot.slane %v5173_v35, %v16163_v25  ;;  %v5188_v48 = vrot.slane %v5174_v23, %v16163_v25  ;;  %v5225_v19 = vcombine.low %v5200_v9, %v5208_v38  ;;  %v5226_v8 = vcombine.high %v5200_v9, %v5208_v38  ;;  %5652 = vrot.lane.b32.xlu1 %v17627_v54, %s15696_s17  ;;  %v21753_v38 = vld [vmem:[#allocation43_spill] sm:$0xff] }
 0x272   : > { %v5241_v39 = vcombine.low %v5216_v49, %v5224_v17  ;;  %v5242_v45 = vcombine.high %v5216_v49, %v5224_v17  ;;  %v2065_v49 = vcombine.low %v21753_v38, %v17681_v28  ;;  %v2066_v17 = vcombine.high %v21753_v38, %v17681_v28 }
 0x273   : > { %v5189_v11 = vcombine.low %v5165_v3, %v5181_v52  ;;  %v5190_v27 = vcombine.high %v5165_v3, %v5181_v52  ;;  %v5191_v33 = vcombine.low %v5172_v0, %v5188_v48  ;;  %v5192_v16 = vcombine.high %v5172_v0, %v5188_v48  ;;  %v17873_v3 = vpop.permute.xlu1 %5656 }
 0x274   : > { %v5233_v10 = vrot.slane %v5225_v19, %v16163_v25  ;;  %v5240_v35 = vrot.slane %v5226_v8, %v16163_v25  ;;  %v5249_v23 = vrot.slane %v5241_v39, %v16163_v25  ;;  %v5256_v9 = vrot.slane %v5242_v45, %v16163_v25  ;;  %v17875_v8 = vpop.permute.xlu0 %5686 }
 0x275   : > { %5426 = vst.msk [vmem:[%s16325_s24 + $0xe0] sm:$0xff] %vm5397_vm1, %v5189_v11  ;;  %5458 = vst.msk [vmem:[%s16325_s24 + $0x1e0] sm:$0xff] %vm5397_vm1, %v5190_v27  ;;  %v2005_v39 = vrot.slane %v1997_v36, %v16158_v15  ;;  %v2012_v45 = vrot.slane %v1998_v31, %v16158_v15  ;;  %v3085_v11 = vcombine.low %v16237_v61, %v17693_v43  ;;  %5684 = vrot.lane.b32.xlu1 %v17681_v28, %s15696_s17  ;;  %v21754_v28 = vld [vmem:[#allocation42_spill] sm:$0xff] }
 0x276   : > { %5490 = vst.msk [vmem:[%s16325_s24 + $0x2e0] sm:$0xff] %vm5397_vm1, %v5191_v33  ;;  %5522 = vst.msk [vmem:[%s16325_s24 + $0x3e0] sm:$0xff] %vm5397_vm1, %v5192_v16  ;;  %v5257_v0 = vcombine.low %v5233_v10, %v5249_v23  ;;  %v5258_v52 = vcombine.high %v5233_v10, %v5249_v23  ;;  %v5259_v48 = vcombine.low %v5240_v35, %v5256_v9  ;;  %5718 = vrot.lane.b32.xlu0 %v21754_v28, %s15696_s17 }
 0x277   : > { %v5260_v19 = vcombine.high %v5240_v35, %v5256_v9  ;;  %v3086_v27 = vcombine.high %v16237_v61, %v17693_v43  ;;  %v2073_v57 = vrot.slane %v2065_v49, %v16158_v15  ;;  %v2080_v42 = vrot.slane %v2066_v17, %v16158_v15  ;;  %v17915_v10 = vpop.permute.xlu1 %5688 }
 0x278   : > { %5427 = vst.msk [vmem:[%s16325_s24 + $0xe8] sm:$0xff] %vm5397_vm1, %v5257_v0  ;;  %5459 = vst.msk [vmem:[%s16325_s24 + $0x1e8] sm:$0xff] %vm5397_vm1, %v5258_v52  ;;  %v2013_v36 = vcombine.low %v17601_v29, %v17719_v7  ;;  %v2014_v61 = vcombine.high %v17601_v29, %v17719_v7  ;;  %v2081_v33 = vcombine.low %v17611_v14, %v17733_v44  ;;  %v17925_v38 = vpop.permute.xlu0 %5594 }
 0x279   : > { %5491 = vst.msk [vmem:[%s16325_s24 + $0x2e8] sm:$0xff] %vm5397_vm1, %v5259_v48  ;;  %5523 = vst.msk [vmem:[%s16325_s24 + $0x3e8] sm:$0xff] %vm5397_vm1, %v5260_v19  ;;  %v2082_v16 = vcombine.high %v17611_v14, %v17733_v44  ;;  %v17918_v35 = vrot.slane %v3085_v11, %v16158_v15  ;;  %v17921_v29 = vrot.slane %v3086_v27, %v16158_v15  ;;  %5716 = vrot.lane.b32.xlu1 %v17717_v51, %s15696_s17  ;;  %v21756_v27 = vld [vmem:[#allocation56_spill] sm:$0xff] }
 0x27a   : > { %v2021_v23 = vrot.slane %v2013_v36, %v16158_v15  ;;  %v2028_v9 = vrot.slane %v2014_v61, %v16158_v15  ;;  %21755 = vst [vmem:[#allocation65_spill] sm:$0xff] %v17925_v38  ;;  %v2089_v49 = vrot.slane %v2081_v33, %v16158_v15  ;;  %5722 = vrot.lane.b32.xlu0 %v21756_v27, %s15696_s17  ;;  %v21836_v38 = vld [vmem:[#allocation28_spill] sm:$0xff] }
 0x27b   : > { %v2096_v17 = vrot.slane %v2082_v16, %v16158_v15  ;;  %v17937_v16 = vpop.permute.xlu1 %5596 }
 0x27c   : > { %v2029_v52 = vcombine.low %v2005_v39, %v2021_v23  ;;  %v2030_v48 = vcombine.high %v2005_v39, %v2021_v23  ;;  %v2045_v19 = vcombine.low %v2012_v45, %v2028_v9  ;;  %v2046_v11 = vcombine.high %v2012_v45, %v2028_v9  ;;  %21757 = vst [vmem:[#allocation66_spill] sm:$0xff] %v17937_v16  ;;  %v17943_v39 = vpop.permute.xlu0 %5626  ;;  %v21759_v9 = vld [vmem:[#allocation57_spill] sm:$0xff] }
 0x27d   : > { %v2097_v36 = vcombine.low %v2073_v57, %v2089_v49  ;;  %v2098_v61 = vcombine.high %v2073_v57, %v2089_v49  ;;  %v2113_v28 = vcombine.low %v2080_v42, %v2096_v17  ;;  %v2114_v33 = vcombine.high %v2080_v42, %v2096_v17  ;;  %21758 = vst [vmem:[#allocation33_spill] sm:$0xff] %v17943_v39 }
 0x27e   : > { %v2037_v31 = vrot.slane %v2029_v52, %v16163_v25  ;;  %v2044_v43 = vrot.slane %v2030_v48, %v16163_v25  ;;  %v2053_v0 = vrot.slane %v2045_v19, %v16163_v25  ;;  %v2060_v14 = vrot.slane %v2046_v11, %v16163_v25  ;;  %5724 = vrot.lane.b32.xlu1 %v21759_v9, %s15696_s17  ;;  %v21760_v19 = vld [vmem:[#allocation67_spill] sm:$0xff] }
 0x27f   : > { %v2105_v45 = vrot.slane %v2097_v36, %v16163_v25  ;;  %v2112_v23 = vrot.slane %v2098_v61, %v16163_v25  ;;  %v2121_v57 = vrot.slane %v2113_v28, %v16163_v25  ;;  %v2128_v42 = vrot.slane %v2114_v33, %v16163_v25  ;;  %5726 = vrot.lane.b32.xlu0 %v21760_v19, %s15696_s17  ;;  %v17953_v12 = vpop.permute.xlu1 %5628 }
 0x280   : > { %v4173_v49 = vcombine.low %v2037_v31, %v2044_v43  ;;  %v15450_v17 = vcombine.high %v2037_v31, %v2044_v43  ;;  %v4189_v52 = vcombine.low %v2053_v0, %v2060_v14  ;;  %v15451_v48 = vcombine.high %v2053_v0, %v2060_v14  ;;  %21761 = vst [vmem:[#allocation34_spill] sm:$0xff] %v17953_v12  ;;  %v17959_v43 = vpop.permute.xlu0 %5658 }
 0x281   : > { %v4241_v11 = vcombine.low %v2105_v45, %v2112_v23  ;;  %v15452_v27 = vcombine.high %v2105_v45, %v2112_v23  ;;  %v4257_v39 = vcombine.low %v2121_v57, %v2128_v42  ;;  %v15453_v36 = vcombine.high %v2121_v57, %v2128_v42  ;;  %v21762_v23 = vld [vmem:[#allocation68_spill] sm:$0xff] }
 0x282   : > { %v4180_v61 = vrot.slane %v4173_v49, %v16158_v15  ;;  %v4188_v28 = vrot.slane %v15450_v17, %v16158_v15  ;;  %v4196_v33 = vrot.slane %v4189_v52, %v16158_v15  ;;  %v4204_v9 = vrot.slane %v15451_v48, %v16158_v15  ;;  %5728 = vrot.lane.b32.xlu1 %v21762_v23, %s15696_s17  ;;  %v21763_v52 = vld [vmem:[#allocation75_spill] sm:$0xff] }
 0x283   : > { %v4248_v31 = vrot.slane %v4241_v11, %v16158_v15  ;;  %v4256_v14 = vrot.slane %v15452_v27, %v16158_v15  ;;  %v4264_v0 = vrot.slane %v4257_v39, %v16158_v15  ;;  %v4272_v45 = vrot.slane %v15453_v36, %v16158_v15  ;;  %5730 = vrot.lane.b32.xlu0 %v21763_v52, %s15696_s17  ;;  %v17969_v62 = vpop.permute.xlu1 %5660 }
 0x284   : > { %v4205_v57 = vcombine.low %v4180_v61, %v4188_v28  ;;  %v4206_v42 = vcombine.high %v4180_v61, %v4188_v28  ;;  %v4221_v49 = vcombine.low %v4196_v33, %v4204_v9  ;;  %v4222_v17 = vcombine.high %v4196_v33, %v4204_v9  ;;  %v17975_v61 = vpop.permute.xlu0 %5690 }
 0x285   : > { %v4273_v48 = vcombine.low %v4248_v31, %v4256_v14  ;;  %v4274_v19 = vcombine.high %v4248_v31, %v4256_v14  ;;  %v4289_v12 = vcombine.low %v4264_v0, %v4272_v45  ;;  %v4290_v11 = vcombine.high %v4264_v0, %v4272_v45  ;;  %v21764_v14 = vld [vmem:[#allocation76_spill] sm:$0xff] }
 0x286   : > { %v4213_v39 = vrot.slane %v4205_v57, %v16163_v25  ;;  %v4220_v27 = vrot.slane %v4206_v42, %v16163_v25  ;;  %v4229_v36 = vrot.slane %v4221_v49, %v16163_v25  ;;  %v4236_v23 = vrot.slane %v4222_v17, %v16163_v25  ;;  %5732 = vrot.lane.b32.xlu1 %v21764_v14, %s15696_s17 }
 0x287   : > { %v4281_v28 = vrot.slane %v4273_v48, %v16163_v25  ;;  %v4288_v33 = vrot.slane %v4274_v19, %v16163_v25  ;;  %v4297_v9 = vrot.slane %v4289_v12, %v16163_v25  ;;  %v4304_v31 = vrot.slane %v4290_v11, %v16163_v25  ;;  %5734 = vrot.lane.b32.xlu0 %v17069_v46, %s15696_s17  ;;  %v17985_v48 = vpop.permute.xlu1 %5692 }
 0x288   : > { %v4237_v0 = vcombine.low %v4213_v39, %v4229_v36  ;;  %v4238_v45 = vcombine.high %v4213_v39, %v4229_v36  ;;  %v4239_v57 = vcombine.low %v4220_v27, %v4236_v23  ;;  %v4240_v42 = vcombine.high %v4220_v27, %v4236_v23  ;;  %v18007_v23 = vpop.permute.xlu0 %5598 }
 0x289   : > { %v4305_v49 = vcombine.low %v4281_v28, %v4297_v9  ;;  %v4306_v17 = vcombine.high %v4281_v28, %v4297_v9  ;;  %v4307_v12 = vcombine.low %v4288_v33, %v4304_v31  ;;  %v4308_v52 = vcombine.high %v4288_v33, %v4304_v31  ;;  %21767 = vst [vmem:[#allocation35_spill] sm:$0xff] %v18007_v23 }
 0x28a   : > { %5412 = vst.msk [vmem:[%s16325_s24 + $0x70] sm:$0xff] %vm5397_vm1, %v4237_v0  ;;  %5444 = vst.msk [vmem:[%s16325_s24 + $0x170] sm:$0xff] %vm5397_vm1, %v4238_v45  ;;  %v21765_v46 = vcombine.low %v17617_v60, %v17735_v13  ;;  %v21766_v11 = vcombine.high %v17617_v60, %v17735_v13  ;;  %v3169_v27 = vcombine.low %v17627_v54, %v17749_v34  ;;  %5736 = vrot.lane.b32.xlu1 %v17103_v32, %s15696_s17 }
 0x28b   : > { %5476 = vst.msk [vmem:[%s16325_s24 + $0x270] sm:$0xff] %vm5397_vm1, %v4239_v57  ;;  %5508 = vst.msk [vmem:[%s16325_s24 + $0x370] sm:$0xff] %vm5397_vm1, %v4240_v42  ;;  %v3170_v36 = vcombine.high %v17627_v54, %v17749_v34  ;;  %5738 = vrot.lane.b32.xlu0 %v17279_v6, %s15696_s17  ;;  %v21768_v9 = vcombine.low %v16248_v21, %v17717_v51  ;;  %v21769_v32 = vcombine.high %v16248_v21, %v17717_v51  ;;  %v18035_v45 = vpop.permute.xlu1 %5600 }
 0x28c   : > { %v3109_v19 = vrot.slane %v21765_v46, %v16158_v15  ;;  %v3116_v39 = vrot.slane %v21766_v11, %v16158_v15  ;;  %5413 = vst.msk [vmem:[%s16325_s24 + $0x78] sm:$0xff] %vm5397_vm1, %v4305_v49  ;;  %5445 = vst.msk [vmem:[%s16325_s24 + $0x178] sm:$0xff] %vm5397_vm1, %v4306_v17  ;;  %v3177_v0 = vrot.slane %v3169_v27, %v16158_v15  ;;  %v18041_v49 = vpop.permute.xlu0 %5630 }
 0x28d   : > { %5477 = vst.msk [vmem:[%s16325_s24 + $0x278] sm:$0xff] %vm5397_vm1, %v4307_v12  ;;  %5509 = vst.msk [vmem:[%s16325_s24 + $0x378] sm:$0xff] %vm5397_vm1, %v4308_v52  ;;  %v3161_v31 = vrot.slane %v21768_v9, %v16158_v15  ;;  %v3168_v14 = vrot.slane %v21769_v32, %v16158_v15 }
 0x28e   : > { %v3117_v60 = vcombine.low %v17918_v35, %v3109_v19  ;;  %v3118_v28 = vcombine.high %v17918_v35, %v3109_v19  ;;  %v3133_v33 = vcombine.low %v17921_v29, %v3116_v39  ;;  %v3134_v54 = vcombine.high %v17921_v29, %v3116_v39  ;;  %21770 = vst [vmem:[#allocation37_spill] sm:$0xff] %v18035_v45  ;;  %v21824_v45 = vld [vmem:[#allocation22_spill] sm:$0xff] }
 0x28f   : > { %v3184_v35 = vrot.slane %v3170_v36, %v16158_v15  ;;  %21771 = vst [vmem:[#allocation38_spill] sm:$0xff] %v18041_v49  ;;  %v3185_v17 = vcombine.low %v3161_v31, %v3177_v0  ;;  %v3186_v12 = vcombine.high %v3161_v31, %v3177_v0  ;;  %5740 = vrot.lane.b32.xlu1 %v17293_v55, %s15696_s17 }
 0x290   : > { %v3125_v29 = vrot.slane %v3117_v60, %v16163_v25  ;;  %v3132_v6 = vrot.slane %v3118_v28, %v16163_v25  ;;  %v3141_v57 = vrot.slane %v3133_v33, %v16163_v25  ;;  %v3148_v42 = vrot.slane %v3134_v54, %v16163_v25  ;;  %5742 = vrot.lane.b32.xlu0 %v17493_v56, %s15696_s17  ;;  %v18051_v28 = vpop.permute.xlu1 %5632  ;;  %v18057_v31 = vpop.permute.xlu0 %5662 }
 0x291   : > { %v3201_v21 = vcombine.low %v3168_v14, %v3184_v35  ;;  %v3202_v51 = vcombine.high %v3168_v14, %v3184_v35  ;;  %v3193_v39 = vrot.slane %v3185_v17, %v16163_v25  ;;  %v3200_v27 = vrot.slane %v3186_v12, %v16163_v25  ;;  %21772 = vst [vmem:[#allocation39_spill] sm:$0xff] %v18051_v28  ;;  %v21813_v28 = vld [vmem:[#allocation14_spill] sm:$0xff] }
 0x292   : > { %v5261_v52 = vcombine.low %v3125_v29, %v3132_v6  ;;  %v15482_v46 = vcombine.high %v3125_v29, %v3132_v6  ;;  %v5277_v19 = vcombine.low %v3141_v57, %v3148_v42  ;;  %v15483_v11 = vcombine.high %v3141_v57, %v3148_v42 }
 0x293   : > { %v3209_v36 = vrot.slane %v3201_v21, %v16163_v25  ;;  %v3216_v60 = vrot.slane %v3202_v51, %v16163_v25  ;;  %v5329_v56 = vcombine.low %v3193_v39, %v3200_v27  ;;  %v15484_v32 = vcombine.high %v3193_v39, %v3200_v27  ;;  %5744 = vrot.lane.b32.xlu1 %v17503_v50, %s15696_s17 }
 0x294   : > { %v5268_v33 = vrot.slane %v5261_v52, %v16158_v15  ;;  %v5276_v55 = vrot.slane %v15482_v46, %v16158_v15  ;;  %v5284_v54 = vrot.slane %v5277_v19, %v16158_v15  ;;  %v5292_v9 = vrot.slane %v15483_v11, %v16158_v15  ;;  %5746 = vrot.lane.b32.xlu0 %v17719_v7, %s15696_s17  ;;  %v18067_v51 = vpop.permute.xlu1 %5664  ;;  %v18073_v11 = vpop.permute.xlu0 %5694 }
 0x295   : > { %v5345_v14 = vcombine.low %v3209_v36, %v3216_v60  ;;  %v15485_v0 = vcombine.high %v3209_v36, %v3216_v60  ;;  %v5336_v42 = vrot.slane %v5329_v56, %v16158_v15  ;;  %v5344_v17 = vrot.slane %v15484_v32, %v16158_v15 }
 0x296   : > { %v5293_v35 = vcombine.low %v5268_v33, %v5276_v55  ;;  %v5294_v29 = vcombine.high %v5268_v33, %v5276_v55  ;;  %v5309_v6 = vcombine.low %v5284_v54, %v5292_v9  ;;  %v5310_v57 = vcombine.high %v5284_v54, %v5292_v9  ;;  %v21773_v9 = vld [vmem:[#allocation45_spill] sm:$0xff] }
 0x297   : > { %v5352_v12 = vrot.slane %v5345_v14, %v16158_v15  ;;  %v5360_v21 = vrot.slane %v15485_v0, %v16158_v15  ;;  %v5361_v7 = vcombine.low %v5336_v42, %v5344_v17  ;;  %v5362_v39 = vcombine.high %v5336_v42, %v5344_v17  ;;  %5748 = vrot.lane.b32.xlu1 %v17733_v44, %s15696_s17  ;;  %v21775_v17 = vld [vmem:[#allocation44_spill] sm:$0xff] }
 0x298   : > { %v5301_v52 = vrot.slane %v5293_v35, %v16163_v25  ;;  %v5308_v50 = vrot.slane %v5294_v29, %v16163_v25  ;;  %v5317_v46 = vrot.slane %v5309_v6, %v16163_v25  ;;  %v5324_v19 = vrot.slane %v5310_v57, %v16163_v25  ;;  %5750 = vrot.lane.b32.xlu0 %v21773_v9, %s15696_s17  ;;  %v18083_v44 = vpop.permute.xlu1 %5696  ;;  %v18093_v35 = vpop.permute.xlu0 %5602 }
 0x299   : > { %v5377_v27 = vcombine.low %v5352_v12, %v5360_v21  ;;  %v5378_v36 = vcombine.high %v5352_v12, %v5360_v21  ;;  %v5369_v56 = vrot.slane %v5361_v7, %v16163_v25  ;;  %v5376_v32 = vrot.slane %v5362_v39, %v16163_v25  ;;  %21774 = vst [vmem:[#allocation40_spill] sm:$0xff] %v18093_v35  ;;  %v21776_v12 = vld [vmem:[#allocation58_spill] sm:$0xff]  ;;  %v21822_v35 = vld [vmem:[#allocation20_spill] sm:$0xff] }
 0x29a   : > { %v5325_v60 = vcombine.low %v5301_v52, %v5317_v46  ;;  %v5326_v33 = vcombine.high %v5301_v52, %v5317_v46  ;;  %v5327_v55 = vcombine.low %v5308_v50, %v5324_v19  ;;  %v5328_v54 = vcombine.high %v5308_v50, %v5324_v19  ;;  %v21779_v50 = vld [vmem:[#allocation59_spill] sm:$0xff]  ;;  %v21780_v46 = vld [vmem:[#allocation69_spill] sm:$0xff]  ;;  %v21782_v39 = vld [vmem:[#allocation70_spill] sm:$0xff] }
 0x29b   : > { %v5385_v14 = vrot.slane %v5377_v27, %v16163_v25  ;;  %v5392_v0 = vrot.slane %v5378_v36, %v16163_v25  ;;  %5752 = vrot.lane.b32.xlu1 %v21775_v17, %s15696_s17  ;;  %v21783_v27 = vld [vmem:[#allocation77_spill] sm:$0xff] }
 0x29c   : > { %5428 = vst.msk [vmem:[%s16325_s24 + $0xf0] sm:$0xff] %vm5397_vm1, %v5325_v60  ;;  %5460 = vst.msk [vmem:[%s16325_s24 + $0x1f0] sm:$0xff] %vm5397_vm1, %v5326_v33  ;;  %5754 = vrot.lane.b32.xlu0 %v21776_v12, %s15696_s17  ;;  %v18107_v21 = vpop.permute.xlu1 %5604  ;;  %v18109_v52 = vpop.permute.xlu0 %5634  ;;  %v21784_v33 = vld [vmem:[#allocation78_spill] sm:$0xff] }
 0x29d   : > { %5492 = vst.msk [vmem:[%s16325_s24 + $0x2f0] sm:$0xff] %vm5397_vm1, %v5327_v55  ;;  %5524 = vst.msk [vmem:[%s16325_s24 + $0x3f0] sm:$0xff] %vm5397_vm1, %v5328_v54  ;;  %v5393_v29 = vcombine.low %v5369_v56, %v5385_v14  ;;  %v5394_v6 = vcombine.high %v5369_v56, %v5385_v14  ;;  %v5395_v57 = vcombine.low %v5376_v32, %v5392_v0  ;;  %v21785_v55 = vld [vmem:[#allocation83_spill] sm:$0xff]  ;;  %v21789_v14 = vld [vmem:[#allocation2_spill] sm:$0xff] }
 0x29e   : > { %v5396_v42 = vcombine.high %v5376_v32, %v5392_v0  ;;  %21777 = vst [vmem:[#allocation41_spill] sm:$0xff] %v18107_v21  ;;  %21778 = vst [vmem:[#allocation43_spill] sm:$0xff] %v18109_v52  ;;  %v367_v0 = vsub.s32 1, %v21789_v14  ;;  %v21812_v52 = vld [vmem:[#allocation12_spill] sm:$0xff] }
 0x29f   : > { %5429 = vst.msk [vmem:[%s16325_s24 + $0xf8] sm:$0xff] %vm5397_vm1, %v5393_v29  ;;  %5461 = vst.msk [vmem:[%s16325_s24 + $0x1f8] sm:$0xff] %vm5397_vm1, %v5394_v6  ;;  %5756 = vrot.lane.b32.xlu1 %v21779_v50, %s15696_s17  ;;  %v21795_v50 = vld [vmem:[#allocation7_spill] sm:$0xff] }
 0x2a0   : > { %5493 = vst.msk [vmem:[%s16325_s24 + $0x2f8] sm:$0xff] %vm5397_vm1, %v5395_v57  ;;  %5525 = vst.msk [vmem:[%s16325_s24 + $0x3f8] sm:$0xff] %vm5397_vm1, %v5396_v42  ;;  %5758 = vrot.lane.b32.xlu0 %v21780_v46, %s15696_s17  ;;  %v18115_v19 = vpop.permute.xlu1 %5636  ;;  %v18117_v7 = vpop.permute.xlu0 %5666  ;;  %v21791_v57 = vld [vmem:[#allocation4_spill] sm:$0xff] }
 0x2a1   : > { %21781 = vst [vmem:[#allocation42_spill] sm:$0xff] %v18115_v19 }
 0x2a3   : > { %5760 = vrot.lane.b32.xlu1 %v21782_v39, %s15696_s17 }
 0x2a4   : > { %5762 = vrot.lane.b32.xlu0 %v21783_v27, %s15696_s17  ;;  %v18123_v36 = vpop.permute.xlu1 %5668  ;;  %v18125_v60 = vpop.permute.xlu0 %5698 }
 0x2a7   : > { %5764 = vrot.lane.b32.xlu1 %v21784_v33, %s15696_s17  ;;  %v21801_v33 = vld [vmem:[#allocation11_spill] sm:$0xff] }
 0x2a8   : > { %5766 = vrot.lane.b32.xlu0 %v21785_v55, %s15696_s17  ;;  %v18131_v54 = vpop.permute.xlu1 %5700  ;;  %v18133_v9 = vpop.permute.xlu0 %5606 }
 0x2a9   : > { %21786 = vst [vmem:[#allocation56_spill] sm:$0xff] %v18133_v9 }
 0x2ab   : > { %5768 = vrot.lane.b32.xlu1 %v17123_v47, %s15696_s17  ;;  %v15667_v47 = vld [vmem:[%s21376_s2] sm:$0x3] }
 0x2ac   : > { %5770 = vrot.lane.b32.xlu0 %v17295_v30, %s15696_s17  ;;  %v18139_v56 = vpop.permute.xlu1 %5608  ;;  %v18141_v32 = vpop.permute.xlu0 %5638  ;;  %v368_v30 = vrot.slane %v15667_v47, %v367_v0  ;;  %v21804_v0 = vld [vmem:[#allocation3_spill] sm:$0xff] }
 0x2ad   : > { %21787 = vst [vmem:[#allocation57_spill] sm:$0xff] %v18139_v56  ;;  %21788 = vst [vmem:[#allocation67_spill] sm:$0xff] %v18141_v32  ;;  %v21809_v32 = vld [vmem:[#allocation13_spill] sm:$0xff] }
 0x2ae   : > { %v18162_v42 = vadd.f32 %v21791_v57, %v368_v30  ;;  %v18190_v55 = vadd.f32 %v21801_v33, %v368_v30  ;;  %v18197_v47 = vadd.f32 %v21804_v0, %v368_v30  ;;  %v21806_v57 = vld [vmem:[#allocation6_spill] sm:$0xff]  ;;  %v18216_v0 = vadd.f32 %v21812_v52, %v368_v30 }
 0x2af   : > { %5772 = vrot.lane.b32.xlu1 %v17341_v58, %s15696_s17  ;;  %v18219_v49 = vadd.f32 %v21813_v28, %v368_v30  ;;  %v18239_v28 = vadd.f32 %v21822_v35, %v368_v30  ;;  %v21829_v35 = vld [vmem:[#allocation24_spill] sm:$0xff] }
 0x2b0   : > { %5774 = vrot.lane.b32.xlu0 %v17509_v59, %s15696_s17  ;;  %v18148_v29 = vpop.permute.xlu1 %5640  ;;  %v18150_v6 = vpop.permute.xlu0 %5670  ;;  %21792 = vst [vmem:[#allocation75_spill] sm:$0xff] %v18162_v42  ;;  %21802 = vst [vmem:[#allocation69_spill] sm:$0xff] %v18190_v55  ;;  %v18258_v16 = vadd.f32 %v21829_v35, %v368_v30  ;;  %v21838_v35 = vld [vmem:[#allocation46_spill] sm:$0xff] }
 0x2b1   : > { %21790 = vst [vmem:[#allocation68_spill] sm:$0xff] %v18148_v29  ;;  %21805 = vst [vmem:[#allocation77_spill] sm:$0xff] %v18197_v47  ;;  %v21808_v29 = vld [vmem:[#allocation10_spill] sm:$0xff] }
 0x2b2   : > { %v18208_v33 = vadd.f32 %v21808_v29, %v368_v30  ;;  %v21817_v29 = vld [vmem:[#allocation17_spill] sm:$0xff]  ;;  %21830 = vst [vmem:[#allocation11_spill] sm:$0xff] %v18258_v16  ;;  %v5978_v16 = vcombine.low %v21838_v35, %v17873_v3 }
 0x2b3   : > { %5776 = vrot.lane.b32.xlu1 %v17519_v37, %s15696_s17  ;;  %v21793_v37 = vld [vmem:[#allocation5_spill] sm:$0xff]  ;;  %v18230_v9 = vadd.f32 %v21817_v29, %v368_v30  ;;  %v21826_v29 = vld [vmem:[#allocation23_spill] sm:$0xff] }
 0x2b4   : > { %5778 = vrot.lane.b32.xlu0 %v17735_v13, %s15696_s17  ;;  %v18159_v58 = vpop.permute.xlu1 %5672  ;;  %v18164_v59 = vpop.permute.xlu0 %5702  ;;  %v18171_v17 = vadd.f32 %v21793_v37, %v368_v30  ;;  %v18176_v13 = vadd.f32 %v21795_v50, %v368_v30  ;;  %v18202_v37 = vadd.f32 %v21806_v57, %v368_v30  ;;  %v21807_v50 = vld [vmem:[#allocation8_spill] sm:$0xff] }
 0x2b5   : > { %21818 = vst [vmem:[#allocation4_spill] sm:$0xff] %v18230_v9 }
 0x2b6   : > { %21794 = vst [vmem:[#allocation76_spill] sm:$0xff] %v18171_v17  ;;  %21796 = vst [vmem:[#allocation45_spill] sm:$0xff] %v18176_v13 }
 0x2b7   : > { %5780 = vrot.lane.b32.xlu1 %v17749_v34, %s15696_s17  ;;  %v21798_v34 = vld [vmem:[#allocation9_spill] sm:$0xff] }
 0x2b8   : > { %10422 = vrot.lane.b32.xlu0 %v18162_v42, %s15693_s14  ;;  %v18173_v12 = vpop.permute.xlu1 %5704  ;;  %v18178_v46 = vpop.permute.xlu0 %5610  ;;  %v18185_v39 = vadd.f32 %v21798_v34, %v368_v30  ;;  %v18205_v34 = vadd.f32 %v21807_v50, %v368_v30 }
 0x2b9   : > { %21797 = vst [vmem:[#allocation44_spill] sm:$0xff] %v18178_v46  ;;  %v21816_v46 = vld [vmem:[#allocation16_spill] sm:$0xff] }
 0x2ba   : > { %21799 = vst [vmem:[#allocation58_spill] sm:$0xff] %v18185_v39  ;;  %v18225_v50 = vadd.f32 %v21816_v46, %v368_v30 }
 0x2bb   : > { %10424 = vrot.lane.b32.xlu1 %v18171_v17, %s15693_s14 }
 0x2bc   : > { %10426 = vrot.lane.b32.xlu0 %v18176_v13, %s15693_s14  ;;  %v18187_v27 = vpop.permute.xlu1 %5612  ;;  %v18192_v14 = vpop.permute.xlu0 %5642 }
 0x2bd   : > { %21800 = vst [vmem:[#allocation59_spill] sm:$0xff] %v18187_v27  ;;  %21803 = vst [vmem:[#allocation70_spill] sm:$0xff] %v18192_v14  ;;  %v18211_v14 = vadd.f32 %v21809_v32, %v368_v30  ;;  %v21814_v27 = vld [vmem:[#allocation15_spill] sm:$0xff]  ;;  %v21819_v32 = vld [vmem:[#allocation18_spill] sm:$0xff] }
 0x2be   : > { %v18222_v57 = vadd.f32 %v21814_v27, %v368_v30  ;;  %v18233_v21 = vadd.f32 %v21819_v32, %v368_v30  ;;  %v21823_v27 = vld [vmem:[#allocation21_spill] sm:$0xff] }
 0x2bf   : > { %10428 = vrot.lane.b32.xlu1 %v18185_v39, %s15693_s14  ;;  %21810 = vst [vmem:[#allocation78_spill] sm:$0xff] %v18211_v14  ;;  %v18244_v46 = vadd.f32 %v21823_v27, %v368_v30  ;;  %v18250_v39 = vadd.f32 %v21826_v29, %v368_v30  ;;  %v21827_v32 = vld [vmem:[#allocation25_spill] sm:$0xff]  ;;  %v722_v27 = vpop.f32.mrf.mxu1 }
 0x2c0   : > { %10430 = vrot.lane.b32.xlu0 %v18190_v55, %s15693_s14  ;;  %v18213_v19 = vpop.permute.xlu1 %5644  ;;  %21815 = vst [vmem:[#allocation2_spill] sm:$0xff] %v18222_v57  ;;  %v18227_v56 = vpop.permute.xlu0 %5674  ;;  %v18247_v55 = vadd.f32 %v21824_v45, %v368_v30  ;;  %v18253_v23 = vadd.f32 %v21827_v32, %v368_v30  ;;  %v21833_v45 = vld [vmem:[#allocation47_spill] sm:$0xff] }
 0x2c1   : > { %21811 = vst [vmem:[#allocation83_spill] sm:$0xff] %v18213_v19  ;;  %v21820_v19 = vld [vmem:[#allocation19_spill] sm:$0xff]  ;;  %v5910_v17 = vcombine.low %v21833_v45, %v17851_v20  ;;  %v5911_v29 = vcombine.high %v21833_v45, %v17851_v20  ;;  %v21841_v20 = vld [vmem:[#allocation30_spill] sm:$0xff] }
 0x2c2   : > { %v18236_v52 = vadd.f32 %v21820_v19, %v368_v30  ;;  %21825 = vst [vmem:[#allocation7_spill] sm:$0xff] %v18247_v55  ;;  %21828 = vst [vmem:[#allocation9_spill] sm:$0xff] %v18253_v23  ;;  %v626_v19 = vpop.f32.mrf.mxu0  ;;  %v21834_v32 = vld [vmem:[#allocation27_spill] sm:$0xff]  ;;  %v21839_v55 = vld [vmem:[#allocation29_spill] sm:$0xff]  ;;  %v18285_v45 = vadd.f32 %v21841_v20, %v368_v30 }
 0x2c3   : > { %10432 = vrot.lane.b32.xlu1 %v18211_v14, %s15693_s14  ;;  %v21831_v14 = vld [vmem:[#allocation26_spill] sm:$0xff]  ;;  %v18270_v63 = vadd.f32 %v21834_v32, %v368_v30  ;;  %v18282_v41 = vadd.f32 %v21839_v55, %v368_v30  ;;  %v18288_v32 = vadd.f32 %v21843_v53, %v368_v30  ;;  %v18306_v53 = vrot.slane %v5910_v17, %v16158_v15  ;;  %v21851_v17 = vld [vmem:[#allocation60_spill] sm:$0xff] }
 0x2c4   : > { %21821 = vst [vmem:[#allocation5_spill] sm:$0xff] %v18236_v52  ;;  %10434 = vrot.lane.b32.xlu0 %v18222_v57, %s15693_s14  ;;  %v18261_v13 = vadd.f32 %v21831_v14, %v368_v30  ;;  %v18267_v42 = vpop.permute.xlu1 %5676  ;;  %v18273_v57 = vadd.f32 %v21836_v38, %v368_v30  ;;  %v5979_v14 = vcombine.high %v21838_v35, %v17873_v3  ;;  %21842 = vst [vmem:[#allocation13_spill] sm:$0xff] %v18285_v45  ;;  %v21848_v35 = vld [vmem:[#allocation49_spill] sm:$0xff] }
 0x2c5   : > { %21835 = vst [vmem:[#allocation6_spill] sm:$0xff] %v18270_v63  ;;  %21840 = vst [vmem:[#allocation10_spill] sm:$0xff] %v18282_v41  ;;  %v18291_v38 = vadd.f32 %v21845_v5, %v368_v30  ;;  %v18297_v3 = vadd.f32 %v722_v27, %v368_v30  ;;  %v6998_v55 = vcombine.low %v21848_v35, %v17875_v8 }
 0x2c6   : > { %21832 = vst [vmem:[#allocation3_spill] sm:$0xff] %v18261_v13  ;;  %21837 = vst [vmem:[#allocation8_spill] sm:$0xff] %v18273_v57  ;;  %v18279_v13 = vpop.permute.xlu0 %5706  ;;  %v18295_v57 = vadd.f32 %v626_v19, %v368_v30  ;;  %v6999_v20 = vcombine.high %v21848_v35, %v17875_v8  ;;  %v18309_v5 = vrot.slane %v5911_v29, %v16158_v15  ;;  %v21850_v19 = vld [vmem:[#allocation48_spill] sm:$0xff] }
 0x2c7   : > { %21844 = vst [vmem:[#allocation12_spill] sm:$0xff] %v18288_v32  ;;  %21846 = vst [vmem:[#allocation14_spill] sm:$0xff] %v18291_v38  ;;  %10436 = vrot.lane.b32.xlu1 %v18230_v9, %s15693_s14  ;;  %v7066_v9 = vcombine.low %v21850_v19, %v17915_v10  ;;  %v7067_v30 = vcombine.high %v21850_v19, %v17915_v10  ;;  %v18321_v8 = vrot.slane %v5979_v14, %v16158_v15  ;;  %v21853_v38 = vld [vmem:[#allocation61_spill] sm:$0xff] }
 0x2c8   : > { %21847 = vst [vmem:[#allocation15_spill] sm:$0xff] %v18297_v3  ;;  %10438 = vrot.lane.b32.xlu0 %v18236_v52, %s15693_s14  ;;  %21849 = vst [vmem:[#allocation16_spill] sm:$0xff] %v18309_v5  ;;  %v18315_v27 = vpop.permute.xlu1 %5708  ;;  %v18318_v3 = vrot.slane %v5978_v16, %v16158_v15  ;;  %v6046_v35 = vcombine.low %v21851_v17, %v17959_v43  ;;  %v6047_v29 = vcombine.high %v21851_v17, %v17959_v43  ;;  %v21854_v16 = vld [vmem:[#allocation62_spill] sm:$0xff]  ;;  %v21857_v17 = vld [vmem:[#allocation63_spill] sm:$0xff] }
 0x2c9   : > { %v6114_v45 = vcombine.low %v21853_v38, %v17969_v62  ;;  %v6115_v10 = vcombine.high %v21853_v38, %v17969_v62  ;;  %v7134_v19 = vcombine.low %v21854_v16, %v17975_v61  ;;  %v7135_v14 = vcombine.high %v21854_v16, %v17975_v61 }
 0x2ca   : > { %v18327_v52 = vpop.permute.xlu0 %5614  ;;  %v18340_v5 = vrot.slane %v6998_v55, %v16158_v15  ;;  %v18343_v43 = vrot.slane %v6999_v20, %v16158_v15  ;;  %v7203_v62 = vcombine.high %v21857_v17, %v17985_v48  ;;  %v18352_v61 = vrot.slane %v7066_v9, %v16158_v15  ;;  %v21860_v55 = vld [vmem:[#allocation71_spill] sm:$0xff]  ;;  %v21862_v9 = vld [vmem:[#allocation72_spill] sm:$0xff] }
 0x2cb   : > { %21852 = vst [vmem:[#allocation17_spill] sm:$0xff] %v18327_v52  ;;  %10440 = vrot.lane.b32.xlu1 %v18244_v46, %s15693_s14  ;;  %v7202_v52 = vcombine.low %v21857_v17, %v17985_v48  ;;  %v18355_v38 = vrot.slane %v7067_v30, %v16158_v15  ;;  %v6182_v16 = vcombine.low %v21860_v55, %v18057_v31 }
 0x2cc   : > { %21855 = vst [vmem:[#allocation18_spill] sm:$0xff] %v18340_v5  ;;  %21856 = vst [vmem:[#allocation19_spill] sm:$0xff] %v18343_v43  ;;  %10442 = vrot.lane.b32.xlu0 %v18250_v39, %s15693_s14  ;;  %v6183_v20 = vcombine.high %v21860_v55, %v18057_v31  ;;  %v18361_v43 = vpop.permute.xlu1 %5616  ;;  %v18364_v5 = vrot.slane %v6046_v35, %v16158_v15  ;;  %v18367_v48 = vrot.slane %v6047_v29, %v16158_v15 }
 0x2cd   : > { %21858 = vst [vmem:[#allocation20_spill] sm:$0xff] %v18352_v61  ;;  %21859 = vst [vmem:[#allocation21_spill] sm:$0xff] %v18355_v38  ;;  %v6250_v17 = vcombine.low %v21862_v9, %v18067_v51  ;;  %v6251_v30 = vcombine.high %v21862_v9, %v18067_v51  ;;  %v18376_v61 = vrot.slane %v6114_v45, %v16158_v15  ;;  %v21868_v45 = vld [vmem:[#allocation73_spill] sm:$0xff] }
 0x2ce   : > { %21861 = vst [vmem:[#allocation22_spill] sm:$0xff] %v18361_v43  ;;  %v18373_v38 = vpop.permute.xlu0 %5646  ;;  %v18379_v31 = vrot.slane %v6115_v10, %v16158_v15  ;;  %v18382_v35 = vrot.slane %v7134_v19, %v16158_v15  ;;  %v18385_v29 = vrot.slane %v7135_v14, %v16158_v15  ;;  %v18390_v55 = vrot.slane %v7202_v52, %v16158_v15  ;;  %v21869_v52 = vld [vmem:[#allocation74_spill] sm:$0xff] }
 0x2cf   : > { %21863 = vst [vmem:[#allocation23_spill] sm:$0xff] %v18373_v38  ;;  %10444 = vrot.lane.b32.xlu1 %v18253_v23, %s15693_s14  ;;  %v18393_v51 = vrot.slane %v7203_v62, %v16158_v15  ;;  %v7270_v9 = vcombine.low %v21868_v45, %v18073_v11  ;;  %v7271_v10 = vcombine.high %v21868_v45, %v18073_v11 }
 0x2d0   : > { %21864 = vst [vmem:[#allocation25_spill] sm:$0xff] %v18382_v35  ;;  %21865 = vst [vmem:[#allocation24_spill] sm:$0xff] %v18385_v29  ;;  %10446 = vrot.lane.b32.xlu0 %v18270_v63, %s15693_s14  ;;  %v18402_v19 = vrot.slane %v6182_v16, %v16158_v15  ;;  %v18405_v14 = vrot.slane %v6183_v20, %v16158_v15  ;;  %v7338_v38 = vcombine.low %v21869_v52, %v18083_v44  ;;  %v21872_v16 = vld [vmem:[#allocation79_spill] sm:$0xff]  ;;  %v21873_v35 = vld [vmem:[#allocation80_spill] sm:$0xff] }
 0x2d1   : > { %21866 = vst [vmem:[#allocation26_spill] sm:$0xff] %v18390_v55  ;;  %21867 = vst [vmem:[#allocation47_spill] sm:$0xff] %v18393_v51  ;;  %v7339_v62 = vcombine.high %v21869_v52, %v18083_v44  ;;  %v18411_v51 = vpop.permute.xlu1 %5648  ;;  %v18414_v55 = vrot.slane %v6250_v17, %v16158_v15  ;;  %v18417_v11 = vrot.slane %v6251_v30, %v16158_v15  ;;  %v21874_v17 = vld [vmem:[#allocation81_spill] sm:$0xff] }
 0x2d2   : > { %21870 = vst [vmem:[#allocation27_spill] sm:$0xff] %v18411_v51  ;;  %v6318_v45 = vcombine.low %v21872_v16, %v18117_v7  ;;  %v6319_v20 = vcombine.high %v21872_v16, %v18117_v7  ;;  %v18423_v29 = vpop.permute.xlu0 %5678  ;;  %v6386_v43 = vcombine.low %v21873_v35, %v18123_v36  ;;  %v6387_v44 = vcombine.high %v21873_v35, %v18123_v36  ;;  %v21877_v16 = vld [vmem:[#allocation82_spill] sm:$0xff] }
 0x2d3   : > { %21871 = vst [vmem:[#allocation28_spill] sm:$0xff] %v18417_v11  ;;  %v7406_v52 = vcombine.low %v21874_v17, %v18125_v60  ;;  %v7407_v30 = vcombine.high %v21874_v17, %v18125_v60  ;;  %10448 = vrot.lane.b32.xlu1 %v18282_v41, %s15693_s14  ;;  %v18436_v51 = vrot.slane %v7270_v9, %v16158_v15  ;;  %v21880_v9 = vld [vmem:[#allocation84_spill] sm:$0xff] }
 0x2d4   : > { %v18439_v7 = vrot.slane %v7271_v10, %v16158_v15  ;;  %v7474_v11 = vcombine.low %v21877_v16, %v18131_v54  ;;  %v7475_v36 = vcombine.high %v21877_v16, %v18131_v54  ;;  %10450 = vrot.lane.b32.xlu0 %v18288_v32, %s15693_s14  ;;  %v18448_v60 = vrot.slane %v7338_v38, %v16158_v15  ;;  %v21881_v38 = vld [vmem:[#allocation85_spill] sm:$0xff] }
 0x2d5   : > { %21875 = vst [vmem:[#allocation46_spill] sm:$0xff] %v18436_v51  ;;  %v18451_v35 = vrot.slane %v7339_v62, %v16158_v15  ;;  %v6454_v17 = vcombine.low %v21880_v9, %v18150_v6  ;;  %v6455_v10 = vcombine.high %v21880_v9, %v18150_v6  ;;  %v18460_v51 = vrot.slane %v6318_v45, %v16158_v15 }
 0x2d6   : > { %21876 = vst [vmem:[#allocation29_spill] sm:$0xff] %v18439_v7  ;;  %21878 = vst [vmem:[#allocation30_spill] sm:$0xff] %v18448_v60  ;;  %v18457_v7 = vpop.permute.xlu1 %5680  ;;  %v18463_v54 = vrot.slane %v6319_v20, %v16158_v15  ;;  %v6522_v16 = vcombine.low %v21881_v38, %v18159_v58  ;;  %v6523_v62 = vcombine.high %v21881_v38, %v18159_v58 }
 0x2d7   : > { %21879 = vst [vmem:[#allocation31_spill] sm:$0xff] %v18451_v35  ;;  %v18469_v35 = vpop.permute.xlu0 %5710  ;;  %v18472_v60 = vrot.slane %v6386_v43, %v16158_v15  ;;  %v18475_v6 = vrot.slane %v6387_v44, %v16158_v15  ;;  %v18478_v45 = vrot.slane %v7406_v52, %v16158_v15  ;;  %v18481_v20 = vrot.slane %v7407_v30, %v16158_v15  ;;  %v21886_v43 = vld [vmem:[#allocation86_spill] sm:$0xff] }
 0x2d8   : > { %10452 = vrot.lane.b32.xlu1 %v18295_v57, %s15693_s14  ;;  %v18486_v9 = vrot.slane %v7474_v11, %v16158_v15  ;;  %v18489_v58 = vrot.slane %v7475_v36, %v16158_v15  ;;  %v7542_v38 = vcombine.low %v21886_v43, %v18164_v59  ;;  %v7543_v44 = vcombine.high %v21886_v43, %v18164_v59  ;;  %v21887_v11 = vld [vmem:[#allocation87_spill] sm:$0xff] }
 0x2d9   : > { %21882 = vst [vmem:[#allocation36_spill] sm:$0xff] %v18478_v45  ;;  %21883 = vst [vmem:[#allocation49_spill] sm:$0xff] %v18481_v20  ;;  %10454 = vrot.lane.b32.xlu0 %v18197_v47, %s15693_s14  ;;  %v18498_v52 = vrot.slane %v6454_v17, %v16158_v15  ;;  %v18501_v30 = vrot.slane %v6455_v10, %v16158_v15  ;;  %v7611_v36 = vcombine.high %v21887_v11, %v18173_v12 }
 0x2da   : > { %21884 = vst [vmem:[#allocation48_spill] sm:$0xff] %v18486_v9  ;;  %21885 = vst [vmem:[#allocation60_spill] sm:$0xff] %v18489_v58  ;;  %v7610_v9 = vcombine.low %v21887_v11, %v18173_v12  ;;  %v18507_v58 = vpop.permute.xlu1 %5712  ;;  %v18510_v20 = vrot.slane %v6522_v16, %v16158_v15  ;;  %v18513_v59 = vrot.slane %v6523_v62, %v16158_v15 }
 0x2db   : > { %v6590_v17 = vcombine.low %v17347_v18, %v18227_v56  ;;  %v6591_v10 = vcombine.high %v17347_v18, %v18227_v56  ;;  %v18519_v43 = vpop.permute.xlu0 %5618  ;;  %v6658_v45 = vcombine.low %v17361_v26, %v18267_v42  ;;  %v6659_v12 = vcombine.high %v17361_v26, %v18267_v42 }
 0x2dc   : > { %21888 = vst [vmem:[#allocation61_spill] sm:$0xff] %v18519_v43  ;;  %v7678_v16 = vcombine.low %v17363_v4, %v18279_v13  ;;  %v7679_v62 = vcombine.high %v17363_v4, %v18279_v13  ;;  %10456 = vrot.lane.b32.xlu1 %v18202_v37, %s15693_s14  ;;  %v18532_v11 = vrot.slane %v7542_v38, %v16158_v15 }
 0x2dd   : > { %v18535_v18 = vrot.slane %v7543_v44, %v16158_v15  ;;  %v7746_v56 = vcombine.low %v17377_v24, %v18315_v27  ;;  %v7747_v26 = vcombine.high %v17377_v24, %v18315_v27  ;;  %10458 = vrot.lane.b32.xlu0 %v18205_v34, %s15693_s14  ;;  %v18544_v4 = vrot.slane %v7610_v9, %v16158_v15 }
 0x2de   : > { %21889 = vst [vmem:[#allocation62_spill] sm:$0xff] %v18532_v11  ;;  %v18547_v42 = vrot.slane %v7611_v36, %v16158_v15  ;;  %v6726_v13 = vcombine.low %v17541_v40, %v18423_v29  ;;  %v6727_v38 = vcombine.high %v17541_v40, %v18423_v29  ;;  %v5721_v44 = vpop.permute.xlu1 %5720  ;;  %v18557_v24 = vrot.slane %v6591_v10, %v16158_v15 }
 0x2df   : > { %21890 = vst [vmem:[#allocation63_spill] sm:$0xff] %v18535_v18  ;;  %21891 = vst [vmem:[#allocation71_spill] sm:$0xff] %v18544_v4  ;;  %v18554_v18 = vrot.slane %v6590_v17, %v16158_v15  ;;  %v5994_v27 = vcombine.low %v17833_v22, %v5721_v44  ;;  %v5995_v9 = vcombine.high %v17833_v22, %v5721_v44  ;;  %v18561_v4 = vpop.permute.xlu0 %5650 }
 0x2e0   : > { %21892 = vst [vmem:[#allocation72_spill] sm:$0xff] %v18547_v42  ;;  %21893 = vst [vmem:[#allocation73_spill] sm:$0xff] %v18561_v4  ;;  %v18564_v36 = vrot.slane %v6658_v45, %v16158_v15  ;;  %v18567_v42 = vrot.slane %v6659_v12, %v16158_v15  ;;  %v18570_v40 = vrot.slane %v7678_v16, %v16158_v15  ;;  %10460 = vrot.lane.b32.xlu1 %v18208_v33, %s15693_s14 }
 0x2e1   : > { %v18573_v29 = vrot.slane %v7679_v62, %v16158_v15  ;;  %v18578_v17 = vrot.slane %v7746_v56, %v16158_v15  ;;  %v18581_v22 = vrot.slane %v7747_v26, %v16158_v15  ;;  %v6002_v45 = vrot.slane %v5994_v27, %v16158_v15  ;;  %10462 = vrot.lane.b32.xlu0 %v18216_v0, %s15693_s14 }
 0x2e2   : > { %21894 = vst [vmem:[#allocation74_spill] sm:$0xff] %v18564_v36  ;;  %21895 = vst [vmem:[#allocation79_spill] sm:$0xff] %v18567_v42  ;;  %v6009_v10 = vrot.slane %v5995_v9, %v16158_v15  ;;  %v18588_v12 = vrot.slane %v6726_v13, %v16158_v15  ;;  %v18591_v16 = vrot.slane %v6727_v38, %v16158_v15  ;;  %v18597_v26 = vpop.permute.xlu1 %5620  ;;  %v21903_v38 = vld [vmem:[#allocation50_spill] sm:$0xff]  ;;  %v21934_v42 = vld [vmem:[#allocation45_spill] sm:$0xff] }
 0x2e3   : > { %21896 = vst [vmem:[#allocation80_spill] sm:$0xff] %v18570_v40  ;;  %21897 = vst [vmem:[#allocation81_spill] sm:$0xff] %v18573_v29  ;;  %v6794_v62 = vcombine.low %v17575_v1, %v18457_v7  ;;  %v6795_v56 = vcombine.high %v17575_v1, %v18457_v7  ;;  %v6010_v44 = vcombine.low %v18318_v3, %v6002_v45  ;;  %v5683_v4 = vpop.permute.xlu0 %5682  ;;  %v21904_v29 = vld [vmem:[#allocation32_spill] sm:$0xff] }
 0x2e4   : > { %21898 = vst [vmem:[#allocation82_spill] sm:$0xff] %v18578_v17  ;;  %21899 = vst [vmem:[#allocation84_spill] sm:$0xff] %v18581_v22  ;;  %v6011_v27 = vcombine.high %v18318_v3, %v6002_v45  ;;  %v6026_v9 = vcombine.low %v18321_v8, %v6009_v10  ;;  %v6027_v13 = vcombine.high %v18321_v8, %v6009_v10  ;;  %10464 = vrot.lane.b32.xlu1 %v18219_v49, %s15693_s14 }
 0x2e5   : > { %21900 = vst [vmem:[#allocation85_spill] sm:$0xff] %v18588_v12  ;;  %21901 = vst [vmem:[#allocation86_spill] sm:$0xff] %v18591_v16  ;;  %v7814_v22 = vcombine.low %v21903_v38, %v18469_v35  ;;  %v7815_v17 = vcombine.high %v21903_v38, %v18469_v35  ;;  %v7882_v1 = vcombine.low %v21904_v29, %v18507_v58  ;;  %10466 = vrot.lane.b32.xlu0 %v18225_v50, %s15693_s14 }
 0x2e6   : > { %21902 = vst [vmem:[#allocation87_spill] sm:$0xff] %v18597_v26  ;;  %v7883_v7 = vcombine.high %v21904_v29, %v18507_v58  ;;  %v6018_v3 = vrot.slane %v6010_v44, %v16163_v25  ;;  %v6025_v8 = vrot.slane %v6011_v27, %v16163_v25  ;;  %v6034_v45 = vrot.slane %v6026_v9, %v16163_v25  ;;  %v18627_v44 = vpop.permute.xlu1 %5652 }
 0x2e7   : > { %v6041_v10 = vrot.slane %v6027_v13, %v16163_v25  ;;  %v18620_v35 = vrot.slane %v6794_v62, %v16158_v15  ;;  %v18623_v38 = vrot.slane %v6795_v56, %v16158_v15  ;;  %v6862_v58 = vcombine.low %v17751_v2, %v5683_v4  ;;  %21907 = vst [vmem:[#allocation88_spill] sm:$0xff] %v18627_v44  ;;  %v5715_v13 = vpop.permute.xlu0 %5714 }
 0x2e8   : > { %v6863_v29 = vcombine.high %v17751_v2, %v5683_v4  ;;  %v8154_v27 = vcombine.low %v6018_v3, %v6025_v8  ;;  %v15488_v40 = vcombine.high %v6018_v3, %v6025_v8  ;;  %v18630_v26 = vrot.slane %v7814_v22, %v16158_v15  ;;  %10468 = vrot.lane.b32.xlu1 %v18233_v21, %s15693_s14 }
 0x2e9   : > { %21905 = vst [vmem:[#allocation50_spill] sm:$0xff] %v18620_v35  ;;  %21906 = vst [vmem:[#allocation32_spill] sm:$0xff] %v18623_v38  ;;  %v8170_v9 = vcombine.low %v6034_v45, %v6041_v10  ;;  %v15489_v11 = vcombine.high %v6034_v45, %v6041_v10  ;;  %v18633_v62 = vrot.slane %v7815_v17, %v16158_v15  ;;  %10470 = vrot.lane.b32.xlu0 %v18239_v28, %s15693_s14 }
 0x2ea   : > { %21908 = vst [vmem:[#allocation89_spill] sm:$0xff] %v18630_v26  ;;  %v18636_v56 = vrot.slane %v7882_v1, %v16158_v15  ;;  %v18639_v38 = vrot.slane %v7883_v7, %v16158_v15  ;;  %v8161_v2 = vrot.slane %v8154_v27, %v16158_v15  ;;  %v8169_v4 = vrot.slane %v15488_v40, %v16158_v15  ;;  %v21914_v7 = vld [vmem:[#allocation52_spill] sm:$0xff]  ;;  %v5685_v10 = vpop.permute.xlu1 %5684 }
 0x2eb   : > { %21909 = vst [vmem:[#allocation90_spill] sm:$0xff] %v18633_v62  ;;  %v8177_v3 = vrot.slane %v8170_v9, %v16158_v15  ;;  %v8185_v22 = vrot.slane %v15489_v11, %v16158_v15  ;;  %v18650_v17 = vrot.slane %v6862_v58, %v16158_v15  ;;  %v18653_v1 = vrot.slane %v6863_v29, %v16158_v15  ;;  %v5719_v11 = vpop.permute.xlu0 %5718  ;;  %v21916_v58 = vld [vmem:[#allocation54_spill] sm:$0xff] }
 0x2ec   : > { %21910 = vst [vmem:[#allocation91_spill] sm:$0xff] %v18636_v56  ;;  %21911 = vst [vmem:[#allocation92_spill] sm:$0xff] %v18639_v38  ;;  %v7950_v8 = vcombine.low %v21914_v7, %v5715_v13  ;;  %v7951_v45 = vcombine.high %v21914_v7, %v5715_v13  ;;  %v8186_v40 = vcombine.low %v8161_v2, %v8169_v4  ;;  %v21915_v56 = vld [vmem:[#allocation51_spill] sm:$0xff] }
 0x2ed   : > { %21912 = vst [vmem:[#allocation93_spill] sm:$0xff] %v18650_v17  ;;  %21913 = vst [vmem:[#allocation94_spill] sm:$0xff] %v18653_v1  ;;  %v8187_v27 = vcombine.high %v8161_v2, %v8169_v4  ;;  %v8202_v9 = vcombine.low %v8177_v3, %v8185_v22  ;;  %v8203_v38 = vcombine.high %v8177_v3, %v8185_v22  ;;  %v21917_v1 = vld [vmem:[#allocation7_spill] sm:$0xff] }
 0x2ee   : > { %v6930_v44 = vcombine.low %v21915_v56, %v5685_v10  ;;  %v6931_v62 = vcombine.high %v21915_v56, %v5685_v10  ;;  %v5926_v26 = vcombine.low %v21916_v58, %v5719_v11  ;;  %v5927_v29 = vcombine.high %v21916_v58, %v5719_v11  ;;  %10472 = vrot.lane.b32.xlu1 %v21917_v1, %s15693_s14  ;;  %v21918_v3 = vld [vmem:[#allocation11_spill] sm:$0xff] }
 0x2ef   : > { %v8194_v13 = vrot.slane %v8186_v40, %v16163_v25  ;;  %v8201_v7 = vrot.slane %v8187_v27, %v16163_v25  ;;  %v8210_v2 = vrot.slane %v8202_v9, %v16163_v25  ;;  %v8217_v4 = vrot.slane %v8203_v38, %v16163_v25  ;;  %10474 = vrot.lane.b32.xlu0 %v21918_v3, %s15693_s14  ;;  %v5723_v58 = vpop.permute.xlu0 %5722 }
 0x2f0   : > { %v18676_v56 = vrot.slane %v7950_v8, %v16158_v15  ;;  %v18679_v22 = vrot.slane %v7951_v45, %v16158_v15  ;;  %v5934_v10 = vrot.slane %v5926_v26, %v16158_v15  ;;  %v5941_v38 = vrot.slane %v5927_v29, %v16158_v15  ;;  %v21923_v26 = vld [vmem:[#allocation3_spill] sm:$0xff] }
 0x2f1   : > { %v8218_v40 = vcombine.low %v8194_v13, %v8210_v2  ;;  %v8219_v27 = vcombine.high %v8194_v13, %v8210_v2  ;;  %v8220_v9 = vcombine.low %v8201_v7, %v8217_v4  ;;  %v8221_v11 = vcombine.high %v8201_v7, %v8217_v4  ;;  %v21926_v13 = vld [vmem:[#allocation65_spill] sm:$0xff]  ;;  %v21927_v4 = vld [vmem:[#allocation8_spill] sm:$0xff] }
 0x2f2   : > { %21919 = vst [vmem:[#allocation52_spill] sm:$0xff] %v18676_v56  ;;  %21920 = vst [vmem:[#allocation51_spill] sm:$0xff] %v18679_v22  ;;  %v5942_v17 = vcombine.low %v18306_v53, %v5934_v10  ;;  %v5943_v8 = vcombine.high %v18306_v53, %v5934_v10  ;;  %v21921_v56 = vld [vmem:[#allocation16_spill] sm:$0xff]  ;;  %v18687_v22 = vpop.permute.xlu1 %5716  ;;  %10476 = vrot.lane.b32.xlu1 %v21923_v26, %s15693_s14  ;;  %v18700_v29 = vrot.slane %v6930_v44, %v16158_v15 }
 0x2f3   : > { %v5958_v35 = vcombine.low %v21921_v56, %v5941_v38  ;;  %v5959_v45 = vcombine.high %v21921_v56, %v5941_v38  ;;  %21922 = vst [vmem:[#allocation54_spill] sm:$0xff] %v18687_v22  ;;  %10263 = vst.msk [vmem:[%s18673_s29 + $0x8] sm:$0xff] %vm5397_vm1, %v8218_v40  ;;  %v18703_v53 = vrot.slane %v6931_v62, %v16158_v15  ;;  %10478 = vrot.lane.b32.xlu0 %v21927_v4, %s15693_s14  ;;  %v21930_v62 = vld [vmem:[#allocation14_spill] sm:$0xff] }
 0x2f4   : > { %10295 = vst.msk [vmem:[%s18673_s29 + $0x108] sm:$0xff] %vm5397_vm1, %v8219_v27  ;;  %10327 = vst.msk [vmem:[%s18673_s29 + $0x208] sm:$0xff] %vm5397_vm1, %v8220_v9  ;;  %v6062_v7 = vcombine.low %v21926_v13, %v5723_v58  ;;  %v6063_v2 = vcombine.high %v21926_v13, %v5723_v58  ;;  %v5950_v56 = vrot.slane %v5942_v17, %v16163_v25 }
 0x2f5   : > { %10359 = vst.msk [vmem:[%s18673_s29 + $0x308] sm:$0xff] %vm5397_vm1, %v8221_v11  ;;  %21924 = vst [vmem:[#allocation16_spill] sm:$0xff] %v18700_v29  ;;  %v5957_v10 = vrot.slane %v5943_v8, %v16163_v25  ;;  %v5966_v38 = vrot.slane %v5958_v35, %v16163_v25  ;;  %v5973_v40 = vrot.slane %v5959_v45, %v16163_v25  ;;  %v21929_v8 = vld [vmem:[#allocation13_spill] sm:$0xff] }
 0x2f6   : > { %21925 = vst [vmem:[#allocation95_spill] sm:$0xff] %v18703_v53  ;;  %v6070_v9 = vrot.slane %v6062_v7, %v16158_v15  ;;  %v6077_v11 = vrot.slane %v6063_v2, %v16158_v15  ;;  %10480 = vrot.lane.b32.xlu1 %v21929_v8, %s15693_s14 }
 0x2f7   : > { %v8086_v58 = vcombine.low %v5950_v56, %v5957_v10  ;;  %v15486_v13 = vcombine.high %v5950_v56, %v5957_v10  ;;  %v8102_v53 = vcombine.low %v5966_v38, %v5973_v40  ;;  %v15487_v17 = vcombine.high %v5966_v38, %v5973_v40  ;;  %10482 = vrot.lane.b32.xlu0 %v21930_v62, %s15693_s14 }
 0x2f8   : > { %v6078_v35 = vcombine.low %v18364_v5, %v6070_v9  ;;  %v6079_v45 = vcombine.high %v18364_v5, %v6070_v9  ;;  %v6094_v27 = vcombine.low %v18367_v48, %v6077_v11  ;;  %v6095_v29 = vcombine.high %v18367_v48, %v6077_v11 }
 0x2f9   : > { %v8093_v7 = vrot.slane %v8086_v58, %v16158_v15  ;;  %v8101_v2 = vrot.slane %v15486_v13, %v16158_v15  ;;  %v8109_v56 = vrot.slane %v8102_v53, %v16158_v15  ;;  %v8117_v10 = vrot.slane %v15487_v17, %v16158_v15  ;;  %v21931_v58 = vld [vmem:[#allocation15_spill] sm:$0xff] }
 0x2fa   : > { %v6086_v38 = vrot.slane %v6078_v35, %v16163_v25  ;;  %v6093_v40 = vrot.slane %v6079_v45, %v16163_v25  ;;  %v6102_v5 = vrot.slane %v6094_v27, %v16163_v25  ;;  %v6109_v9 = vrot.slane %v6095_v29, %v16163_v25  ;;  %10484 = vrot.lane.b32.xlu1 %v21931_v58, %s15693_s14  ;;  %v21932_v17 = vld [vmem:[#allocation75_spill] sm:$0xff] }
 0x2fb   : > { %v8118_v48 = vcombine.low %v8093_v7, %v8101_v2  ;;  %v8119_v11 = vcombine.high %v8093_v7, %v8101_v2  ;;  %v8134_v22 = vcombine.low %v8109_v56, %v8117_v10  ;;  %v8135_v44 = vcombine.high %v8109_v56, %v8117_v10  ;;  %10518 = vrot.lane.b32.xlu0 %v21932_v17, %s15694_s15 }
 0x2fc   : > { %v8222_v13 = vcombine.low %v6086_v38, %v6093_v40  ;;  %v15490_v43 = vcombine.high %v6086_v38, %v6093_v40  ;;  %v8238_v53 = vcombine.low %v6102_v5, %v6109_v9  ;;  %v15491_v16 = vcombine.high %v6102_v5, %v6109_v9  ;;  %v5725_v38 = vpop.permute.xlu1 %5724  ;;  %v5727_v40 = vpop.permute.xlu0 %5726 }
 0x2fd   : > { %v8126_v35 = vrot.slane %v8118_v48, %v16163_v25  ;;  %v8133_v27 = vrot.slane %v8119_v11, %v16163_v25  ;;  %v8142_v29 = vrot.slane %v8134_v22, %v16163_v25  ;;  %v8149_v45 = vrot.slane %v8135_v44, %v16163_v25  ;;  %v21933_v44 = vld [vmem:[#allocation76_spill] sm:$0xff] }
 0x2fe   : > { %v8229_v7 = vrot.slane %v8222_v13, %v16158_v15  ;;  %v8237_v2 = vrot.slane %v15490_v43, %v16158_v15  ;;  %v8245_v56 = vrot.slane %v8238_v53, %v16158_v15  ;;  %v8253_v10 = vrot.slane %v15491_v16, %v16158_v15  ;;  %10520 = vrot.lane.b32.xlu1 %v21933_v44, %s15694_s15  ;;  %v21935_v16 = vld [vmem:[#allocation66_spill] sm:$0xff] }
 0x2ff   : > { %v8150_v5 = vcombine.low %v8126_v35, %v8142_v29  ;;  %v8151_v9 = vcombine.high %v8126_v35, %v8142_v29  ;;  %v8152_v48 = vcombine.low %v8133_v27, %v8149_v45  ;;  %v8153_v22 = vcombine.high %v8133_v27, %v8149_v45  ;;  %10522 = vrot.lane.b32.xlu0 %v21934_v42, %s15694_s15  ;;  %v21936_v27 = vld [vmem:[#allocation35_spill] sm:$0xff] }
 0x300   : > { %v8254_v11 = vcombine.low %v8229_v7, %v8237_v2  ;;  %v8255_v13 = vcombine.high %v8229_v7, %v8237_v2  ;;  %v8270_v12 = vcombine.low %v8245_v56, %v8253_v10  ;;  %v8271_v43 = vcombine.high %v8245_v56, %v8253_v10  ;;  %v5731_v36 = vpop.permute.xlu0 %5730 }
 0x301   : > { %10262 = vst.msk [vmem:[%s18673_s29] sm:$0xff] %vm5397_vm1, %v8150_v5  ;;  %10294 = vst.msk [vmem:[%s18673_s29 + $0x100] sm:$0xff] %vm5397_vm1, %v8151_v9  ;;  %v6130_v53 = vcombine.low %v21935_v16, %v5725_v38  ;;  %v6131_v35 = vcombine.high %v21935_v16, %v5725_v38  ;;  %v6198_v29 = vcombine.low %v21936_v27, %v5727_v40 }
 0x302   : > { %10326 = vst.msk [vmem:[%s18673_s29 + $0x200] sm:$0xff] %vm5397_vm1, %v8152_v48  ;;  %10358 = vst.msk [vmem:[%s18673_s29 + $0x300] sm:$0xff] %vm5397_vm1, %v8153_v22  ;;  %v6199_v45 = vcombine.high %v21936_v27, %v5727_v40  ;;  %v8262_v7 = vrot.slane %v8254_v11, %v16163_v25  ;;  %v8269_v2 = vrot.slane %v8255_v13, %v16163_v25  ;;  %v21937_v48 = vld [vmem:[#allocation58_spill] sm:$0xff] }
 0x303   : > { %v8278_v56 = vrot.slane %v8270_v12, %v16163_v25  ;;  %v8285_v10 = vrot.slane %v8271_v43, %v16163_v25  ;;  %v6138_v5 = vrot.slane %v6130_v53, %v16158_v15  ;;  %v6145_v9 = vrot.slane %v6131_v35, %v16158_v15  ;;  %10524 = vrot.lane.b32.xlu1 %v21937_v48, %s15694_s15  ;;  %v21938_v43 = vld [vmem:[#allocation69_spill] sm:$0xff] }
 0x304   : > { %v6206_v38 = vrot.slane %v6198_v29, %v16158_v15  ;;  %v6213_v40 = vrot.slane %v6199_v45, %v16158_v15  ;;  %10526 = vrot.lane.b32.xlu0 %v21938_v43, %s15694_s15 }
 0x305   : > { %v8286_v22 = vcombine.low %v8262_v7, %v8278_v56  ;;  %v8287_v11 = vcombine.high %v8262_v7, %v8278_v56  ;;  %v8288_v12 = vcombine.low %v8269_v2, %v8285_v10  ;;  %v8289_v13 = vcombine.high %v8269_v2, %v8285_v10 }
 0x306   : > { %v6146_v16 = vcombine.low %v18376_v61, %v6138_v5  ;;  %v6147_v53 = vcombine.high %v18376_v61, %v6138_v5  ;;  %v6162_v35 = vcombine.low %v18379_v31, %v6145_v9  ;;  %v6163_v27 = vcombine.high %v18379_v31, %v6145_v9  ;;  %v21939_v5 = vld [vmem:[#allocation78_spill] sm:$0xff] }
 0x307   : > { %10264 = vst.msk [vmem:[%s18673_s29 + $0x10] sm:$0xff] %vm5397_vm1, %v8286_v22  ;;  %10296 = vst.msk [vmem:[%s18673_s29 + $0x110] sm:$0xff] %vm5397_vm1, %v8287_v11  ;;  %v6214_v29 = vcombine.low %v18402_v19, %v6206_v38  ;;  %v6215_v45 = vcombine.high %v18402_v19, %v6206_v38  ;;  %v6230_v7 = vcombine.low %v18405_v14, %v6213_v40  ;;  %10528 = vrot.lane.b32.xlu1 %v21939_v5, %s15694_s15 }
 0x308   : > { %10328 = vst.msk [vmem:[%s18673_s29 + $0x210] sm:$0xff] %vm5397_vm1, %v8288_v12  ;;  %10360 = vst.msk [vmem:[%s18673_s29 + $0x310] sm:$0xff] %vm5397_vm1, %v8289_v13  ;;  %v6231_v61 = vcombine.high %v18405_v14, %v6213_v40  ;;  %v6154_v2 = vrot.slane %v6146_v16, %v16163_v25  ;;  %v6161_v31 = vrot.slane %v6147_v53, %v16163_v25  ;;  %v21940_v14 = vld [vmem:[#allocation2_spill] sm:$0xff] }
 0x309   : > { %v6170_v56 = vrot.slane %v6162_v35, %v16163_v25  ;;  %v6177_v10 = vrot.slane %v6163_v27, %v16163_v25  ;;  %v6222_v9 = vrot.slane %v6214_v29, %v16163_v25  ;;  %v6229_v22 = vrot.slane %v6215_v45, %v16163_v25  ;;  %10530 = vrot.lane.b32.xlu0 %v21940_v14, %s15694_s15  ;;  %v21941_v14 = vld [vmem:[#allocation4_spill] sm:$0xff] }
 0x30a   : > { %v6238_v19 = vrot.slane %v6230_v7, %v16163_v25  ;;  %v6245_v38 = vrot.slane %v6231_v61, %v16163_v25  ;;  %v8290_v40 = vcombine.low %v6154_v2, %v6161_v31  ;;  %v15492_v11 = vcombine.high %v6154_v2, %v6161_v31  ;;  %v5729_v61 = vpop.permute.xlu1 %5728 }
 0x30b   : > { %v8306_v12 = vcombine.low %v6170_v56, %v6177_v10  ;;  %v15493_v13 = vcombine.high %v6170_v56, %v6177_v10  ;;  %v8358_v16 = vcombine.low %v6222_v9, %v6229_v22  ;;  %v15494_v53 = vcombine.high %v6222_v9, %v6229_v22  ;;  %10532 = vrot.lane.b32.xlu1 %v21941_v14, %s15694_s15  ;;  %v21942_v9 = vld [vmem:[#allocation5_spill] sm:$0xff] }
 0x30c   : > { %v8374_v35 = vcombine.low %v6238_v19, %v6245_v38  ;;  %v15495_v27 = vcombine.high %v6238_v19, %v6245_v38  ;;  %v8297_v5 = vrot.slane %v8290_v40, %v16158_v15  ;;  %v8305_v29 = vrot.slane %v15492_v11, %v16158_v15 }
 0x30d   : > { %v8313_v45 = vrot.slane %v8306_v12, %v16158_v15  ;;  %v8321_v7 = vrot.slane %v15493_v13, %v16158_v15  ;;  %v8365_v2 = vrot.slane %v8358_v16, %v16158_v15  ;;  %v8373_v31 = vrot.slane %v15494_v53, %v16158_v15  ;;  %10534 = vrot.lane.b32.xlu0 %v21942_v9, %s15694_s15 }
 0x30e   : > { %v8381_v56 = vrot.slane %v8374_v35, %v16158_v15  ;;  %v8389_v10 = vrot.slane %v15495_v27, %v16158_v15  ;;  %v8322_v22 = vcombine.low %v8297_v5, %v8305_v29  ;;  %v8323_v19 = vcombine.high %v8297_v5, %v8305_v29 }
 0x30f   : > { %v8338_v38 = vcombine.low %v8313_v45, %v8321_v7  ;;  %v8339_v40 = vcombine.high %v8313_v45, %v8321_v7  ;;  %v8390_v11 = vcombine.low %v8365_v2, %v8373_v31  ;;  %v8391_v12 = vcombine.high %v8365_v2, %v8373_v31  ;;  %10536 = vrot.lane.b32.xlu1 %v18244_v46, %s15694_s15 }
 0x310   : > { %v8406_v13 = vcombine.low %v8381_v56, %v8389_v10  ;;  %v8407_v43 = vcombine.high %v8381_v56, %v8389_v10  ;;  %v8330_v14 = vrot.slane %v8322_v22, %v16163_v25  ;;  %v8337_v16 = vrot.slane %v8323_v19, %v16163_v25  ;;  %v5733_v10 = vpop.permute.xlu1 %5732  ;;  %v5735_v22 = vpop.permute.xlu0 %5734 }
 0x311   : > { %v8346_v53 = vrot.slane %v8338_v38, %v16163_v25  ;;  %v8353_v35 = vrot.slane %v8339_v40, %v16163_v25  ;;  %v8398_v5 = vrot.slane %v8390_v11, %v16163_v25  ;;  %v8405_v27 = vrot.slane %v8391_v12, %v16163_v25  ;;  %10538 = vrot.lane.b32.xlu0 %v18250_v39, %s15694_s15 }
 0x312   : > { %v8414_v29 = vrot.slane %v8406_v13, %v16163_v25  ;;  %v8421_v45 = vrot.slane %v8407_v43, %v16163_v25  ;;  %v21943_v43 = vld [vmem:[#allocation37_spill] sm:$0xff]  ;;  %v21944_v13 = vld [vmem:[#allocation40_spill] sm:$0xff] }
 0x313   : > { %v8354_v7 = vcombine.low %v8330_v14, %v8346_v53  ;;  %v8355_v2 = vcombine.high %v8330_v14, %v8346_v53  ;;  %v8356_v31 = vcombine.low %v8337_v16, %v8353_v35  ;;  %v8357_v56 = vcombine.high %v8337_v16, %v8353_v35  ;;  %10540 = vrot.lane.b32.xlu1 %v18253_v23, %s15694_s15  ;;  %v21945_v35 = vld [vmem:[#allocation41_spill] sm:$0xff] }
 0x314   : > { %v8422_v19 = vcombine.low %v8398_v5, %v8414_v29  ;;  %v8423_v38 = vcombine.high %v8398_v5, %v8414_v29  ;;  %v8424_v40 = vcombine.low %v8405_v27, %v8421_v45  ;;  %v8425_v11 = vcombine.high %v8405_v27, %v8421_v45 }
 0x315   : > { %10265 = vst.msk [vmem:[%s18673_s29 + $0x18] sm:$0xff] %vm5397_vm1, %v8354_v7  ;;  %10297 = vst.msk [vmem:[%s18673_s29 + $0x118] sm:$0xff] %vm5397_vm1, %v8355_v2  ;;  %v6266_v14 = vcombine.low %v21943_v43, %v5729_v61  ;;  %v6267_v12 = vcombine.high %v21943_v43, %v5729_v61  ;;  %v6334_v16 = vcombine.low %v21944_v13, %v5731_v36  ;;  %v21946_v61 = vld [vmem:[#allocation56_spill] sm:$0xff]  ;;  %10542 = vrot.lane.b32.xlu0 %v18270_v63, %s15694_s15 }
 0x316   : > { %10329 = vst.msk [vmem:[%s18673_s29 + $0x218] sm:$0xff] %vm5397_vm1, %v8356_v31  ;;  %10361 = vst.msk [vmem:[%s18673_s29 + $0x318] sm:$0xff] %vm5397_vm1, %v8357_v56  ;;  %v6335_v53 = vcombine.high %v21944_v13, %v5731_v36  ;;  %v6402_v5 = vcombine.low %v21945_v35, %v5733_v10  ;;  %v6403_v27 = vcombine.high %v21945_v35, %v5733_v10 }
 0x317   : > { %10266 = vst.msk [vmem:[%s18673_s29 + $0x20] sm:$0xff] %vm5397_vm1, %v8422_v19  ;;  %10298 = vst.msk [vmem:[%s18673_s29 + $0x120] sm:$0xff] %vm5397_vm1, %v8423_v38  ;;  %v6470_v29 = vcombine.low %v21946_v61, %v5735_v22  ;;  %v6471_v45 = vcombine.high %v21946_v61, %v5735_v22  ;;  %v6274_v36 = vrot.slane %v6266_v14, %v16158_v15  ;;  %10544 = vrot.lane.b32.xlu1 %v18282_v41, %s15694_s15 }
 0x318   : > { %10330 = vst.msk [vmem:[%s18673_s29 + $0x220] sm:$0xff] %vm5397_vm1, %v8424_v40  ;;  %10362 = vst.msk [vmem:[%s18673_s29 + $0x320] sm:$0xff] %vm5397_vm1, %v8425_v11  ;;  %v6281_v7 = vrot.slane %v6267_v12, %v16158_v15  ;;  %v6342_v2 = vrot.slane %v6334_v16, %v16158_v15  ;;  %v6349_v31 = vrot.slane %v6335_v53, %v16158_v15  ;;  %v21947_v11 = vld [vmem:[#allocation28_spill] sm:$0xff] }
 0x319   : > { %v18860_v56 = vrot.slane %v6402_v5, %v16158_v15  ;;  %v18863_v10 = vrot.slane %v6403_v27, %v16158_v15  ;;  %v18866_v19 = vrot.slane %v6470_v29, %v16158_v15  ;;  %v18869_v22 = vrot.slane %v6471_v45, %v16158_v15  ;;  %10546 = vrot.lane.b32.xlu0 %v18288_v32, %s15694_s15 }
 0x31a   : > { %v6282_v38 = vcombine.low %v18414_v55, %v6274_v36  ;;  %v6283_v40 = vcombine.high %v18414_v55, %v6274_v36  ;;  %v6298_v43 = vcombine.low %v21947_v11, %v6281_v7  ;;  %v6299_v14 = vcombine.high %v21947_v11, %v6281_v7 }
 0x31b   : > { %v6350_v12 = vcombine.low %v18460_v51, %v6342_v2  ;;  %v6351_v13 = vcombine.high %v18460_v51, %v6342_v2  ;;  %v6366_v16 = vcombine.low %v18463_v54, %v6349_v31  ;;  %v6367_v53 = vcombine.high %v18463_v54, %v6349_v31  ;;  %10548 = vrot.lane.b32.xlu1 %v18295_v57, %s15694_s15 }
 0x31c   : > { %v6290_v55 = vrot.slane %v6282_v38, %v16163_v25  ;;  %v6297_v35 = vrot.slane %v6283_v40, %v16163_v25  ;;  %v6306_v5 = vrot.slane %v6298_v43, %v16163_v25  ;;  %v6313_v27 = vrot.slane %v6299_v14, %v16163_v25  ;;  %v18893_v43 = vpop.permute.xlu1 %5736 }
 0x31d   : > { %v6358_v61 = vrot.slane %v6350_v12, %v16163_v25  ;;  %v6365_v29 = vrot.slane %v6351_v13, %v16163_v25  ;;  %v6374_v51 = vrot.slane %v6366_v16, %v16163_v25  ;;  %v6381_v45 = vrot.slane %v6367_v53, %v16163_v25  ;;  %10550 = vrot.lane.b32.xlu0 %v18197_v47, %s15694_s15 }
 0x31e   : > { %v8426_v54 = vcombine.low %v6290_v55, %v6297_v35  ;;  %v15496_v36 = vcombine.high %v6290_v55, %v6297_v35  ;;  %v8442_v7 = vcombine.low %v6306_v5, %v6313_v27  ;;  %v15497_v2 = vcombine.high %v6306_v5, %v6313_v27  ;;  %v18905_v27 = vpop.permute.xlu0 %5738 }
 0x31f   : > { %v8494_v31 = vcombine.low %v6358_v61, %v6365_v29  ;;  %v15498_v38 = vcombine.high %v6358_v61, %v6365_v29  ;;  %v8510_v40 = vcombine.low %v6374_v51, %v6381_v45  ;;  %v15499_v11 = vcombine.high %v6374_v51, %v6381_v45  ;;  %10552 = vrot.lane.b32.xlu1 %v18202_v37, %s15694_s15 }
 0x320   : > { %v8433_v14 = vrot.slane %v8426_v54, %v16158_v15  ;;  %v8441_v12 = vrot.slane %v15496_v36, %v16158_v15  ;;  %v8449_v13 = vrot.slane %v8442_v7, %v16158_v15  ;;  %v8457_v16 = vrot.slane %v15497_v2, %v16158_v15 }
 0x321   : > { %v8501_v53 = vrot.slane %v8494_v31, %v16158_v15  ;;  %v8509_v55 = vrot.slane %v15498_v38, %v16158_v15  ;;  %v8517_v35 = vrot.slane %v8510_v40, %v16158_v15  ;;  %v8525_v5 = vrot.slane %v15499_v11, %v16158_v15  ;;  %10554 = vrot.lane.b32.xlu0 %v18205_v34, %s15694_s15 }
 0x322   : > { %v8458_v61 = vcombine.low %v8433_v14, %v8441_v12  ;;  %v8459_v29 = vcombine.high %v8433_v14, %v8441_v12  ;;  %v8474_v51 = vcombine.low %v8449_v13, %v8457_v16  ;;  %v8475_v45 = vcombine.high %v8449_v13, %v8457_v16 }
 0x323   : > { %v8526_v54 = vcombine.low %v8501_v53, %v8509_v55  ;;  %v8527_v36 = vcombine.high %v8501_v53, %v8509_v55  ;;  %v8542_v7 = vcombine.low %v8517_v35, %v8525_v5  ;;  %v8543_v2 = vcombine.high %v8517_v35, %v8525_v5  ;;  %v18919_v53 = vpop.permute.xlu1 %5740  ;;  %10556 = vrot.lane.b32.xlu1 %v18208_v33, %s15694_s15 }
 0x324   : > { %v8466_v31 = vrot.slane %v8458_v61, %v16163_v25  ;;  %v8473_v38 = vrot.slane %v8459_v29, %v16163_v25  ;;  %v8482_v40 = vrot.slane %v8474_v51, %v16163_v25  ;;  %v8489_v11 = vrot.slane %v8475_v45, %v16163_v25 }
 0x325   : > { %v8534_v14 = vrot.slane %v8526_v54, %v16163_v25  ;;  %v8541_v12 = vrot.slane %v8527_v36, %v16163_v25  ;;  %v8550_v13 = vrot.slane %v8542_v7, %v16163_v25  ;;  %v8557_v16 = vrot.slane %v8543_v2, %v16163_v25  ;;  %v18923_v36 = vpop.permute.xlu0 %5742  ;;  %10558 = vrot.lane.b32.xlu0 %v18216_v0, %s15694_s15 }
 0x326   : > { %v8490_v55 = vcombine.low %v8466_v31, %v8482_v40  ;;  %v8491_v35 = vcombine.high %v8466_v31, %v8482_v40  ;;  %v8492_v5 = vcombine.low %v8473_v38, %v8489_v11  ;;  %v8493_v61 = vcombine.high %v8473_v38, %v8489_v11 }
 0x327   : > { %v8558_v29 = vcombine.low %v8534_v14, %v8550_v13  ;;  %v8559_v51 = vcombine.high %v8534_v14, %v8550_v13  ;;  %v8560_v45 = vcombine.low %v8541_v12, %v8557_v16  ;;  %v8561_v54 = vcombine.high %v8541_v12, %v8557_v16  ;;  %10560 = vrot.lane.b32.xlu1 %v18219_v49, %s15694_s15 }
 0x328   : > { %10267 = vst.msk [vmem:[%s18673_s29 + $0x28] sm:$0xff] %vm5397_vm1, %v8490_v55  ;;  %10299 = vst.msk [vmem:[%s18673_s29 + $0x128] sm:$0xff] %vm5397_vm1, %v8491_v35  ;;  %v6418_v7 = vcombine.low %v18472_v60, %v18860_v56  ;;  %v6419_v2 = vcombine.high %v18472_v60, %v18860_v56  ;;  %v6434_v31 = vcombine.low %v18475_v6, %v18863_v10 }
 0x329   : > { %10331 = vst.msk [vmem:[%s18673_s29 + $0x228] sm:$0xff] %vm5397_vm1, %v8492_v5  ;;  %10363 = vst.msk [vmem:[%s18673_s29 + $0x328] sm:$0xff] %vm5397_vm1, %v8493_v61  ;;  %v6435_v38 = vcombine.high %v18475_v6, %v18863_v10  ;;  %v6486_v40 = vcombine.low %v18498_v52, %v18866_v19  ;;  %v6487_v60 = vcombine.high %v18498_v52, %v18866_v19  ;;  %10562 = vrot.lane.b32.xlu0 %v18225_v50, %s15694_s15 }
 0x32a   : > { %10268 = vst.msk [vmem:[%s18673_s29 + $0x30] sm:$0xff] %vm5397_vm1, %v8558_v29  ;;  %10300 = vst.msk [vmem:[%s18673_s29 + $0x130] sm:$0xff] %vm5397_vm1, %v8559_v51  ;;  %v6502_v56 = vcombine.low %v18501_v30, %v18869_v22  ;;  %v6503_v6 = vcombine.high %v18501_v30, %v18869_v22  ;;  %v6426_v10 = vrot.slane %v6418_v7, %v16163_v25  ;;  %v18969_v30 = vpop.permute.xlu1 %5744 }
 0x32b   : > { %10332 = vst.msk [vmem:[%s18673_s29 + $0x230] sm:$0xff] %vm5397_vm1, %v8560_v45  ;;  %10364 = vst.msk [vmem:[%s18673_s29 + $0x330] sm:$0xff] %vm5397_vm1, %v8561_v54  ;;  %v6433_v11 = vrot.slane %v6419_v2, %v16163_v25  ;;  %v6442_v14 = vrot.slane %v6434_v31, %v16163_v25  ;;  %v6449_v12 = vrot.slane %v6435_v38, %v16163_v25  ;;  %v18973_v54 = vpop.permute.xlu0 %5746  ;;  %10564 = vrot.lane.b32.xlu1 %v18233_v21, %s15694_s15 }
 0x32c   : > { %v6494_v13 = vrot.slane %v6486_v40, %v16163_v25  ;;  %v6501_v52 = vrot.slane %v6487_v60, %v16163_v25  ;;  %v6510_v19 = vrot.slane %v6502_v56, %v16163_v25  ;;  %v6517_v16 = vrot.slane %v6503_v6, %v16163_v25 }
 0x32d   : > { %v8562_v22 = vcombine.low %v6426_v10, %v6433_v11  ;;  %v15500_v55 = vcombine.high %v6426_v10, %v6433_v11  ;;  %v8578_v35 = vcombine.low %v6442_v14, %v6449_v12  ;;  %v15501_v5 = vcombine.high %v6442_v14, %v6449_v12  ;;  %10566 = vrot.lane.b32.xlu0 %v18239_v28, %s15694_s15 }
 0x32e   : > { %v8630_v61 = vcombine.low %v6494_v13, %v6501_v52  ;;  %v15502_v29 = vcombine.high %v6494_v13, %v6501_v52  ;;  %v8646_v51 = vcombine.low %v6510_v19, %v6517_v16  ;;  %v15503_v45 = vcombine.high %v6510_v19, %v6517_v16 }
 0x32f   : > { %v8569_v7 = vrot.slane %v8562_v22, %v16158_v15  ;;  %v8577_v2 = vrot.slane %v15500_v55, %v16158_v15  ;;  %v8585_v31 = vrot.slane %v8578_v35, %v16158_v15  ;;  %v8593_v38 = vrot.slane %v15501_v5, %v16158_v15  ;;  %v18987_v22 = vpop.permute.xlu1 %5748  ;;  %10568 = vrot.lane.b32.xlu1 %v21917_v1, %s15694_s15 }
 0x330   : > { %v8637_v40 = vrot.slane %v8630_v61, %v16158_v15  ;;  %v8645_v60 = vrot.slane %v15502_v29, %v16158_v15  ;;  %v8653_v56 = vrot.slane %v8646_v51, %v16158_v15  ;;  %v8661_v6 = vrot.slane %v15503_v45, %v16158_v15 }
 0x331   : > { %v8594_v10 = vcombine.low %v8569_v7, %v8577_v2  ;;  %v8595_v11 = vcombine.high %v8569_v7, %v8577_v2  ;;  %v8610_v14 = vcombine.low %v8585_v31, %v8593_v38  ;;  %v8611_v12 = vcombine.high %v8585_v31, %v8593_v38  ;;  %v18999_v2 = vpop.permute.xlu0 %5750  ;;  %10570 = vrot.lane.b32.xlu0 %v21918_v3, %s15694_s15 }
 0x332   : > { %v8662_v13 = vcombine.low %v8637_v40, %v8645_v60  ;;  %v8663_v52 = vcombine.high %v8637_v40, %v8645_v60  ;;  %v8678_v19 = vcombine.low %v8653_v56, %v8661_v6  ;;  %v8679_v16 = vcombine.high %v8653_v56, %v8661_v6 }
 0x333   : > { %v8602_v55 = vrot.slane %v8594_v10, %v16163_v25  ;;  %v8609_v35 = vrot.slane %v8595_v11, %v16163_v25  ;;  %v8618_v5 = vrot.slane %v8610_v14, %v16163_v25  ;;  %v8625_v61 = vrot.slane %v8611_v12, %v16163_v25  ;;  %v21948_v14 = vld [vmem:[#allocation57_spill] sm:$0xff]  ;;  %10572 = vrot.lane.b32.xlu1 %v21923_v26, %s15694_s15 }
 0x334   : > { %v8670_v29 = vrot.slane %v8662_v13, %v16163_v25  ;;  %v8677_v51 = vrot.slane %v8663_v52, %v16163_v25  ;;  %v8686_v45 = vrot.slane %v8678_v19, %v16163_v25  ;;  %v8693_v7 = vrot.slane %v8679_v16, %v16163_v25  ;;  %v21949_v52 = vld [vmem:[#allocation44_spill] sm:$0xff] }
 0x335   : > { %v8626_v31 = vcombine.low %v8602_v55, %v8618_v5  ;;  %v8627_v38 = vcombine.high %v8602_v55, %v8618_v5  ;;  %v8628_v40 = vcombine.low %v8609_v35, %v8625_v61  ;;  %v8629_v60 = vcombine.high %v8609_v35, %v8625_v61  ;;  %v21950_v55 = vld [vmem:[#allocation59_spill] sm:$0xff]  ;;  %v21951_v5 = vld [vmem:[#allocation17_spill] sm:$0xff]  ;;  %10574 = vrot.lane.b32.xlu0 %v21927_v4, %s15694_s15 }
 0x336   : > { %v8694_v56 = vcombine.low %v8670_v29, %v8686_v45  ;;  %v8695_v6 = vcombine.high %v8670_v29, %v8686_v45  ;;  %v8696_v10 = vcombine.low %v8677_v51, %v8693_v7  ;;  %v8697_v11 = vcombine.high %v8677_v51, %v8693_v7  ;;  %v19037_v29 = vpop.permute.xlu1 %5752 }
 0x337   : > { %10269 = vst.msk [vmem:[%s18673_s29 + $0x38] sm:$0xff] %vm5397_vm1, %v8626_v31  ;;  %10301 = vst.msk [vmem:[%s18673_s29 + $0x138] sm:$0xff] %vm5397_vm1, %v8627_v38  ;;  %v6538_v12 = vcombine.low %v21948_v14, %v18893_v43  ;;  %v6539_v13 = vcombine.high %v21948_v14, %v18893_v43  ;;  %v6606_v19 = vcombine.low %v21949_v52, %v18905_v27  ;;  %10576 = vrot.lane.b32.xlu1 %v21929_v8, %s15694_s15 }
 0x338   : > { %10333 = vst.msk [vmem:[%s18673_s29 + $0x238] sm:$0xff] %vm5397_vm1, %v8628_v40  ;;  %10365 = vst.msk [vmem:[%s18673_s29 + $0x338] sm:$0xff] %vm5397_vm1, %v8629_v60  ;;  %v6607_v16 = vcombine.high %v21949_v52, %v18905_v27  ;;  %v6674_v43 = vcombine.low %v21950_v55, %v18919_v53  ;;  %v6675_v35 = vcombine.high %v21950_v55, %v18919_v53  ;;  %v19057_v60 = vpop.permute.xlu0 %5754 }
 0x339   : > { %10270 = vst.msk [vmem:[%s18673_s29 + $0x40] sm:$0xff] %vm5397_vm1, %v8694_v56  ;;  %10302 = vst.msk [vmem:[%s18673_s29 + $0x140] sm:$0xff] %vm5397_vm1, %v8695_v6  ;;  %v6742_v27 = vcombine.low %v21951_v5, %v18923_v36  ;;  %v6743_v61 = vcombine.high %v21951_v5, %v18923_v36  ;;  %v6546_v51 = vrot.slane %v6538_v12, %v16158_v15  ;;  %10578 = vrot.lane.b32.xlu0 %v21930_v62, %s15694_s15 }
 0x33a   : > { %10334 = vst.msk [vmem:[%s18673_s29 + $0x240] sm:$0xff] %vm5397_vm1, %v8696_v10  ;;  %10366 = vst.msk [vmem:[%s18673_s29 + $0x340] sm:$0xff] %vm5397_vm1, %v8697_v11  ;;  %v6553_v45 = vrot.slane %v6539_v13, %v16158_v15  ;;  %v6614_v7 = vrot.slane %v6606_v19, %v16158_v15  ;;  %v6621_v31 = vrot.slane %v6607_v16, %v16158_v15 }
 0x33b   : > { %v19046_v53 = vrot.slane %v6674_v43, %v16158_v15  ;;  %v19049_v38 = vrot.slane %v6675_v35, %v16158_v15  ;;  %v19052_v36 = vrot.slane %v6742_v27, %v16158_v15  ;;  %v19055_v40 = vrot.slane %v6743_v61, %v16158_v15  ;;  %10580 = vrot.lane.b32.xlu1 %v21931_v58, %s15694_s15 }
 0x33c   : > { %v6554_v56 = vcombine.low %v18510_v20, %v6546_v51  ;;  %v6555_v6 = vcombine.high %v18510_v20, %v6546_v51  ;;  %v6570_v10 = vcombine.low %v18513_v59, %v6553_v45  ;;  %v6571_v11 = vcombine.high %v18513_v59, %v6553_v45 }
 0x33d   : > { %v6622_v14 = vcombine.low %v18554_v18, %v6614_v7  ;;  %v6623_v12 = vcombine.high %v18554_v18, %v6614_v7  ;;  %v6638_v13 = vcombine.low %v18557_v24, %v6621_v31  ;;  %v6639_v52 = vcombine.high %v18557_v24, %v6621_v31  ;;  %v19079_v24 = vpop.permute.xlu1 %5756  ;;  %10614 = vrot.lane.b32.xlu0 %v21932_v17, %s15695_s16 }
 0x33e   : > { %v6562_v20 = vrot.slane %v6554_v56, %v16163_v25  ;;  %v6569_v19 = vrot.slane %v6555_v6, %v16163_v25  ;;  %v6578_v59 = vrot.slane %v6570_v10, %v16163_v25  ;;  %v6585_v16 = vrot.slane %v6571_v11, %v16163_v25  ;;  %v19083_v6 = vpop.permute.xlu0 %5758 }
 0x33f   : > { %v6630_v55 = vrot.slane %v6622_v14, %v16163_v25  ;;  %v6637_v43 = vrot.slane %v6623_v12, %v16163_v25  ;;  %v6646_v18 = vrot.slane %v6638_v13, %v16163_v25  ;;  %v6653_v35 = vrot.slane %v6639_v52, %v16163_v25  ;;  %10616 = vrot.lane.b32.xlu1 %v21933_v44, %s15695_s16 }
 0x340   : > { %v8698_v5 = vcombine.low %v6562_v20, %v6569_v19  ;;  %v15504_v27 = vcombine.high %v6562_v20, %v6569_v19  ;;  %v8714_v61 = vcombine.low %v6578_v59, %v6585_v16  ;;  %v15505_v51 = vcombine.high %v6578_v59, %v6585_v16 }
 0x341   : > { %v8766_v45 = vcombine.low %v6630_v55, %v6637_v43  ;;  %v15506_v7 = vcombine.high %v6630_v55, %v6637_v43  ;;  %v8782_v31 = vcombine.low %v6646_v18, %v6653_v35  ;;  %v15507_v56 = vcombine.high %v6646_v18, %v6653_v35  ;;  %10618 = vrot.lane.b32.xlu0 %v21934_v42, %s15695_s16 }
 0x342   : > { %v8705_v10 = vrot.slane %v8698_v5, %v16158_v15  ;;  %v8713_v11 = vrot.slane %v15504_v27, %v16158_v15  ;;  %v8721_v14 = vrot.slane %v8714_v61, %v16158_v15  ;;  %v8729_v12 = vrot.slane %v15505_v51, %v16158_v15  ;;  %v19097_v61 = vpop.permute.xlu1 %5760 }
 0x343   : > { %v8773_v13 = vrot.slane %v8766_v45, %v16158_v15  ;;  %v8781_v52 = vrot.slane %v15506_v7, %v16158_v15  ;;  %v8789_v20 = vrot.slane %v8782_v31, %v16158_v15  ;;  %v8797_v19 = vrot.slane %v15507_v56, %v16158_v15  ;;  %10620 = vrot.lane.b32.xlu1 %v21937_v48, %s15695_s16 }
 0x344   : > { %v8730_v59 = vcombine.low %v8705_v10, %v8713_v11  ;;  %v8731_v16 = vcombine.high %v8705_v10, %v8713_v11  ;;  %v8746_v55 = vcombine.low %v8721_v14, %v8729_v12  ;;  %v8747_v43 = vcombine.high %v8721_v14, %v8729_v12  ;;  %v19109_v12 = vpop.permute.xlu0 %5762 }
 0x345   : > { %v8798_v18 = vcombine.low %v8773_v13, %v8781_v52  ;;  %v8799_v35 = vcombine.high %v8773_v13, %v8781_v52  ;;  %v8814_v5 = vcombine.low %v8789_v20, %v8797_v19  ;;  %v8815_v27 = vcombine.high %v8789_v20, %v8797_v19 }
 0x346   : > { %v8738_v51 = vrot.slane %v8730_v59, %v16163_v25  ;;  %v8745_v45 = vrot.slane %v8731_v16, %v16163_v25  ;;  %v8754_v7 = vrot.slane %v8746_v55, %v16163_v25  ;;  %v8761_v31 = vrot.slane %v8747_v43, %v16163_v25 }
 0x347   : > { %v8806_v56 = vrot.slane %v8798_v18, %v16163_v25  ;;  %v8813_v10 = vrot.slane %v8799_v35, %v16163_v25  ;;  %v8822_v11 = vrot.slane %v8814_v5, %v16163_v25  ;;  %v8829_v14 = vrot.slane %v8815_v27, %v16163_v25  ;;  %v21952_v18 = vld [vmem:[#allocation69_spill] sm:$0xff]  ;;  %v21953_v35 = vld [vmem:[#allocation74_spill] sm:$0xff] }
 0x348   : > { %v8762_v13 = vcombine.low %v8738_v51, %v8754_v7  ;;  %v8763_v52 = vcombine.high %v8738_v51, %v8754_v7  ;;  %v8764_v20 = vcombine.low %v8745_v45, %v8761_v31  ;;  %v8765_v19 = vcombine.high %v8745_v45, %v8761_v31  ;;  %10622 = vrot.lane.b32.xlu0 %v21952_v18, %s15695_s16  ;;  %v21954_v51 = vld [vmem:[#allocation79_spill] sm:$0xff]  ;;  %v21955_v31 = vld [vmem:[#allocation85_spill] sm:$0xff]  ;;  %v21959_v18 = vld [vmem:[#allocation4_spill] sm:$0xff] }
 0x349   : > { %v8830_v59 = vcombine.low %v8806_v56, %v8822_v11  ;;  %v8831_v16 = vcombine.high %v8806_v56, %v8822_v11  ;;  %v8832_v55 = vcombine.low %v8813_v10, %v8829_v14  ;;  %v8833_v43 = vcombine.high %v8813_v10, %v8829_v14  ;;  %v21956_v10 = vld [vmem:[#allocation86_spill] sm:$0xff]  ;;  %v19147_v14 = vpop.permute.xlu1 %5764 }
 0x34a   : > { %10271 = vst.msk [vmem:[%s18673_s29 + $0x48] sm:$0xff] %vm5397_vm1, %v8762_v13  ;;  %10303 = vst.msk [vmem:[%s18673_s29 + $0x148] sm:$0xff] %vm5397_vm1, %v8763_v52  ;;  %v6690_v5 = vcombine.low %v21953_v35, %v19046_v53  ;;  %v6691_v27 = vcombine.high %v21953_v35, %v19046_v53  ;;  %v6706_v45 = vcombine.low %v21954_v51, %v19049_v38  ;;  %v21958_v35 = vld [vmem:[#allocation2_spill] sm:$0xff] }
 0x34b   : > { %10335 = vst.msk [vmem:[%s18673_s29 + $0x248] sm:$0xff] %vm5397_vm1, %v8764_v20  ;;  %10367 = vst.msk [vmem:[%s18673_s29 + $0x348] sm:$0xff] %vm5397_vm1, %v8765_v19  ;;  %v6707_v7 = vcombine.high %v21954_v51, %v19049_v38  ;;  %v6758_v56 = vcombine.low %v21955_v31, %v19052_v36  ;;  %v6759_v53 = vcombine.high %v21955_v31, %v19052_v36 }
 0x34c   : > { %10272 = vst.msk [vmem:[%s18673_s29 + $0x50] sm:$0xff] %vm5397_vm1, %v8830_v59  ;;  %10304 = vst.msk [vmem:[%s18673_s29 + $0x150] sm:$0xff] %vm5397_vm1, %v8831_v16  ;;  %v6774_v11 = vcombine.low %v21956_v10, %v19055_v40  ;;  %v6775_v38 = vcombine.high %v21956_v10, %v19055_v40  ;;  %v6698_v13 = vrot.slane %v6690_v5, %v16163_v25  ;;  %v21957_v59 = vld [vmem:[#allocation78_spill] sm:$0xff]  ;;  %10626 = vrot.lane.b32.xlu0 %v21958_v35, %s15695_s16 }
 0x34d   : > { %10336 = vst.msk [vmem:[%s18673_s29 + $0x250] sm:$0xff] %vm5397_vm1, %v8832_v55  ;;  %10368 = vst.msk [vmem:[%s18673_s29 + $0x350] sm:$0xff] %vm5397_vm1, %v8833_v43  ;;  %v6705_v52 = vrot.slane %v6691_v27, %v16163_v25  ;;  %v6714_v20 = vrot.slane %v6706_v45, %v16163_v25  ;;  %v6721_v19 = vrot.slane %v6707_v7, %v16163_v25  ;;  %10624 = vrot.lane.b32.xlu1 %v21957_v59, %s15695_s16  ;;  %v19159_v43 = vpop.permute.xlu0 %5766 }
 0x34e   : > { %v6766_v36 = vrot.slane %v6758_v56, %v16163_v25  ;;  %v6773_v16 = vrot.slane %v6759_v53, %v16163_v25  ;;  %v6782_v55 = vrot.slane %v6774_v11, %v16163_v25  ;;  %v6789_v40 = vrot.slane %v6775_v38, %v16163_v25 }
 0x34f   : > { %v8834_v5 = vcombine.low %v6698_v13, %v6705_v52  ;;  %v15508_v27 = vcombine.high %v6698_v13, %v6705_v52  ;;  %v8850_v51 = vcombine.low %v6714_v20, %v6721_v19  ;;  %v15509_v45 = vcombine.high %v6714_v20, %v6721_v19  ;;  %v19173_v19 = vpop.permute.xlu1 %5768 }
 0x350   : > { %v8902_v7 = vcombine.low %v6766_v36, %v6773_v16  ;;  %v15510_v31 = vcombine.high %v6766_v36, %v6773_v16  ;;  %v8918_v10 = vcombine.low %v6782_v55, %v6789_v40  ;;  %v15511_v59 = vcombine.high %v6782_v55, %v6789_v40  ;;  %10630 = vrot.lane.b32.xlu0 %v21942_v9, %s15695_s16 }
 0x351   : > { %v8841_v56 = vrot.slane %v8834_v5, %v16158_v15  ;;  %v8849_v53 = vrot.slane %v15508_v27, %v16158_v15  ;;  %v8857_v11 = vrot.slane %v8850_v51, %v16158_v15  ;;  %v8865_v38 = vrot.slane %v15509_v45, %v16158_v15  ;;  %10628 = vrot.lane.b32.xlu1 %v21959_v18, %s15695_s16 }
 0x352   : > { %v8909_v35 = vrot.slane %v8902_v7, %v16158_v15  ;;  %v8917_v13 = vrot.slane %v15510_v31, %v16158_v15  ;;  %v8925_v52 = vrot.slane %v8918_v10, %v16158_v15  ;;  %v8933_v20 = vrot.slane %v15511_v59, %v16158_v15  ;;  %v19177_v7 = vpop.permute.xlu0 %5770 }
 0x353   : > { %v8866_v36 = vcombine.low %v8841_v56, %v8849_v53  ;;  %v8867_v16 = vcombine.high %v8841_v56, %v8849_v53  ;;  %v8882_v55 = vcombine.low %v8857_v11, %v8865_v38  ;;  %v8883_v40 = vcombine.high %v8857_v11, %v8865_v38 }
 0x354   : > { %v8934_v5 = vcombine.low %v8909_v35, %v8917_v13  ;;  %v8935_v27 = vcombine.high %v8909_v35, %v8917_v13  ;;  %v8950_v51 = vcombine.low %v8925_v52, %v8933_v20  ;;  %v8951_v45 = vcombine.high %v8925_v52, %v8933_v20  ;;  %10634 = vrot.lane.b32.xlu0 %v18250_v39, %s15695_s16 }
 0x355   : > { %v8874_v31 = vrot.slane %v8866_v36, %v16163_v25  ;;  %v8881_v10 = vrot.slane %v8867_v16, %v16163_v25  ;;  %v8890_v59 = vrot.slane %v8882_v55, %v16163_v25  ;;  %v8897_v18 = vrot.slane %v8883_v40, %v16163_v25  ;;  %10632 = vrot.lane.b32.xlu1 %v18244_v46, %s15695_s16 }
 0x356   : > { %v8942_v56 = vrot.slane %v8934_v5, %v16163_v25  ;;  %v8949_v35 = vrot.slane %v8935_v27, %v16163_v25  ;;  %v8958_v53 = vrot.slane %v8950_v51, %v16163_v25  ;;  %v8965_v11 = vrot.slane %v8951_v45, %v16163_v25  ;;  %v19191_v5 = vpop.permute.xlu1 %5772  ;;  %v21960_v27 = vld [vmem:[#allocation22_spill] sm:$0xff]  ;;  %v21961_v45 = vld [vmem:[#allocation61_spill] sm:$0xff] }
 0x357   : > { %v8898_v38 = vcombine.low %v8874_v31, %v8890_v59  ;;  %v8899_v13 = vcombine.high %v8874_v31, %v8890_v59  ;;  %v8900_v52 = vcombine.low %v8881_v10, %v8897_v18  ;;  %v8901_v20 = vcombine.high %v8881_v10, %v8897_v18  ;;  %v21962_v59 = vld [vmem:[#allocation87_spill] sm:$0xff] }
 0x358   : > { %v8966_v36 = vcombine.low %v8942_v56, %v8958_v53  ;;  %v8967_v16 = vcombine.high %v8942_v56, %v8958_v53  ;;  %v8968_v55 = vcombine.low %v8949_v35, %v8965_v11  ;;  %v8969_v40 = vcombine.high %v8949_v35, %v8965_v11  ;;  %v21963_v35 = vld [vmem:[#allocation55_spill] sm:$0xff]  ;;  %v19227_v11 = vpop.permute.xlu0 %5774  ;;  %10638 = vrot.lane.b32.xlu0 %v18270_v63, %s15695_s16 }
 0x359   : > { %10273 = vst.msk [vmem:[%s18673_s29 + $0x58] sm:$0xff] %vm5397_vm1, %v8898_v38  ;;  %10305 = vst.msk [vmem:[%s18673_s29 + $0x158] sm:$0xff] %vm5397_vm1, %v8899_v13  ;;  %v6810_v18 = vcombine.low %v21960_v27, %v18969_v30  ;;  %v6811_v51 = vcombine.high %v21960_v27, %v18969_v30  ;;  %v6878_v31 = vcombine.low %v21961_v45, %v18973_v54  ;;  %10636 = vrot.lane.b32.xlu1 %v18253_v23, %s15695_s16 }
 0x35a   : > { %10337 = vst.msk [vmem:[%s18673_s29 + $0x258] sm:$0xff] %vm5397_vm1, %v8900_v52  ;;  %10369 = vst.msk [vmem:[%s18673_s29 + $0x358] sm:$0xff] %vm5397_vm1, %v8901_v20  ;;  %v6879_v10 = vcombine.high %v21961_v45, %v18973_v54  ;;  %v6946_v30 = vcombine.low %v21962_v59, %v18987_v22  ;;  %v6947_v56 = vcombine.high %v21962_v59, %v18987_v22 }
 0x35b   : > { %10274 = vst.msk [vmem:[%s18673_s29 + $0x60] sm:$0xff] %vm5397_vm1, %v8966_v36  ;;  %10306 = vst.msk [vmem:[%s18673_s29 + $0x160] sm:$0xff] %vm5397_vm1, %v8967_v16  ;;  %v7014_v54 = vcombine.low %v21963_v35, %v18999_v2  ;;  %v7015_v53 = vcombine.high %v21963_v35, %v18999_v2  ;;  %v6818_v38 = vrot.slane %v6810_v18, %v16158_v15  ;;  %v21965_v18 = vld [vmem:[#allocation32_spill] sm:$0xff] }
 0x35c   : > { %10338 = vst.msk [vmem:[%s18673_s29 + $0x260] sm:$0xff] %vm5397_vm1, %v8968_v55  ;;  %10370 = vst.msk [vmem:[%s18673_s29 + $0x360] sm:$0xff] %vm5397_vm1, %v8969_v40  ;;  %v6825_v13 = vrot.slane %v6811_v51, %v16158_v15  ;;  %v6886_v52 = vrot.slane %v6878_v31, %v16158_v15  ;;  %v6893_v20 = vrot.slane %v6879_v10, %v16158_v15  ;;  %v21964_v55 = vld [vmem:[#allocation50_spill] sm:$0xff]  ;;  %v21966_v31 = vld [vmem:[#allocation93_spill] sm:$0xff]  ;;  %10642 = vrot.lane.b32.xlu0 %v18288_v32, %s15695_s16 }
 0x35d   : > { %v19236_v22 = vrot.slane %v6946_v30, %v16158_v15  ;;  %v19239_v36 = vrot.slane %v6947_v56, %v16158_v15  ;;  %v19242_v2 = vrot.slane %v7014_v54, %v16158_v15  ;;  %v19245_v16 = vrot.slane %v7015_v53, %v16158_v15  ;;  %10640 = vrot.lane.b32.xlu1 %v18282_v41, %s15695_s16  ;;  %v21967_v30 = vld [vmem:[#allocation94_spill] sm:$0xff]  ;;  %v19257_v54 = vpop.permute.xlu1 %5776 }
 0x35e   : > { %v6826_v40 = vcombine.low %v21964_v55, %v6818_v38  ;;  %v6827_v27 = vcombine.high %v21964_v55, %v6818_v38  ;;  %v6842_v51 = vcombine.low %v21965_v18, %v6825_v13  ;;  %v6843_v45 = vcombine.high %v21965_v18, %v6825_v13 }
 0x35f   : > { %v6894_v10 = vcombine.low %v21966_v31, %v6886_v52  ;;  %v6895_v59 = vcombine.high %v21966_v31, %v6886_v52  ;;  %v6910_v56 = vcombine.low %v21967_v30, %v6893_v20  ;;  %v6911_v35 = vcombine.high %v21967_v30, %v6893_v20  ;;  %v19269_v30 = vpop.permute.xlu0 %5778 }
 0x360   : > { %v6834_v53 = vrot.slane %v6826_v40, %v16163_v25  ;;  %v6841_v38 = vrot.slane %v6827_v27, %v16163_v25  ;;  %v6850_v13 = vrot.slane %v6842_v51, %v16163_v25  ;;  %v6857_v55 = vrot.slane %v6843_v45, %v16163_v25  ;;  %10646 = vrot.lane.b32.xlu0 %v18197_v47, %s15695_s16 }
 0x361   : > { %v6902_v18 = vrot.slane %v6894_v10, %v16163_v25  ;;  %v6909_v52 = vrot.slane %v6895_v59, %v16163_v25  ;;  %v6918_v31 = vrot.slane %v6910_v56, %v16163_v25  ;;  %v6925_v20 = vrot.slane %v6911_v35, %v16163_v25  ;;  %10644 = vrot.lane.b32.xlu1 %v18295_v57, %s15695_s16 }
 0x362   : > { %v8970_v41 = vcombine.low %v6834_v53, %v6841_v38  ;;  %v15512_v32 = vcombine.high %v6834_v53, %v6841_v38  ;;  %v8986_v63 = vcombine.low %v6850_v13, %v6857_v55  ;;  %v15513_v40 = vcombine.high %v6850_v13, %v6857_v55 }
 0x363   : > { %v9038_v27 = vcombine.low %v6902_v18, %v6909_v52  ;;  %v15514_v51 = vcombine.high %v6902_v18, %v6909_v52  ;;  %v9054_v45 = vcombine.low %v6918_v31, %v6925_v20  ;;  %v15515_v23 = vcombine.high %v6918_v31, %v6925_v20  ;;  %v19283_v18 = vpop.permute.xlu1 %5780 }
 0x364   : > { %v8977_v10 = vrot.slane %v8970_v41, %v16158_v15  ;;  %v8985_v59 = vrot.slane %v15512_v32, %v16158_v15  ;;  %v8993_v56 = vrot.slane %v8986_v63, %v16158_v15  ;;  %v9001_v35 = vrot.slane %v15513_v40, %v16158_v15  ;;  %10650 = vrot.lane.b32.xlu0 %v18205_v34, %s15695_s16 }
 0x365   : > { %v9045_v53 = vrot.slane %v9038_v27, %v16158_v15  ;;  %v9053_v38 = vrot.slane %v15514_v51, %v16158_v15  ;;  %v9061_v13 = vrot.slane %v9054_v45, %v16158_v15  ;;  %v9069_v55 = vrot.slane %v15515_v23, %v16158_v15  ;;  %10648 = vrot.lane.b32.xlu1 %v18202_v37, %s15695_s16  ;;  %v19287_v27 = vpop.permute.xlu0 %10422 }
 0x366   : > { %v9002_v52 = vcombine.low %v8977_v10, %v8985_v59  ;;  %v9003_v31 = vcombine.high %v8977_v10, %v8985_v59  ;;  %v9018_v20 = vcombine.low %v8993_v56, %v9001_v35  ;;  %v9019_v41 = vcombine.high %v8993_v56, %v9001_v35  ;;  %21968 = vst [vmem:[#allocation65_spill] sm:$0xff] %v19287_v27 }
 0x367   : > { %v9070_v63 = vcombine.low %v9045_v53, %v9053_v38  ;;  %v9071_v32 = vcombine.high %v9045_v53, %v9053_v38  ;;  %v9086_v40 = vcombine.low %v9061_v13, %v9069_v55  ;;  %v9087_v47 = vcombine.high %v9061_v13, %v9069_v55 }
 0x368   : > { %v9010_v23 = vrot.slane %v9002_v52, %v16163_v25  ;;  %v9017_v51 = vrot.slane %v9003_v31, %v16163_v25  ;;  %v9026_v45 = vrot.slane %v9018_v20, %v16163_v25  ;;  %v9033_v10 = vrot.slane %v9019_v41, %v16163_v25  ;;  %10654 = vrot.lane.b32.xlu0 %v18216_v0, %s15695_s16 }
 0x369   : > { %v9078_v59 = vrot.slane %v9070_v63, %v16163_v25  ;;  %v9085_v56 = vrot.slane %v9071_v32, %v16163_v25  ;;  %v9094_v35 = vrot.slane %v9086_v40, %v16163_v25  ;;  %v9101_v53 = vrot.slane %v9087_v47, %v16163_v25  ;;  %10652 = vrot.lane.b32.xlu1 %v18208_v33, %s15695_s16  ;;  %v19301_v32 = vpop.permute.xlu1 %10424  ;;  %v19303_v40 = vpop.permute.xlu0 %10426  ;;  %v21971_v47 = vld [vmem:[#allocation16_spill] sm:$0xff] }
 0x36a   : > { %v9034_v38 = vcombine.low %v9010_v23, %v9026_v45  ;;  %v9035_v13 = vcombine.high %v9010_v23, %v9026_v45  ;;  %v9036_v55 = vcombine.low %v9017_v51, %v9033_v10  ;;  %v9037_v52 = vcombine.high %v9017_v51, %v9033_v10  ;;  %21969 = vst [vmem:[#allocation75_spill] sm:$0xff] %v19301_v32  ;;  %v21972_v45 = vld [vmem:[#allocation95_spill] sm:$0xff] }
 0x36b   : > { %v9102_v31 = vcombine.low %v9078_v59, %v9094_v35  ;;  %v9103_v20 = vcombine.high %v9078_v59, %v9094_v35  ;;  %v9104_v41 = vcombine.low %v9085_v56, %v9101_v53  ;;  %v9105_v63 = vcombine.high %v9085_v56, %v9101_v53  ;;  %21970 = vst [vmem:[#allocation76_spill] sm:$0xff] %v19303_v40  ;;  %v21973_v56 = vld [vmem:[#allocation18_spill] sm:$0xff]  ;;  %v21974_v53 = vld [vmem:[#allocation19_spill] sm:$0xff] }
 0x36c   : > { %10275 = vst.msk [vmem:[%s18673_s29 + $0x68] sm:$0xff] %vm5397_vm1, %v9034_v38  ;;  %10307 = vst.msk [vmem:[%s18673_s29 + $0x168] sm:$0xff] %vm5397_vm1, %v9035_v13  ;;  %v6962_v23 = vcombine.low %v21971_v47, %v19236_v22  ;;  %v6963_v51 = vcombine.high %v21971_v47, %v19236_v22  ;;  %v6978_v10 = vcombine.low %v21972_v45, %v19239_v36  ;;  %10658 = vrot.lane.b32.xlu0 %v18225_v50, %s15695_s16 }
 0x36d   : > { %10339 = vst.msk [vmem:[%s18673_s29 + $0x268] sm:$0xff] %vm5397_vm1, %v9036_v55  ;;  %10371 = vst.msk [vmem:[%s18673_s29 + $0x368] sm:$0xff] %vm5397_vm1, %v9037_v52  ;;  %v6979_v59 = vcombine.high %v21972_v45, %v19239_v36  ;;  %v7030_v35 = vcombine.low %v21973_v56, %v19242_v2  ;;  %v7031_v22 = vcombine.high %v21973_v56, %v19242_v2  ;;  %10656 = vrot.lane.b32.xlu1 %v18219_v49, %s15695_s16  ;;  %v19351_v47 = vpop.permute.xlu0 %10430 }
 0x36e   : > { %10276 = vst.msk [vmem:[%s18673_s29 + $0x70] sm:$0xff] %vm5397_vm1, %v9102_v31  ;;  %10308 = vst.msk [vmem:[%s18673_s29 + $0x170] sm:$0xff] %vm5397_vm1, %v9103_v20  ;;  %v7046_v38 = vcombine.low %v21974_v53, %v19245_v16  ;;  %v7047_v36 = vcombine.high %v21974_v53, %v19245_v16  ;;  %v6970_v13 = vrot.slane %v6962_v23, %v16163_v25  ;;  %v19349_v16 = vpop.permute.xlu1 %10428 }
 0x36f   : > { %10340 = vst.msk [vmem:[%s18673_s29 + $0x270] sm:$0xff] %vm5397_vm1, %v9104_v41  ;;  %10372 = vst.msk [vmem:[%s18673_s29 + $0x370] sm:$0xff] %vm5397_vm1, %v9105_v63  ;;  %v6977_v55 = vrot.slane %v6963_v51, %v16163_v25  ;;  %v6986_v52 = vrot.slane %v6978_v10, %v16163_v25  ;;  %v6993_v31 = vrot.slane %v6979_v59, %v16163_v25 }
 0x370   : > { %v7038_v20 = vrot.slane %v7030_v35, %v16163_v25  ;;  %v7045_v2 = vrot.slane %v7031_v22, %v16163_v25  ;;  %v7054_v41 = vrot.slane %v7046_v38, %v16163_v25  ;;  %v7061_v63 = vrot.slane %v7047_v36, %v16163_v25  ;;  %21975 = vst [vmem:[#allocation45_spill] sm:$0xff] %v19349_v16 }
 0x371   : > { %21976 = vst [vmem:[#allocation66_spill] sm:$0xff] %v19351_v47  ;;  %v9106_v23 = vcombine.low %v6970_v13, %v6977_v55  ;;  %v15516_v51 = vcombine.high %v6970_v13, %v6977_v55  ;;  %v9122_v45 = vcombine.low %v6986_v52, %v6993_v31  ;;  %v15517_v10 = vcombine.high %v6986_v52, %v6993_v31 }
 0x372   : > { %v9174_v59 = vcombine.low %v7038_v20, %v7045_v2  ;;  %v15518_v56 = vcombine.high %v7038_v20, %v7045_v2  ;;  %v9190_v35 = vcombine.low %v7054_v41, %v7061_v63  ;;  %v15519_v53 = vcombine.high %v7054_v41, %v7061_v63  ;;  %10660 = vrot.lane.b32.xlu1 %v18233_v21, %s15695_s16  ;;  %v19365_v31 = vpop.permute.xlu1 %10432  ;;  %v19367_v20 = vpop.permute.xlu0 %10434 }
 0x373   : > { %v9113_v22 = vrot.slane %v9106_v23, %v16158_v15  ;;  %v9121_v38 = vrot.slane %v15516_v51, %v16158_v15  ;;  %v9129_v36 = vrot.slane %v9122_v45, %v16158_v15  ;;  %v9137_v16 = vrot.slane %v15517_v10, %v16158_v15  ;;  %21977 = vst [vmem:[#allocation35_spill] sm:$0xff] %v19365_v31 }
 0x374   : > { %v9181_v47 = vrot.slane %v9174_v59, %v16158_v15  ;;  %v9189_v13 = vrot.slane %v15518_v56, %v16158_v15  ;;  %v9197_v55 = vrot.slane %v9190_v35, %v16158_v15  ;;  %v9205_v52 = vrot.slane %v15519_v53, %v16158_v15  ;;  %21978 = vst [vmem:[#allocation58_spill] sm:$0xff] %v19367_v20 }
 0x375   : > { %10662 = vrot.lane.b32.xlu0 %v18239_v28, %s15695_s16  ;;  %v9138_v2 = vcombine.low %v9113_v22, %v9121_v38  ;;  %v9139_v41 = vcombine.high %v9113_v22, %v9121_v38  ;;  %v9154_v63 = vcombine.low %v9129_v36, %v9137_v16  ;;  %v9155_v23 = vcombine.high %v9129_v36, %v9137_v16 }
 0x376   : > { %v9206_v51 = vcombine.low %v9181_v47, %v9189_v13  ;;  %v9207_v45 = vcombine.high %v9181_v47, %v9189_v13  ;;  %v9222_v10 = vcombine.low %v9197_v55, %v9205_v52  ;;  %v9223_v59 = vcombine.high %v9197_v55, %v9205_v52  ;;  %10664 = vrot.lane.b32.xlu1 %v21917_v1, %s15695_s16  ;;  %v19381_v36 = vpop.permute.xlu1 %10436  ;;  %v19383_v13 = vpop.permute.xlu0 %10438 }
 0x377   : > { %v9146_v56 = vrot.slane %v9138_v2, %v16163_v25  ;;  %v9153_v35 = vrot.slane %v9139_v41, %v16163_v25  ;;  %v9162_v53 = vrot.slane %v9154_v63, %v16163_v25  ;;  %v9169_v31 = vrot.slane %v9155_v23, %v16163_v25  ;;  %21979 = vst [vmem:[#allocation5_spill] sm:$0xff] %v19381_v36 }
 0x378   : > { %v9214_v22 = vrot.slane %v9206_v51, %v16163_v25  ;;  %v9221_v16 = vrot.slane %v9207_v45, %v16163_v25  ;;  %v9230_v47 = vrot.slane %v9222_v10, %v16163_v25  ;;  %v9237_v38 = vrot.slane %v9223_v59, %v16163_v25  ;;  %21980 = vst [vmem:[#allocation37_spill] sm:$0xff] %v19383_v13  ;;  %v21981_v10 = vld [vmem:[#allocation64_spill] sm:$0xff] }
 0x379   : > { %10666 = vrot.lane.b32.xlu0 %v21918_v3, %s15695_s16  ;;  %v9170_v55 = vcombine.low %v9146_v56, %v9162_v53  ;;  %v9171_v52 = vcombine.high %v9146_v56, %v9162_v53  ;;  %v9172_v2 = vcombine.low %v9153_v35, %v9169_v31  ;;  %v9173_v41 = vcombine.high %v9153_v35, %v9169_v31  ;;  %v21982_v56 = vld [vmem:[#allocation33_spill] sm:$0xff] }
 0x37a   : > { %v9238_v63 = vcombine.low %v9214_v22, %v9230_v47  ;;  %v9239_v23 = vcombine.high %v9214_v22, %v9230_v47  ;;  %v9240_v51 = vcombine.low %v9221_v16, %v9237_v38  ;;  %v9241_v45 = vcombine.high %v9221_v16, %v9237_v38  ;;  %10668 = vrot.lane.b32.xlu1 %v21923_v26, %s15695_s16  ;;  %v21983_v22 = vld [vmem:[#allocation34_spill] sm:$0xff] }
 0x37b   : > { %10277 = vst.msk [vmem:[%s18673_s29 + $0x78] sm:$0xff] %vm5397_vm1, %v9170_v55  ;;  %10309 = vst.msk [vmem:[%s18673_s29 + $0x178] sm:$0xff] %vm5397_vm1, %v9171_v52  ;;  %v7082_v59 = vcombine.low %v21981_v10, %v19037_v29  ;;  %v7083_v31 = vcombine.high %v21981_v10, %v19037_v29  ;;  %v7150_v35 = vcombine.low %v21982_v56, %v19057_v60  ;;  %v21984_v47 = vld [vmem:[#allocation38_spill] sm:$0xff]  ;;  %v19421_v55 = vpop.permute.xlu1 %10440  ;;  %v19423_v52 = vpop.permute.xlu0 %10442  ;;  %v21987_v10 = vld [vmem:[#allocation20_spill] sm:$0xff] }
 0x37c   : > { %10341 = vst.msk [vmem:[%s18673_s29 + $0x278] sm:$0xff] %vm5397_vm1, %v9172_v2  ;;  %10373 = vst.msk [vmem:[%s18673_s29 + $0x378] sm:$0xff] %vm5397_vm1, %v9173_v41  ;;  %v7151_v53 = vcombine.high %v21982_v56, %v19057_v60  ;;  %v7218_v29 = vcombine.low %v21983_v22, %v19079_v24  ;;  %v7219_v16 = vcombine.high %v21983_v22, %v19079_v24  ;;  %v21988_v56 = vld [vmem:[#allocation21_spill] sm:$0xff] }
 0x37d   : > { %10278 = vst.msk [vmem:[%s18673_s29 + $0x80] sm:$0xff] %vm5397_vm1, %v9238_v63  ;;  %10310 = vst.msk [vmem:[%s18673_s29 + $0x180] sm:$0xff] %vm5397_vm1, %v9239_v23  ;;  %v7286_v60 = vcombine.low %v21984_v47, %v19083_v6  ;;  %v7287_v38 = vcombine.high %v21984_v47, %v19083_v6  ;;  %10670 = vrot.lane.b32.xlu0 %v21927_v4, %s15695_s16  ;;  %v7090_v2 = vrot.slane %v7082_v59, %v16158_v15  ;;  %v21989_v22 = vld [vmem:[#allocation25_spill] sm:$0xff]  ;;  %v21990_v47 = vld [vmem:[#allocation24_spill] sm:$0xff] }
 0x37e   : > { %10342 = vst.msk [vmem:[%s18673_s29 + $0x280] sm:$0xff] %vm5397_vm1, %v9240_v51  ;;  %10374 = vst.msk [vmem:[%s18673_s29 + $0x380] sm:$0xff] %vm5397_vm1, %v9241_v45  ;;  %v7097_v41 = vrot.slane %v7083_v31, %v16158_v15  ;;  %v7158_v63 = vrot.slane %v7150_v35, %v16158_v15  ;;  %v7165_v24 = vrot.slane %v7151_v53, %v16158_v15  ;;  %10672 = vrot.lane.b32.xlu1 %v21929_v8, %s15695_s16 }
 0x37f   : > { %21985 = vst [vmem:[#allocation40_spill] sm:$0xff] %v19421_v55  ;;  %21986 = vst [vmem:[#allocation41_spill] sm:$0xff] %v19423_v52  ;;  %v19432_v23 = vrot.slane %v7218_v29, %v16158_v15  ;;  %v19435_v6 = vrot.slane %v7219_v16, %v16158_v15  ;;  %v19438_v51 = vrot.slane %v7286_v60, %v16158_v15  ;;  %v19453_v52 = vpop.permute.xlu1 %10444  ;;  %v19455_v55 = vpop.permute.xlu0 %10446 }
 0x380   : > { %v19441_v45 = vrot.slane %v7287_v38, %v16158_v15  ;;  %v7098_v59 = vcombine.low %v21987_v10, %v7090_v2  ;;  %v7099_v31 = vcombine.high %v21987_v10, %v7090_v2  ;;  %v7114_v35 = vcombine.low %v21988_v56, %v7097_v41  ;;  %21991 = vst [vmem:[#allocation56_spill] sm:$0xff] %v19453_v52 }
 0x381   : > { %v7115_v53 = vcombine.high %v21988_v56, %v7097_v41  ;;  %v7166_v29 = vcombine.low %v21989_v22, %v7158_v63  ;;  %v7167_v16 = vcombine.high %v21989_v22, %v7158_v63  ;;  %v7182_v60 = vcombine.low %v21990_v47, %v7165_v24  ;;  %21992 = vst [vmem:[#allocation28_spill] sm:$0xff] %v19455_v55 }
 0x382   : > { %v7183_v38 = vcombine.high %v21990_v47, %v7165_v24  ;;  %10674 = vrot.lane.b32.xlu0 %v21930_v62, %s15695_s16  ;;  %v7106_v2 = vrot.slane %v7098_v59, %v16163_v25  ;;  %v7113_v41 = vrot.slane %v7099_v31, %v16163_v25  ;;  %v7122_v10 = vrot.slane %v7114_v35, %v16163_v25 }
 0x383   : > { %v7129_v56 = vrot.slane %v7115_v53, %v16163_v25  ;;  %v7174_v63 = vrot.slane %v7166_v29, %v16163_v25  ;;  %v7181_v22 = vrot.slane %v7167_v16, %v16163_v25  ;;  %v7190_v24 = vrot.slane %v7182_v60, %v16163_v25  ;;  %10676 = vrot.lane.b32.xlu1 %v21931_v58, %s15695_s16  ;;  %v19469_v53 = vpop.permute.xlu1 %10448  ;;  %v19471_v29 = vpop.permute.xlu0 %10450 }
 0x384   : > { %v7197_v47 = vrot.slane %v7183_v38, %v16163_v25  ;;  %v9242_v55 = vcombine.low %v7106_v2, %v7113_v41  ;;  %v15520_v52 = vcombine.high %v7106_v2, %v7113_v41  ;;  %21993 = vst [vmem:[#allocation57_spill] sm:$0xff] %v19469_v53  ;;  %21994 = vst [vmem:[#allocation44_spill] sm:$0xff] %v19471_v29 }
 0x385   : > { %v9258_v13 = vcombine.low %v7122_v10, %v7129_v56  ;;  %v15521_v36 = vcombine.high %v7122_v10, %v7129_v56  ;;  %v9310_v59 = vcombine.low %v7174_v63, %v7181_v22  ;;  %v15522_v31 = vcombine.high %v7174_v63, %v7181_v22 }
 0x386   : > { %v9326_v35 = vcombine.low %v7190_v24, %v7197_v47  ;;  %v15523_v20 = vcombine.high %v7190_v24, %v7197_v47  ;;  %v9249_v16 = vrot.slane %v9242_v55, %v16158_v15  ;;  %v9257_v60 = vrot.slane %v15520_v52, %v16158_v15 }
 0x387   : > { %v9265_v38 = vrot.slane %v9258_v13, %v16158_v15  ;;  %v9273_v2 = vrot.slane %v15521_v36, %v16158_v15  ;;  %v9317_v41 = vrot.slane %v9310_v59, %v16158_v15  ;;  %v9325_v10 = vrot.slane %v15522_v31, %v16158_v15  ;;  %v19481_v40 = vpop.permute.xlu1 %10452  ;;  %v19483_v13 = vpop.permute.xlu0 %10454 }
 0x388   : > { %v9333_v56 = vrot.slane %v9326_v35, %v16158_v15  ;;  %v9341_v63 = vrot.slane %v15523_v20, %v16158_v15  ;;  %v9274_v22 = vcombine.low %v9249_v16, %v9257_v60  ;;  %v9275_v24 = vcombine.high %v9249_v16, %v9257_v60  ;;  %21995 = vst [vmem:[#allocation59_spill] sm:$0xff] %v19481_v40 }
 0x389   : > { %v9290_v47 = vcombine.low %v9265_v38, %v9273_v2  ;;  %v9291_v29 = vcombine.high %v9265_v38, %v9273_v2  ;;  %v9342_v53 = vcombine.low %v9317_v41, %v9325_v10  ;;  %v9343_v55 = vcombine.high %v9317_v41, %v9325_v10  ;;  %21996 = vst [vmem:[#allocation17_spill] sm:$0xff] %v19483_v13 }
 0x38a   : > { %v9358_v58 = vcombine.low %v9333_v56, %v9341_v63  ;;  %v9359_v52 = vcombine.high %v9333_v56, %v9341_v63  ;;  %v9282_v36 = vrot.slane %v9274_v22, %v16163_v25  ;;  %v9289_v59 = vrot.slane %v9275_v24, %v16163_v25 }
 0x38b   : > { %v9298_v31 = vrot.slane %v9290_v47, %v16163_v25  ;;  %v9305_v20 = vrot.slane %v9291_v29, %v16163_v25  ;;  %v9350_v35 = vrot.slane %v9342_v53, %v16163_v25  ;;  %v9357_v16 = vrot.slane %v9343_v55, %v16163_v25  ;;  %v19493_v24 = vpop.permute.xlu1 %10456  ;;  %v19495_v47 = vpop.permute.xlu0 %10458 }
 0x38c   : > { %v9366_v60 = vrot.slane %v9358_v58, %v16163_v25  ;;  %v9373_v38 = vrot.slane %v9359_v52, %v16163_v25  ;;  %21997 = vst [vmem:[#allocation74_spill] sm:$0xff] %v19493_v24  ;;  %21998 = vst [vmem:[#allocation79_spill] sm:$0xff] %v19495_v47  ;;  %v21999_v58 = vld [vmem:[#allocation26_spill] sm:$0xff] }
 0x38d   : > { %v9306_v2 = vcombine.low %v9282_v36, %v9298_v31  ;;  %v9307_v41 = vcombine.high %v9282_v36, %v9298_v31  ;;  %v9308_v10 = vcombine.low %v9289_v59, %v9305_v20  ;;  %v9309_v56 = vcombine.high %v9289_v59, %v9305_v20  ;;  %v22000_v36 = vld [vmem:[#allocation47_spill] sm:$0xff]  ;;  %v22001_v20 = vld [vmem:[#allocation46_spill] sm:$0xff] }
 0x38e   : > { %v9374_v63 = vcombine.low %v9350_v35, %v9366_v60  ;;  %v9375_v29 = vcombine.high %v9350_v35, %v9366_v60  ;;  %v9376_v22 = vcombine.low %v9357_v16, %v9373_v38  ;;  %v9377_v53 = vcombine.high %v9357_v16, %v9373_v38  ;;  %v22002_v16 = vld [vmem:[#allocation29_spill] sm:$0xff] }
 0x38f   : > { %10279 = vst.msk [vmem:[%s18673_s29 + $0x88] sm:$0xff] %vm5397_vm1, %v9306_v2  ;;  %10311 = vst.msk [vmem:[%s18673_s29 + $0x188] sm:$0xff] %vm5397_vm1, %v9307_v41  ;;  %v7234_v55 = vcombine.low %v21999_v58, %v19432_v23  ;;  %v7235_v52 = vcombine.high %v21999_v58, %v19432_v23  ;;  %v7250_v59 = vcombine.low %v22000_v36, %v19435_v6 }
 0x390   : > { %10343 = vst.msk [vmem:[%s18673_s29 + $0x288] sm:$0xff] %vm5397_vm1, %v9308_v10  ;;  %10375 = vst.msk [vmem:[%s18673_s29 + $0x388] sm:$0xff] %vm5397_vm1, %v9309_v56  ;;  %v7251_v31 = vcombine.high %v22000_v36, %v19435_v6  ;;  %v7302_v35 = vcombine.low %v22001_v20, %v19438_v51  ;;  %v7303_v23 = vcombine.high %v22001_v20, %v19438_v51 }
 0x391   : > { %10280 = vst.msk [vmem:[%s18673_s29 + $0x90] sm:$0xff] %vm5397_vm1, %v9374_v63  ;;  %10312 = vst.msk [vmem:[%s18673_s29 + $0x190] sm:$0xff] %vm5397_vm1, %v9375_v29  ;;  %v7318_v60 = vcombine.low %v22002_v16, %v19441_v45  ;;  %v7319_v6 = vcombine.high %v22002_v16, %v19441_v45  ;;  %v7242_v38 = vrot.slane %v7234_v55, %v16163_v25 }
 0x392   : > { %10344 = vst.msk [vmem:[%s18673_s29 + $0x290] sm:$0xff] %vm5397_vm1, %v9376_v22  ;;  %10376 = vst.msk [vmem:[%s18673_s29 + $0x390] sm:$0xff] %vm5397_vm1, %v9377_v53  ;;  %v7249_v2 = vrot.slane %v7235_v52, %v16163_v25  ;;  %v7258_v41 = vrot.slane %v7250_v59, %v16163_v25  ;;  %v7265_v10 = vrot.slane %v7251_v31, %v16163_v25  ;;  %v19537_v22 = vpop.permute.xlu1 %10460  ;;  %v19539_v53 = vpop.permute.xlu0 %10462 }
 0x393   : > { %v7310_v56 = vrot.slane %v7302_v35, %v16163_v25  ;;  %v7317_v63 = vrot.slane %v7303_v23, %v16163_v25  ;;  %v7326_v51 = vrot.slane %v7318_v60, %v16163_v25  ;;  %v7333_v29 = vrot.slane %v7319_v6, %v16163_v25  ;;  %22003 = vst [vmem:[#allocation85_spill] sm:$0xff] %v19537_v22 }
 0x394   : > { %22004 = vst [vmem:[#allocation86_spill] sm:$0xff] %v19539_v53  ;;  %v9378_v45 = vcombine.low %v7242_v38, %v7249_v2  ;;  %v15524_v58 = vcombine.high %v7242_v38, %v7249_v2  ;;  %v9394_v55 = vcombine.low %v7258_v41, %v7265_v10  ;;  %v15525_v52 = vcombine.high %v7258_v41, %v7265_v10 }
 0x395   : > { %v9446_v36 = vcombine.low %v7310_v56, %v7317_v63  ;;  %v15526_v59 = vcombine.high %v7310_v56, %v7317_v63  ;;  %v9462_v20 = vcombine.low %v7326_v51, %v7333_v29  ;;  %v15527_v31 = vcombine.high %v7326_v51, %v7333_v29 }
 0x396   : > { %v9385_v35 = vrot.slane %v9378_v45, %v16158_v15  ;;  %v9393_v23 = vrot.slane %v15524_v58, %v16158_v15  ;;  %v9401_v16 = vrot.slane %v9394_v55, %v16158_v15  ;;  %v9409_v60 = vrot.slane %v15525_v52, %v16158_v15  ;;  %v19549_v41 = vpop.permute.xlu1 %10464  ;;  %v19551_v10 = vpop.permute.xlu0 %10466 }
 0x397   : > { %v9453_v6 = vrot.slane %v9446_v36, %v16158_v15  ;;  %v9461_v53 = vrot.slane %v15526_v59, %v16158_v15  ;;  %v9469_v38 = vrot.slane %v9462_v20, %v16158_v15  ;;  %v9477_v2 = vrot.slane %v15527_v31, %v16158_v15  ;;  %22005 = vst [vmem:[#allocation22_spill] sm:$0xff] %v19549_v41 }
 0x398   : > { %22006 = vst [vmem:[#allocation61_spill] sm:$0xff] %v19551_v10  ;;  %v9410_v56 = vcombine.low %v9385_v35, %v9393_v23  ;;  %v9411_v63 = vcombine.high %v9385_v35, %v9393_v23  ;;  %v9426_v51 = vcombine.low %v9401_v16, %v9409_v60  ;;  %v9427_v29 = vcombine.high %v9401_v16, %v9409_v60 }
 0x399   : > { %v9478_v45 = vcombine.low %v9453_v6, %v9461_v53  ;;  %v9479_v58 = vcombine.high %v9453_v6, %v9461_v53  ;;  %v9494_v55 = vcombine.low %v9469_v38, %v9477_v2  ;;  %v9495_v52 = vcombine.high %v9469_v38, %v9477_v2 }
 0x39a   : > { %v9418_v36 = vrot.slane %v9410_v56, %v16163_v25  ;;  %v9425_v59 = vrot.slane %v9411_v63, %v16163_v25  ;;  %v9434_v20 = vrot.slane %v9426_v51, %v16163_v25  ;;  %v9441_v31 = vrot.slane %v9427_v29, %v16163_v25  ;;  %v19561_v16 = vpop.permute.xlu1 %10468  ;;  %v19563_v60 = vpop.permute.xlu0 %10470 }
 0x39b   : > { %v9486_v10 = vrot.slane %v9478_v45, %v16163_v25  ;;  %v9493_v35 = vrot.slane %v9479_v58, %v16163_v25  ;;  %v9502_v53 = vrot.slane %v9494_v55, %v16163_v25  ;;  %v9509_v23 = vrot.slane %v9495_v52, %v16163_v25  ;;  %22007 = vst [vmem:[#allocation87_spill] sm:$0xff] %v19561_v16  ;;  %v22009_v58 = vld [vmem:[#allocation39_spill] sm:$0xff] }
 0x39c   : > { %22008 = vst [vmem:[#allocation55_spill] sm:$0xff] %v19563_v60  ;;  %v9442_v6 = vcombine.low %v9418_v36, %v9434_v20  ;;  %v9443_v38 = vcombine.high %v9418_v36, %v9434_v20  ;;  %v9444_v2 = vcombine.low %v9425_v59, %v9441_v31  ;;  %v9445_v56 = vcombine.high %v9425_v59, %v9441_v31  ;;  %v22010_v36 = vld [vmem:[#allocation43_spill] sm:$0xff]  ;;  %v22011_v20 = vld [vmem:[#allocation42_spill] sm:$0xff] }
 0x39d   : > { %v9510_v63 = vcombine.low %v9486_v10, %v9502_v53  ;;  %v9511_v51 = vcombine.high %v9486_v10, %v9502_v53  ;;  %v9512_v29 = vcombine.low %v9493_v35, %v9509_v23  ;;  %v9513_v45 = vcombine.high %v9493_v35, %v9509_v23  ;;  %v22012_v35 = vld [vmem:[#allocation67_spill] sm:$0xff] }
 0x39e   : > { %10281 = vst.msk [vmem:[%s18673_s29 + $0x98] sm:$0xff] %vm5397_vm1, %v9442_v6  ;;  %10313 = vst.msk [vmem:[%s18673_s29 + $0x198] sm:$0xff] %vm5397_vm1, %v9443_v38  ;;  %v7354_v55 = vcombine.low %v22009_v58, %v19097_v61  ;;  %v7355_v52 = vcombine.high %v22009_v58, %v19097_v61  ;;  %v7422_v59 = vcombine.low %v22010_v36, %v19109_v12  ;;  %v19597_v23 = vpop.permute.xlu1 %10472  ;;  %v19599_v6 = vpop.permute.xlu0 %10474 }
 0x39f   : > { %10345 = vst.msk [vmem:[%s18673_s29 + $0x298] sm:$0xff] %vm5397_vm1, %v9444_v2  ;;  %10377 = vst.msk [vmem:[%s18673_s29 + $0x398] sm:$0xff] %vm5397_vm1, %v9445_v56  ;;  %v7423_v10 = vcombine.high %v22010_v36, %v19109_v12  ;;  %v7490_v31 = vcombine.low %v22011_v20, %v19147_v14  ;;  %v7491_v61 = vcombine.high %v22011_v20, %v19147_v14 }
 0x3a0   : > { %10282 = vst.msk [vmem:[%s18673_s29 + $0xa0] sm:$0xff] %vm5397_vm1, %v9510_v63  ;;  %10314 = vst.msk [vmem:[%s18673_s29 + $0x1a0] sm:$0xff] %vm5397_vm1, %v9511_v51  ;;  %v7558_v53 = vcombine.low %v22012_v35, %v19159_v43  ;;  %v7559_v12 = vcombine.high %v22012_v35, %v19159_v43  ;;  %v7362_v38 = vrot.slane %v7354_v55, %v16158_v15 }
 0x3a1   : > { %10346 = vst.msk [vmem:[%s18673_s29 + $0x2a0] sm:$0xff] %vm5397_vm1, %v9512_v29  ;;  %10378 = vst.msk [vmem:[%s18673_s29 + $0x3a0] sm:$0xff] %vm5397_vm1, %v9513_v45  ;;  %v7369_v2 = vrot.slane %v7355_v52, %v16158_v15  ;;  %v7430_v56 = vrot.slane %v7422_v59, %v16158_v15  ;;  %v7437_v63 = vrot.slane %v7423_v10, %v16158_v15  ;;  %v22015_v45 = vld [vmem:[#allocation30_spill] sm:$0xff]  ;;  %v22016_v52 = vld [vmem:[#allocation31_spill] sm:$0xff] }
 0x3a2   : > { %22013 = vst [vmem:[#allocation50_spill] sm:$0xff] %v19597_v23  ;;  %22014 = vst [vmem:[#allocation32_spill] sm:$0xff] %v19599_v6  ;;  %v19606_v14 = vrot.slane %v7490_v31, %v16158_v15  ;;  %v19609_v51 = vrot.slane %v7491_v61, %v16158_v15  ;;  %v19612_v43 = vrot.slane %v7558_v53, %v16158_v15  ;;  %v22017_v10 = vld [vmem:[#allocation36_spill] sm:$0xff]  ;;  %v22018_v61 = vld [vmem:[#allocation49_spill] sm:$0xff]  ;;  %v19625_v6 = vpop.permute.xlu1 %10476 }
 0x3a3   : > { %v19615_v29 = vrot.slane %v7559_v12, %v16158_v15  ;;  %v7370_v58 = vcombine.low %v22015_v45, %v7362_v38  ;;  %v7371_v55 = vcombine.high %v22015_v45, %v7362_v38  ;;  %v7386_v36 = vcombine.low %v22016_v52, %v7369_v2  ;;  %22019 = vst [vmem:[#allocation93_spill] sm:$0xff] %v19625_v6  ;;  %v19627_v12 = vpop.permute.xlu0 %10478 }
 0x3a4   : > { %v7387_v59 = vcombine.high %v22016_v52, %v7369_v2  ;;  %v7438_v20 = vcombine.low %v22017_v10, %v7430_v56  ;;  %v7439_v31 = vcombine.high %v22017_v10, %v7430_v56  ;;  %v7454_v35 = vcombine.low %v22018_v61, %v7437_v63  ;;  %22020 = vst [vmem:[#allocation94_spill] sm:$0xff] %v19627_v12 }
 0x3a5   : > { %v7455_v53 = vcombine.high %v22018_v61, %v7437_v63  ;;  %v7378_v23 = vrot.slane %v7370_v58, %v16163_v25  ;;  %v7385_v38 = vrot.slane %v7371_v55, %v16163_v25  ;;  %v7394_v45 = vrot.slane %v7386_v36, %v16163_v25 }
 0x3a6   : > { %v7401_v2 = vrot.slane %v7387_v59, %v16163_v25  ;;  %v7446_v52 = vrot.slane %v7438_v20, %v16163_v25  ;;  %v7453_v56 = vrot.slane %v7439_v31, %v16163_v25  ;;  %v7462_v10 = vrot.slane %v7454_v35, %v16163_v25  ;;  %v19637_v22 = vpop.permute.xlu1 %10480 }
 0x3a7   : > { %v7469_v63 = vrot.slane %v7455_v53, %v16163_v25  ;;  %v9514_v61 = vcombine.low %v7378_v23, %v7385_v38  ;;  %v15528_v6 = vcombine.high %v7378_v23, %v7385_v38  ;;  %22021 = vst [vmem:[#allocation16_spill] sm:$0xff] %v19637_v22  ;;  %v19639_v36 = vpop.permute.xlu0 %10482 }
 0x3a8   : > { %v9530_v60 = vcombine.low %v7394_v45, %v7401_v2  ;;  %v15529_v12 = vcombine.high %v7394_v45, %v7401_v2  ;;  %v9582_v16 = vcombine.low %v7446_v52, %v7453_v56  ;;  %v15530_v58 = vcombine.high %v7446_v52, %v7453_v56  ;;  %22022 = vst [vmem:[#allocation95_spill] sm:$0xff] %v19639_v36 }
 0x3a9   : > { %v9598_v41 = vcombine.low %v7462_v10, %v7469_v63  ;;  %v15531_v55 = vcombine.high %v7462_v10, %v7469_v63  ;;  %v9521_v59 = vrot.slane %v9514_v61, %v16158_v15  ;;  %v9529_v20 = vrot.slane %v15528_v6, %v16158_v15 }
 0x3aa   : > { %v9537_v31 = vrot.slane %v9530_v60, %v16158_v15  ;;  %v9545_v35 = vrot.slane %v15529_v12, %v16158_v15  ;;  %v9589_v23 = vrot.slane %v9582_v16, %v16158_v15  ;;  %v9597_v53 = vrot.slane %v15530_v58, %v16158_v15 }
 0x3ab   : > { %v9605_v38 = vrot.slane %v9598_v41, %v16158_v15  ;;  %v9613_v45 = vrot.slane %v15531_v55, %v16158_v15  ;;  %v9546_v2 = vcombine.low %v9521_v59, %v9529_v20  ;;  %v9547_v52 = vcombine.high %v9521_v59, %v9529_v20 }
 0x3ac   : > { %v9562_v56 = vcombine.low %v9537_v31, %v9545_v35  ;;  %v9563_v10 = vcombine.high %v9537_v31, %v9545_v35  ;;  %v9614_v63 = vcombine.low %v9589_v23, %v9597_v53  ;;  %v9615_v61 = vcombine.high %v9589_v23, %v9597_v53  ;;  %v19657_v31 = vpop.permute.xlu1 %10484  ;;  %v19659_v35 = vpop.permute.xlu0 %10518 }
 0x3ad   : > { %v9630_v36 = vcombine.low %v9605_v38, %v9613_v45  ;;  %v9631_v6 = vcombine.high %v9605_v38, %v9613_v45  ;;  %v9554_v60 = vrot.slane %v9546_v2, %v16163_v25  ;;  %v9561_v12 = vrot.slane %v9547_v52, %v16163_v25  ;;  %22023 = vst [vmem:[#allocation18_spill] sm:$0xff] %v19657_v31 }
 0x3ae   : > { %v9570_v16 = vrot.slane %v9562_v56, %v16163_v25  ;;  %v9577_v58 = vrot.slane %v9563_v10, %v16163_v25  ;;  %v9622_v41 = vrot.slane %v9614_v63, %v16163_v25  ;;  %v9629_v55 = vrot.slane %v9615_v61, %v16163_v25 }
 0x3af   : > { %v9638_v59 = vrot.slane %v9630_v36, %v16163_v25  ;;  %v9645_v20 = vrot.slane %v9631_v6, %v16163_v25  ;;  %v22024_v36 = vld [vmem:[#allocation48_spill] sm:$0xff] }
 0x3b0   : > { %v9578_v23 = vcombine.low %v9554_v60, %v9570_v16  ;;  %v9579_v53 = vcombine.high %v9554_v60, %v9570_v16  ;;  %v9580_v38 = vcombine.low %v9561_v12, %v9577_v58  ;;  %v9581_v45 = vcombine.high %v9561_v12, %v9577_v58  ;;  %v22025_v6 = vld [vmem:[#allocation60_spill] sm:$0xff]  ;;  %v22026_v16 = vld [vmem:[#allocation62_spill] sm:$0xff] }
 0x3b1   : > { %v9646_v2 = vcombine.low %v9622_v41, %v9638_v59  ;;  %v9647_v52 = vcombine.high %v9622_v41, %v9638_v59  ;;  %v9648_v56 = vcombine.low %v9629_v55, %v9645_v20  ;;  %v9649_v10 = vcombine.high %v9629_v55, %v9645_v20  ;;  %v22027_v41 = vld [vmem:[#allocation63_spill] sm:$0xff] }
 0x3b2   : > { %10283 = vst.msk [vmem:[%s18673_s29 + $0xa8] sm:$0xff] %vm5397_vm1, %v9578_v23  ;;  %10315 = vst.msk [vmem:[%s18673_s29 + $0x1a8] sm:$0xff] %vm5397_vm1, %v9579_v53  ;;  %v7506_v63 = vcombine.low %v22024_v36, %v19606_v14  ;;  %v7507_v61 = vcombine.high %v22024_v36, %v19606_v14  ;;  %v7522_v60 = vcombine.low %v22025_v6, %v19609_v51 }
 0x3b3   : > { %10347 = vst.msk [vmem:[%s18673_s29 + $0x2a8] sm:$0xff] %vm5397_vm1, %v9580_v38  ;;  %10379 = vst.msk [vmem:[%s18673_s29 + $0x3a8] sm:$0xff] %vm5397_vm1, %v9581_v45  ;;  %v7523_v12 = vcombine.high %v22025_v6, %v19609_v51  ;;  %v7574_v58 = vcombine.low %v22026_v16, %v19612_v43  ;;  %v7575_v14 = vcombine.high %v22026_v16, %v19612_v43 }
 0x3b4   : > { %10284 = vst.msk [vmem:[%s18673_s29 + $0xb0] sm:$0xff] %vm5397_vm1, %v9646_v2  ;;  %10316 = vst.msk [vmem:[%s18673_s29 + $0x1b0] sm:$0xff] %vm5397_vm1, %v9647_v52  ;;  %v7590_v55 = vcombine.low %v22027_v41, %v19615_v29  ;;  %v7591_v51 = vcombine.high %v22027_v41, %v19615_v29  ;;  %v7514_v59 = vrot.slane %v7506_v63, %v16163_v25  ;;  %v19701_v52 = vpop.permute.xlu1 %10520 }
 0x3b5   : > { %10348 = vst.msk [vmem:[%s18673_s29 + $0x2b0] sm:$0xff] %vm5397_vm1, %v9648_v56  ;;  %10380 = vst.msk [vmem:[%s18673_s29 + $0x3b0] sm:$0xff] %vm5397_vm1, %v9649_v10  ;;  %v7521_v20 = vrot.slane %v7507_v61, %v16163_v25  ;;  %v7530_v23 = vrot.slane %v7522_v60, %v16163_v25  ;;  %v7537_v53 = vrot.slane %v7523_v12, %v16163_v25  ;;  %v19703_v56 = vpop.permute.xlu0 %10522 }
 0x3b6   : > { %v7582_v38 = vrot.slane %v7574_v58, %v16163_v25  ;;  %v7589_v45 = vrot.slane %v7575_v14, %v16163_v25  ;;  %v7598_v43 = vrot.slane %v7590_v55, %v16163_v25  ;;  %v7605_v2 = vrot.slane %v7591_v51, %v16163_v25 }
 0x3b7   : > { %v9650_v29 = vcombine.low %v7514_v59, %v7521_v20  ;;  %v15532_v10 = vcombine.high %v7514_v59, %v7521_v20  ;;  %v9666_v36 = vcombine.low %v7530_v23, %v7537_v53  ;;  %v15533_v63 = vcombine.high %v7530_v23, %v7537_v53 }
 0x3b8   : > { %v9718_v61 = vcombine.low %v7582_v38, %v7589_v45  ;;  %v15534_v6 = vcombine.high %v7582_v38, %v7589_v45  ;;  %v9734_v60 = vcombine.low %v7598_v43, %v7605_v2  ;;  %v15535_v12 = vcombine.high %v7598_v43, %v7605_v2  ;;  %v19713_v31 = vpop.permute.xlu1 %10524 }
 0x3b9   : > { %v9657_v16 = vrot.slane %v9650_v29, %v16158_v15  ;;  %v9665_v58 = vrot.slane %v15532_v10, %v16158_v15  ;;  %v9673_v14 = vrot.slane %v9666_v36, %v16158_v15  ;;  %v9681_v41 = vrot.slane %v15533_v63, %v16158_v15  ;;  %v19715_v36 = vpop.permute.xlu0 %10526 }
 0x3ba   : > { %v9725_v55 = vrot.slane %v9718_v61, %v16158_v15  ;;  %v9733_v51 = vrot.slane %v15534_v6, %v16158_v15  ;;  %v9741_v59 = vrot.slane %v9734_v60, %v16158_v15  ;;  %v9749_v20 = vrot.slane %v15535_v12, %v16158_v15 }
 0x3bb   : > { %v9682_v23 = vcombine.low %v9657_v16, %v9665_v58  ;;  %v9683_v53 = vcombine.high %v9657_v16, %v9665_v58  ;;  %v9698_v38 = vcombine.low %v9673_v14, %v9681_v41  ;;  %v9699_v45 = vcombine.high %v9673_v14, %v9681_v41 }
 0x3bc   : > { %v9750_v43 = vcombine.low %v9725_v55, %v9733_v51  ;;  %v9751_v2 = vcombine.high %v9725_v55, %v9733_v51  ;;  %v9766_v29 = vcombine.low %v9741_v59, %v9749_v20  ;;  %v9767_v10 = vcombine.high %v9741_v59, %v9749_v20 }
 0x3bd   : > { %v9690_v63 = vrot.slane %v9682_v23, %v16163_v25  ;;  %v9697_v61 = vrot.slane %v9683_v53, %v16163_v25  ;;  %v9706_v6 = vrot.slane %v9698_v38, %v16163_v25  ;;  %v9713_v60 = vrot.slane %v9699_v45, %v16163_v25  ;;  %v22028_v45 = vld [vmem:[#allocation68_spill] sm:$0xff] }
 0x3be   : > { %v9758_v12 = vrot.slane %v9750_v43, %v16163_v25  ;;  %v9765_v16 = vrot.slane %v9751_v2, %v16163_v25  ;;  %v9774_v58 = vrot.slane %v9766_v29, %v16163_v25  ;;  %v9781_v14 = vrot.slane %v9767_v10, %v16163_v25  ;;  %v22029_v29 = vld [vmem:[#allocation70_spill] sm:$0xff] }
 0x3bf   : > { %v9714_v41 = vcombine.low %v9690_v63, %v9706_v6  ;;  %v9715_v55 = vcombine.high %v9690_v63, %v9706_v6  ;;  %v9716_v51 = vcombine.low %v9697_v61, %v9713_v60  ;;  %v9717_v59 = vcombine.high %v9697_v61, %v9713_v60  ;;  %v22030_v61 = vld [vmem:[#allocation83_spill] sm:$0xff] }
 0x3c0   : > { %v9782_v20 = vcombine.low %v9758_v12, %v9774_v58  ;;  %v9783_v23 = vcombine.high %v9758_v12, %v9774_v58  ;;  %v9784_v53 = vcombine.low %v9765_v16, %v9781_v14  ;;  %v9785_v38 = vcombine.high %v9765_v16, %v9781_v14  ;;  %v22031_v60 = vld [vmem:[#allocation23_spill] sm:$0xff]  ;;  %v19757_v16 = vpop.permute.xlu1 %10528  ;;  %v19759_v58 = vpop.permute.xlu0 %10530 }
 0x3c1   : > { %10285 = vst.msk [vmem:[%s18673_s29 + $0xb8] sm:$0xff] %vm5397_vm1, %v9714_v41  ;;  %10317 = vst.msk [vmem:[%s18673_s29 + $0x1b8] sm:$0xff] %vm5397_vm1, %v9715_v55  ;;  %v7626_v43 = vcombine.low %v22028_v45, %v19173_v19  ;;  %v7627_v2 = vcombine.high %v22028_v45, %v19173_v19  ;;  %v7694_v10 = vcombine.low %v22029_v29, %v19177_v7  ;;  %v22033_v45 = vld [vmem:[#allocation72_spill] sm:$0xff] }
 0x3c2   : > { %10349 = vst.msk [vmem:[%s18673_s29 + $0x2b8] sm:$0xff] %vm5397_vm1, %v9716_v51  ;;  %10381 = vst.msk [vmem:[%s18673_s29 + $0x3b8] sm:$0xff] %vm5397_vm1, %v9717_v59  ;;  %v7695_v63 = vcombine.high %v22029_v29, %v19177_v7  ;;  %v7762_v6 = vcombine.low %v22030_v61, %v19191_v5  ;;  %v7763_v19 = vcombine.high %v22030_v61, %v19191_v5  ;;  %v22034_v29 = vld [vmem:[#allocation80_spill] sm:$0xff]  ;;  %v22035_v61 = vld [vmem:[#allocation81_spill] sm:$0xff] }
 0x3c3   : > { %10286 = vst.msk [vmem:[%s18673_s29 + $0xc0] sm:$0xff] %vm5397_vm1, %v9782_v20  ;;  %10318 = vst.msk [vmem:[%s18673_s29 + $0x1c0] sm:$0xff] %vm5397_vm1, %v9783_v23  ;;  %v7830_v12 = vcombine.low %v22031_v60, %v19227_v11  ;;  %v7831_v7 = vcombine.high %v22031_v60, %v19227_v11  ;;  %v7634_v14 = vrot.slane %v7626_v43, %v16158_v15  ;;  %v22032_v23 = vld [vmem:[#allocation71_spill] sm:$0xff] }
 0x3c4   : > { %10350 = vst.msk [vmem:[%s18673_s29 + $0x2c0] sm:$0xff] %vm5397_vm1, %v9784_v53  ;;  %10382 = vst.msk [vmem:[%s18673_s29 + $0x3c0] sm:$0xff] %vm5397_vm1, %v9785_v38  ;;  %v7641_v41 = vrot.slane %v7627_v2, %v16158_v15  ;;  %v7702_v55 = vrot.slane %v7694_v10, %v16158_v15  ;;  %v7709_v51 = vrot.slane %v7695_v63, %v16158_v15  ;;  %v19795_v22 = vpop.permute.xlu0 %10534 }
 0x3c5   : > { %v19766_v5 = vrot.slane %v7762_v6, %v16158_v15  ;;  %v19769_v59 = vrot.slane %v7763_v19, %v16158_v15  ;;  %v19772_v11 = vrot.slane %v7830_v12, %v16158_v15  ;;  %v19775_v20 = vrot.slane %v7831_v7, %v16158_v15 }
 0x3c6   : > { %v7642_v53 = vcombine.low %v22032_v23, %v7634_v14  ;;  %v7643_v38 = vcombine.high %v22032_v23, %v7634_v14  ;;  %v7658_v43 = vcombine.low %v22033_v45, %v7641_v41  ;;  %v7659_v2 = vcombine.high %v22033_v45, %v7641_v41 }
 0x3c7   : > { %v7710_v10 = vcombine.low %v22034_v29, %v7702_v55  ;;  %v7711_v63 = vcombine.high %v22034_v29, %v7702_v55  ;;  %v7726_v6 = vcombine.low %v22035_v61, %v7709_v51  ;;  %v7727_v19 = vcombine.high %v22035_v61, %v7709_v51  ;;  %v19793_v29 = vpop.permute.xlu1 %10532 }
 0x3c8   : > { %v7650_v60 = vrot.slane %v7642_v53, %v16163_v25  ;;  %v7657_v12 = vrot.slane %v7643_v38, %v16163_v25  ;;  %v7666_v7 = vrot.slane %v7658_v43, %v16163_v25  ;;  %v7673_v14 = vrot.slane %v7659_v2, %v16163_v25 }
 0x3c9   : > { %v7718_v23 = vrot.slane %v7710_v10, %v16163_v25  ;;  %v7725_v41 = vrot.slane %v7711_v63, %v16163_v25  ;;  %v7734_v45 = vrot.slane %v7726_v6, %v16163_v25  ;;  %v7741_v55 = vrot.slane %v7727_v19, %v16163_v25 }
 0x3ca   : > { %v9786_v51 = vcombine.low %v7650_v60, %v7657_v12  ;;  %v15536_v53 = vcombine.high %v7650_v60, %v7657_v12  ;;  %v9802_v61 = vcombine.low %v7666_v7, %v7673_v14  ;;  %v15537_v38 = vcombine.high %v7666_v7, %v7673_v14 }
 0x3cb   : > { %v9854_v47 = vcombine.low %v7718_v23, %v7725_v41  ;;  %v15538_v43 = vcombine.high %v7718_v23, %v7725_v41  ;;  %v9870_v24 = vcombine.low %v7734_v45, %v7741_v55  ;;  %v15539_v2 = vcombine.high %v7734_v45, %v7741_v55  ;;  %v19805_v32 = vpop.permute.xlu1 %10536 }
 0x3cc   : > { %v9793_v10 = vrot.slane %v9786_v51, %v16158_v15  ;;  %v9801_v63 = vrot.slane %v15536_v53, %v16158_v15  ;;  %v9809_v6 = vrot.slane %v9802_v61, %v16158_v15  ;;  %v9817_v19 = vrot.slane %v15537_v38, %v16158_v15  ;;  %v19807_v61 = vpop.permute.xlu0 %10538 }
 0x3cd   : > { %v9861_v13 = vrot.slane %v9854_v47, %v16158_v15  ;;  %v9869_v40 = vrot.slane %v15538_v43, %v16158_v15  ;;  %v9877_v60 = vrot.slane %v9870_v24, %v16158_v15  ;;  %v9885_v12 = vrot.slane %v15539_v2, %v16158_v15 }
 0x3ce   : > { %v9818_v7 = vcombine.low %v9793_v10, %v9801_v63  ;;  %v9819_v14 = vcombine.high %v9793_v10, %v9801_v63  ;;  %v9834_v23 = vcombine.low %v9809_v6, %v9817_v19  ;;  %v9835_v41 = vcombine.high %v9809_v6, %v9817_v19 }
 0x3cf   : > { %v9886_v45 = vcombine.low %v9861_v13, %v9869_v40  ;;  %v9887_v55 = vcombine.high %v9861_v13, %v9869_v40  ;;  %v9902_v51 = vcombine.low %v9877_v60, %v9885_v12  ;;  %v9903_v53 = vcombine.high %v9877_v60, %v9885_v12 }
 0x3d0   : > { %v9826_v47 = vrot.slane %v9818_v7, %v16163_v25  ;;  %v9833_v38 = vrot.slane %v9819_v14, %v16163_v25  ;;  %v9842_v24 = vrot.slane %v9834_v23, %v16163_v25  ;;  %v9849_v43 = vrot.slane %v9835_v41, %v16163_v25  ;;  %v22036_v41 = vld [vmem:[#allocation82_spill] sm:$0xff] }
 0x3d1   : > { %v9894_v40 = vrot.slane %v9886_v45, %v16163_v25  ;;  %v9901_v13 = vrot.slane %v9887_v55, %v16163_v25  ;;  %v9910_v2 = vrot.slane %v9902_v51, %v16163_v25  ;;  %v9917_v10 = vrot.slane %v9903_v53, %v16163_v25  ;;  %v22037_v51 = vld [vmem:[#allocation84_spill] sm:$0xff] }
 0x3d2   : > { %v9850_v63 = vcombine.low %v9826_v47, %v9842_v24  ;;  %v9851_v6 = vcombine.high %v9826_v47, %v9842_v24  ;;  %v9852_v19 = vcombine.low %v9833_v38, %v9849_v43  ;;  %v9853_v60 = vcombine.high %v9833_v38, %v9849_v43  ;;  %v22038_v38 = vld [vmem:[#allocation89_spill] sm:$0xff]  ;;  %v22039_v43 = vld [vmem:[#allocation90_spill] sm:$0xff] }
 0x3d3   : > { %v9918_v12 = vcombine.low %v9894_v40, %v9910_v2  ;;  %v9919_v7 = vcombine.high %v9894_v40, %v9910_v2  ;;  %v9920_v14 = vcombine.low %v9901_v13, %v9917_v10  ;;  %v9921_v23 = vcombine.high %v9901_v13, %v9917_v10  ;;  %v19849_v13 = vpop.permute.xlu1 %10540  ;;  %v19851_v2 = vpop.permute.xlu0 %10542 }
 0x3d4   : > { %10287 = vst.msk [vmem:[%s18673_s29 + $0xc8] sm:$0xff] %vm5397_vm1, %v9850_v63  ;;  %10319 = vst.msk [vmem:[%s18673_s29 + $0x1c8] sm:$0xff] %vm5397_vm1, %v9851_v6  ;;  %v7778_v45 = vcombine.low %v22036_v41, %v19766_v5  ;;  %v7779_v55 = vcombine.high %v22036_v41, %v19766_v5  ;;  %v7794_v53 = vcombine.low %v22037_v51, %v19769_v59 }
 0x3d5   : > { %10351 = vst.msk [vmem:[%s18673_s29 + $0x2c8] sm:$0xff] %vm5397_vm1, %v9852_v19  ;;  %10383 = vst.msk [vmem:[%s18673_s29 + $0x3c8] sm:$0xff] %vm5397_vm1, %v9853_v60  ;;  %v7795_v47 = vcombine.high %v22037_v51, %v19769_v59  ;;  %v7846_v24 = vcombine.low %v22038_v38, %v19772_v11  ;;  %v7847_v5 = vcombine.high %v22038_v38, %v19772_v11 }
 0x3d6   : > { %10288 = vst.msk [vmem:[%s18673_s29 + $0xd0] sm:$0xff] %vm5397_vm1, %v9918_v12  ;;  %10320 = vst.msk [vmem:[%s18673_s29 + $0x1d0] sm:$0xff] %vm5397_vm1, %v9919_v7  ;;  %v7862_v40 = vcombine.low %v22039_v43, %v19775_v20  ;;  %v7863_v59 = vcombine.high %v22039_v43, %v19775_v20  ;;  %v7786_v10 = vrot.slane %v7778_v45, %v16163_v25 }
 0x3d7   : > { %10352 = vst.msk [vmem:[%s18673_s29 + $0x2d0] sm:$0xff] %vm5397_vm1, %v9920_v14  ;;  %10384 = vst.msk [vmem:[%s18673_s29 + $0x3d0] sm:$0xff] %vm5397_vm1, %v9921_v23  ;;  %v7793_v63 = vrot.slane %v7779_v55, %v16163_v25  ;;  %v7802_v6 = vrot.slane %v7794_v53, %v16163_v25  ;;  %v7809_v19 = vrot.slane %v7795_v47, %v16163_v25 }
 0x3d8   : > { %v7854_v11 = vrot.slane %v7846_v24, %v16163_v25  ;;  %v7861_v60 = vrot.slane %v7847_v5, %v16163_v25  ;;  %v7870_v12 = vrot.slane %v7862_v40, %v16163_v25  ;;  %v7877_v20 = vrot.slane %v7863_v59, %v16163_v25 }
 0x3d9   : > { %v9922_v7 = vcombine.low %v7786_v10, %v7793_v63  ;;  %v15540_v14 = vcombine.high %v7786_v10, %v7793_v63  ;;  %v9938_v23 = vcombine.low %v7802_v6, %v7809_v19  ;;  %v15541_v41 = vcombine.high %v7802_v6, %v7809_v19  ;;  %v19869_v63 = vpop.permute.xlu1 %10544  ;;  %v19871_v6 = vpop.permute.xlu0 %10546 }
 0x3da   : > { %v9990_v51 = vcombine.low %v7854_v11, %v7861_v60  ;;  %v15542_v45 = vcombine.high %v7854_v11, %v7861_v60  ;;  %v10006_v38 = vcombine.low %v7870_v12, %v7877_v20  ;;  %v15543_v55 = vcombine.high %v7870_v12, %v7877_v20 }
 0x3db   : > { %v9929_v53 = vrot.slane %v9922_v7, %v16158_v15  ;;  %v9937_v47 = vrot.slane %v15540_v14, %v16158_v15  ;;  %v9945_v24 = vrot.slane %v9938_v23, %v16158_v15  ;;  %v9953_v5 = vrot.slane %v15541_v41, %v16158_v15 }
 0x3dc   : > { %v9997_v43 = vrot.slane %v9990_v51, %v16158_v15  ;;  %v10005_v40 = vrot.slane %v15542_v45, %v16158_v15  ;;  %v10013_v59 = vrot.slane %v10006_v38, %v16158_v15  ;;  %v10021_v10 = vrot.slane %v15543_v55, %v16158_v15 }
 0x3dd   : > { %v9954_v19 = vcombine.low %v9929_v53, %v9937_v47  ;;  %v9955_v11 = vcombine.high %v9929_v53, %v9937_v47  ;;  %v9970_v60 = vcombine.low %v9945_v24, %v9953_v5  ;;  %v9971_v12 = vcombine.high %v9945_v24, %v9953_v5 }
 0x3de   : > { %v10022_v20 = vcombine.low %v9997_v43, %v10005_v40  ;;  %v10023_v7 = vcombine.high %v9997_v43, %v10005_v40  ;;  %v10038_v14 = vcombine.low %v10013_v59, %v10021_v10  ;;  %v10039_v23 = vcombine.high %v10013_v59, %v10021_v10 }
 0x3df   : > { %v9962_v41 = vrot.slane %v9954_v19, %v16163_v25  ;;  %v9969_v51 = vrot.slane %v9955_v11, %v16163_v25  ;;  %v9978_v45 = vrot.slane %v9970_v60, %v16163_v25  ;;  %v9985_v38 = vrot.slane %v9971_v12, %v16163_v25  ;;  %v19881_v12 = vpop.permute.xlu1 %10548 }
 0x3e0   : > { %v10030_v55 = vrot.slane %v10022_v20, %v16163_v25  ;;  %v10037_v53 = vrot.slane %v10023_v7, %v16163_v25  ;;  %v10046_v47 = vrot.slane %v10038_v14, %v16163_v25  ;;  %v10053_v24 = vrot.slane %v10039_v23, %v16163_v25  ;;  %v19883_v20 = vpop.permute.xlu0 %10550  ;;  %v22040_v7 = vld [vmem:[#allocation27_spill] sm:$0xff] }
 0x3e1   : > { %v9986_v5 = vcombine.low %v9962_v41, %v9978_v45  ;;  %v9987_v43 = vcombine.high %v9962_v41, %v9978_v45  ;;  %v9988_v40 = vcombine.low %v9969_v51, %v9985_v38  ;;  %v9989_v59 = vcombine.high %v9969_v51, %v9985_v38  ;;  %v22041_v41 = vld [vmem:[#allocation73_spill] sm:$0xff] }
 0x3e2   : > { %v10054_v10 = vcombine.low %v10030_v55, %v10046_v47  ;;  %v10055_v19 = vcombine.high %v10030_v55, %v10046_v47  ;;  %v10056_v11 = vcombine.low %v10037_v53, %v10053_v24  ;;  %v10057_v60 = vcombine.high %v10037_v53, %v10053_v24  ;;  %v22042_v38 = vld [vmem:[#allocation53_spill] sm:$0xff]  ;;  %v22043_v55 = vld [vmem:[#allocation54_spill] sm:$0xff] }
 0x3e3   : > { %10289 = vst.msk [vmem:[%s18673_s29 + $0xd8] sm:$0xff] %vm5397_vm1, %v9986_v5  ;;  %10321 = vst.msk [vmem:[%s18673_s29 + $0x1d8] sm:$0xff] %vm5397_vm1, %v9987_v43  ;;  %v7898_v14 = vcombine.low %v22040_v7, %v19257_v54  ;;  %v7899_v23 = vcombine.high %v22040_v7, %v19257_v54  ;;  %v7966_v51 = vcombine.low %v22041_v41, %v19269_v30  ;;  %v22046_v54 = vld [vmem:[#allocation88_spill] sm:$0xff] }
 0x3e4   : > { %10353 = vst.msk [vmem:[%s18673_s29 + $0x2d8] sm:$0xff] %vm5397_vm1, %v9988_v40  ;;  %10385 = vst.msk [vmem:[%s18673_s29 + $0x3d8] sm:$0xff] %vm5397_vm1, %v9989_v59  ;;  %v7967_v45 = vcombine.high %v22041_v41, %v19269_v30  ;;  %v22044_v53 = vcombine.low %v22042_v38, %v22043_v55  ;;  %v22045_v24 = vcombine.high %v22042_v38, %v22043_v55  ;;  %v22047_v41 = vld [vmem:[#allocation91_spill] sm:$0xff]  ;;  %v22048_v38 = vld [vmem:[#allocation92_spill] sm:$0xff]  ;;  %v19949_v27 = vpop.permute.xlu0 %10554 }
 0x3e5   : > { %10290 = vst.msk [vmem:[%s18673_s29 + $0xe0] sm:$0xff] %vm5397_vm1, %v10054_v10  ;;  %10322 = vst.msk [vmem:[%s18673_s29 + $0x1e0] sm:$0xff] %vm5397_vm1, %v10055_v19  ;;  %v8034_v30 = vcombine.low %v22046_v54, %v19283_v18  ;;  %v8035_v43 = vcombine.high %v22046_v54, %v19283_v18  ;;  %v7906_v40 = vrot.slane %v7898_v14, %v16158_v15  ;;  %v22049_v55 = vld [vmem:[#allocation52_spill] sm:$0xff]  ;;  %v22050_v54 = vld [vmem:[#allocation51_spill] sm:$0xff] }
 0x3e6   : > { %v19905_v47 = vrot.slane %v22044_v53, %v16158_v15  ;;  %v19911_v5 = vrot.slane %v22045_v24, %v16158_v15  ;;  %10354 = vst.msk [vmem:[%s18673_s29 + $0x2e0] sm:$0xff] %vm5397_vm1, %v10056_v11  ;;  %10386 = vst.msk [vmem:[%s18673_s29 + $0x3e0] sm:$0xff] %vm5397_vm1, %v10057_v60  ;;  %v7913_v59 = vrot.slane %v7899_v23, %v16158_v15  ;;  %v19947_v60 = vpop.permute.xlu1 %10552 }
 0x3e7   : > { %v7974_v7 = vrot.slane %v7966_v51, %v16158_v15  ;;  %v7981_v10 = vrot.slane %v7967_v45, %v16158_v15  ;;  %v19930_v19 = vrot.slane %v8034_v30, %v16158_v15  ;;  %v19933_v11 = vrot.slane %v8035_v43, %v16158_v15 }
 0x3e8   : > { %v7914_v14 = vcombine.low %v22047_v41, %v7906_v40  ;;  %v7915_v23 = vcombine.high %v22047_v41, %v7906_v40  ;;  %v7930_v51 = vcombine.low %v22048_v38, %v7913_v59  ;;  %v7931_v45 = vcombine.high %v22048_v38, %v7913_v59 }
 0x3e9   : > { %v7982_v53 = vcombine.low %v22049_v55, %v7974_v7  ;;  %v7983_v24 = vcombine.high %v22049_v55, %v7974_v7  ;;  %v7998_v30 = vcombine.low %v22050_v54, %v7981_v10  ;;  %v7999_v43 = vcombine.high %v22050_v54, %v7981_v10 }
 0x3ea   : > { %v7922_v18 = vrot.slane %v7914_v14, %v16163_v25  ;;  %v7929_v40 = vrot.slane %v7915_v23, %v16163_v25  ;;  %v7938_v41 = vrot.slane %v7930_v51, %v16163_v25  ;;  %v7945_v59 = vrot.slane %v7931_v45, %v16163_v25 }
 0x3eb   : > { %v7990_v38 = vrot.slane %v7982_v53, %v16163_v25  ;;  %v7997_v7 = vrot.slane %v7983_v24, %v16163_v25  ;;  %v8006_v55 = vrot.slane %v7998_v30, %v16163_v25  ;;  %v8013_v10 = vrot.slane %v7999_v43, %v16163_v25 }
 0x3ec   : > { %v10058_v54 = vcombine.low %v7922_v18, %v7929_v40  ;;  %v15544_v62 = vcombine.high %v7922_v18, %v7929_v40  ;;  %v10074_v8 = vcombine.low %v7938_v41, %v7945_v59  ;;  %v15545_v4 = vcombine.high %v7938_v41, %v7945_v59  ;;  %v19967_v41 = vpop.permute.xlu1 %10556  ;;  %v19969_v59 = vpop.permute.xlu0 %10558 }
 0x3ed   : > { %v10126_v26 = vcombine.low %v7990_v38, %v7997_v7  ;;  %v15546_v14 = vcombine.high %v7990_v38, %v7997_v7  ;;  %v10142_v3 = vcombine.low %v8006_v55, %v8013_v10  ;;  %v15547_v23 = vcombine.high %v8006_v55, %v8013_v10 }
 0x3ee   : > { %v10065_v51 = vrot.slane %v10058_v54, %v16158_v15  ;;  %v10073_v45 = vrot.slane %v15544_v62, %v16158_v15  ;;  %v10081_v53 = vrot.slane %v10074_v8, %v16158_v15  ;;  %v10089_v24 = vrot.slane %v15545_v4, %v16158_v15 }
 0x3ef   : > { %v10133_v30 = vrot.slane %v10126_v26, %v16158_v15  ;;  %v10141_v43 = vrot.slane %v15546_v14, %v16158_v15  ;;  %v10149_v18 = vrot.slane %v10142_v3, %v16158_v15  ;;  %v10157_v40 = vrot.slane %v15547_v23, %v16158_v15 }
 0x3f0   : > { %v10090_v38 = vcombine.low %v10065_v51, %v10073_v45  ;;  %v10091_v7 = vcombine.high %v10065_v51, %v10073_v45  ;;  %v10106_v55 = vcombine.low %v10081_v53, %v10089_v24  ;;  %v10107_v62 = vcombine.high %v10081_v53, %v10089_v24 }
 0x3f1   : > { %v10158_v10 = vcombine.low %v10133_v30, %v10141_v43  ;;  %v10159_v8 = vcombine.high %v10133_v30, %v10141_v43  ;;  %v10174_v54 = vcombine.low %v10149_v18, %v10157_v40  ;;  %v10175_v4 = vcombine.high %v10149_v18, %v10157_v40 }
 0x3f2   : > { %v10098_v26 = vrot.slane %v10090_v38, %v16163_v25  ;;  %v10105_v14 = vrot.slane %v10091_v7, %v16163_v25  ;;  %v10114_v3 = vrot.slane %v10106_v55, %v16163_v25  ;;  %v10121_v23 = vrot.slane %v10107_v62, %v16163_v25  ;;  %v19979_v62 = vpop.permute.xlu1 %10560 }
 0x3f3   : > { %v10166_v1 = vrot.slane %v10158_v10, %v16163_v25  ;;  %v10173_v51 = vrot.slane %v10159_v8, %v16163_v25  ;;  %v10182_v45 = vrot.slane %v10174_v54, %v16163_v25  ;;  %v10189_v53 = vrot.slane %v10175_v4, %v16163_v25  ;;  %v19981_v10 = vpop.permute.xlu0 %10562 }
 0x3f4   : > { %v10122_v24 = vcombine.low %v10098_v26, %v10114_v3  ;;  %v10123_v30 = vcombine.high %v10098_v26, %v10114_v3  ;;  %v10124_v43 = vcombine.low %v10105_v14, %v10121_v23  ;;  %v10125_v18 = vcombine.high %v10105_v14, %v10121_v23 }
 0x3f5   : > { %v10190_v40 = vcombine.low %v10166_v1, %v10182_v45  ;;  %v10191_v38 = vcombine.high %v10166_v1, %v10182_v45  ;;  %v10192_v7 = vcombine.low %v10173_v51, %v10189_v53  ;;  %v10193_v55 = vcombine.high %v10173_v51, %v10189_v53 }
 0x3f6   : > { %10291 = vst.msk [vmem:[%s18673_s29 + $0xe8] sm:$0xff] %vm5397_vm1, %v10122_v24  ;;  %10323 = vst.msk [vmem:[%s18673_s29 + $0x1e8] sm:$0xff] %vm5397_vm1, %v10123_v30  ;;  %v8050_v8 = vcombine.low %v19905_v47, %v19930_v19  ;;  %v8051_v1 = vcombine.high %v19905_v47, %v19930_v19  ;;  %v8066_v54 = vcombine.low %v19911_v5, %v19933_v11 }
 0x3f7   : > { %10355 = vst.msk [vmem:[%s18673_s29 + $0x2e8] sm:$0xff] %vm5397_vm1, %v10124_v43  ;;  %10387 = vst.msk [vmem:[%s18673_s29 + $0x3e8] sm:$0xff] %vm5397_vm1, %v10125_v18  ;;  %v8067_v4 = vcombine.high %v19911_v5, %v19933_v11  ;;  %v10778_v26 = vcombine.low %v21933_v44, %v19701_v52  ;;  %v10779_v47 = vcombine.high %v21933_v44, %v19701_v52 }
 0x3f8   : > { %10292 = vst.msk [vmem:[%s18673_s29 + $0xf0] sm:$0xff] %vm5397_vm1, %v10190_v40  ;;  %10324 = vst.msk [vmem:[%s18673_s29 + $0x1f0] sm:$0xff] %vm5397_vm1, %v10191_v38  ;;  %v8058_v19 = vrot.slane %v8050_v8, %v16163_v25  ;;  %v8065_v14 = vrot.slane %v8051_v1, %v16163_v25  ;;  %v8074_v5 = vrot.slane %v8066_v54, %v16163_v25  ;;  %v20041_v38 = vpop.permute.xlu1 %10564 }
 0x3f9   : > { %10356 = vst.msk [vmem:[%s18673_s29 + $0x2f0] sm:$0xff] %vm5397_vm1, %v10192_v7  ;;  %10388 = vst.msk [vmem:[%s18673_s29 + $0x3f0] sm:$0xff] %vm5397_vm1, %v10193_v55  ;;  %v8081_v11 = vrot.slane %v8067_v4, %v16163_v25  ;;  %v22051_v3 = vcombine.low %v21932_v17, %v19659_v35  ;;  %v22052_v51 = vcombine.high %v21932_v17, %v19659_v35  ;;  %v20043_v7 = vpop.permute.xlu0 %10566 }
 0x3fa   : > { %v10846_v44 = vcombine.low %v21934_v42, %v19703_v56  ;;  %v10847_v52 = vcombine.high %v21934_v42, %v19703_v56  ;;  %v10194_v53 = vcombine.low %v8058_v19, %v8065_v14  ;;  %v15548_v24 = vcombine.high %v8058_v19, %v8065_v14 }
 0x3fb   : > { %v20019_v23 = vrot.slane %v22051_v3, %v16158_v15  ;;  %v20025_v45 = vrot.slane %v22052_v51, %v16158_v15  ;;  %v10210_v30 = vcombine.low %v8074_v5, %v8081_v11  ;;  %v15549_v43 = vcombine.high %v8074_v5, %v8081_v11  ;;  %v22054_v3 = vld [vmem:[#allocation78_spill] sm:$0xff] }
 0x3fc   : > { %v20032_v18 = vrot.slane %v10778_v26, %v16158_v15  ;;  %v20035_v40 = vrot.slane %v10779_v47, %v16158_v15  ;;  %v10914_v17 = vcombine.low %v21937_v48, %v19713_v31  ;;  %v10915_v35 = vcombine.high %v21937_v48, %v19713_v31  ;;  %v22053_v48 = vld [vmem:[#allocation69_spill] sm:$0xff] }
 0x3fd   : > { %v10201_v42 = vrot.slane %v10194_v53, %v16158_v15  ;;  %v10209_v56 = vrot.slane %v15548_v24, %v16158_v15  ;;  %v10217_v55 = vrot.slane %v10210_v30, %v16158_v15  ;;  %v10225_v8 = vrot.slane %v15549_v43, %v16158_v15 }
 0x3fe   : > { %v20050_v1 = vrot.slane %v10846_v44, %v16158_v15  ;;  %v20053_v54 = vrot.slane %v10847_v52, %v16158_v15  ;;  %v10982_v31 = vcombine.low %v22053_v48, %v19715_v36  ;;  %v10983_v4 = vcombine.high %v22053_v48, %v19715_v36 }
 0x3ff   : > { %v10226_v26 = vcombine.low %v10201_v42, %v10209_v56  ;;  %v10227_v47 = vcombine.high %v10201_v42, %v10209_v56  ;;  %v10242_v19 = vcombine.low %v10217_v55, %v10225_v8  ;;  %v10243_v14 = vcombine.high %v10217_v55, %v10225_v8  ;;  %v20083_v42 = vpop.permute.xlu1 %10568  ;;  %v20085_v56 = vpop.permute.xlu0 %10570 }
 0x400   : > { %v20060_v5 = vrot.slane %v10914_v17, %v16158_v15  ;;  %v20063_v11 = vrot.slane %v10915_v35, %v16158_v15  ;;  %v11050_v51 = vcombine.low %v22054_v3, %v19757_v16  ;;  %v11051_v44 = vcombine.high %v22054_v3, %v19757_v16  ;;  %v22055_v17 = vld [vmem:[#allocation2_spill] sm:$0xff] }
 0x401   : > { %v10234_v52 = vrot.slane %v10226_v26, %v16163_v25  ;;  %v10241_v36 = vrot.slane %v10227_v47, %v16163_v25  ;;  %v10250_v53 = vrot.slane %v10242_v19, %v16163_v25  ;;  %v10257_v24 = vrot.slane %v10243_v14, %v16163_v25  ;;  %v22056_v26 = vld [vmem:[#allocation4_spill] sm:$0xff] }
 0x402   : > { %v20074_v30 = vrot.slane %v10982_v31, %v16158_v15  ;;  %v20077_v43 = vrot.slane %v10983_v4, %v16158_v15  ;;  %v11118_v16 = vcombine.low %v22055_v17, %v19759_v58  ;;  %v11119_v35 = vcombine.high %v22055_v17, %v19759_v58 }
 0x403   : > { %v10258_v55 = vcombine.low %v10234_v52, %v10250_v53  ;;  %v10259_v8 = vcombine.high %v10234_v52, %v10250_v53  ;;  %v10260_v48 = vcombine.low %v10241_v36, %v10257_v24  ;;  %v10261_v31 = vcombine.high %v10241_v36, %v10257_v24  ;;  %v22057_v24 = vld [vmem:[#allocation9_spill] sm:$0xff] }
 0x404   : > { %v11186_v47 = vcombine.low %v22056_v26, %v19793_v29  ;;  %v11187_v4 = vcombine.high %v22056_v26, %v19793_v29  ;;  %v11254_v19 = vcombine.low %v21942_v9, %v19795_v22  ;;  %v11255_v58 = vcombine.high %v21942_v9, %v19795_v22  ;;  %v22059_v26 = vld [vmem:[#allocation10_spill] sm:$0xff] }
 0x405   : > { %10293 = vst.msk [vmem:[%s18673_s29 + $0xf8] sm:$0xff] %vm5397_vm1, %v10258_v55  ;;  %10325 = vst.msk [vmem:[%s18673_s29 + $0x1f8] sm:$0xff] %vm5397_vm1, %v10259_v8  ;;  %v20104_v14 = vrot.slane %v11050_v51, %v16158_v15  ;;  %v20107_v3 = vrot.slane %v11051_v44, %v16158_v15  ;;  %v11322_v29 = vcombine.low %v18244_v46, %v19805_v32  ;;  %v20143_v55 = vpop.permute.xlu1 %10572  ;;  %v20145_v8 = vpop.permute.xlu0 %10574 }
 0x406   : > { %10357 = vst.msk [vmem:[%s18673_s29 + $0x2f8] sm:$0xff] %vm5397_vm1, %v10260_v48  ;;  %10389 = vst.msk [vmem:[%s18673_s29 + $0x3f8] sm:$0xff] %vm5397_vm1, %v10261_v31  ;;  %v11323_v9 = vcombine.high %v18244_v46, %v19805_v32  ;;  %v20114_v22 = vrot.slane %v11118_v16, %v16158_v15  ;;  %v20117_v52 = vrot.slane %v11119_v35, %v16158_v15 }
 0x407   : > { %v11390_v36 = vcombine.low %v18250_v39, %v19807_v61  ;;  %v11391_v51 = vcombine.high %v18250_v39, %v19807_v61  ;;  %v20124_v44 = vrot.slane %v11186_v47, %v16158_v15  ;;  %v20127_v53 = vrot.slane %v11187_v4, %v16158_v15  ;;  %v22058_v39 = vld [vmem:[#allocation6_spill] sm:$0xff] }
 0x408   : > { %v20130_v46 = vrot.slane %v11254_v19, %v16158_v15  ;;  %v20133_v32 = vrot.slane %v11255_v58, %v16158_v15  ;;  %v11458_v17 = vcombine.low %v22057_v24, %v19849_v13  ;;  %v11459_v16 = vcombine.high %v22057_v24, %v19849_v13  ;;  %v22060_v19 = vld [vmem:[#allocation12_spill] sm:$0xff] }
 0x409   : > { %v11526_v61 = vcombine.low %v22058_v39, %v19851_v2  ;;  %v11527_v35 = vcombine.high %v22058_v39, %v19851_v2  ;;  %v20148_v48 = vrot.slane %v11322_v29, %v16158_v15  ;;  %v20151_v31 = vrot.slane %v11323_v9, %v16158_v15 }
 0x40a   : > { %v11594_v47 = vcombine.low %v22059_v26, %v19869_v63  ;;  %v11595_v13 = vcombine.high %v22059_v26, %v19869_v63  ;;  %v20158_v4 = vrot.slane %v11390_v36, %v16158_v15  ;;  %v20161_v2 = vrot.slane %v11391_v51, %v16158_v15 }
 0x40b   : > { %v11662_v58 = vcombine.low %v22060_v19, %v19871_v6  ;;  %v11663_v29 = vcombine.high %v22060_v19, %v19871_v6  ;;  %v20168_v9 = vrot.slane %v11458_v17, %v16158_v15  ;;  %v20171_v24 = vrot.slane %v11459_v16, %v16158_v15  ;;  %v22061_v6 = vld [vmem:[#allocation77_spill] sm:$0xff] }
 0x40c   : > { %v20174_v63 = vrot.slane %v11526_v61, %v16158_v15  ;;  %v20177_v36 = vrot.slane %v11527_v35, %v16158_v15  ;;  %v11730_v51 = vcombine.low %v18295_v57, %v19881_v12  ;;  %v11731_v39 = vcombine.high %v18295_v57, %v19881_v12 }
 0x40d   : > { %v11798_v26 = vcombine.low %v22061_v6, %v19883_v20  ;;  %v11799_v17 = vcombine.high %v22061_v6, %v19883_v20  ;;  %v20188_v16 = vrot.slane %v11594_v47, %v16158_v15  ;;  %v20191_v61 = vrot.slane %v11595_v13, %v16158_v15  ;;  %v10577_v13 = vpop.permute.xlu1 %10576  ;;  %v20207_v6 = vpop.permute.xlu0 %10578 }
 0x40e   : > { %v11866_v35 = vcombine.low %v18202_v37, %v19947_v60  ;;  %v11867_v19 = vcombine.high %v18202_v37, %v19947_v60  ;;  %v20198_v57 = vrot.slane %v11662_v58, %v16158_v15  ;;  %v20201_v12 = vrot.slane %v11663_v29, %v16158_v15  ;;  %22063 = vst [vmem:[#allocation64_spill] sm:$0xff] %v20207_v6  ;;  %v22089_v6 = vld [vmem:[#allocation75_spill] sm:$0xff] }
 0x40f   : > { %22062 = vst [vmem:[#allocation19_spill] sm:$0xff] %v20191_v61  ;;  %v11934_v20 = vcombine.low %v18205_v34, %v19949_v27  ;;  %v11935_v47 = vcombine.high %v18205_v34, %v19949_v27  ;;  %v20210_v61 = vrot.slane %v11730_v51, %v16158_v15  ;;  %v20213_v37 = vrot.slane %v11731_v39, %v16158_v15 }
 0x410   : > { %v20216_v60 = vrot.slane %v11798_v26, %v16158_v15  ;;  %v20219_v58 = vrot.slane %v11799_v17, %v16158_v15  ;;  %v12002_v29 = vcombine.low %v18208_v33, %v19967_v41  ;;  %v12003_v34 = vcombine.high %v18208_v33, %v19967_v41 }
 0x411   : > { %v12070_v27 = vcombine.low %v18216_v0, %v19969_v59  ;;  %v12071_v51 = vcombine.high %v18216_v0, %v19969_v59  ;;  %v20230_v39 = vrot.slane %v11866_v35, %v16158_v15  ;;  %v20233_v26 = vrot.slane %v11867_v19, %v16158_v15 }
 0x412   : > { %22064 = vst [vmem:[#allocation33_spill] sm:$0xff] %v20219_v58  ;;  %v12138_v17 = vcombine.low %v18219_v49, %v19979_v62  ;;  %v12139_v58 = vcombine.high %v18219_v49, %v19979_v62  ;;  %v20240_v33 = vrot.slane %v11934_v20, %v16158_v15  ;;  %v20243_v41 = vrot.slane %v11935_v47, %v16158_v15 }
 0x413   : > { %v12206_v0 = vcombine.low %v18225_v50, %v19981_v10  ;;  %v12207_v59 = vcombine.high %v18225_v50, %v19981_v10  ;;  %v20250_v35 = vrot.slane %v12002_v29, %v16158_v15  ;;  %v20253_v19 = vrot.slane %v12003_v34, %v16158_v15  ;;  %v20269_v29 = vpop.permute.xlu1 %10580  ;;  %v10615_v34 = vpop.permute.xlu0 %10614 }
 0x414   : > { %v20256_v49 = vrot.slane %v12070_v27, %v16158_v15  ;;  %v20259_v62 = vrot.slane %v12071_v51, %v16158_v15  ;;  %v12274_v20 = vcombine.low %v18233_v21, %v20041_v38  ;;  %v12275_v47 = vcombine.high %v18233_v21, %v20041_v38  ;;  %22068 = vst [vmem:[#allocation21_spill] sm:$0xff] %v20269_v29 }
 0x415   : > { %22065 = vst [vmem:[#allocation34_spill] sm:$0xff] %v20253_v19  ;;  %v12342_v50 = vcombine.low %v18239_v28, %v20043_v7  ;;  %v12343_v10 = vcombine.high %v18239_v28, %v20043_v7  ;;  %v20272_v27 = vrot.slane %v12138_v17, %v16158_v15  ;;  %v20275_v51 = vrot.slane %v12139_v58, %v16158_v15  ;;  %v22072_v7 = vld [vmem:[#allocation11_spill] sm:$0xff] }
 0x416   : > { %22066 = vst [vmem:[#allocation38_spill] sm:$0xff] %v20256_v49  ;;  %22067 = vst [vmem:[#allocation20_spill] sm:$0xff] %v20259_v62  ;;  %v22070_v62 = vld [vmem:[#allocation7_spill] sm:$0xff]  ;;  %v20282_v38 = vrot.slane %v12206_v0, %v16158_v15  ;;  %v20285_v28 = vrot.slane %v12207_v59, %v16158_v15  ;;  %v12478_v19 = vcombine.low %v22072_v7, %v20085_v56 }
 0x417   : > { %22069 = vst [vmem:[#allocation25_spill] sm:$0xff] %v20275_v51  ;;  %v12410_v49 = vcombine.low %v22070_v62, %v20083_v42  ;;  %v12411_v21 = vcombine.high %v22070_v62, %v20083_v42  ;;  %v12479_v17 = vcombine.high %v22072_v7, %v20085_v56  ;;  %v20292_v58 = vrot.slane %v12274_v20, %v16158_v15  ;;  %v22077_v59 = vld [vmem:[#allocation3_spill] sm:$0xff]  ;;  %v22078_v56 = vld [vmem:[#allocation8_spill] sm:$0xff] }
 0x418   : > { %22071 = vst [vmem:[#allocation24_spill] sm:$0xff] %v20285_v28  ;;  %v20295_v51 = vrot.slane %v12275_v47, %v16158_v15  ;;  %v20298_v42 = vrot.slane %v12342_v50, %v16158_v15  ;;  %v20301_v0 = vrot.slane %v12343_v10, %v16158_v15  ;;  %v12546_v62 = vcombine.low %v22077_v59, %v20143_v55  ;;  %v22080_v10 = vld [vmem:[#allocation13_spill] sm:$0xff] }
 0x419   : > { %22073 = vst [vmem:[#allocation26_spill] sm:$0xff] %v20292_v58  ;;  %v12547_v28 = vcombine.high %v22077_v59, %v20143_v55  ;;  %v12614_v7 = vcombine.low %v22078_v56, %v20145_v8  ;;  %v12615_v20 = vcombine.high %v22078_v56, %v20145_v8  ;;  %v20312_v47 = vrot.slane %v12410_v49, %v16158_v15  ;;  %v10617_v49 = vpop.permute.xlu1 %10616  ;;  %v10619_v56 = vpop.permute.xlu0 %10618  ;;  %v22088_v8 = vld [vmem:[#allocation65_spill] sm:$0xff] }
 0x41a   : > { %22074 = vst [vmem:[#allocation47_spill] sm:$0xff] %v20295_v51  ;;  %22075 = vst [vmem:[#allocation46_spill] sm:$0xff] %v20298_v42  ;;  %v20315_v50 = vrot.slane %v12411_v21, %v16158_v15  ;;  %v12683_v42 = vcombine.high %v22080_v10, %v10577_v13  ;;  %v20320_v51 = vrot.slane %v12478_v19, %v16158_v15 }
 0x41b   : > { %22076 = vst [vmem:[#allocation29_spill] sm:$0xff] %v20301_v0  ;;  %v12682_v0 = vcombine.low %v22080_v10, %v10577_v13  ;;  %v20323_v55 = vrot.slane %v12479_v17, %v16158_v15  ;;  %v20330_v21 = vrot.slane %v12546_v62, %v16158_v15  ;;  %v20336_v13 = vrot.slane %v12614_v7, %v16158_v15 }
 0x41c   : > { %22079 = vst [vmem:[#allocation39_spill] sm:$0xff] %v20315_v50  ;;  %v20333_v50 = vrot.slane %v12547_v28, %v16158_v15  ;;  %v20339_v19 = vrot.slane %v12615_v20, %v16158_v15  ;;  %v20345_v10 = vrot.slane %v12683_v42, %v16158_v15  ;;  %v10726_v58 = vcombine.low %v22088_v8, %v10615_v34 }
 0x41d   : > { %22082 = vst [vmem:[#allocation43_spill] sm:$0xff] %v20330_v21  ;;  %22084 = vst [vmem:[#allocation67_spill] sm:$0xff] %v20336_v13  ;;  %v20342_v17 = vrot.slane %v12682_v0, %v16158_v15  ;;  %v10727_v62 = vcombine.high %v22088_v8, %v10615_v34  ;;  %v10794_v59 = vcombine.low %v22089_v6, %v10617_v49 }
 0x41e   : > { %22083 = vst [vmem:[#allocation42_spill] sm:$0xff] %v20333_v50  ;;  %22085 = vst [vmem:[#allocation30_spill] sm:$0xff] %v20339_v19  ;;  %v10795_v28 = vcombine.high %v22089_v6, %v10617_v49  ;;  %v22090_v50 = vld [vmem:[#allocation76_spill] sm:$0xff]  ;;  %v10734_v42 = vrot.slane %v10726_v58, %v16158_v15 }
 0x41f   : > { %22086 = vst [vmem:[#allocation31_spill] sm:$0xff] %v20342_v17  ;;  %22087 = vst [vmem:[#allocation36_spill] sm:$0xff] %v20345_v10  ;;  %v10862_v7 = vcombine.low %v22090_v50, %v10619_v56  ;;  %v10863_v13 = vcombine.high %v22090_v50, %v10619_v56  ;;  %v10741_v10 = vrot.slane %v10727_v62, %v16158_v15 }
 0x420   : > { %v10802_v34 = vrot.slane %v10794_v59, %v16158_v15  ;;  %v10809_v8 = vrot.slane %v10795_v28, %v16158_v15  ;;  %v10742_v50 = vcombine.low %v20019_v23, %v10734_v42  ;;  %v10743_v56 = vcombine.high %v20019_v23, %v10734_v42 }
 0x421   : > { %v20362_v6 = vrot.slane %v10862_v7, %v16158_v15  ;;  %v20365_v49 = vrot.slane %v10863_v13, %v16158_v15  ;;  %v10758_v0 = vcombine.low %v20025_v45, %v10741_v10  ;;  %v10759_v58 = vcombine.high %v20025_v45, %v10741_v10 }
 0x422   : > { %v10810_v62 = vcombine.low %v20032_v18, %v10802_v34  ;;  %v10811_v59 = vcombine.high %v20032_v18, %v10802_v34  ;;  %v10826_v28 = vcombine.low %v20035_v40, %v10809_v8  ;;  %v10827_v7 = vcombine.high %v20035_v40, %v10809_v8 }
 0x423   : > { %v10750_v19 = vrot.slane %v10742_v50, %v16163_v25  ;;  %v10757_v13 = vrot.slane %v10743_v56, %v16163_v25  ;;  %v10766_v17 = vrot.slane %v10758_v0, %v16163_v25  ;;  %v10773_v23 = vrot.slane %v10759_v58, %v16163_v25 }
 0x424   : > { %v10818_v42 = vrot.slane %v10810_v62, %v16163_v25  ;;  %v10825_v45 = vrot.slane %v10811_v59, %v16163_v25  ;;  %v10834_v10 = vrot.slane %v10826_v28, %v16163_v25  ;;  %v10841_v18 = vrot.slane %v10827_v7, %v16163_v25 }
 0x425   : > { %v12886_v34 = vcombine.low %v10750_v19, %v10757_v13  ;;  %v15550_v29 = vcombine.high %v10750_v19, %v10757_v13  ;;  %v12902_v20 = vcombine.low %v10766_v17, %v10773_v23  ;;  %v15551_v40 = vcombine.high %v10766_v17, %v10773_v23 }
 0x426   : > { %v12954_v8 = vcombine.low %v10818_v42, %v10825_v45  ;;  %v15552_v50 = vcombine.high %v10818_v42, %v10825_v45  ;;  %v12970_v21 = vcombine.low %v10834_v10, %v10841_v18  ;;  %v15553_v56 = vcombine.high %v10834_v10, %v10841_v18 }
 0x427   : > { %v12893_v0 = vrot.slane %v12886_v34, %v16158_v15  ;;  %v12901_v58 = vrot.slane %v15550_v29, %v16158_v15  ;;  %v12909_v62 = vrot.slane %v12902_v20, %v16158_v15  ;;  %v12917_v59 = vrot.slane %v15551_v40, %v16158_v15 }
 0x428   : > { %v12961_v28 = vrot.slane %v12954_v8, %v16158_v15  ;;  %v12969_v7 = vrot.slane %v15552_v50, %v16158_v15  ;;  %v12977_v19 = vrot.slane %v12970_v21, %v16158_v15  ;;  %v12985_v17 = vrot.slane %v15553_v56, %v16158_v15 }
 0x429   : > { %v12918_v13 = vcombine.low %v12893_v0, %v12901_v58  ;;  %v12919_v23 = vcombine.high %v12893_v0, %v12901_v58  ;;  %v12934_v42 = vcombine.low %v12909_v62, %v12917_v59  ;;  %v12935_v45 = vcombine.high %v12909_v62, %v12917_v59 }
 0x42a   : > { %v12986_v10 = vcombine.low %v12961_v28, %v12969_v7  ;;  %v12987_v18 = vcombine.high %v12961_v28, %v12969_v7  ;;  %v13002_v29 = vcombine.low %v12977_v19, %v12985_v17  ;;  %v13003_v34 = vcombine.high %v12977_v19, %v12985_v17  ;;  %v10621_v19 = vpop.permute.xlu1 %10620  ;;  %v10623_v17 = vpop.permute.xlu0 %10622 }
 0x42b   : > { %v12926_v20 = vrot.slane %v12918_v13, %v16163_v25  ;;  %v12933_v40 = vrot.slane %v12919_v23, %v16163_v25  ;;  %v12942_v8 = vrot.slane %v12934_v42, %v16163_v25  ;;  %v12949_v50 = vrot.slane %v12935_v45, %v16163_v25 }
 0x42c   : > { %v12994_v21 = vrot.slane %v12986_v10, %v16163_v25  ;;  %v13001_v56 = vrot.slane %v12987_v18, %v16163_v25  ;;  %v13010_v0 = vrot.slane %v13002_v29, %v16163_v25  ;;  %v13017_v58 = vrot.slane %v13003_v34, %v16163_v25 }
 0x42d   : > { %v12950_v62 = vcombine.low %v12926_v20, %v12942_v8  ;;  %v12951_v59 = vcombine.high %v12926_v20, %v12942_v8  ;;  %v12952_v28 = vcombine.low %v12933_v40, %v12949_v50  ;;  %v12953_v7 = vcombine.high %v12933_v40, %v12949_v50  ;;  %v22092_v20 = vld [vmem:[#allocation45_spill] sm:$0xff]  ;;  %v22093_v50 = vld [vmem:[#allocation66_spill] sm:$0xff] }
 0x42e   : > { %v13018_v13 = vcombine.low %v12994_v21, %v13010_v0  ;;  %v13019_v23 = vcombine.high %v12994_v21, %v13010_v0  ;;  %v13020_v42 = vcombine.low %v13001_v56, %v13017_v58  ;;  %v13021_v45 = vcombine.high %v13001_v56, %v13017_v58 }
 0x42f   : > { %15062 = vst.msk [vmem:[%s20399_s7] sm:$0xff] %vm5397_vm1, %v12950_v62  ;;  %15094 = vst.msk [vmem:[%s20399_s7 + $0x100] sm:$0xff] %vm5397_vm1, %v12951_v59  ;;  %v10878_v10 = vcombine.low %v20050_v1, %v20362_v6  ;;  %v10879_v18 = vcombine.high %v20050_v1, %v20362_v6  ;;  %v10894_v29 = vcombine.low %v20053_v54, %v20365_v49 }
 0x430   : > { %15126 = vst.msk [vmem:[%s20399_s7 + $0x200] sm:$0xff] %vm5397_vm1, %v12952_v28  ;;  %15158 = vst.msk [vmem:[%s20399_s7 + $0x300] sm:$0xff] %vm5397_vm1, %v12953_v7  ;;  %v10895_v34 = vcombine.high %v20053_v54, %v20365_v49  ;;  %v10930_v40 = vcombine.low %v22092_v20, %v10621_v19  ;;  %v10931_v8 = vcombine.high %v22092_v20, %v10621_v19 }
 0x431   : > { %15063 = vst.msk [vmem:[%s20399_s7 + $0x8] sm:$0xff] %vm5397_vm1, %v13018_v13  ;;  %15095 = vst.msk [vmem:[%s20399_s7 + $0x108] sm:$0xff] %vm5397_vm1, %v13019_v23  ;;  %v10998_v1 = vcombine.low %v22093_v50, %v10623_v17  ;;  %v10999_v6 = vcombine.high %v22093_v50, %v10623_v17  ;;  %v10886_v21 = vrot.slane %v10878_v10, %v16163_v25 }
 0x432   : > { %15127 = vst.msk [vmem:[%s20399_s7 + $0x208] sm:$0xff] %vm5397_vm1, %v13020_v42  ;;  %15159 = vst.msk [vmem:[%s20399_s7 + $0x308] sm:$0xff] %vm5397_vm1, %v13021_v45  ;;  %v10893_v54 = vrot.slane %v10879_v18, %v16163_v25  ;;  %v10902_v49 = vrot.slane %v10894_v29, %v16163_v25  ;;  %v10909_v56 = vrot.slane %v10895_v34, %v16163_v25 }
 0x433   : > { %v10938_v0 = vrot.slane %v10930_v40, %v16158_v15  ;;  %v10945_v58 = vrot.slane %v10931_v8, %v16158_v15  ;;  %v11006_v62 = vrot.slane %v10998_v1, %v16158_v15  ;;  %v11013_v59 = vrot.slane %v10999_v6, %v16158_v15 }
 0x434   : > { %v13022_v28 = vcombine.low %v10886_v21, %v10893_v54  ;;  %v15554_v7 = vcombine.high %v10886_v21, %v10893_v54  ;;  %v13038_v19 = vcombine.low %v10902_v49, %v10909_v56  ;;  %v15555_v17 = vcombine.high %v10902_v49, %v10909_v56 }
 0x435   : > { %v10946_v13 = vcombine.low %v20060_v5, %v10938_v0  ;;  %v10947_v23 = vcombine.high %v20060_v5, %v10938_v0  ;;  %v10962_v42 = vcombine.low %v20063_v11, %v10945_v58  ;;  %v10963_v45 = vcombine.high %v20063_v11, %v10945_v58 }
 0x436   : > { %v13029_v10 = vrot.slane %v13022_v28, %v16158_v15  ;;  %v13037_v18 = vrot.slane %v15554_v7, %v16158_v15  ;;  %v13045_v29 = vrot.slane %v13038_v19, %v16158_v15  ;;  %v13053_v34 = vrot.slane %v15555_v17, %v16158_v15 }
 0x437   : > { %v10954_v20 = vrot.slane %v10946_v13, %v16163_v25  ;;  %v10961_v40 = vrot.slane %v10947_v23, %v16163_v25  ;;  %v10970_v8 = vrot.slane %v10962_v42, %v16163_v25  ;;  %v10977_v5 = vrot.slane %v10963_v45, %v16163_v25 }
 0x438   : > { %v13054_v50 = vcombine.low %v13029_v10, %v13037_v18  ;;  %v13055_v1 = vcombine.high %v13029_v10, %v13037_v18  ;;  %v13070_v6 = vcombine.low %v13045_v29, %v13053_v34  ;;  %v13071_v11 = vcombine.high %v13045_v29, %v13053_v34 }
 0x439   : > { %v13090_v21 = vcombine.low %v10954_v20, %v10961_v40  ;;  %v15556_v54 = vcombine.high %v10954_v20, %v10961_v40  ;;  %v13106_v49 = vcombine.low %v10970_v8, %v10977_v5  ;;  %v15557_v56 = vcombine.high %v10970_v8, %v10977_v5 }
 0x43a   : > { %v13062_v0 = vrot.slane %v13054_v50, %v16163_v25  ;;  %v13069_v58 = vrot.slane %v13055_v1, %v16163_v25  ;;  %v13078_v28 = vrot.slane %v13070_v6, %v16163_v25  ;;  %v13085_v7 = vrot.slane %v13071_v11, %v16163_v25 }
 0x43b   : > { %v13097_v19 = vrot.slane %v13090_v21, %v16158_v15  ;;  %v13105_v17 = vrot.slane %v15556_v54, %v16158_v15  ;;  %v13113_v13 = vrot.slane %v13106_v49, %v16158_v15  ;;  %v13121_v23 = vrot.slane %v15557_v56, %v16158_v15 }
 0x43c   : > { %v13086_v42 = vcombine.low %v13062_v0, %v13078_v28  ;;  %v13087_v45 = vcombine.high %v13062_v0, %v13078_v28  ;;  %v13088_v10 = vcombine.low %v13069_v58, %v13085_v7  ;;  %v13089_v18 = vcombine.high %v13069_v58, %v13085_v7 }
 0x43d   : > { %v13122_v29 = vcombine.low %v13097_v19, %v13105_v17  ;;  %v13123_v34 = vcombine.high %v13097_v19, %v13105_v17  ;;  %v13138_v20 = vcombine.low %v13113_v13, %v13121_v23  ;;  %v13139_v40 = vcombine.high %v13113_v13, %v13121_v23 }
 0x43e   : > { %15064 = vst.msk [vmem:[%s20399_s7 + $0x10] sm:$0xff] %vm5397_vm1, %v13086_v42  ;;  %15096 = vst.msk [vmem:[%s20399_s7 + $0x110] sm:$0xff] %vm5397_vm1, %v13087_v45  ;;  %v11014_v8 = vcombine.low %v20074_v30, %v11006_v62  ;;  %v11015_v5 = vcombine.high %v20074_v30, %v11006_v62  ;;  %v11030_v50 = vcombine.low %v20077_v43, %v11013_v59  ;;  %v10625_v62 = vpop.permute.xlu1 %10624  ;;  %v22094_v42 = vld [vmem:[#allocation35_spill] sm:$0xff] }
 0x43f   : > { %15128 = vst.msk [vmem:[%s20399_s7 + $0x210] sm:$0xff] %vm5397_vm1, %v13088_v10  ;;  %15160 = vst.msk [vmem:[%s20399_s7 + $0x310] sm:$0xff] %vm5397_vm1, %v13089_v18  ;;  %v11031_v1 = vcombine.high %v20077_v43, %v11013_v59  ;;  %v13130_v6 = vrot.slane %v13122_v29, %v16163_v25  ;;  %v13137_v11 = vrot.slane %v13123_v34, %v16163_v25  ;;  %v10627_v59 = vpop.permute.xlu0 %10626  ;;  %v22095_v18 = vld [vmem:[#allocation58_spill] sm:$0xff] }
 0x440   : > { %v13146_v21 = vrot.slane %v13138_v20, %v16163_v25  ;;  %v13153_v54 = vrot.slane %v13139_v40, %v16163_v25  ;;  %v11022_v49 = vrot.slane %v11014_v8, %v16163_v25  ;;  %v11029_v56 = vrot.slane %v11015_v5, %v16163_v25 }
 0x441   : > { %v11038_v30 = vrot.slane %v11030_v50, %v16163_v25  ;;  %v11045_v43 = vrot.slane %v11031_v1, %v16163_v25  ;;  %v11066_v45 = vcombine.low %v22094_v42, %v10625_v62  ;;  %v11067_v10 = vcombine.high %v22094_v42, %v10625_v62 }
 0x442   : > { %v13154_v0 = vcombine.low %v13130_v6, %v13146_v21  ;;  %v13155_v58 = vcombine.high %v13130_v6, %v13146_v21  ;;  %v13156_v28 = vcombine.low %v13137_v11, %v13153_v54  ;;  %v13157_v7 = vcombine.high %v13137_v11, %v13153_v54 }
 0x443   : > { %v13158_v19 = vcombine.low %v11022_v49, %v11029_v56  ;;  %v15558_v17 = vcombine.high %v11022_v49, %v11029_v56  ;;  %v13174_v13 = vcombine.low %v11038_v30, %v11045_v43  ;;  %v15559_v23 = vcombine.high %v11038_v30, %v11045_v43 }
 0x444   : > { %15065 = vst.msk [vmem:[%s20399_s7 + $0x18] sm:$0xff] %vm5397_vm1, %v13154_v0  ;;  %15097 = vst.msk [vmem:[%s20399_s7 + $0x118] sm:$0xff] %vm5397_vm1, %v13155_v58  ;;  %v11134_v29 = vcombine.low %v22095_v18, %v10627_v59  ;;  %v11135_v34 = vcombine.high %v22095_v18, %v10627_v59  ;;  %v11074_v50 = vrot.slane %v11066_v45, %v16158_v15 }
 0x445   : > { %15129 = vst.msk [vmem:[%s20399_s7 + $0x218] sm:$0xff] %vm5397_vm1, %v13156_v28  ;;  %15161 = vst.msk [vmem:[%s20399_s7 + $0x318] sm:$0xff] %vm5397_vm1, %v13157_v7  ;;  %v13165_v20 = vrot.slane %v13158_v19, %v16158_v15  ;;  %v13173_v40 = vrot.slane %v15558_v17, %v16158_v15  ;;  %v13181_v8 = vrot.slane %v13174_v13, %v16158_v15 }
 0x446   : > { %v13189_v5 = vrot.slane %v15559_v23, %v16158_v15  ;;  %v11081_v1 = vrot.slane %v11067_v10, %v16158_v15  ;;  %v11142_v6 = vrot.slane %v11134_v29, %v16158_v15  ;;  %v11149_v11 = vrot.slane %v11135_v34, %v16158_v15 }
 0x447   : > { %v13190_v21 = vcombine.low %v13165_v20, %v13173_v40  ;;  %v13191_v54 = vcombine.high %v13165_v20, %v13173_v40  ;;  %v11082_v30 = vcombine.low %v20104_v14, %v11074_v50  ;;  %v11083_v43 = vcombine.high %v20104_v14, %v11074_v50 }
 0x448   : > { %v13206_v49 = vcombine.low %v13181_v8, %v13189_v5  ;;  %v13207_v56 = vcombine.high %v13181_v8, %v13189_v5  ;;  %v11098_v62 = vcombine.low %v20107_v3, %v11081_v1  ;;  %v11099_v59 = vcombine.high %v20107_v3, %v11081_v1 }
 0x449   : > { %v13198_v0 = vrot.slane %v13190_v21, %v16163_v25  ;;  %v13205_v58 = vrot.slane %v13191_v54, %v16163_v25  ;;  %v11090_v19 = vrot.slane %v11082_v30, %v16163_v25  ;;  %v11097_v14 = vrot.slane %v11083_v43, %v16163_v25 }
 0x44a   : > { %v13214_v28 = vrot.slane %v13206_v49, %v16163_v25  ;;  %v13221_v7 = vrot.slane %v13207_v56, %v16163_v25  ;;  %v11106_v17 = vrot.slane %v11098_v62, %v16163_v25  ;;  %v11113_v3 = vrot.slane %v11099_v59, %v16163_v25 }
 0x44b   : > { %v13226_v10 = vcombine.low %v11090_v19, %v11097_v14  ;;  %v15560_v18 = vcombine.high %v11090_v19, %v11097_v14  ;;  %v11150_v20 = vcombine.low %v20114_v22, %v11142_v6  ;;  %v11151_v40 = vcombine.high %v20114_v22, %v11142_v6 }
 0x44c   : > { %v13222_v13 = vcombine.low %v13198_v0, %v13214_v28  ;;  %v13223_v23 = vcombine.high %v13198_v0, %v13214_v28  ;;  %v13224_v42 = vcombine.low %v13205_v58, %v13221_v7  ;;  %v13225_v45 = vcombine.high %v13205_v58, %v13221_v7 }
 0x44d   : > { %v13242_v29 = vcombine.low %v11106_v17, %v11113_v3  ;;  %v15561_v34 = vcombine.high %v11106_v17, %v11113_v3  ;;  %v11166_v8 = vcombine.low %v20117_v52, %v11149_v11  ;;  %v11167_v5 = vcombine.high %v20117_v52, %v11149_v11 }
 0x44e   : > { %15066 = vst.msk [vmem:[%s20399_s7 + $0x20] sm:$0xff] %vm5397_vm1, %v13222_v13  ;;  %15098 = vst.msk [vmem:[%s20399_s7 + $0x120] sm:$0xff] %vm5397_vm1, %v13223_v23  ;;  %v13233_v50 = vrot.slane %v13226_v10, %v16158_v15  ;;  %v13241_v1 = vrot.slane %v15560_v18, %v16158_v15  ;;  %v11158_v49 = vrot.slane %v11150_v20, %v16163_v25 }
 0x44f   : > { %15130 = vst.msk [vmem:[%s20399_s7 + $0x220] sm:$0xff] %vm5397_vm1, %v13224_v42  ;;  %15162 = vst.msk [vmem:[%s20399_s7 + $0x320] sm:$0xff] %vm5397_vm1, %v13225_v45  ;;  %v13249_v21 = vrot.slane %v13242_v29, %v16158_v15  ;;  %v13257_v54 = vrot.slane %v15561_v34, %v16158_v15  ;;  %v11165_v56 = vrot.slane %v11151_v40, %v16163_v25  ;;  %v10629_v42 = vpop.permute.xlu1 %10628  ;;  %v10631_v45 = vpop.permute.xlu0 %10630 }
 0x450   : > { %v11174_v30 = vrot.slane %v11166_v8, %v16163_v25  ;;  %v11181_v22 = vrot.slane %v11167_v5, %v16163_v25  ;;  %v13258_v6 = vcombine.low %v13233_v50, %v13241_v1  ;;  %v13259_v43 = vcombine.high %v13233_v50, %v13241_v1  ;;  %v22096_v50 = vld [vmem:[#allocation5_spill] sm:$0xff] }
 0x451   : > { %v13274_v62 = vcombine.low %v13249_v21, %v13257_v54  ;;  %v13275_v52 = vcombine.high %v13249_v21, %v13257_v54  ;;  %v13294_v11 = vcombine.low %v11158_v49, %v11165_v56  ;;  %v15562_v59 = vcombine.high %v11158_v49, %v11165_v56  ;;  %v22097_v54 = vld [vmem:[#allocation37_spill] sm:$0xff] }
 0x452   : > { %v13310_v0 = vcombine.low %v11174_v30, %v11181_v22  ;;  %v15563_v58 = vcombine.high %v11174_v30, %v11181_v22  ;;  %v13266_v28 = vrot.slane %v13258_v6, %v16163_v25  ;;  %v13273_v7 = vrot.slane %v13259_v43, %v16163_v25 }
 0x453   : > { %v13282_v19 = vrot.slane %v13274_v62, %v16163_v25  ;;  %v13289_v14 = vrot.slane %v13275_v52, %v16163_v25  ;;  %v13301_v17 = vrot.slane %v13294_v11, %v16158_v15  ;;  %v13309_v3 = vrot.slane %v15562_v59, %v16158_v15 }
 0x454   : > { %v13317_v13 = vrot.slane %v13310_v0, %v16158_v15  ;;  %v13325_v23 = vrot.slane %v15563_v58, %v16158_v15  ;;  %v11202_v1 = vcombine.low %v22096_v50, %v10629_v42  ;;  %v11203_v21 = vcombine.high %v22096_v50, %v10629_v42 }
 0x455   : > { %v13290_v10 = vcombine.low %v13266_v28, %v13282_v19  ;;  %v13291_v18 = vcombine.high %v13266_v28, %v13282_v19  ;;  %v13292_v29 = vcombine.low %v13273_v7, %v13289_v14  ;;  %v13293_v34 = vcombine.high %v13273_v7, %v13289_v14 }
 0x456   : > { %v13326_v20 = vcombine.low %v13301_v17, %v13309_v3  ;;  %v13327_v40 = vcombine.high %v13301_v17, %v13309_v3  ;;  %v13342_v8 = vcombine.low %v13317_v13, %v13325_v23  ;;  %v13343_v5 = vcombine.high %v13317_v13, %v13325_v23 }
 0x457   : > { %15067 = vst.msk [vmem:[%s20399_s7 + $0x28] sm:$0xff] %vm5397_vm1, %v13290_v10  ;;  %15099 = vst.msk [vmem:[%s20399_s7 + $0x128] sm:$0xff] %vm5397_vm1, %v13291_v18  ;;  %v11270_v49 = vcombine.low %v22097_v54, %v10631_v45  ;;  %v11271_v56 = vcombine.high %v22097_v54, %v10631_v45  ;;  %v11210_v62 = vrot.slane %v11202_v1, %v16158_v15 }
 0x458   : > { %15131 = vst.msk [vmem:[%s20399_s7 + $0x228] sm:$0xff] %vm5397_vm1, %v13292_v29  ;;  %15163 = vst.msk [vmem:[%s20399_s7 + $0x328] sm:$0xff] %vm5397_vm1, %v13293_v34  ;;  %v13334_v30 = vrot.slane %v13326_v20, %v16163_v25  ;;  %v13341_v22 = vrot.slane %v13327_v40, %v16163_v25  ;;  %v13350_v6 = vrot.slane %v13342_v8, %v16163_v25 }
 0x459   : > { %v13357_v43 = vrot.slane %v13343_v5, %v16163_v25  ;;  %v11217_v52 = vrot.slane %v11203_v21, %v16158_v15  ;;  %v11278_v11 = vrot.slane %v11270_v49, %v16158_v15  ;;  %v11285_v59 = vrot.slane %v11271_v56, %v16158_v15 }
 0x45a   : > { %v13358_v0 = vcombine.low %v13334_v30, %v13350_v6  ;;  %v13359_v58 = vcombine.high %v13334_v30, %v13350_v6  ;;  %v11218_v19 = vcombine.low %v20124_v44, %v11210_v62  ;;  %v11219_v14 = vcombine.high %v20124_v44, %v11210_v62  ;;  %v10633_v6 = vpop.permute.xlu1 %10632 }
 0x45b   : > { %v13360_v28 = vcombine.low %v13341_v22, %v13357_v43  ;;  %v13361_v7 = vcombine.high %v13341_v22, %v13357_v43  ;;  %v11234_v17 = vcombine.low %v20127_v53, %v11217_v52  ;;  %v11235_v3 = vcombine.high %v20127_v53, %v11217_v52  ;;  %v10635_v43 = vpop.permute.xlu0 %10634 }
 0x45c   : > { %15068 = vst.msk [vmem:[%s20399_s7 + $0x30] sm:$0xff] %vm5397_vm1, %v13358_v0  ;;  %15100 = vst.msk [vmem:[%s20399_s7 + $0x130] sm:$0xff] %vm5397_vm1, %v13359_v58  ;;  %v11286_v13 = vcombine.low %v20130_v46, %v11278_v11  ;;  %v11287_v23 = vcombine.high %v20130_v46, %v11278_v11  ;;  %v11302_v42 = vcombine.low %v20133_v32, %v11285_v59 }
 0x45d   : > { %15132 = vst.msk [vmem:[%s20399_s7 + $0x230] sm:$0xff] %vm5397_vm1, %v13360_v28  ;;  %15164 = vst.msk [vmem:[%s20399_s7 + $0x330] sm:$0xff] %vm5397_vm1, %v13361_v7  ;;  %v11303_v44 = vcombine.high %v20133_v32, %v11285_v59  ;;  %v11226_v45 = vrot.slane %v11218_v19, %v16163_v25  ;;  %v11233_v53 = vrot.slane %v11219_v14, %v16163_v25 }
 0x45e   : > { %v11242_v10 = vrot.slane %v11234_v17, %v16163_v25  ;;  %v11249_v18 = vrot.slane %v11235_v3, %v16163_v25  ;;  %v11294_v29 = vrot.slane %v11286_v13, %v16163_v25  ;;  %v11301_v34 = vrot.slane %v11287_v23, %v16163_v25 }
 0x45f   : > { %v11310_v20 = vrot.slane %v11302_v42, %v16163_v25  ;;  %v11317_v46 = vrot.slane %v11303_v44, %v16163_v25  ;;  %v13362_v40 = vcombine.low %v11226_v45, %v11233_v53  ;;  %v15564_v8 = vcombine.high %v11226_v45, %v11233_v53 }
 0x460   : > { %v13378_v5 = vcombine.low %v11242_v10, %v11249_v18  ;;  %v15565_v32 = vcombine.high %v11242_v10, %v11249_v18  ;;  %v13430_v50 = vcombine.low %v11294_v29, %v11301_v34  ;;  %v15566_v1 = vcombine.high %v11294_v29, %v11301_v34 }
 0x461   : > { %v13446_v21 = vcombine.low %v11310_v20, %v11317_v46  ;;  %v15567_v54 = vcombine.high %v11310_v20, %v11317_v46  ;;  %v13369_v49 = vrot.slane %v13362_v40, %v16158_v15  ;;  %v13377_v56 = vrot.slane %v15564_v8, %v16158_v15  ;;  %v10637_v40 = vpop.permute.xlu1 %10636  ;;  %v10639_v8 = vpop.permute.xlu0 %10638 }
 0x462   : > { %v13385_v30 = vrot.slane %v13378_v5, %v16158_v15  ;;  %v13393_v22 = vrot.slane %v15565_v32, %v16158_v15  ;;  %v13437_v62 = vrot.slane %v13430_v50, %v16158_v15  ;;  %v13445_v52 = vrot.slane %v15566_v1, %v16158_v15 }
 0x463   : > { %v13453_v11 = vrot.slane %v13446_v21, %v16158_v15  ;;  %v13461_v59 = vrot.slane %v15567_v54, %v16158_v15  ;;  %v13394_v0 = vcombine.low %v13369_v49, %v13377_v56  ;;  %v13395_v58 = vcombine.high %v13369_v49, %v13377_v56  ;;  %v22098_v21 = vld [vmem:[#allocation40_spill] sm:$0xff]  ;;  %v22099_v56 = vld [vmem:[#allocation41_spill] sm:$0xff] }
 0x464   : > { %v13410_v28 = vcombine.low %v13385_v30, %v13393_v22  ;;  %v13411_v7 = vcombine.high %v13385_v30, %v13393_v22  ;;  %v13462_v19 = vcombine.low %v13437_v62, %v13445_v52  ;;  %v13463_v14 = vcombine.high %v13437_v62, %v13445_v52  ;;  %v22100_v62 = vld [vmem:[#allocation56_spill] sm:$0xff] }
 0x465   : > { %v13478_v17 = vcombine.low %v13453_v11, %v13461_v59  ;;  %v13479_v3 = vcombine.high %v13453_v11, %v13461_v59  ;;  %v13402_v13 = vrot.slane %v13394_v0, %v16163_v25  ;;  %v13409_v23 = vrot.slane %v13395_v58, %v16163_v25  ;;  %v22101_v59 = vld [vmem:[#allocation28_spill] sm:$0xff] }
 0x466   : > { %v13418_v42 = vrot.slane %v13410_v28, %v16163_v25  ;;  %v13425_v44 = vrot.slane %v13411_v7, %v16163_v25  ;;  %v13470_v45 = vrot.slane %v13462_v19, %v16163_v25  ;;  %v13477_v53 = vrot.slane %v13463_v14, %v16163_v25 }
 0x467   : > { %v13486_v10 = vrot.slane %v13478_v17, %v16163_v25  ;;  %v13493_v18 = vrot.slane %v13479_v3, %v16163_v25  ;;  %v11338_v54 = vcombine.low %v22098_v21, %v10633_v6  ;;  %v11339_v49 = vcombine.high %v22098_v21, %v10633_v6 }
 0x468   : > { %v13426_v29 = vcombine.low %v13402_v13, %v13418_v42  ;;  %v13427_v34 = vcombine.high %v13402_v13, %v13418_v42  ;;  %v13428_v20 = vcombine.low %v13409_v23, %v13425_v44  ;;  %v13429_v46 = vcombine.high %v13409_v23, %v13425_v44 }
 0x469   : > { %v13494_v5 = vcombine.low %v13470_v45, %v13486_v10  ;;  %v13495_v32 = vcombine.high %v13470_v45, %v13486_v10  ;;  %v13496_v50 = vcombine.low %v13477_v53, %v13493_v18  ;;  %v13497_v1 = vcombine.high %v13477_v53, %v13493_v18 }
 0x46a   : > { %15069 = vst.msk [vmem:[%s20399_s7 + $0x38] sm:$0xff] %vm5397_vm1, %v13426_v29  ;;  %15101 = vst.msk [vmem:[%s20399_s7 + $0x138] sm:$0xff] %vm5397_vm1, %v13427_v34  ;;  %v11406_v30 = vcombine.low %v22099_v56, %v10635_v43  ;;  %v11407_v22 = vcombine.high %v22099_v56, %v10635_v43  ;;  %v11474_v52 = vcombine.low %v22100_v62, %v10637_v40 }
 0x46b   : > { %15133 = vst.msk [vmem:[%s20399_s7 + $0x238] sm:$0xff] %vm5397_vm1, %v13428_v20  ;;  %15165 = vst.msk [vmem:[%s20399_s7 + $0x338] sm:$0xff] %vm5397_vm1, %v13429_v46  ;;  %v11475_v11 = vcombine.high %v22100_v62, %v10637_v40  ;;  %v11542_v0 = vcombine.low %v22101_v59, %v10639_v8  ;;  %v11543_v6 = vcombine.high %v22101_v59, %v10639_v8 }
 0x46c   : > { %15070 = vst.msk [vmem:[%s20399_s7 + $0x40] sm:$0xff] %vm5397_vm1, %v13494_v5  ;;  %15102 = vst.msk [vmem:[%s20399_s7 + $0x140] sm:$0xff] %vm5397_vm1, %v13495_v32  ;;  %v11346_v58 = vrot.slane %v11338_v54, %v16158_v15  ;;  %v11353_v43 = vrot.slane %v11339_v49, %v16158_v15  ;;  %v11414_v28 = vrot.slane %v11406_v30, %v16158_v15 }
 0x46d   : > { %15134 = vst.msk [vmem:[%s20399_s7 + $0x240] sm:$0xff] %vm5397_vm1, %v13496_v50  ;;  %15166 = vst.msk [vmem:[%s20399_s7 + $0x340] sm:$0xff] %vm5397_vm1, %v13497_v1  ;;  %v11421_v7 = vrot.slane %v11407_v22, %v16158_v15  ;;  %v20630_v19 = vrot.slane %v11474_v52, %v16158_v15  ;;  %v20633_v14 = vrot.slane %v11475_v11, %v16158_v15 }
 0x46e   : > { %v20636_v17 = vrot.slane %v11542_v0, %v16158_v15  ;;  %v20639_v3 = vrot.slane %v11543_v6, %v16158_v15  ;;  %v11354_v13 = vcombine.low %v20148_v48, %v11346_v58  ;;  %v11355_v23 = vcombine.high %v20148_v48, %v11346_v58 }
 0x46f   : > { %v11370_v42 = vcombine.low %v20151_v31, %v11353_v43  ;;  %v11371_v44 = vcombine.high %v20151_v31, %v11353_v43  ;;  %v11422_v45 = vcombine.low %v20158_v4, %v11414_v28  ;;  %v11423_v53 = vcombine.high %v20158_v4, %v11414_v28 }
 0x470   : > { %v11438_v10 = vcombine.low %v20161_v2, %v11421_v7  ;;  %v11439_v18 = vcombine.high %v20161_v2, %v11421_v7  ;;  %v11362_v29 = vrot.slane %v11354_v13, %v16163_v25  ;;  %v11369_v34 = vrot.slane %v11355_v23, %v16163_v25 }
 0x471   : > { %v11378_v20 = vrot.slane %v11370_v42, %v16163_v25  ;;  %v11385_v48 = vrot.slane %v11371_v44, %v16163_v25  ;;  %v11430_v46 = vrot.slane %v11422_v45, %v16163_v25  ;;  %v11437_v31 = vrot.slane %v11423_v53, %v16163_v25 }
 0x472   : > { %v11446_v40 = vrot.slane %v11438_v10, %v16163_v25  ;;  %v11453_v4 = vrot.slane %v11439_v18, %v16163_v25  ;;  %v13498_v8 = vcombine.low %v11362_v29, %v11369_v34  ;;  %v15568_v5 = vcombine.high %v11362_v29, %v11369_v34 }
 0x473   : > { %v13514_v32 = vcombine.low %v11378_v20, %v11385_v48  ;;  %v15569_v2 = vcombine.high %v11378_v20, %v11385_v48  ;;  %v13566_v50 = vcombine.low %v11430_v46, %v11437_v31  ;;  %v15570_v1 = vcombine.high %v11430_v46, %v11437_v31 }
 0x474   : > { %v13582_v21 = vcombine.low %v11446_v40, %v11453_v4  ;;  %v15571_v54 = vcombine.high %v11446_v40, %v11453_v4  ;;  %v13505_v49 = vrot.slane %v13498_v8, %v16158_v15  ;;  %v13513_v56 = vrot.slane %v15568_v5, %v16158_v15 }
 0x475   : > { %v13521_v30 = vrot.slane %v13514_v32, %v16158_v15  ;;  %v13529_v22 = vrot.slane %v15569_v2, %v16158_v15  ;;  %v13573_v62 = vrot.slane %v13566_v50, %v16158_v15  ;;  %v13581_v52 = vrot.slane %v15570_v1, %v16158_v15 }
 0x476   : > { %v13589_v11 = vrot.slane %v13582_v21, %v16158_v15  ;;  %v13597_v59 = vrot.slane %v15571_v54, %v16158_v15  ;;  %v13530_v0 = vcombine.low %v13505_v49, %v13513_v56  ;;  %v13531_v6 = vcombine.high %v13505_v49, %v13513_v56 }
 0x477   : > { %v13546_v58 = vcombine.low %v13521_v30, %v13529_v22  ;;  %v13547_v43 = vcombine.high %v13521_v30, %v13529_v22  ;;  %v13598_v28 = vcombine.low %v13573_v62, %v13581_v52  ;;  %v13599_v7 = vcombine.high %v13573_v62, %v13581_v52 }
 0x478   : > { %v13614_v13 = vcombine.low %v13589_v11, %v13597_v59  ;;  %v13615_v23 = vcombine.high %v13589_v11, %v13597_v59  ;;  %v13538_v42 = vrot.slane %v13530_v0, %v16163_v25  ;;  %v13545_v44 = vrot.slane %v13531_v6, %v16163_v25 }
 0x479   : > { %v13554_v45 = vrot.slane %v13546_v58, %v16163_v25  ;;  %v13561_v53 = vrot.slane %v13547_v43, %v16163_v25  ;;  %v13606_v10 = vrot.slane %v13598_v28, %v16163_v25  ;;  %v13613_v18 = vrot.slane %v13599_v7, %v16163_v25 }
 0x47a   : > { %v13622_v29 = vrot.slane %v13614_v13, %v16163_v25  ;;  %v13629_v34 = vrot.slane %v13615_v23, %v16163_v25  ;;  %v11490_v32 = vcombine.low %v20168_v9, %v20630_v19  ;;  %v11491_v2 = vcombine.high %v20168_v9, %v20630_v19  ;;  %v10641_v13 = vpop.permute.xlu1 %10640  ;;  %v10643_v23 = vpop.permute.xlu0 %10642 }
 0x47b   : > { %v13562_v20 = vcombine.low %v13538_v42, %v13554_v45  ;;  %v13563_v48 = vcombine.high %v13538_v42, %v13554_v45  ;;  %v13564_v46 = vcombine.low %v13545_v44, %v13561_v53  ;;  %v13565_v31 = vcombine.high %v13545_v44, %v13561_v53 }
 0x47c   : > { %v13630_v40 = vcombine.low %v13606_v10, %v13622_v29  ;;  %v13631_v4 = vcombine.high %v13606_v10, %v13622_v29  ;;  %v13632_v8 = vcombine.low %v13613_v18, %v13629_v34  ;;  %v13633_v5 = vcombine.high %v13613_v18, %v13629_v34 }
 0x47d   : > { %15071 = vst.msk [vmem:[%s20399_s7 + $0x48] sm:$0xff] %vm5397_vm1, %v13562_v20  ;;  %15103 = vst.msk [vmem:[%s20399_s7 + $0x148] sm:$0xff] %vm5397_vm1, %v13563_v48  ;;  %v11506_v50 = vcombine.low %v20171_v24, %v20633_v14  ;;  %v11507_v1 = vcombine.high %v20171_v24, %v20633_v14  ;;  %v11558_v21 = vcombine.low %v20174_v63, %v20636_v17 }
 0x47e   : > { %15135 = vst.msk [vmem:[%s20399_s7 + $0x248] sm:$0xff] %vm5397_vm1, %v13564_v46  ;;  %15167 = vst.msk [vmem:[%s20399_s7 + $0x348] sm:$0xff] %vm5397_vm1, %v13565_v31  ;;  %v11559_v9 = vcombine.high %v20174_v63, %v20636_v17  ;;  %v11574_v19 = vcombine.low %v20177_v36, %v20639_v3  ;;  %v11575_v24 = vcombine.high %v20177_v36, %v20639_v3 }
 0x47f   : > { %15072 = vst.msk [vmem:[%s20399_s7 + $0x50] sm:$0xff] %vm5397_vm1, %v13630_v40  ;;  %15104 = vst.msk [vmem:[%s20399_s7 + $0x150] sm:$0xff] %vm5397_vm1, %v13631_v4  ;;  %v11498_v14 = vrot.slane %v11490_v32, %v16163_v25  ;;  %v11505_v54 = vrot.slane %v11491_v2, %v16163_v25  ;;  %v11514_v49 = vrot.slane %v11506_v50, %v16163_v25 }
 0x480   : > { %15136 = vst.msk [vmem:[%s20399_s7 + $0x250] sm:$0xff] %vm5397_vm1, %v13632_v8  ;;  %15168 = vst.msk [vmem:[%s20399_s7 + $0x350] sm:$0xff] %vm5397_vm1, %v13633_v5  ;;  %v11521_v56 = vrot.slane %v11507_v1, %v16163_v25  ;;  %v11566_v30 = vrot.slane %v11558_v21, %v16163_v25  ;;  %v11573_v22 = vrot.slane %v11559_v9, %v16163_v25 }
 0x481   : > { %v11582_v63 = vrot.slane %v11574_v19, %v16163_v25  ;;  %v11589_v17 = vrot.slane %v11575_v24, %v16163_v25  ;;  %v13634_v62 = vcombine.low %v11498_v14, %v11505_v54  ;;  %v15572_v52 = vcombine.high %v11498_v14, %v11505_v54  ;;  %v10645_v14 = vpop.permute.xlu1 %10644  ;;  %v10647_v54 = vpop.permute.xlu0 %10646 }
 0x482   : > { %v13650_v11 = vcombine.low %v11514_v49, %v11521_v56  ;;  %v15573_v36 = vcombine.high %v11514_v49, %v11521_v56  ;;  %v13702_v3 = vcombine.low %v11566_v30, %v11573_v22  ;;  %v15574_v59 = vcombine.high %v11566_v30, %v11573_v22 }
 0x483   : > { %v13718_v0 = vcombine.low %v11582_v63, %v11589_v17  ;;  %v15575_v6 = vcombine.high %v11582_v63, %v11589_v17  ;;  %v13641_v58 = vrot.slane %v13634_v62, %v16158_v15  ;;  %v13649_v43 = vrot.slane %v15572_v52, %v16158_v15  ;;  %v22102_v63 = vld [vmem:[#allocation57_spill] sm:$0xff]  ;;  %v22103_v52 = vld [vmem:[#allocation44_spill] sm:$0xff] }
 0x484   : > { %v13657_v28 = vrot.slane %v13650_v11, %v16158_v15  ;;  %v13665_v7 = vrot.slane %v15573_v36, %v16158_v15  ;;  %v13709_v42 = vrot.slane %v13702_v3, %v16158_v15  ;;  %v13717_v44 = vrot.slane %v15574_v59, %v16158_v15  ;;  %v22104_v3 = vld [vmem:[#allocation59_spill] sm:$0xff] }
 0x485   : > { %v13725_v45 = vrot.slane %v13718_v0, %v16158_v15  ;;  %v13733_v53 = vrot.slane %v15575_v6, %v16158_v15  ;;  %v13666_v10 = vcombine.low %v13641_v58, %v13649_v43  ;;  %v13667_v18 = vcombine.high %v13641_v58, %v13649_v43  ;;  %v22105_v6 = vld [vmem:[#allocation17_spill] sm:$0xff] }
 0x486   : > { %v13682_v29 = vcombine.low %v13657_v28, %v13665_v7  ;;  %v13683_v34 = vcombine.high %v13657_v28, %v13665_v7  ;;  %v13734_v20 = vcombine.low %v13709_v42, %v13717_v44  ;;  %v13735_v48 = vcombine.high %v13709_v42, %v13717_v44 }
 0x487   : > { %v13750_v46 = vcombine.low %v13725_v45, %v13733_v53  ;;  %v13751_v31 = vcombine.high %v13725_v45, %v13733_v53  ;;  %v13674_v40 = vrot.slane %v13666_v10, %v16163_v25  ;;  %v13681_v4 = vrot.slane %v13667_v18, %v16163_v25 }
 0x488   : > { %v13690_v8 = vrot.slane %v13682_v29, %v16163_v25  ;;  %v13697_v5 = vrot.slane %v13683_v34, %v16163_v25  ;;  %v13742_v32 = vrot.slane %v13734_v20, %v16163_v25  ;;  %v13749_v2 = vrot.slane %v13735_v48, %v16163_v25  ;;  %v22106_v29 = vld [vmem:[#allocation19_spill] sm:$0xff] }
 0x489   : > { %v13758_v50 = vrot.slane %v13750_v46, %v16163_v25  ;;  %v13765_v1 = vrot.slane %v13751_v31, %v16163_v25  ;;  %v11610_v17 = vcombine.low %v22102_v63, %v10641_v13  ;;  %v11611_v62 = vcombine.high %v22102_v63, %v10641_v13 }
 0x48a   : > { %v13698_v21 = vcombine.low %v13674_v40, %v13690_v8  ;;  %v13699_v9 = vcombine.high %v13674_v40, %v13690_v8  ;;  %v13700_v19 = vcombine.low %v13681_v4, %v13697_v5  ;;  %v13701_v24 = vcombine.high %v13681_v4, %v13697_v5 }
 0x48b   : > { %v13766_v49 = vcombine.low %v13742_v32, %v13758_v50  ;;  %v13767_v56 = vcombine.high %v13742_v32, %v13758_v50  ;;  %v13768_v30 = vcombine.low %v13749_v2, %v13765_v1  ;;  %v13769_v22 = vcombine.high %v13749_v2, %v13765_v1 }
 0x48c   : > { %15073 = vst.msk [vmem:[%s20399_s7 + $0x58] sm:$0xff] %vm5397_vm1, %v13698_v21  ;;  %15105 = vst.msk [vmem:[%s20399_s7 + $0x158] sm:$0xff] %vm5397_vm1, %v13699_v9  ;;  %v11678_v11 = vcombine.low %v22103_v52, %v10643_v23  ;;  %v11679_v36 = vcombine.high %v22103_v52, %v10643_v23  ;;  %v11746_v59 = vcombine.low %v22104_v3, %v10645_v14 }
 0x48d   : > { %15137 = vst.msk [vmem:[%s20399_s7 + $0x258] sm:$0xff] %vm5397_vm1, %v13700_v19  ;;  %15169 = vst.msk [vmem:[%s20399_s7 + $0x358] sm:$0xff] %vm5397_vm1, %v13701_v24  ;;  %v11747_v0 = vcombine.high %v22104_v3, %v10645_v14  ;;  %v11814_v58 = vcombine.low %v22105_v6, %v10647_v54  ;;  %v11815_v43 = vcombine.high %v22105_v6, %v10647_v54 }
 0x48e   : > { %15074 = vst.msk [vmem:[%s20399_s7 + $0x60] sm:$0xff] %vm5397_vm1, %v13766_v49  ;;  %15106 = vst.msk [vmem:[%s20399_s7 + $0x160] sm:$0xff] %vm5397_vm1, %v13767_v56  ;;  %v11618_v28 = vrot.slane %v11610_v17, %v16158_v15  ;;  %v11625_v7 = vrot.slane %v11611_v62, %v16158_v15  ;;  %v11686_v13 = vrot.slane %v11678_v11, %v16158_v15 }
 0x48f   : > { %15138 = vst.msk [vmem:[%s20399_s7 + $0x260] sm:$0xff] %vm5397_vm1, %v13768_v30  ;;  %15170 = vst.msk [vmem:[%s20399_s7 + $0x360] sm:$0xff] %vm5397_vm1, %v13769_v22  ;;  %v11693_v23 = vrot.slane %v11679_v36, %v16158_v15  ;;  %v20758_v42 = vrot.slane %v11746_v59, %v16158_v15  ;;  %v20761_v44 = vrot.slane %v11747_v0, %v16158_v15 }
 0x490   : > { %v20764_v45 = vrot.slane %v11814_v58, %v16158_v15  ;;  %v20767_v53 = vrot.slane %v11815_v43, %v16158_v15  ;;  %v11626_v10 = vcombine.low %v20188_v16, %v11618_v28  ;;  %v11627_v18 = vcombine.high %v20188_v16, %v11618_v28 }
 0x491   : > { %v11642_v34 = vcombine.low %v22106_v29, %v11625_v7  ;;  %v11643_v20 = vcombine.high %v22106_v29, %v11625_v7  ;;  %v11694_v48 = vcombine.low %v20198_v57, %v11686_v13  ;;  %v11695_v46 = vcombine.high %v20198_v57, %v11686_v13 }
 0x492   : > { %v11710_v31 = vcombine.low %v20201_v12, %v11693_v23  ;;  %v11711_v40 = vcombine.high %v20201_v12, %v11693_v23  ;;  %v11634_v4 = vrot.slane %v11626_v10, %v16163_v25  ;;  %v11641_v8 = vrot.slane %v11627_v18, %v16163_v25 }
 0x493   : > { %v11650_v5 = vrot.slane %v11642_v34, %v16163_v25  ;;  %v11657_v16 = vrot.slane %v11643_v20, %v16163_v25  ;;  %v11702_v32 = vrot.slane %v11694_v48, %v16163_v25  ;;  %v11709_v2 = vrot.slane %v11695_v46, %v16163_v25 }
 0x494   : > { %v11718_v50 = vrot.slane %v11710_v31, %v16163_v25  ;;  %v11725_v57 = vrot.slane %v11711_v40, %v16163_v25  ;;  %v13770_v1 = vcombine.low %v11634_v4, %v11641_v8  ;;  %v15576_v21 = vcombine.high %v11634_v4, %v11641_v8 }
 0x495   : > { %v13786_v9 = vcombine.low %v11650_v5, %v11657_v16  ;;  %v15577_v12 = vcombine.high %v11650_v5, %v11657_v16  ;;  %v13838_v19 = vcombine.low %v11702_v32, %v11709_v2  ;;  %v15578_v24 = vcombine.high %v11702_v32, %v11709_v2 }
 0x496   : > { %v13854_v14 = vcombine.low %v11718_v50, %v11725_v57  ;;  %v15579_v54 = vcombine.high %v11718_v50, %v11725_v57  ;;  %v13777_v49 = vrot.slane %v13770_v1, %v16158_v15  ;;  %v13785_v56 = vrot.slane %v15576_v21, %v16158_v15 }
 0x497   : > { %v13793_v30 = vrot.slane %v13786_v9, %v16158_v15  ;;  %v13801_v22 = vrot.slane %v15577_v12, %v16158_v15  ;;  %v13845_v63 = vrot.slane %v13838_v19, %v16158_v15  ;;  %v13853_v17 = vrot.slane %v15578_v24, %v16158_v15 }
 0x498   : > { %v13861_v62 = vrot.slane %v13854_v14, %v16158_v15  ;;  %v13869_v52 = vrot.slane %v15579_v54, %v16158_v15  ;;  %v13802_v11 = vcombine.low %v13777_v49, %v13785_v56  ;;  %v13803_v36 = vcombine.high %v13777_v49, %v13785_v56 }
 0x499   : > { %v13818_v3 = vcombine.low %v13793_v30, %v13801_v22  ;;  %v13819_v59 = vcombine.high %v13793_v30, %v13801_v22  ;;  %v13870_v0 = vcombine.low %v13845_v63, %v13853_v17  ;;  %v13871_v6 = vcombine.high %v13845_v63, %v13853_v17 }
 0x49a   : > { %v13886_v58 = vcombine.low %v13861_v62, %v13869_v52  ;;  %v13887_v43 = vcombine.high %v13861_v62, %v13869_v52  ;;  %v13810_v28 = vrot.slane %v13802_v11, %v16163_v25  ;;  %v13817_v7 = vrot.slane %v13803_v36, %v16163_v25  ;;  %v10649_v36 = vpop.permute.xlu1 %10648 }
 0x49b   : > { %v13826_v13 = vrot.slane %v13818_v3, %v16163_v25  ;;  %v13833_v23 = vrot.slane %v13819_v59, %v16163_v25  ;;  %v13878_v10 = vrot.slane %v13870_v0, %v16163_v25  ;;  %v13885_v18 = vrot.slane %v13871_v6, %v16163_v25  ;;  %v10651_v3 = vpop.permute.xlu0 %10650 }
 0x49c   : > { %v13894_v29 = vrot.slane %v13886_v58, %v16163_v25  ;;  %v13901_v34 = vrot.slane %v13887_v43, %v16163_v25  ;;  %v11762_v16 = vcombine.low %v20210_v61, %v20758_v42  ;;  %v11763_v32 = vcombine.high %v20210_v61, %v20758_v42  ;;  %v22107_v42 = vld [vmem:[#allocation33_spill] sm:$0xff] }
 0x49d   : > { %v13834_v20 = vcombine.low %v13810_v28, %v13826_v13  ;;  %v13835_v48 = vcombine.high %v13810_v28, %v13826_v13  ;;  %v13836_v46 = vcombine.low %v13817_v7, %v13833_v23  ;;  %v13837_v31 = vcombine.high %v13817_v7, %v13833_v23 }
 0x49e   : > { %v13902_v40 = vcombine.low %v13878_v10, %v13894_v29  ;;  %v13903_v4 = vcombine.high %v13878_v10, %v13894_v29  ;;  %v13904_v8 = vcombine.low %v13885_v18, %v13901_v34  ;;  %v13905_v5 = vcombine.high %v13885_v18, %v13901_v34 }
 0x49f   : > { %15075 = vst.msk [vmem:[%s20399_s7 + $0x68] sm:$0xff] %vm5397_vm1, %v13834_v20  ;;  %15107 = vst.msk [vmem:[%s20399_s7 + $0x168] sm:$0xff] %vm5397_vm1, %v13835_v48  ;;  %v11778_v2 = vcombine.low %v20213_v37, %v20761_v44  ;;  %v11779_v50 = vcombine.high %v20213_v37, %v20761_v44  ;;  %v11830_v57 = vcombine.low %v20216_v60, %v20764_v45 }
 0x4a0   : > { %15139 = vst.msk [vmem:[%s20399_s7 + $0x268] sm:$0xff] %vm5397_vm1, %v13836_v46  ;;  %15171 = vst.msk [vmem:[%s20399_s7 + $0x368] sm:$0xff] %vm5397_vm1, %v13837_v31  ;;  %v11831_v61 = vcombine.high %v20216_v60, %v20764_v45  ;;  %v11846_v1 = vcombine.low %v22107_v42, %v20767_v53  ;;  %v11847_v37 = vcombine.high %v22107_v42, %v20767_v53 }
 0x4a1   : > { %15076 = vst.msk [vmem:[%s20399_s7 + $0x70] sm:$0xff] %vm5397_vm1, %v13902_v40  ;;  %15108 = vst.msk [vmem:[%s20399_s7 + $0x170] sm:$0xff] %vm5397_vm1, %v13903_v4  ;;  %v11770_v44 = vrot.slane %v11762_v16, %v16163_v25  ;;  %v11777_v21 = vrot.slane %v11763_v32, %v16163_v25  ;;  %v11786_v9 = vrot.slane %v11778_v2, %v16163_v25 }
 0x4a2   : > { %15140 = vst.msk [vmem:[%s20399_s7 + $0x270] sm:$0xff] %vm5397_vm1, %v13904_v8  ;;  %15172 = vst.msk [vmem:[%s20399_s7 + $0x370] sm:$0xff] %vm5397_vm1, %v13905_v5  ;;  %v11793_v12 = vrot.slane %v11779_v50, %v16163_v25  ;;  %v11838_v19 = vrot.slane %v11830_v57, %v16163_v25  ;;  %v11845_v24 = vrot.slane %v11831_v61, %v16163_v25  ;;  %v10653_v50 = vpop.permute.xlu1 %10652  ;;  %v10655_v57 = vpop.permute.xlu0 %10654 }
 0x4a3   : > { %v11854_v60 = vrot.slane %v11846_v1, %v16163_v25  ;;  %v11861_v45 = vrot.slane %v11847_v37, %v16163_v25  ;;  %v13906_v14 = vcombine.low %v11770_v44, %v11777_v21  ;;  %v15580_v54 = vcombine.high %v11770_v44, %v11777_v21  ;;  %v22108_v44 = vld [vmem:[#allocation74_spill] sm:$0xff] }
 0x4a4   : > { %v13922_v49 = vcombine.low %v11786_v9, %v11793_v12  ;;  %v15581_v53 = vcombine.high %v11786_v9, %v11793_v12  ;;  %v13974_v56 = vcombine.low %v11838_v19, %v11845_v24  ;;  %v15582_v30 = vcombine.high %v11838_v19, %v11845_v24  ;;  %v22109_v12 = vld [vmem:[#allocation79_spill] sm:$0xff] }
 0x4a5   : > { %v13990_v22 = vcombine.low %v11854_v60, %v11861_v45  ;;  %v15583_v63 = vcombine.high %v11854_v60, %v11861_v45  ;;  %v13913_v17 = vrot.slane %v13906_v14, %v16158_v15  ;;  %v13921_v62 = vrot.slane %v15580_v54, %v16158_v15  ;;  %v22110_v60 = vld [vmem:[#allocation85_spill] sm:$0xff]  ;;  %v22111_v54 = vld [vmem:[#allocation86_spill] sm:$0xff] }
 0x4a6   : > { %v13929_v52 = vrot.slane %v13922_v49, %v16158_v15  ;;  %v13937_v11 = vrot.slane %v15581_v53, %v16158_v15  ;;  %v13981_v59 = vrot.slane %v13974_v56, %v16158_v15  ;;  %v13989_v0 = vrot.slane %v15582_v30, %v16158_v15 }
 0x4a7   : > { %v13997_v6 = vrot.slane %v13990_v22, %v16158_v15  ;;  %v14005_v58 = vrot.slane %v15583_v63, %v16158_v15  ;;  %v13938_v43 = vcombine.low %v13913_v17, %v13921_v62  ;;  %v13939_v28 = vcombine.high %v13913_v17, %v13921_v62 }
 0x4a8   : > { %v13954_v7 = vcombine.low %v13929_v52, %v13937_v11  ;;  %v13955_v13 = vcombine.high %v13929_v52, %v13937_v11  ;;  %v14006_v23 = vcombine.low %v13981_v59, %v13989_v0  ;;  %v14007_v10 = vcombine.high %v13981_v59, %v13989_v0 }
 0x4a9   : > { %v14022_v18 = vcombine.low %v13997_v6, %v14005_v58  ;;  %v14023_v29 = vcombine.high %v13997_v6, %v14005_v58  ;;  %v13946_v34 = vrot.slane %v13938_v43, %v16163_v25  ;;  %v13953_v20 = vrot.slane %v13939_v28, %v16163_v25 }
 0x4aa   : > { %v13962_v48 = vrot.slane %v13954_v7, %v16163_v25  ;;  %v13969_v46 = vrot.slane %v13955_v13, %v16163_v25  ;;  %v14014_v31 = vrot.slane %v14006_v23, %v16163_v25  ;;  %v14021_v40 = vrot.slane %v14007_v10, %v16163_v25 }
 0x4ab   : > { %v14030_v4 = vrot.slane %v14022_v18, %v16163_v25  ;;  %v14037_v8 = vrot.slane %v14023_v29, %v16163_v25  ;;  %v11882_v21 = vcombine.low %v22108_v44, %v10649_v36  ;;  %v11883_v9 = vcombine.high %v22108_v44, %v10649_v36 }
 0x4ac   : > { %v13970_v5 = vcombine.low %v13946_v34, %v13962_v48  ;;  %v13971_v16 = vcombine.high %v13946_v34, %v13962_v48  ;;  %v13972_v32 = vcombine.low %v13953_v20, %v13969_v46  ;;  %v13973_v2 = vcombine.high %v13953_v20, %v13969_v46 }
 0x4ad   : > { %v14038_v61 = vcombine.low %v14014_v31, %v14030_v4  ;;  %v14039_v42 = vcombine.high %v14014_v31, %v14030_v4  ;;  %v14040_v1 = vcombine.low %v14021_v40, %v14037_v8  ;;  %v14041_v37 = vcombine.high %v14021_v40, %v14037_v8 }
 0x4ae   : > { %15077 = vst.msk [vmem:[%s20399_s7 + $0x78] sm:$0xff] %vm5397_vm1, %v13970_v5  ;;  %15109 = vst.msk [vmem:[%s20399_s7 + $0x178] sm:$0xff] %vm5397_vm1, %v13971_v16  ;;  %v11950_v19 = vcombine.low %v22109_v12, %v10651_v3  ;;  %v11951_v24 = vcombine.high %v22109_v12, %v10651_v3  ;;  %v12018_v45 = vcombine.low %v22110_v60, %v10653_v50 }
 0x4af   : > { %15141 = vst.msk [vmem:[%s20399_s7 + $0x278] sm:$0xff] %vm5397_vm1, %v13972_v32  ;;  %15173 = vst.msk [vmem:[%s20399_s7 + $0x378] sm:$0xff] %vm5397_vm1, %v13973_v2  ;;  %v12019_v14 = vcombine.high %v22110_v60, %v10653_v50  ;;  %v12086_v49 = vcombine.low %v22111_v54, %v10655_v57  ;;  %v12087_v53 = vcombine.high %v22111_v54, %v10655_v57 }
 0x4b0   : > { %15078 = vst.msk [vmem:[%s20399_s7 + $0x80] sm:$0xff] %vm5397_vm1, %v14038_v61  ;;  %15110 = vst.msk [vmem:[%s20399_s7 + $0x180] sm:$0xff] %vm5397_vm1, %v14039_v42  ;;  %v11890_v56 = vrot.slane %v11882_v21, %v16158_v15  ;;  %v11897_v30 = vrot.slane %v11883_v9, %v16158_v15  ;;  %v11958_v22 = vrot.slane %v11950_v19, %v16158_v15 }
 0x4b1   : > { %15142 = vst.msk [vmem:[%s20399_s7 + $0x280] sm:$0xff] %vm5397_vm1, %v14040_v1  ;;  %15174 = vst.msk [vmem:[%s20399_s7 + $0x380] sm:$0xff] %vm5397_vm1, %v14041_v37  ;;  %v11965_v63 = vrot.slane %v11951_v24, %v16158_v15  ;;  %v20886_v17 = vrot.slane %v12018_v45, %v16158_v15  ;;  %v20889_v62 = vrot.slane %v12019_v14, %v16158_v15 }
 0x4b2   : > { %v20892_v52 = vrot.slane %v12086_v49, %v16158_v15  ;;  %v20895_v11 = vrot.slane %v12087_v53, %v16158_v15  ;;  %v11898_v36 = vcombine.low %v20230_v39, %v11890_v56  ;;  %v11899_v3 = vcombine.high %v20230_v39, %v11890_v56 }
 0x4b3   : > { %v11914_v59 = vcombine.low %v20233_v26, %v11897_v30  ;;  %v11915_v0 = vcombine.high %v20233_v26, %v11897_v30  ;;  %v11966_v6 = vcombine.low %v20240_v33, %v11958_v22  ;;  %v11967_v58 = vcombine.high %v20240_v33, %v11958_v22 }
 0x4b4   : > { %v11982_v43 = vcombine.low %v20243_v41, %v11965_v63  ;;  %v11983_v28 = vcombine.high %v20243_v41, %v11965_v63  ;;  %v11906_v7 = vrot.slane %v11898_v36, %v16163_v25  ;;  %v11913_v13 = vrot.slane %v11899_v3, %v16163_v25 }
 0x4b5   : > { %v11922_v23 = vrot.slane %v11914_v59, %v16163_v25  ;;  %v11929_v39 = vrot.slane %v11915_v0, %v16163_v25  ;;  %v11974_v10 = vrot.slane %v11966_v6, %v16163_v25  ;;  %v11981_v26 = vrot.slane %v11967_v58, %v16163_v25 }
 0x4b6   : > { %v11990_v18 = vrot.slane %v11982_v43, %v16163_v25  ;;  %v11997_v33 = vrot.slane %v11983_v28, %v16163_v25  ;;  %v14042_v29 = vcombine.low %v11906_v7, %v11913_v13  ;;  %v15584_v34 = vcombine.high %v11906_v7, %v11913_v13  ;;  %v22112_v43 = vld [vmem:[#allocation34_spill] sm:$0xff] }
 0x4b7   : > { %v14058_v20 = vcombine.low %v11922_v23, %v11929_v39  ;;  %v15585_v41 = vcombine.high %v11922_v23, %v11929_v39  ;;  %v14110_v48 = vcombine.low %v11974_v10, %v11981_v26  ;;  %v15586_v46 = vcombine.high %v11974_v10, %v11981_v26  ;;  %v22113_v13 = vld [vmem:[#allocation38_spill] sm:$0xff] }
 0x4b8   : > { %v14126_v31 = vcombine.low %v11990_v18, %v11997_v33  ;;  %v15587_v40 = vcombine.high %v11990_v18, %v11997_v33  ;;  %v14049_v4 = vrot.slane %v14042_v29, %v16158_v15  ;;  %v14057_v8 = vrot.slane %v15584_v34, %v16158_v15 }
 0x4b9   : > { %v14065_v5 = vrot.slane %v14058_v20, %v16158_v15  ;;  %v14073_v16 = vrot.slane %v15585_v41, %v16158_v15  ;;  %v14117_v32 = vrot.slane %v14110_v48, %v16158_v15  ;;  %v14125_v2 = vrot.slane %v15586_v46, %v16158_v15 }
 0x4ba   : > { %v14133_v50 = vrot.slane %v14126_v31, %v16158_v15  ;;  %v14141_v57 = vrot.slane %v15587_v40, %v16158_v15  ;;  %v14074_v61 = vcombine.low %v14049_v4, %v14057_v8  ;;  %v14075_v42 = vcombine.high %v14049_v4, %v14057_v8 }
 0x4bb   : > { %v14090_v1 = vcombine.low %v14065_v5, %v14073_v16  ;;  %v14091_v37 = vcombine.high %v14065_v5, %v14073_v16  ;;  %v14142_v44 = vcombine.low %v14117_v32, %v14125_v2  ;;  %v14143_v21 = vcombine.high %v14117_v32, %v14125_v2 }
 0x4bc   : > { %v14158_v9 = vcombine.low %v14133_v50, %v14141_v57  ;;  %v14159_v12 = vcombine.high %v14133_v50, %v14141_v57  ;;  %v14082_v19 = vrot.slane %v14074_v61, %v16163_v25  ;;  %v14089_v24 = vrot.slane %v14075_v42, %v16163_v25  ;;  %v10657_v50 = vpop.permute.xlu1 %10656  ;;  %v10659_v57 = vpop.permute.xlu0 %10658 }
 0x4bd   : > { %v14098_v60 = vrot.slane %v14090_v1, %v16163_v25  ;;  %v14105_v45 = vrot.slane %v14091_v37, %v16163_v25  ;;  %v14150_v14 = vrot.slane %v14142_v44, %v16163_v25  ;;  %v14157_v54 = vrot.slane %v14143_v21, %v16163_v25 }
 0x4be   : > { %v14166_v49 = vrot.slane %v14158_v9, %v16163_v25  ;;  %v14173_v53 = vrot.slane %v14159_v12, %v16163_v25  ;;  %v12034_v6 = vcombine.low %v20250_v35, %v20886_v17  ;;  %v12035_v58 = vcombine.high %v20250_v35, %v20886_v17  ;;  %v22114_v17 = vld [vmem:[#allocation20_spill] sm:$0xff] }
 0x4bf   : > { %v14106_v56 = vcombine.low %v14082_v19, %v14098_v60  ;;  %v14107_v30 = vcombine.high %v14082_v19, %v14098_v60  ;;  %v14108_v22 = vcombine.low %v14089_v24, %v14105_v45  ;;  %v14109_v63 = vcombine.high %v14089_v24, %v14105_v45 }
 0x4c0   : > { %v14174_v36 = vcombine.low %v14150_v14, %v14166_v49  ;;  %v14175_v3 = vcombine.high %v14150_v14, %v14166_v49  ;;  %v14176_v59 = vcombine.low %v14157_v54, %v14173_v53  ;;  %v14177_v0 = vcombine.high %v14157_v54, %v14173_v53 }
 0x4c1   : > { %15079 = vst.msk [vmem:[%s20399_s7 + $0x88] sm:$0xff] %vm5397_vm1, %v14106_v56  ;;  %15111 = vst.msk [vmem:[%s20399_s7 + $0x188] sm:$0xff] %vm5397_vm1, %v14107_v30  ;;  %v12050_v28 = vcombine.low %v22112_v43, %v20889_v62  ;;  %v12051_v7 = vcombine.high %v22112_v43, %v20889_v62  ;;  %v12102_v23 = vcombine.low %v22113_v13, %v20892_v52 }
 0x4c2   : > { %15143 = vst.msk [vmem:[%s20399_s7 + $0x288] sm:$0xff] %vm5397_vm1, %v14108_v22  ;;  %15175 = vst.msk [vmem:[%s20399_s7 + $0x388] sm:$0xff] %vm5397_vm1, %v14109_v63  ;;  %v12103_v35 = vcombine.high %v22113_v13, %v20892_v52  ;;  %v12118_v39 = vcombine.low %v22114_v17, %v20895_v11  ;;  %v12119_v62 = vcombine.high %v22114_v17, %v20895_v11 }
 0x4c3   : > { %15080 = vst.msk [vmem:[%s20399_s7 + $0x90] sm:$0xff] %vm5397_vm1, %v14174_v36  ;;  %15112 = vst.msk [vmem:[%s20399_s7 + $0x190] sm:$0xff] %vm5397_vm1, %v14175_v3  ;;  %v12042_v10 = vrot.slane %v12034_v6, %v16163_v25  ;;  %v12049_v26 = vrot.slane %v12035_v58, %v16163_v25  ;;  %v12058_v18 = vrot.slane %v12050_v28, %v16163_v25  ;;  %v10661_v6 = vpop.permute.xlu1 %10660  ;;  %v10663_v58 = vpop.permute.xlu0 %10662 }
 0x4c4   : > { %15144 = vst.msk [vmem:[%s20399_s7 + $0x290] sm:$0xff] %vm5397_vm1, %v14176_v59  ;;  %15176 = vst.msk [vmem:[%s20399_s7 + $0x390] sm:$0xff] %vm5397_vm1, %v14177_v0  ;;  %v12065_v33 = vrot.slane %v12051_v7, %v16163_v25  ;;  %v12110_v29 = vrot.slane %v12102_v23, %v16163_v25  ;;  %v12117_v34 = vrot.slane %v12103_v35, %v16163_v25  ;;  %v22115_v23 = vld [vmem:[#allocation22_spill] sm:$0xff] }
 0x4c5   : > { %v12126_v52 = vrot.slane %v12118_v39, %v16163_v25  ;;  %v12133_v20 = vrot.slane %v12119_v62, %v16163_v25  ;;  %v14178_v41 = vcombine.low %v12042_v10, %v12049_v26  ;;  %v15588_v48 = vcombine.high %v12042_v10, %v12049_v26  ;;  %v22116_v39 = vld [vmem:[#allocation61_spill] sm:$0xff]  ;;  %v22117_v26 = vld [vmem:[#allocation87_spill] sm:$0xff] }
 0x4c6   : > { %v14194_v46 = vcombine.low %v12058_v18, %v12065_v33  ;;  %v15589_v11 = vcombine.high %v12058_v18, %v12065_v33  ;;  %v14246_v31 = vcombine.low %v12110_v29, %v12117_v34  ;;  %v15590_v40 = vcombine.high %v12110_v29, %v12117_v34  ;;  %v22118_v29 = vld [vmem:[#allocation55_spill] sm:$0xff] }
 0x4c7   : > { %v14262_v4 = vcombine.low %v12126_v52, %v12133_v20  ;;  %v15591_v8 = vcombine.high %v12126_v52, %v12133_v20  ;;  %v14185_v5 = vrot.slane %v14178_v41, %v16158_v15  ;;  %v14193_v16 = vrot.slane %v15588_v48, %v16158_v15 }
 0x4c8   : > { %v14201_v32 = vrot.slane %v14194_v46, %v16158_v15  ;;  %v14209_v2 = vrot.slane %v15589_v11, %v16158_v15  ;;  %v14253_v61 = vrot.slane %v14246_v31, %v16158_v15  ;;  %v14261_v42 = vrot.slane %v15590_v40, %v16158_v15 }
 0x4c9   : > { %v14269_v1 = vrot.slane %v14262_v4, %v16158_v15  ;;  %v14277_v37 = vrot.slane %v15591_v8, %v16158_v15  ;;  %v14210_v44 = vcombine.low %v14185_v5, %v14193_v16  ;;  %v14211_v21 = vcombine.high %v14185_v5, %v14193_v16  ;;  %v22119_v16 = vld [vmem:[#allocation25_spill] sm:$0xff] }
 0x4ca   : > { %v14226_v9 = vcombine.low %v14201_v32, %v14209_v2  ;;  %v14227_v12 = vcombine.high %v14201_v32, %v14209_v2  ;;  %v14278_v19 = vcombine.low %v14253_v61, %v14261_v42  ;;  %v14279_v24 = vcombine.high %v14253_v61, %v14261_v42  ;;  %v22120_v61 = vld [vmem:[#allocation24_spill] sm:$0xff] }
 0x4cb   : > { %v14294_v60 = vcombine.low %v14269_v1, %v14277_v37  ;;  %v14295_v45 = vcombine.high %v14269_v1, %v14277_v37  ;;  %v14218_v14 = vrot.slane %v14210_v44, %v16163_v25  ;;  %v14225_v54 = vrot.slane %v14211_v21, %v16163_v25 }
 0x4cc   : > { %v14234_v49 = vrot.slane %v14226_v9, %v16163_v25  ;;  %v14241_v53 = vrot.slane %v14227_v12, %v16163_v25  ;;  %v14286_v56 = vrot.slane %v14278_v19, %v16163_v25  ;;  %v14293_v30 = vrot.slane %v14279_v24, %v16163_v25 }
 0x4cd   : > { %v14302_v22 = vrot.slane %v14294_v60, %v16163_v25  ;;  %v14309_v63 = vrot.slane %v14295_v45, %v16163_v25  ;;  %v12154_v35 = vcombine.low %v22115_v23, %v10657_v50  ;;  %v12155_v17 = vcombine.high %v22115_v23, %v10657_v50 }
 0x4ce   : > { %v14242_v36 = vcombine.low %v14218_v14, %v14234_v49  ;;  %v14243_v3 = vcombine.high %v14218_v14, %v14234_v49  ;;  %v14244_v59 = vcombine.low %v14225_v54, %v14241_v53  ;;  %v14245_v0 = vcombine.high %v14225_v54, %v14241_v53 }
 0x4cf   : > { %v14310_v43 = vcombine.low %v14286_v56, %v14302_v22  ;;  %v14311_v28 = vcombine.high %v14286_v56, %v14302_v22  ;;  %v14312_v7 = vcombine.low %v14293_v30, %v14309_v63  ;;  %v14313_v13 = vcombine.high %v14293_v30, %v14309_v63 }
 0x4d0   : > { %15081 = vst.msk [vmem:[%s20399_s7 + $0x98] sm:$0xff] %vm5397_vm1, %v14242_v36  ;;  %15113 = vst.msk [vmem:[%s20399_s7 + $0x198] sm:$0xff] %vm5397_vm1, %v14243_v3  ;;  %v12222_v62 = vcombine.low %v22116_v39, %v10659_v57  ;;  %v12223_v10 = vcombine.high %v22116_v39, %v10659_v57  ;;  %v12290_v18 = vcombine.low %v22117_v26, %v10661_v6 }
 0x4d1   : > { %15145 = vst.msk [vmem:[%s20399_s7 + $0x298] sm:$0xff] %vm5397_vm1, %v14244_v59  ;;  %15177 = vst.msk [vmem:[%s20399_s7 + $0x398] sm:$0xff] %vm5397_vm1, %v14245_v0  ;;  %v12291_v33 = vcombine.high %v22117_v26, %v10661_v6  ;;  %v12358_v34 = vcombine.low %v22118_v29, %v10663_v58  ;;  %v12359_v52 = vcombine.high %v22118_v29, %v10663_v58 }
 0x4d2   : > { %15082 = vst.msk [vmem:[%s20399_s7 + $0xa0] sm:$0xff] %vm5397_vm1, %v14310_v43  ;;  %15114 = vst.msk [vmem:[%s20399_s7 + $0x1a0] sm:$0xff] %vm5397_vm1, %v14311_v28  ;;  %v12162_v20 = vrot.slane %v12154_v35, %v16158_v15  ;;  %v12169_v41 = vrot.slane %v12155_v17, %v16158_v15  ;;  %v12230_v48 = vrot.slane %v12222_v62, %v16158_v15 }
 0x4d3   : > { %15146 = vst.msk [vmem:[%s20399_s7 + $0x2a0] sm:$0xff] %vm5397_vm1, %v14312_v7  ;;  %15178 = vst.msk [vmem:[%s20399_s7 + $0x3a0] sm:$0xff] %vm5397_vm1, %v14313_v13  ;;  %v12237_v46 = vrot.slane %v12223_v10, %v16158_v15  ;;  %v21014_v11 = vrot.slane %v12290_v18, %v16158_v15  ;;  %v21017_v31 = vrot.slane %v12291_v33, %v16158_v15 }
 0x4d4   : > { %v21020_v40 = vrot.slane %v12358_v34, %v16158_v15  ;;  %v21023_v4 = vrot.slane %v12359_v52, %v16158_v15  ;;  %v12170_v8 = vcombine.low %v20272_v27, %v12162_v20  ;;  %v12171_v5 = vcombine.high %v20272_v27, %v12162_v20 }
 0x4d5   : > { %v12186_v32 = vcombine.low %v22119_v16, %v12169_v41  ;;  %v12187_v2 = vcombine.high %v22119_v16, %v12169_v41  ;;  %v12238_v50 = vcombine.low %v20282_v38, %v12230_v48  ;;  %v12239_v57 = vcombine.high %v20282_v38, %v12230_v48 }
 0x4d6   : > { %v12254_v42 = vcombine.low %v22120_v61, %v12237_v46  ;;  %v12255_v1 = vcombine.high %v22120_v61, %v12237_v46  ;;  %v12178_v37 = vrot.slane %v12170_v8, %v16163_v25  ;;  %v12185_v44 = vrot.slane %v12171_v5, %v16163_v25 }
 0x4d7   : > { %v12194_v21 = vrot.slane %v12186_v32, %v16163_v25  ;;  %v12201_v27 = vrot.slane %v12187_v2, %v16163_v25  ;;  %v12246_v9 = vrot.slane %v12238_v50, %v16163_v25  ;;  %v12253_v12 = vrot.slane %v12239_v57, %v16163_v25  ;;  %v22121_v32 = vld [vmem:[#allocation26_spill] sm:$0xff]  ;;  %v22122_v57 = vld [vmem:[#allocation47_spill] sm:$0xff] }
 0x4d8   : > { %v12262_v19 = vrot.slane %v12254_v42, %v16163_v25  ;;  %v12269_v38 = vrot.slane %v12255_v1, %v16163_v25  ;;  %v14314_v24 = vcombine.low %v12178_v37, %v12185_v44  ;;  %v15592_v60 = vcombine.high %v12178_v37, %v12185_v44  ;;  %v22123_v1 = vld [vmem:[#allocation46_spill] sm:$0xff]  ;;  %v22124_v44 = vld [vmem:[#allocation29_spill] sm:$0xff] }
 0x4d9   : > { %v14330_v45 = vcombine.low %v12194_v21, %v12201_v27  ;;  %v15593_v14 = vcombine.high %v12194_v21, %v12201_v27  ;;  %v14382_v54 = vcombine.low %v12246_v9, %v12253_v12  ;;  %v15594_v49 = vcombine.high %v12246_v9, %v12253_v12 }
 0x4da   : > { %v14398_v53 = vcombine.low %v12262_v19, %v12269_v38  ;;  %v15595_v56 = vcombine.high %v12262_v19, %v12269_v38  ;;  %v14321_v30 = vrot.slane %v14314_v24, %v16158_v15  ;;  %v14329_v22 = vrot.slane %v15592_v60, %v16158_v15 }
 0x4db   : > { %v14337_v63 = vrot.slane %v14330_v45, %v16158_v15  ;;  %v14345_v36 = vrot.slane %v15593_v14, %v16158_v15  ;;  %v14389_v3 = vrot.slane %v14382_v54, %v16158_v15  ;;  %v14397_v59 = vrot.slane %v15594_v49, %v16158_v15 }
 0x4dc   : > { %v14405_v0 = vrot.slane %v14398_v53, %v16158_v15  ;;  %v14413_v6 = vrot.slane %v15595_v56, %v16158_v15  ;;  %v14346_v58 = vcombine.low %v14321_v30, %v14329_v22  ;;  %v14347_v43 = vcombine.high %v14321_v30, %v14329_v22 }
 0x4dd   : > { %v14362_v28 = vcombine.low %v14337_v63, %v14345_v36  ;;  %v14363_v7 = vcombine.high %v14337_v63, %v14345_v36  ;;  %v14414_v13 = vcombine.low %v14389_v3, %v14397_v59  ;;  %v14415_v23 = vcombine.high %v14389_v3, %v14397_v59  ;;  %v10665_v59 = vpop.permute.xlu1 %10664 }
 0x4de   : > { %v14430_v35 = vcombine.low %v14405_v0, %v14413_v6  ;;  %v14431_v17 = vcombine.high %v14405_v0, %v14413_v6  ;;  %v14354_v39 = vrot.slane %v14346_v58, %v16163_v25  ;;  %v14361_v62 = vrot.slane %v14347_v43, %v16163_v25  ;;  %v10667_v0 = vpop.permute.xlu0 %10666 }
 0x4df   : > { %v14370_v10 = vrot.slane %v14362_v28, %v16163_v25  ;;  %v14377_v26 = vrot.slane %v14363_v7, %v16163_v25  ;;  %v14422_v18 = vrot.slane %v14414_v13, %v16163_v25  ;;  %v14429_v33 = vrot.slane %v14415_v23, %v16163_v25 }
 0x4e0   : > { %v14438_v29 = vrot.slane %v14430_v35, %v16163_v25  ;;  %v14445_v34 = vrot.slane %v14431_v17, %v16163_v25  ;;  %v12306_v2 = vcombine.low %v22121_v32, %v21014_v11  ;;  %v12307_v50 = vcombine.high %v22121_v32, %v21014_v11 }
 0x4e1   : > { %v14378_v52 = vcombine.low %v14354_v39, %v14370_v10  ;;  %v14379_v20 = vcombine.high %v14354_v39, %v14370_v10  ;;  %v14380_v41 = vcombine.low %v14361_v62, %v14377_v26  ;;  %v14381_v48 = vcombine.high %v14361_v62, %v14377_v26 }
 0x4e2   : > { %v14446_v46 = vcombine.low %v14422_v18, %v14438_v29  ;;  %v14447_v8 = vcombine.high %v14422_v18, %v14438_v29  ;;  %v14448_v5 = vcombine.low %v14429_v33, %v14445_v34  ;;  %v14449_v16 = vcombine.high %v14429_v33, %v14445_v34  ;;  %v10671_v32 = vpop.permute.xlu0 %10670 }
 0x4e3   : > { %15083 = vst.msk [vmem:[%s20399_s7 + $0xa8] sm:$0xff] %vm5397_vm1, %v14378_v52  ;;  %15115 = vst.msk [vmem:[%s20399_s7 + $0x1a8] sm:$0xff] %vm5397_vm1, %v14379_v20  ;;  %v12322_v61 = vcombine.low %v22122_v57, %v21017_v31  ;;  %v12323_v42 = vcombine.high %v22122_v57, %v21017_v31  ;;  %v12374_v37 = vcombine.low %v22123_v1, %v21020_v40 }
 0x4e4   : > { %15147 = vst.msk [vmem:[%s20399_s7 + $0x2a8] sm:$0xff] %vm5397_vm1, %v14380_v41  ;;  %15179 = vst.msk [vmem:[%s20399_s7 + $0x3a8] sm:$0xff] %vm5397_vm1, %v14381_v48  ;;  %v12375_v11 = vcombine.high %v22123_v1, %v21020_v40  ;;  %v12390_v21 = vcombine.low %v22124_v44, %v21023_v4  ;;  %v12391_v31 = vcombine.high %v22124_v44, %v21023_v4 }
 0x4e5   : > { %15084 = vst.msk [vmem:[%s20399_s7 + $0xb0] sm:$0xff] %vm5397_vm1, %v14446_v46  ;;  %15116 = vst.msk [vmem:[%s20399_s7 + $0x1b0] sm:$0xff] %vm5397_vm1, %v14447_v8  ;;  %v12314_v27 = vrot.slane %v12306_v2, %v16163_v25  ;;  %v12321_v9 = vrot.slane %v12307_v50, %v16163_v25  ;;  %v12330_v12 = vrot.slane %v12322_v61, %v16163_v25 }
 0x4e6   : > { %15148 = vst.msk [vmem:[%s20399_s7 + $0x2b0] sm:$0xff] %vm5397_vm1, %v14448_v5  ;;  %15180 = vst.msk [vmem:[%s20399_s7 + $0x3b0] sm:$0xff] %vm5397_vm1, %v14449_v16  ;;  %v12337_v19 = vrot.slane %v12323_v42, %v16163_v25  ;;  %v12382_v38 = vrot.slane %v12374_v37, %v16163_v25  ;;  %v12389_v24 = vrot.slane %v12375_v11, %v16163_v25  ;;  %v10669_v16 = vpop.permute.xlu1 %10668  ;;  %v22125_v42 = vld [vmem:[#allocation50_spill] sm:$0xff]  ;;  %v22126_v11 = vld [vmem:[#allocation32_spill] sm:$0xff] }
 0x4e7   : > { %v12398_v40 = vrot.slane %v12390_v21, %v16163_v25  ;;  %v12405_v60 = vrot.slane %v12391_v31, %v16163_v25  ;;  %v14450_v45 = vcombine.low %v12314_v27, %v12321_v9  ;;  %v15596_v14 = vcombine.high %v12314_v27, %v12321_v9  ;;  %v22127_v31 = vld [vmem:[#allocation93_spill] sm:$0xff] }
 0x4e8   : > { %v14466_v54 = vcombine.low %v12330_v12, %v12337_v19  ;;  %v15597_v4 = vcombine.high %v12330_v12, %v12337_v19  ;;  %v14518_v49 = vcombine.low %v12382_v38, %v12389_v24  ;;  %v15598_v53 = vcombine.high %v12382_v38, %v12389_v24  ;;  %v22128_v12 = vld [vmem:[#allocation94_spill] sm:$0xff] }
 0x4e9   : > { %v14534_v56 = vcombine.low %v12398_v40, %v12405_v60  ;;  %v15599_v30 = vcombine.high %v12398_v40, %v12405_v60  ;;  %v14457_v22 = vrot.slane %v14450_v45, %v16158_v15  ;;  %v14465_v63 = vrot.slane %v15596_v14, %v16158_v15 }
 0x4ea   : > { %v14473_v36 = vrot.slane %v14466_v54, %v16158_v15  ;;  %v14481_v3 = vrot.slane %v15597_v4, %v16158_v15  ;;  %v14525_v6 = vrot.slane %v14518_v49, %v16158_v15  ;;  %v14533_v58 = vrot.slane %v15598_v53, %v16158_v15 }
 0x4eb   : > { %v14541_v43 = vrot.slane %v14534_v56, %v16158_v15  ;;  %v14549_v28 = vrot.slane %v15599_v30, %v16158_v15  ;;  %v14482_v7 = vcombine.low %v14457_v22, %v14465_v63  ;;  %v14483_v13 = vcombine.high %v14457_v22, %v14465_v63  ;;  %v22129_v30 = vld [vmem:[#allocation39_spill] sm:$0xff] }
 0x4ec   : > { %v14498_v23 = vcombine.low %v14473_v36, %v14481_v3  ;;  %v14499_v35 = vcombine.high %v14473_v36, %v14481_v3  ;;  %v14550_v17 = vcombine.low %v14525_v6, %v14533_v58  ;;  %v14551_v39 = vcombine.high %v14525_v6, %v14533_v58 }
 0x4ed   : > { %v14566_v62 = vcombine.low %v14541_v43, %v14549_v28  ;;  %v14567_v10 = vcombine.high %v14541_v43, %v14549_v28  ;;  %v14490_v26 = vrot.slane %v14482_v7, %v16163_v25  ;;  %v14497_v18 = vrot.slane %v14483_v13, %v16163_v25 }
 0x4ee   : > { %v14506_v33 = vrot.slane %v14498_v23, %v16163_v25  ;;  %v14513_v29 = vrot.slane %v14499_v35, %v16163_v25  ;;  %v14558_v34 = vrot.slane %v14550_v17, %v16163_v25  ;;  %v14565_v52 = vrot.slane %v14551_v39, %v16163_v25 }
 0x4ef   : > { %v14574_v20 = vrot.slane %v14566_v62, %v16163_v25  ;;  %v14581_v41 = vrot.slane %v14567_v10, %v16163_v25  ;;  %v12426_v1 = vcombine.low %v22125_v42, %v10665_v59  ;;  %v12427_v37 = vcombine.high %v22125_v42, %v10665_v59 }
 0x4f0   : > { %v14514_v48 = vcombine.low %v14490_v26, %v14506_v33  ;;  %v14515_v46 = vcombine.high %v14490_v26, %v14506_v33  ;;  %v14516_v8 = vcombine.low %v14497_v18, %v14513_v29  ;;  %v14517_v5 = vcombine.high %v14497_v18, %v14513_v29 }
 0x4f1   : > { %v14582_v2 = vcombine.low %v14558_v34, %v14574_v20  ;;  %v14583_v50 = vcombine.high %v14558_v34, %v14574_v20  ;;  %v14584_v57 = vcombine.low %v14565_v52, %v14581_v41  ;;  %v14585_v61 = vcombine.high %v14565_v52, %v14581_v41 }
 0x4f2   : > { %15085 = vst.msk [vmem:[%s20399_s7 + $0xb8] sm:$0xff] %vm5397_vm1, %v14514_v48  ;;  %15117 = vst.msk [vmem:[%s20399_s7 + $0x1b8] sm:$0xff] %vm5397_vm1, %v14515_v46  ;;  %v12494_v44 = vcombine.low %v22126_v11, %v10667_v0  ;;  %v12495_v21 = vcombine.high %v22126_v11, %v10667_v0  ;;  %v12562_v27 = vcombine.low %v22127_v31, %v10669_v16 }
 0x4f3   : > { %15149 = vst.msk [vmem:[%s20399_s7 + $0x2b8] sm:$0xff] %vm5397_vm1, %v14516_v8  ;;  %15181 = vst.msk [vmem:[%s20399_s7 + $0x3b8] sm:$0xff] %vm5397_vm1, %v14517_v5  ;;  %v12563_v9 = vcombine.high %v22127_v31, %v10669_v16  ;;  %v12630_v19 = vcombine.low %v22128_v12, %v10671_v32  ;;  %v12631_v38 = vcombine.high %v22128_v12, %v10671_v32 }
 0x4f4   : > { %15086 = vst.msk [vmem:[%s20399_s7 + $0xc0] sm:$0xff] %vm5397_vm1, %v14582_v2  ;;  %15118 = vst.msk [vmem:[%s20399_s7 + $0x1c0] sm:$0xff] %vm5397_vm1, %v14583_v50  ;;  %v12434_v24 = vrot.slane %v12426_v1, %v16158_v15  ;;  %v12441_v40 = vrot.slane %v12427_v37, %v16158_v15  ;;  %v12502_v60 = vrot.slane %v12494_v44, %v16158_v15 }
 0x4f5   : > { %15150 = vst.msk [vmem:[%s20399_s7 + $0x2c0] sm:$0xff] %vm5397_vm1, %v14584_v57  ;;  %15182 = vst.msk [vmem:[%s20399_s7 + $0x3c0] sm:$0xff] %vm5397_vm1, %v14585_v61  ;;  %v12509_v45 = vrot.slane %v12495_v21, %v16158_v15  ;;  %v21142_v14 = vrot.slane %v12562_v27, %v16158_v15  ;;  %v21145_v54 = vrot.slane %v12563_v9, %v16158_v15 }
 0x4f6   : > { %v21148_v4 = vrot.slane %v12630_v19, %v16158_v15  ;;  %v21151_v49 = vrot.slane %v12631_v38, %v16158_v15  ;;  %v12442_v53 = vcombine.low %v20312_v47, %v12434_v24  ;;  %v12443_v56 = vcombine.high %v20312_v47, %v12434_v24 }
 0x4f7   : > { %v12458_v22 = vcombine.low %v22129_v30, %v12441_v40  ;;  %v12459_v63 = vcombine.high %v22129_v30, %v12441_v40  ;;  %v12510_v36 = vcombine.low %v20320_v51, %v12502_v60  ;;  %v12511_v3 = vcombine.high %v20320_v51, %v12502_v60  ;;  %v22131_v30 = vld [vmem:[#allocation42_spill] sm:$0xff] }
 0x4f8   : > { %v12526_v59 = vcombine.low %v20323_v55, %v12509_v45  ;;  %v12527_v0 = vcombine.high %v20323_v55, %v12509_v45  ;;  %v12450_v6 = vrot.slane %v12442_v53, %v16163_v25  ;;  %v12457_v58 = vrot.slane %v12443_v56, %v16163_v25  ;;  %v22130_v45 = vld [vmem:[#allocation43_spill] sm:$0xff] }
 0x4f9   : > { %v12466_v43 = vrot.slane %v12458_v22, %v16163_v25  ;;  %v12473_v47 = vrot.slane %v12459_v63, %v16163_v25  ;;  %v12518_v28 = vrot.slane %v12510_v36, %v16163_v25  ;;  %v12525_v7 = vrot.slane %v12511_v3, %v16163_v25  ;;  %v22132_v36 = vld [vmem:[#allocation67_spill] sm:$0xff] }
 0x4fa   : > { %v12534_v13 = vrot.slane %v12526_v59, %v16163_v25  ;;  %v12541_v51 = vrot.slane %v12527_v0, %v16163_v25  ;;  %v14586_v23 = vcombine.low %v12450_v6, %v12457_v58  ;;  %v15600_v35 = vcombine.high %v12450_v6, %v12457_v58  ;;  %v22133_v59 = vld [vmem:[#allocation30_spill] sm:$0xff] }
 0x4fb   : > { %v14602_v17 = vcombine.low %v12466_v43, %v12473_v47  ;;  %v15601_v55 = vcombine.high %v12466_v43, %v12473_v47  ;;  %v14654_v39 = vcombine.low %v12518_v28, %v12525_v7  ;;  %v15602_v62 = vcombine.high %v12518_v28, %v12525_v7 }
 0x4fc   : > { %v14670_v10 = vcombine.low %v12534_v13, %v12541_v51  ;;  %v15603_v26 = vcombine.high %v12534_v13, %v12541_v51  ;;  %v14593_v18 = vrot.slane %v14586_v23, %v16158_v15  ;;  %v14601_v33 = vrot.slane %v15600_v35, %v16158_v15 }
 0x4fd   : > { %v14609_v29 = vrot.slane %v14602_v17, %v16158_v15  ;;  %v14617_v34 = vrot.slane %v15601_v55, %v16158_v15  ;;  %v14661_v52 = vrot.slane %v14654_v39, %v16158_v15  ;;  %v14669_v20 = vrot.slane %v15602_v62, %v16158_v15 }
 0x4fe   : > { %v14677_v41 = vrot.slane %v14670_v10, %v16158_v15  ;;  %v14685_v48 = vrot.slane %v15603_v26, %v16158_v15  ;;  %v14618_v46 = vcombine.low %v14593_v18, %v14601_v33  ;;  %v14619_v8 = vcombine.high %v14593_v18, %v14601_v33 }
 0x4ff   : > { %v14634_v5 = vcombine.low %v14609_v29, %v14617_v34  ;;  %v14635_v16 = vcombine.high %v14609_v29, %v14617_v34  ;;  %v14686_v32 = vcombine.low %v14661_v52, %v14669_v20  ;;  %v14687_v2 = vcombine.high %v14661_v52, %v14669_v20  ;;  %v10673_v29 = vpop.permute.xlu1 %10672 }
 0x500   : > { %v14702_v50 = vcombine.low %v14677_v41, %v14685_v48  ;;  %v14703_v57 = vcombine.high %v14677_v41, %v14685_v48  ;;  %v14626_v61 = vrot.slane %v14618_v46, %v16163_v25  ;;  %v14633_v42 = vrot.slane %v14619_v8, %v16163_v25 }
 0x501   : > { %v14642_v1 = vrot.slane %v14634_v5, %v16163_v25  ;;  %v14649_v37 = vrot.slane %v14635_v16, %v16163_v25  ;;  %v14694_v11 = vrot.slane %v14686_v32, %v16163_v25  ;;  %v14701_v44 = vrot.slane %v14687_v2, %v16163_v25 }
 0x502   : > { %v14710_v21 = vrot.slane %v14702_v50, %v16163_v25  ;;  %v14717_v31 = vrot.slane %v14703_v57, %v16163_v25  ;;  %v12578_v53 = vcombine.low %v22130_v45, %v21142_v14  ;;  %v12579_v56 = vcombine.high %v22130_v45, %v21142_v14 }
 0x503   : > { %v14650_v27 = vcombine.low %v14626_v61, %v14642_v1  ;;  %v14651_v9 = vcombine.high %v14626_v61, %v14642_v1  ;;  %v14652_v12 = vcombine.low %v14633_v42, %v14649_v37  ;;  %v14653_v19 = vcombine.high %v14633_v42, %v14649_v37 }
 0x504   : > { %v14718_v38 = vcombine.low %v14694_v11, %v14710_v21  ;;  %v14719_v24 = vcombine.high %v14694_v11, %v14710_v21  ;;  %v14720_v40 = vcombine.low %v14701_v44, %v14717_v31  ;;  %v14721_v60 = vcombine.high %v14701_v44, %v14717_v31  ;;  %v10675_v31 = vpop.permute.xlu0 %10674 }
 0x505   : > { %15087 = vst.msk [vmem:[%s20399_s7 + $0xc8] sm:$0xff] %vm5397_vm1, %v14650_v27  ;;  %15119 = vst.msk [vmem:[%s20399_s7 + $0x1c8] sm:$0xff] %vm5397_vm1, %v14651_v9  ;;  %v12594_v22 = vcombine.low %v22131_v30, %v21145_v54  ;;  %v12595_v63 = vcombine.high %v22131_v30, %v21145_v54  ;;  %v12646_v3 = vcombine.low %v22132_v36, %v21148_v4 }
 0x506   : > { %15151 = vst.msk [vmem:[%s20399_s7 + $0x2c8] sm:$0xff] %vm5397_vm1, %v14652_v12  ;;  %15183 = vst.msk [vmem:[%s20399_s7 + $0x3c8] sm:$0xff] %vm5397_vm1, %v14653_v19  ;;  %v12647_v14 = vcombine.high %v22132_v36, %v21148_v4  ;;  %v12662_v0 = vcombine.low %v22133_v59, %v21151_v49  ;;  %v12663_v54 = vcombine.high %v22133_v59, %v21151_v49 }
 0x507   : > { %15088 = vst.msk [vmem:[%s20399_s7 + $0xd0] sm:$0xff] %vm5397_vm1, %v14718_v38  ;;  %15120 = vst.msk [vmem:[%s20399_s7 + $0x1d0] sm:$0xff] %vm5397_vm1, %v14719_v24  ;;  %v12586_v6 = vrot.slane %v12578_v53, %v16163_v25  ;;  %v12593_v58 = vrot.slane %v12579_v56, %v16163_v25  ;;  %v12602_v43 = vrot.slane %v12594_v22, %v16163_v25  ;;  %v10677_v38 = vpop.permute.xlu1 %10676  ;;  %v22134_v53 = vld [vmem:[#allocation16_spill] sm:$0xff]  ;;  %v22135_v22 = vld [vmem:[#allocation95_spill] sm:$0xff] }
 0x508   : > { %15152 = vst.msk [vmem:[%s20399_s7 + $0x2d0] sm:$0xff] %vm5397_vm1, %v14720_v40  ;;  %15184 = vst.msk [vmem:[%s20399_s7 + $0x3d0] sm:$0xff] %vm5397_vm1, %v14721_v60  ;;  %v12609_v47 = vrot.slane %v12595_v63, %v16163_v25  ;;  %v12654_v28 = vrot.slane %v12646_v3, %v16163_v25  ;;  %v12661_v7 = vrot.slane %v12647_v14, %v16163_v25  ;;  %v22136_v3 = vld [vmem:[#allocation14_spill] sm:$0xff]  ;;  %v22137_v14 = vld [vmem:[#allocation64_spill] sm:$0xff] }
 0x509   : > { %v12670_v4 = vrot.slane %v12662_v0, %v16163_v25  ;;  %v12677_v13 = vrot.slane %v12663_v54, %v16163_v25  ;;  %v14722_v51 = vcombine.low %v12586_v6, %v12593_v58  ;;  %v15604_v23 = vcombine.high %v12586_v6, %v12593_v58  ;;  %v22140_v58 = vld [vmem:[#allocation18_spill] sm:$0xff] }
 0x50a   : > { %v14738_v35 = vcombine.low %v12602_v43, %v12609_v47  ;;  %v15605_v49 = vcombine.high %v12602_v43, %v12609_v47  ;;  %v14790_v17 = vcombine.low %v12654_v28, %v12661_v7  ;;  %v15606_v55 = vcombine.high %v12654_v28, %v12661_v7 }
 0x50b   : > { %v14806_v39 = vcombine.low %v12670_v4, %v12677_v13  ;;  %v15607_v62 = vcombine.high %v12670_v4, %v12677_v13  ;;  %v14729_v10 = vrot.slane %v14722_v51, %v16158_v15  ;;  %v14737_v26 = vrot.slane %v15604_v23, %v16158_v15  ;;  %v22141_v51 = vld [vmem:[#allocation15_spill] sm:$0xff]  ;;  %v22142_v23 = vld [vmem:[#allocation21_spill] sm:$0xff] }
 0x50c   : > { %v14745_v18 = vrot.slane %v14738_v35, %v16158_v15  ;;  %v14753_v33 = vrot.slane %v15605_v49, %v16158_v15  ;;  %v14797_v34 = vrot.slane %v14790_v17, %v16158_v15  ;;  %v14805_v52 = vrot.slane %v15606_v55, %v16158_v15 }
 0x50d   : > { %v14813_v20 = vrot.slane %v14806_v39, %v16158_v15  ;;  %v14821_v41 = vrot.slane %v15607_v62, %v16158_v15  ;;  %v14754_v48 = vcombine.low %v14729_v10, %v14737_v26  ;;  %v14755_v46 = vcombine.high %v14729_v10, %v14737_v26  ;;  %v22145_v10 = vld [vmem:[#allocation31_spill] sm:$0xff] }
 0x50e   : > { %v14770_v8 = vcombine.low %v14745_v18, %v14753_v33  ;;  %v14771_v5 = vcombine.high %v14745_v18, %v14753_v33  ;;  %v14822_v16 = vcombine.low %v14797_v34, %v14805_v52  ;;  %v14823_v32 = vcombine.high %v14797_v34, %v14805_v52  ;;  %v22146_v33 = vld [vmem:[#allocation36_spill] sm:$0xff] }
 0x50f   : > { %v14838_v2 = vcombine.low %v14813_v20, %v14821_v41  ;;  %v14839_v50 = vcombine.high %v14813_v20, %v14821_v41  ;;  %v14762_v57 = vrot.slane %v14754_v48, %v16163_v25  ;;  %v14769_v61 = vrot.slane %v14755_v46, %v16163_v25 }
 0x510   : > { %v14778_v42 = vrot.slane %v14770_v8, %v16163_v25  ;;  %v14785_v1 = vrot.slane %v14771_v5, %v16163_v25  ;;  %v14830_v37 = vrot.slane %v14822_v16, %v16163_v25  ;;  %v14837_v11 = vrot.slane %v14823_v32, %v16163_v25 }
 0x511   : > { %v14846_v44 = vrot.slane %v14838_v2, %v16163_v25  ;;  %v14853_v21 = vrot.slane %v14839_v50, %v16163_v25  ;;  %v12698_v56 = vcombine.low %v22134_v53, %v10673_v29  ;;  %v12699_v30 = vcombine.high %v22134_v53, %v10673_v29 }
 0x512   : > { %v14786_v27 = vcombine.low %v14762_v57, %v14778_v42  ;;  %v14787_v9 = vcombine.high %v14762_v57, %v14778_v42  ;;  %v14788_v12 = vcombine.low %v14769_v61, %v14785_v1  ;;  %v14789_v19 = vcombine.high %v14769_v61, %v14785_v1 }
 0x513   : > { %v14854_v24 = vcombine.low %v14830_v37, %v14846_v44  ;;  %v14855_v40 = vcombine.high %v14830_v37, %v14846_v44  ;;  %v14856_v60 = vcombine.low %v14837_v11, %v14853_v21  ;;  %v14857_v45 = vcombine.high %v14837_v11, %v14853_v21 }
 0x514   : > { %15089 = vst.msk [vmem:[%s20399_s7 + $0xd8] sm:$0xff] %vm5397_vm1, %v14786_v27  ;;  %15121 = vst.msk [vmem:[%s20399_s7 + $0x1d8] sm:$0xff] %vm5397_vm1, %v14787_v9  ;;  %v12766_v63 = vcombine.low %v22135_v22, %v10675_v31  ;;  %v12767_v36 = vcombine.high %v22135_v22, %v10675_v31  ;;  %v22138_v59 = vcombine.low %v22136_v3, %v22137_v14 }
 0x515   : > { %15153 = vst.msk [vmem:[%s20399_s7 + $0x2d8] sm:$0xff] %vm5397_vm1, %v14788_v12  ;;  %15185 = vst.msk [vmem:[%s20399_s7 + $0x3d8] sm:$0xff] %vm5397_vm1, %v14789_v19  ;;  %v22139_v54 = vcombine.high %v22136_v3, %v22137_v14  ;;  %v12834_v43 = vcombine.low %v22140_v58, %v10677_v38  ;;  %v12835_v47 = vcombine.high %v22140_v58, %v10677_v38 }
 0x516   : > { %v12758_v0 = vrot.slane %v22138_v59, %v16158_v15  ;;  %15090 = vst.msk [vmem:[%s20399_s7 + $0xe0] sm:$0xff] %vm5397_vm1, %v14854_v24  ;;  %15122 = vst.msk [vmem:[%s20399_s7 + $0x1e0] sm:$0xff] %vm5397_vm1, %v14855_v40  ;;  %v12706_v28 = vrot.slane %v12698_v56, %v16158_v15  ;;  %v12713_v7 = vrot.slane %v12699_v30, %v16158_v15 }
 0x517   : > { %v12765_v6 = vrot.slane %v22139_v54, %v16158_v15  ;;  %15154 = vst.msk [vmem:[%s20399_s7 + $0x2e0] sm:$0xff] %vm5397_vm1, %v14856_v60  ;;  %15186 = vst.msk [vmem:[%s20399_s7 + $0x3e0] sm:$0xff] %vm5397_vm1, %v14857_v45  ;;  %v12774_v4 = vrot.slane %v12766_v63, %v16158_v15  ;;  %v12781_v13 = vrot.slane %v12767_v36, %v16158_v15 }
 0x518   : > { %v22143_v35 = vcombine.low %v22141_v51, %v22142_v23  ;;  %v22144_v17 = vcombine.high %v22141_v51, %v22142_v23  ;;  %v21288_v39 = vrot.slane %v12834_v43, %v16158_v15  ;;  %v21291_v62 = vrot.slane %v12835_v47, %v16158_v15 }
 0x519   : > { %v12714_v26 = vcombine.low %v22145_v10, %v12706_v28  ;;  %v12715_v18 = vcombine.high %v22145_v10, %v12706_v28  ;;  %v12730_v29 = vcombine.low %v22146_v33, %v12713_v7  ;;  %v12731_v34 = vcombine.high %v22146_v33, %v12713_v7 }
 0x51a   : > { %v21279_v49 = vrot.slane %v22143_v35, %v16158_v15  ;;  %v21285_v55 = vrot.slane %v22144_v17, %v16158_v15  ;;  %v12782_v52 = vcombine.low %v12758_v0, %v12774_v4  ;;  %v12783_v20 = vcombine.high %v12758_v0, %v12774_v4 }
 0x51b   : > { %v12798_v41 = vcombine.low %v12765_v6, %v12781_v13  ;;  %v12799_v48 = vcombine.high %v12765_v6, %v12781_v13  ;;  %v12722_v46 = vrot.slane %v12714_v26, %v16163_v25  ;;  %v12729_v8 = vrot.slane %v12715_v18, %v16163_v25 }
 0x51c   : > { %v12738_v5 = vrot.slane %v12730_v29, %v16163_v25  ;;  %v12745_v16 = vrot.slane %v12731_v34, %v16163_v25  ;;  %v12790_v32 = vrot.slane %v12782_v52, %v16163_v25  ;;  %v12797_v2 = vrot.slane %v12783_v20, %v16163_v25 }
 0x51d   : > { %v12806_v50 = vrot.slane %v12798_v41, %v16163_v25  ;;  %v12813_v57 = vrot.slane %v12799_v48, %v16163_v25  ;;  %v14858_v61 = vcombine.low %v12722_v46, %v12729_v8  ;;  %v15608_v42 = vcombine.high %v12722_v46, %v12729_v8 }
 0x51e   : > { %v14874_v1 = vcombine.low %v12738_v5, %v12745_v16  ;;  %v15609_v37 = vcombine.high %v12738_v5, %v12745_v16  ;;  %v14926_v11 = vcombine.low %v12790_v32, %v12797_v2  ;;  %v15610_v44 = vcombine.high %v12790_v32, %v12797_v2 }
 0x51f   : > { %v14942_v21 = vcombine.low %v12806_v50, %v12813_v57  ;;  %v15611_v31 = vcombine.high %v12806_v50, %v12813_v57  ;;  %v14865_v27 = vrot.slane %v14858_v61, %v16158_v15  ;;  %v14873_v9 = vrot.slane %v15608_v42, %v16158_v15 }
 0x520   : > { %v14881_v12 = vrot.slane %v14874_v1, %v16158_v15  ;;  %v14889_v19 = vrot.slane %v15609_v37, %v16158_v15  ;;  %v14933_v38 = vrot.slane %v14926_v11, %v16158_v15  ;;  %v14941_v24 = vrot.slane %v15610_v44, %v16158_v15 }
 0x521   : > { %v14949_v40 = vrot.slane %v14942_v21, %v16158_v15  ;;  %v14957_v60 = vrot.slane %v15611_v31, %v16158_v15  ;;  %v14890_v45 = vcombine.low %v14865_v27, %v14873_v9  ;;  %v14891_v53 = vcombine.high %v14865_v27, %v14873_v9 }
 0x522   : > { %v14906_v56 = vcombine.low %v14881_v12, %v14889_v19  ;;  %v14907_v30 = vcombine.high %v14881_v12, %v14889_v19  ;;  %v14958_v22 = vcombine.low %v14933_v38, %v14941_v24  ;;  %v14959_v63 = vcombine.high %v14933_v38, %v14941_v24 }
 0x523   : > { %v14974_v36 = vcombine.low %v14949_v40, %v14957_v60  ;;  %v14975_v3 = vcombine.high %v14949_v40, %v14957_v60  ;;  %v14898_v14 = vrot.slane %v14890_v45, %v16163_v25  ;;  %v14905_v59 = vrot.slane %v14891_v53, %v16163_v25 }
 0x524   : > { %v14914_v0 = vrot.slane %v14906_v56, %v16163_v25  ;;  %v14921_v54 = vrot.slane %v14907_v30, %v16163_v25  ;;  %v14966_v6 = vrot.slane %v14958_v22, %v16163_v25  ;;  %v14973_v58 = vrot.slane %v14959_v63, %v16163_v25 }
 0x525   : > { %v14982_v43 = vrot.slane %v14974_v36, %v16163_v25  ;;  %v14989_v47 = vrot.slane %v14975_v3, %v16163_v25  ;;  %v12850_v10 = vcombine.low %v21279_v49, %v21288_v39  ;;  %v12851_v26 = vcombine.high %v21279_v49, %v21288_v39 }
 0x526   : > { %v14922_v28 = vcombine.low %v14898_v14, %v14914_v0  ;;  %v14923_v7 = vcombine.high %v14898_v14, %v14914_v0  ;;  %v14924_v4 = vcombine.low %v14905_v59, %v14921_v54  ;;  %v14925_v13 = vcombine.high %v14905_v59, %v14921_v54 }
 0x527   : > { %v14990_v51 = vcombine.low %v14966_v6, %v14982_v43  ;;  %v14991_v23 = vcombine.high %v14966_v6, %v14982_v43  ;;  %v14992_v35 = vcombine.low %v14973_v58, %v14989_v47  ;;  %v14993_v17 = vcombine.high %v14973_v58, %v14989_v47 }
 0x528   : > { %15091 = vst.msk [vmem:[%s20399_s7 + $0xe8] sm:$0xff] %vm5397_vm1, %v14922_v28  ;;  %15123 = vst.msk [vmem:[%s20399_s7 + $0x1e8] sm:$0xff] %vm5397_vm1, %v14923_v7  ;;  %v12866_v18 = vcombine.low %v21285_v55, %v21291_v62  ;;  %v12867_v33 = vcombine.high %v21285_v55, %v21291_v62  ;;  %v12858_v29 = vrot.slane %v12850_v10, %v16163_v25 }
 0x529   : > { %15155 = vst.msk [vmem:[%s20399_s7 + $0x2e8] sm:$0xff] %vm5397_vm1, %v14924_v4  ;;  %15187 = vst.msk [vmem:[%s20399_s7 + $0x3e8] sm:$0xff] %vm5397_vm1, %v14925_v13  ;;  %v12865_v34 = vrot.slane %v12851_v26, %v16163_v25 }
 0x52a   : > { %15092 = vst.msk [vmem:[%s20399_s7 + $0xf0] sm:$0xff] %vm5397_vm1, %v14990_v51  ;;  %15124 = vst.msk [vmem:[%s20399_s7 + $0x1f0] sm:$0xff] %vm5397_vm1, %v14991_v23  ;;  %v12874_v49 = vrot.slane %v12866_v18, %v16163_v25  ;;  %v12881_v39 = vrot.slane %v12867_v33, %v16163_v25 }
 0x52b   : > { %15156 = vst.msk [vmem:[%s20399_s7 + $0x2f0] sm:$0xff] %vm5397_vm1, %v14992_v35  ;;  %15188 = vst.msk [vmem:[%s20399_s7 + $0x3f0] sm:$0xff] %vm5397_vm1, %v14993_v17  ;;  %v14994_v52 = vcombine.low %v12858_v29, %v12865_v34  ;;  %v15612_v20 = vcombine.high %v12858_v29, %v12865_v34 }
 0x52c   : > { %v15010_v41 = vcombine.low %v12874_v49, %v12881_v39  ;;  %v15613_v55 = vcombine.high %v12874_v49, %v12881_v39 }
 0x52d   : > { %v15001_v62 = vrot.slane %v14994_v52, %v16158_v15  ;;  %v15009_v48 = vrot.slane %v15612_v20, %v16158_v15 }
 0x52e   : > { %v15017_v46 = vrot.slane %v15010_v41, %v16158_v15  ;;  %v15025_v8 = vrot.slane %v15613_v55, %v16158_v15 }
 0x52f   : > { %v15026_v5 = vcombine.low %v15001_v62, %v15009_v48  ;;  %v15027_v16 = vcombine.high %v15001_v62, %v15009_v48 }
 0x530   : > { %v15042_v32 = vcombine.low %v15017_v46, %v15025_v8  ;;  %v15043_v2 = vcombine.high %v15017_v46, %v15025_v8 }
 0x531   : > { %v15034_v50 = vrot.slane %v15026_v5, %v16163_v25  ;;  %v15041_v57 = vrot.slane %v15027_v16, %v16163_v25 }
 0x532   : > { %v15050_v61 = vrot.slane %v15042_v32, %v16163_v25  ;;  %v15057_v42 = vrot.slane %v15043_v2, %v16163_v25 }
 0x534   : > { %v15058_v1 = vcombine.low %v15034_v50, %v15050_v61  ;;  %v15059_v37 = vcombine.high %v15034_v50, %v15050_v61  ;;  %v15060_v11 = vcombine.low %v15041_v57, %v15057_v42  ;;  %v15061_v44 = vcombine.high %v15041_v57, %v15057_v42 }
 0x536   : > { %15093 = vst.msk [vmem:[%s20399_s7 + $0xf8] sm:$0xff] %vm5397_vm1, %v15058_v1  ;;  %15125 = vst.msk [vmem:[%s20399_s7 + $0x1f8] sm:$0xff] %vm5397_vm1, %v15059_v37 }
 0x537   : > { %15157 = vst.msk [vmem:[%s20399_s7 + $0x2f8] sm:$0xff] %vm5397_vm1, %v15060_v11  ;;  %15189 = vst.msk [vmem:[%s20399_s7 + $0x3f8] sm:$0xff] %vm5397_vm1, %v15061_v44 }
 0x538 PF: > { %s16_s20 = sadd.s32 1, %s15690_s20   ;;  %s22147_s18 = smov %s15686_s19 }
 0x539   : > { %p13_p5 = scmp.ge.s32.totalorder %s16_s20, 4   ;;  %s22148_s19 = smov %s22150_s21 }
 0x53b   :  { %15 = sbr.rel (!%p13_p5) target bundleno = 2 (0x2), region = 86 }

</bundles_post_ra>
